<compile_context>
chip_gen: v6e
topology: v6e:2x2x1
jax: 0.10.0
libtpu: 0.0.40
codegen_flags: <defaults>
</compile_context>

<pallas_src>
import functools

import jax
import jax.numpy as jnp
from jax import lax
from jax.experimental import pallas as pl
from jax.experimental.pallas import tpu as pltpu

NEG_SLOPE = 0.1   # LeakyReLU(0.1)
EPS = 1e-5        # BatchNorm2d default eps
LANE = 128        # TPU lane width


def _lrelu(x):
    return jnp.where(x > 0, x, NEG_SLOPE * x)


def _round_up(x, m):
    return (x + m - 1) // m * m


def resblock_kernel(x_ref, w1_ref, b1_ref, w2s_ref, b2s_ref, out_ref,
                    im_ref, h1_ref, *, H, W, Wp):
    # Shapes / layout (all channel counts already zero-padded to a multiple of 128):
    #   x_ref   : (1, (H+3)*Wp, Cp)   zero-padded input, (row, col) flattened, compute dtype
    #   w1_ref  : (9*Cp, Cop)         conv1 3x3 weights, BN1 scale folded, tap-major along K
    #   b1_ref  : (1, Cop)            folded BN1 shift (f32)
    #   w2s_ref : (9*Cop + Cp, Cop)   conv2 3x3 weights stacked with the 1x1 shortcut weights
    #   b2s_ref : (1, Cop)            folded BN2 + shortcut-BN shift (f32)
    #   out_ref : (1, H*Wp, Cop)      full-width output rows (garbage columns dropped outside)
    #   im_ref  : (H*Wp, Kmax)        shared im2col scratch (reused by both convs)
    #   h1_ref  : ((H+2)*Wp+16, Cop)  zero-bordered intermediate activation
    Cp = x_ref.shape[2]
    Cop = out_ref.shape[2]
    Q = H * Wp
    pad0 = Wp + 8          # multiple of 8 -> aligned interior store; >= Wp+1 rows of halo

    # ---- conv1 (3x3, pad=1) + BN1 + LeakyReLU: im2col + ONE K = 9*Cp MXU matmul ----------
    for t in range(9):
        dy, dx = divmod(t, 3)
        off = dy * Wp + dx                                  # contiguous flat window (static)
        im_ref[:, t * Cp:(t + 1) * Cp] = x_ref[0, off:off + Q, :]
    acc1 = jnp.dot(im_ref[:, :9 * Cp], w1_ref[...],
                   preferred_element_type=jnp.float32)
    h1 = _lrelu(acc1 + b1_ref[...])                         # (Q, Cop) f32

    # Zero the garbage columns (flat column >= W).  This simultaneously provides conv2's
    # left/right zero padding when its shifted windows wrap across row boundaries.
    row_idx = lax.broadcasted_iota(jnp.int32, (Q, Cop), 0)
    h1 = jnp.where((row_idx % Wp) < W, h1, 0.0)

    # Padded intermediate: aligned zero slabs top/bottom, aligned interior store.
    h1_ref[0:pad0, :] = jnp.zeros((pad0, Cop), h1_ref.dtype)
    h1_ref[pad0 + Q:h1_ref.shape[0], :] = jnp.zeros(
        (h1_ref.shape[0] - pad0 - Q, Cop), h1_ref.dtype)
    h1_ref[pad0:pad0 + Q, :] = h1.astype(h1_ref.dtype)

    # ---- conv2 (3x3, pad=1) + BN2, with the 1x1 shortcut + its BN fused into K -----------
    for t in range(9):
        dy, dx = divmod(t, 3)
        off = pad0 + (dy - 1) * Wp + (dx - 1)
        im_ref[:, t * Cop:(t + 1) * Cop] = h1_ref[off:off + Q, :]
    # shortcut operand = input at the center tap (y+1, x+1)
    im_ref[:, 9 * Cop:9 * Cop + Cp] = x_ref[0, Wp + 1:Wp + 1 + Q, :]
    acc2 = jnp.dot(im_ref[:, :9 * Cop + Cp], w2s_ref[...],
                   preferred_element_type=jnp.float32)
    out_ref[0] = _lrelu(acc2 + b2s_ref[...]).astype(out_ref.dtype)


def _fold_bn(g, b, m, v):
    s = g / jnp.sqrt(v + EPS)
    return s, b - m * s


@functools.partial(jax.jit, static_argnames=("compute_dtype",))
def resblock_pallas(x_nchw, p, *, compute_dtype=jnp.bfloat16):
    """x_nchw: (N, Cin, H, W) float32.  Returns (N, Cout, H, W) float32 (stride=1, eval BN)."""
    N, Cin, H, W = x_nchw.shape
    Cout = p["w1"].shape[0]
    Cp = _round_up(Cin, LANE)          # lane-dense input channels
    Cop = _round_up(Cout, LANE)        # lane-dense output channels
    Wp = _round_up(W + 2, 8)           # sublane-aligned padded width
    Hp = H + 3                         # 1 top halo row, 1 bottom halo row, 1 safety row
    Q = H * Wp                         # flat output rows computed in-kernel (incl. garbage cols)
    K1 = 9 * Cp
    K2 = 9 * Cop + Cp
    Kmax = max(K1, K2)
    R1 = (H + 2) * Wp + 16             # rows of the padded-intermediate scratch

    # Input: NCHW -> NHWC, spatial zero pad (conv border + alignment cols + safety row),
    # channel zero pad to Cp, flatten (row, col) so every tap window is one contiguous slice.
    x = jnp.transpose(x_nchw, (0, 2, 3, 1)).astype(jnp.float32)
    xpad = jnp.pad(x, ((0, 0), (1, 2), (1, Wp - W - 1), (0, Cp - Cin)))
    xflat = xpad.reshape(N, Hp * Wp, Cp).astype(compute_dtype)

    s1, t1 = _fold_bn(p["g1"], p["b1"], p["m1"], p["v1"])
    s2, t2 = _fold_bn(p["g2"], p["b2"], p["m2"], p["v2"])
    ss, ts = _fold_bn(p["gs"], p["bs"], p["ms"], p["vs"])

    def prep_w3(w, s, cin_p, cout_p):          # (Cout, Cin, 3, 3) -> (9*cin_p, cout_p)
        co, ci = w.shape[0], w.shape[1]
        w = w * s[:, None, None, None]
        w = jnp.transpose(w, (2, 3, 1, 0)).reshape(9, ci, co)
        w = jnp.pad(w, ((0, 0), (0, cin_p - ci), (0, cout_p - co)))
        return w.reshape(9 * cin_p, cout_p)

    def prep_w1x1(w, s, cin_p, cout_p):        # (Cout, Cin, 1, 1) -> (cin_p, cout_p)
        co, ci = w.shape[0], w.shape[1]
        w = jnp.transpose(w[:, :, 0, 0] * s[:, None], (1, 0))
        return jnp.pad(w, ((0, cin_p - ci), (0, cout_p - co)))

    def prep_b(t, cout_p):
        return jnp.pad(t, (0, cout_p - t.shape[0])).reshape(1, cout_p).astype(jnp.float32)

    w1k = prep_w3(p["w1"], s1, Cp, Cop).astype(compute_dtype)
    w2s = jnp.concatenate(
        [prep_w3(p["w2"], s2, Cop, Cop), prep_w1x1(p["ws"], ss, Cp, Cop)],
        axis=0).astype(compute_dtype)                       # (9*Cop + Cp, Cop)
    b1 = prep_b(t1, Cop)
    b2s = prep_b(t2 + ts, Cop)                              # BN2 shift + shortcut-BN shift

    # VMEM budget: clamp to the device's physical capacity (v7x has only 64 MiB per TC).
    itemsize = jnp.dtype(compute_dtype).itemsize
    vmem_need = (2 * Hp * Wp * Cp * itemsize                # double-buffered input block
                 + 2 * (K1 + K2 + 2) * Cop * itemsize       # weights / biases (2x buffered)
                 + 2 * Q * Cop * itemsize                   # double-buffered output block
                 + (Q * Kmax + R1 * Cop) * itemsize         # im2col + intermediate scratch
                 + 2 * Q * Cop * 4)                         # f32 matmul results
    try:
        vmem_cap = int(getattr(pltpu.get_tpu_info(), "vmem_capacity_bytes",
                               64 * 1024 * 1024))
    except Exception:  # pragma: no cover - conservative fallback
        vmem_cap = 64 * 1024 * 1024
    vmem_limit = int(min(max(2 * vmem_need, 32 * 1024 * 1024),
                         vmem_cap - 4 * 1024 * 1024))

    kernel = functools.partial(resblock_kernel, H=H, W=W, Wp=Wp)
    out = pl.pallas_call(
        kernel,
        out_shape=jax.ShapeDtypeStruct((N, Q, Cop), compute_dtype),
        grid_spec=pltpu.PrefetchScalarGridSpec(
            num_scalar_prefetch=0,
            grid=(N,),
            in_specs=[
                pl.BlockSpec((1, Hp * Wp, Cp), lambda n: (n, 0, 0)),
                pl.BlockSpec((K1, Cop), lambda n: (0, 0)),
                pl.BlockSpec((1, Cop), lambda n: (0, 0)),
                pl.BlockSpec((K2, Cop), lambda n: (0, 0)),
                pl.BlockSpec((1, Cop), lambda n: (0, 0)),
            ],
            out_specs=pl.BlockSpec((1, Q, Cop), lambda n: (n, 0, 0)),
            scratch_shapes=[
                pltpu.VMEM((Q, Kmax), compute_dtype),       # shared im2col scratch
                pltpu.VMEM((R1, Cop), compute_dtype),       # padded intermediate activation
            ],
        ),
        compiler_params=pltpu.CompilerParams(
            dimension_semantics=("parallel",),
            vmem_limit_bytes=vmem_limit,
        ),
    )(xflat, w1k, b1, w2s, b2s)

    # Drop garbage columns and padded channels, upcast, back to NCHW.
    out = out.reshape(N, H, Wp, Cop)[:, :, :W, :Cout].astype(jnp.float32)
    return jnp.transpose(out, (0, 3, 1, 2))


def resblock_ref(x, p):
    """Pure-JAX reference (eval-mode BN), NCHW, float32 with HIGHEST matmul precision."""
    def conv(inp, w, pad):
        return lax.conv_general_dilated(
            inp, w, (1, 1), [(pad, pad), (pad, pad)],
            dimension_numbers=("NCHW", "OIHW", "NCHW"),
            precision=lax.Precision.HIGHEST)

    def bn(inp, g, b, m, v):
        sh = (1, -1, 1, 1)
        return (inp - m.reshape(sh)) / jnp.sqrt(v.reshape(sh) + EPS) * g.reshape(sh) + b.reshape(sh)

    h = conv(x, p["w1"], 1)
    h = _lrelu(bn(h, p["g1"], p["b1"], p["m1"], p["v1"]))
    h = conv(h, p["w2"], 1)
    h = bn(h, p["g2"], p["b2"], p["m2"], p["v2"])
    s = conv(x, p["ws"], 0)
    s = bn(s, p["gs"], p["bs"], p["ms"], p["vs"])
    return _lrelu(h + s)


def make_params(key, in_feat, out_feat):
    ks = jax.random.split(key, 16)

    def bn_params(k0, k1, k2, k3, c):
        return (1.0 + 0.1 * jax.random.normal(k0, (c,), jnp.float32),   # gamma
                0.1 * jax.random.normal(k1, (c,), jnp.float32),         # beta
                0.1 * jax.random.normal(k2, (c,), jnp.float32),         # running_mean
                jax.random.uniform(k3, (c,), jnp.float32, 0.5, 1.5))    # running_var

    g1, b1, m1, v1 = bn_params(ks[1], ks[2], ks[3], ks[4], out_feat)
    g2, b2, m2, v2 = bn_params(ks[6], ks[7], ks[8], ks[9], out_feat)
    gs, bs, ms, vs = bn_params(ks[11], ks[12], ks[13], ks[14], out_feat)
    return {
        "w1": 0.3 * jax.random.normal(ks[0], (out_feat, in_feat, 3, 3), jnp.float32),
        "g1": g1, "b1": b1, "m1": m1, "v1": v1,
        "w2": 0.3 * jax.random.normal(ks[5], (out_feat, out_feat, 3, 3), jnp.float32),
        "g2": g2, "b2": b2, "m2": m2, "v2": v2,
        "ws": 0.3 * jax.random.normal(ks[10], (out_feat, in_feat, 1, 1), jnp.float32),
        "gs": gs, "bs": bs, "ms": ms, "vs": vs,
    }


if __name__ == "__main__":
    key = jax.random.PRNGKey(0)
    k_x, k_p = jax.random.split(key)

    N, in_feat, out_feat, H, W = 2, 4, 8, 16, 16
    x = jax.random.normal(k_x, (N, in_feat, H, W), jnp.float32)
    params = make_params(k_p, in_feat, out_feat)

    y_ref = jax.block_until_ready(resblock_ref(x, params))
    ref_scale = float(jnp.max(jnp.abs(y_ref)))

    # Structural check with f32 MXU operands (tight, precision-robust tolerance).
    y_f32 = jax.block_until_ready(resblock_pallas(x, params, compute_dtype=jnp.float32))
    assert y_f32.shape == (N, out_feat, H, W), y_f32.shape
    err_f32 = float(jnp.max(jnp.abs(y_f32 - y_ref)))
    assert err_f32 < 2e-2 * ref_scale + 1e-2, (
        f"f32 path max abs error vs reference: {err_f32} (ref scale {ref_scale})")

    # Fast path: bf16 MXU operands / bf16 output with f32 accumulation.
    y_bf16 = jax.block_until_ready(resblock_pallas(x, params, compute_dtype=jnp.bfloat16))
    assert y_bf16.shape == (N, out_feat, H, W), y_bf16.shape
    err_bf16 = float(jnp.max(jnp.abs(y_bf16 - y_ref)))
    assert err_bf16 < 4e-2 * ref_scale + 2e-2, (
        f"bf16 path max abs error vs reference: {err_bf16} (ref scale {ref_scale})")

    print("KERNEL_OK")
</pallas_src>

<mosaic_0001>
module attributes {stable_mosaic.version = 11 : i64} {
  func.func @resblock_kernel(%arg0: i32, %arg1: memref<1x456x128xf32, #tpu.memory_space<vmem>>, %arg2: memref<1152x128xf32, #tpu.memory_space<vmem>>, %arg3: memref<1x128xf32, #tpu.memory_space<vmem>>, %arg4: memref<1280x128xf32, #tpu.memory_space<vmem>>, %arg5: memref<1x128xf32, #tpu.memory_space<vmem>>, %arg6: memref<1x384x128xf32, #tpu.memory_space<vmem>>, %arg7: memref<384x1280xf32, #tpu.memory_space<vmem>>, %arg8: memref<448x128xf32, #tpu.memory_space<vmem>>) attributes {dimension_semantics = [#tpu.dimension_semantics<parallel>], iteration_bounds = array<i64: 2>, scalar_prefetch = 0 : i64, scratch_operands = 2 : i64, tpu.core_type = #tpu.core_type<tc>, window_params = [{transform_indices = @transform_0, window_bounds = array<i64: 1, 456, 128>}, {pipeline_mode = #tpu.pipeline_mode<synchronous>, transform_indices = @transform_1, window_bounds = array<i64: 1152, 128>}, {pipeline_mode = #tpu.pipeline_mode<synchronous>, transform_indices = @transform_2, window_bounds = array<i64: 1, 128>}, {pipeline_mode = #tpu.pipeline_mode<synchronous>, transform_indices = @transform_3, window_bounds = array<i64: 1280, 128>}, {pipeline_mode = #tpu.pipeline_mode<synchronous>, transform_indices = @transform_4, window_bounds = array<i64: 1, 128>}, {transform_indices = @transform_5, window_bounds = array<i64: 1, 384, 128>}]} {
    %c0 = arith.constant 0 : index
    %c0_0 = arith.constant 0 : index
    %c0_1 = arith.constant 0 : index
    %0 = vector.load %arg1[%c0, %c0_0, %c0_1] : memref<1x456x128xf32, #tpu.memory_space<vmem>>, vector<1x384x128xf32>
    %1 = vector.shape_cast %0 : vector<1x384x128xf32> to vector<384x128xf32>
    %c0_2 = arith.constant 0 : index
    %c0_3 = arith.constant 0 : index
    %2 = vector.load %arg7[%c0_2, %c0_3] : memref<384x1280xf32, #tpu.memory_space<vmem>>, vector<384x128xf32>
    tpu.vector_store %arg7[%c0_2, %c0_3], %1 {strides = array<i32>} : memref<384x1280xf32, #tpu.memory_space<vmem>>, vector<384x128xf32>,
    %c0_4 = arith.constant 0 : index
    %c1 = arith.constant 1 : index
    %c0_5 = arith.constant 0 : index
    %3 = vector.load %arg1[%c0_4, %c1, %c0_5] : memref<1x456x128xf32, #tpu.memory_space<vmem>>, vector<1x384x128xf32>
    %4 = vector.shape_cast %3 : vector<1x384x128xf32> to vector<384x128xf32>
    %c0_6 = arith.constant 0 : index
    %c128 = arith.constant 128 : index
    %5 = vector.load %arg7[%c0_6, %c128] : memref<384x1280xf32, #tpu.memory_space<vmem>>, vector<384x128xf32>
    tpu.vector_store %arg7[%c0_6, %c128], %4 {strides = array<i32>} : memref<384x1280xf32, #tpu.memory_space<vmem>>, vector<384x128xf32>,
    %c0_7 = arith.constant 0 : index
    %c2 = arith.constant 2 : index
    %c0_8 = arith.constant 0 : index
    %6 = vector.load %arg1[%c0_7, %c2, %c0_8] : memref<1x456x128xf32, #tpu.memory_space<vmem>>, vector<1x384x128xf32>
    %7 = vector.shape_cast %6 : vector<1x384x128xf32> to vector<384x128xf32>
    %c0_9 = arith.constant 0 : index
    %c256 = arith.constant 256 : index
    %8 = vector.load %arg7[%c0_9, %c256] : memref<384x1280xf32, #tpu.memory_space<vmem>>, vector<384x128xf32>
    tpu.vector_store %arg7[%c0_9, %c256], %7 {strides = array<i32>} : memref<384x1280xf32, #tpu.memory_space<vmem>>, vector<384x128xf32>,
    %c0_10 = arith.constant 0 : index
    %c24 = arith.constant 24 : index
    %c0_11 = arith.constant 0 : index
    %9 = vector.load %arg1[%c0_10, %c24, %c0_11] : memref<1x456x128xf32, #tpu.memory_space<vmem>>, vector<1x384x128xf32>
    %10 = vector.shape_cast %9 : vector<1x384x128xf32> to vector<384x128xf32>
    %c0_12 = arith.constant 0 : index
    %c384 = arith.constant 384 : index
    %11 = vector.load %arg7[%c0_12, %c384] : memref<384x1280xf32, #tpu.memory_space<vmem>>, vector<384x128xf32>
    tpu.vector_store %arg7[%c0_12, %c384], %10 {strides = array<i32>} : memref<384x1280xf32, #tpu.memory_space<vmem>>, vector<384x128xf32>,
    %c0_13 = arith.constant 0 : index
    %c25 = arith.constant 25 : index
    %c0_14 = arith.constant 0 : index
    %12 = vector.load %arg1[%c0_13, %c25, %c0_14] : memref<1x456x128xf32, #tpu.memory_space<vmem>>, vector<1x384x128xf32>
    %13 = vector.shape_cast %12 : vector<1x384x128xf32> to vector<384x128xf32>
    %c0_15 = arith.constant 0 : index
    %c512 = arith.constant 512 : index
    %14 = vector.load %arg7[%c0_15, %c512] : memref<384x1280xf32, #tpu.memory_space<vmem>>, vector<384x128xf32>
    tpu.vector_store %arg7[%c0_15, %c512], %13 {strides = array<i32>} : memref<384x1280xf32, #tpu.memory_space<vmem>>, vector<384x128xf32>,
    %c0_16 = arith.constant 0 : index
    %c26 = arith.constant 26 : index
    %c0_17 = arith.constant 0 : index
    %15 = vector.load %arg1[%c0_16, %c26, %c0_17] : memref<1x456x128xf32, #tpu.memory_space<vmem>>, vector<1x384x128xf32>
    %16 = vector.shape_cast %15 : vector<1x384x128xf32> to vector<384x128xf32>
    %c0_18 = arith.constant 0 : index
    %c640 = arith.constant 640 : index
    %17 = vector.load %arg7[%c0_18, %c640] : memref<384x1280xf32, #tpu.memory_space<vmem>>, vector<384x128xf32>
    tpu.vector_store %arg7[%c0_18, %c640], %16 {strides = array<i32>} : memref<384x1280xf32, #tpu.memory_space<vmem>>, vector<384x128xf32>,
    %c0_19 = arith.constant 0 : index
    %c48 = arith.constant 48 : index
    %c0_20 = arith.constant 0 : index
    %18 = vector.load %arg1[%c0_19, %c48, %c0_20] : memref<1x456x128xf32, #tpu.memory_space<vmem>>, vector<1x384x128xf32>
    %19 = vector.shape_cast %18 : vector<1x384x128xf32> to vector<384x128xf32>
    %c0_21 = arith.constant 0 : index
    %c768 = arith.constant 768 : index
    %20 = vector.load %arg7[%c0_21, %c768] : memref<384x1280xf32, #tpu.memory_space<vmem>>, vector<384x128xf32>
    tpu.vector_store %arg7[%c0_21, %c768], %19 {strides = array<i32>} : memref<384x1280xf32, #tpu.memory_space<vmem>>, vector<384x128xf32>,
    %c0_22 = arith.constant 0 : index
    %c49 = arith.constant 49 : index
    %c0_23 = arith.constant 0 : index
    %21 = vector.load %arg1[%c0_22, %c49, %c0_23] : memref<1x456x128xf32, #tpu.memory_space<vmem>>, vector<1x384x128xf32>
    %22 = vector.shape_cast %21 : vector<1x384x128xf32> to vector<384x128xf32>
    %c0_24 = arith.constant 0 : index
    %c896 = arith.constant 896 : index
    %23 = vector.load %arg7[%c0_24, %c896] : memref<384x1280xf32, #tpu.memory_space<vmem>>, vector<384x128xf32>
    tpu.vector_store %arg7[%c0_24, %c896], %22 {strides = array<i32>} : memref<384x1280xf32, #tpu.memory_space<vmem>>, vector<384x128xf32>,
    %c0_25 = arith.constant 0 : index
    %c50 = arith.constant 50 : index
    %c0_26 = arith.constant 0 : index
    %24 = vector.load %arg1[%c0_25, %c50, %c0_26] : memref<1x456x128xf32, #tpu.memory_space<vmem>>, vector<1x384x128xf32>
    %25 = vector.shape_cast %24 : vector<1x384x128xf32> to vector<384x128xf32>
    %c0_27 = arith.constant 0 : index
    %c1024 = arith.constant 1024 : index
    %26 = vector.load %arg7[%c0_27, %c1024] : memref<384x1280xf32, #tpu.memory_space<vmem>>, vector<384x128xf32>
    tpu.vector_store %arg7[%c0_27, %c1024], %25 {strides = array<i32>} : memref<384x1280xf32, #tpu.memory_space<vmem>>, vector<384x128xf32>,
    %c0_28 = arith.constant 0 : index
    %c0_29 = arith.constant 0 : index
    %27 = vector.load %arg7[%c0_28, %c0_29] : memref<384x1280xf32, #tpu.memory_space<vmem>>, vector<384x1152xf32>
    %c0_30 = arith.constant 0 : index
    %c0_31 = arith.constant 0 : index
    %28 = vector.load %arg2[%c0_30, %c0_31] : memref<1152x128xf32, #tpu.memory_space<vmem>>, vector<1152x128xf32>
    %cst = arith.constant dense<0.000000e+00> : vector<384x128xf32>
    %29 = tpu.matmul %27, %28, %cst {dimension_numbers = #tpu.dot_dimension_numbers<[1], [0], [0], [1], [0, 0, 1, 1], [], []>} : vector<384x1152xf32>, vector<1152x128xf32>, vector<384x128xf32> -> vector<384x128xf32>
    %c0_32 = arith.constant 0 : index
    %c0_33 = arith.constant 0 : index
    %30 = vector.load %arg3[%c0_32, %c0_33] : memref<1x128xf32, #tpu.memory_space<vmem>>, vector<1x128xf32>
    %31 = vector.broadcast %30 : vector<1x128xf32> to vector<384x128xf32>
    %32 = arith.addf %29, %31 : vector<384x128xf32>
    %cst_34 = arith.constant 0.000000e+00 : f32
    %33 = vector.broadcast %cst_34 : f32 to vector<384x128xf32>
    %34 = arith.cmpf ogt, %32, %33 : vector<384x128xf32>
    %cst_35 = arith.constant 1.000000e-01 : f32
    %35 = vector.broadcast %cst_35 : f32 to vector<384x128xf32>
    %36 = arith.mulf %35, %32 : vector<384x128xf32>
    %37 = arith.select %34, %32, %36 : vector<384x128xi1>, vector<384x128xf32>
    %38 = tpu.iota {dimensions = array<i32: 0>} : vector<384x128xi32>
    %c24_i32 = arith.constant 24 : i32
    %c0_i32 = arith.constant 0 : i32
    %39 = arith.cmpi eq, %c24_i32, %c0_i32 : i32
    %c1_i32 = arith.constant 1 : i32
    %40 = arith.select %39, %c1_i32, %c24_i32 : i32
    %41 = vector.broadcast %40 : i32 to vector<384x128xi32>
    %42 = arith.remsi %38, %41 : vector<384x128xi32>
    %c0_i32_36 = arith.constant 0 : i32
    %43 = vector.broadcast %c0_i32_36 : i32 to vector<384x128xi32>
    %44 = arith.cmpi ne, %42, %43 : vector<384x128xi32>
    %c0_i32_37 = arith.constant 0 : i32
    %45 = vector.broadcast %c0_i32_37 : i32 to vector<384x128xi32>
    %46 = arith.cmpi slt, %42, %45 : vector<384x128xi32>
    %c0_i32_38 = arith.constant 0 : i32
    %47 = arith.cmpi slt, %40, %c0_i32_38 : i32
    %48 = vector.broadcast %47 : i1 to vector<384x128xi1>
    %49 = vector.broadcast %48 : vector<384x128xi1> to vector<384x128xi1>
    %50 = arith.xori %46, %49 : vector<384x128xi1>
    %51 = arith.andi %50, %44 : vector<384x128xi1>
    %52 = vector.broadcast %40 : i32 to vector<384x128xi32>
    %53 = arith.addi %42, %52 : vector<384x128xi32>
    %54 = arith.select %51, %53, %42 : vector<384x128xi1>, vector<384x128xi32>
    %c16_i32 = arith.constant 16 : i32
    %55 = vector.broadcast %c16_i32 : i32 to vector<384x128xi32>
    %56 = arith.cmpi slt, %54, %55 : vector<384x128xi32>
    %cst_39 = arith.constant 0.000000e+00 : f32
    %57 = vector.broadcast %cst_39 : f32 to vector<384x128xf32>
    %58 = arith.select %56, %37, %57 : vector<384x128xi1>, vector<384x128xf32>
    %cst_40 = arith.constant 0.000000e+00 : f32
    %59 = vector.broadcast %cst_40 : f32 to vector<32x128xf32>
    %c0_41 = arith.constant 0 : index
    %c0_42 = arith.constant 0 : index
    %60 = vector.load %arg8[%c0_41, %c0_42] : memref<448x128xf32, #tpu.memory_space<vmem>>, vector<32x128xf32>
    tpu.vector_store %arg8[%c0_41, %c0_42], %59 {strides = array<i32>} : memref<448x128xf32, #tpu.memory_space<vmem>>, vector<32x128xf32>,
    %cst_43 = arith.constant 0.000000e+00 : f32
    %61 = vector.broadcast %cst_43 : f32 to vector<32x128xf32>
    %c416 = arith.constant 416 : index
    %c0_44 = arith.constant 0 : index
    %62 = vector.load %arg8[%c416, %c0_44] : memref<448x128xf32, #tpu.memory_space<vmem>>, vector<32x128xf32>
    tpu.vector_store %arg8[%c416, %c0_44], %61 {strides = array<i32>} : memref<448x128xf32, #tpu.memory_space<vmem>>, vector<32x128xf32>,
    %c32 = arith.constant 32 : index
    %c0_45 = arith.constant 0 : index
    %63 = vector.load %arg8[%c32, %c0_45] : memref<448x128xf32, #tpu.memory_space<vmem>>, vector<384x128xf32>
    tpu.vector_store %arg8[%c32, %c0_45], %58 {strides = array<i32>} : memref<448x128xf32, #tpu.memory_space<vmem>>, vector<384x128xf32>,
    %c7 = arith.constant 7 : index
    %c0_46 = arith.constant 0 : index
    %64 = vector.load %arg8[%c7, %c0_46] : memref<448x128xf32, #tpu.memory_space<vmem>>, vector<384x128xf32>
    %c0_47 = arith.constant 0 : index
    %c0_48 = arith.constant 0 : index
    %65 = vector.load %arg7[%c0_47, %c0_48] : memref<384x1280xf32, #tpu.memory_space<vmem>>, vector<384x128xf32>
    tpu.vector_store %arg7[%c0_47, %c0_48], %64 {strides = array<i32>} : memref<384x1280xf32, #tpu.memory_space<vmem>>, vector<384x128xf32>,
    %c8 = arith.constant 8 : index
    %c0_49 = arith.constant 0 : index
    %66 = vector.load %arg8[%c8, %c0_49] : memref<448x128xf32, #tpu.memory_space<vmem>>, vector<384x128xf32>
    %c0_50 = arith.constant 0 : index
    %c128_51 = arith.constant 128 : index
    %67 = vector.load %arg7[%c0_50, %c128_51] : memref<384x1280xf32, #tpu.memory_space<vmem>>, vector<384x128xf32>
    tpu.vector_store %arg7[%c0_50, %c128_51], %66 {strides = array<i32>} : memref<384x1280xf32, #tpu.memory_space<vmem>>, vector<384x128xf32>,
    %c9 = arith.constant 9 : index
    %c0_52 = arith.constant 0 : index
    %68 = vector.load %arg8[%c9, %c0_52] : memref<448x128xf32, #tpu.memory_space<vmem>>, vector<384x128xf32>
    %c0_53 = arith.constant 0 : index
    %c256_54 = arith.constant 256 : index
    %69 = vector.load %arg7[%c0_53, %c256_54] : memref<384x1280xf32, #tpu.memory_space<vmem>>, vector<384x128xf32>
    tpu.vector_store %arg7[%c0_53, %c256_54], %68 {strides = array<i32>} : memref<384x1280xf32, #tpu.memory_space<vmem>>, vector<384x128xf32>,
    %c31 = arith.constant 31 : index
    %c0_55 = arith.constant 0 : index
    %70 = vector.load %arg8[%c31, %c0_55] : memref<448x128xf32, #tpu.memory_space<vmem>>, vector<384x128xf32>
    %c0_56 = arith.constant 0 : index
    %c384_57 = arith.constant 384 : index
    %71 = vector.load %arg7[%c0_56, %c384_57] : memref<384x1280xf32, #tpu.memory_space<vmem>>, vector<384x128xf32>
    tpu.vector_store %arg7[%c0_56, %c384_57], %70 {strides = array<i32>} : memref<384x1280xf32, #tpu.memory_space<vmem>>, vector<384x128xf32>,
    %c32_58 = arith.constant 32 : index
    %c0_59 = arith.constant 0 : index
    %72 = vector.load %arg8[%c32_58, %c0_59] : memref<448x128xf32, #tpu.memory_space<vmem>>, vector<384x128xf32>
    %c0_60 = arith.constant 0 : index
    %c512_61 = arith.constant 512 : index
    %73 = vector.load %arg7[%c0_60, %c512_61] : memref<384x1280xf32, #tpu.memory_space<vmem>>, vector<384x128xf32>
    tpu.vector_store %arg7[%c0_60, %c512_61], %72 {strides = array<i32>} : memref<384x1280xf32, #tpu.memory_space<vmem>>, vector<384x128xf32>,
    %c33 = arith.constant 33 : index
    %c0_62 = arith.constant 0 : index
    %74 = vector.load %arg8[%c33, %c0_62] : memref<448x128xf32, #tpu.memory_space<vmem>>, vector<384x128xf32>
    %c0_63 = arith.constant 0 : index
    %c640_64 = arith.constant 640 : index
    %75 = vector.load %arg7[%c0_63, %c640_64] : memref<384x1280xf32, #tpu.memory_space<vmem>>, vector<384x128xf32>
    tpu.vector_store %arg7[%c0_63, %c640_64], %74 {strides = array<i32>} : memref<384x1280xf32, #tpu.memory_space<vmem>>, vector<384x128xf32>,
    %c55 = arith.constant 55 : index
    %c0_65 = arith.constant 0 : index
    %76 = vector.load %arg8[%c55, %c0_65] : memref<448x128xf32, #tpu.memory_space<vmem>>, vector<384x128xf32>
    %c0_66 = arith.constant 0 : index
    %c768_67 = arith.constant 768 : index
    %77 = vector.load %arg7[%c0_66, %c768_67] : memref<384x1280xf32, #tpu.memory_space<vmem>>, vector<384x128xf32>
    tpu.vector_store %arg7[%c0_66, %c768_67], %76 {strides = array<i32>} : memref<384x1280xf32, #tpu.memory_space<vmem>>, vector<384x128xf32>,
    %c56 = arith.constant 56 : index
    %c0_68 = arith.constant 0 : index
    %78 = vector.load %arg8[%c56, %c0_68] : memref<448x128xf32, #tpu.memory_space<vmem>>, vector<384x128xf32>
    %c0_69 = arith.constant 0 : index
    %c896_70 = arith.constant 896 : index
    %79 = vector.load %arg7[%c0_69, %c896_70] : memref<384x1280xf32, #tpu.memory_space<vmem>>, vector<384x128xf32>
    tpu.vector_store %arg7[%c0_69, %c896_70], %78 {strides = array<i32>} : memref<384x1280xf32, #tpu.memory_space<vmem>>, vector<384x128xf32>,
    %c57 = arith.constant 57 : index
    %c0_71 = arith.constant 0 : index
    %80 = vector.load %arg8[%c57, %c0_71] : memref<448x128xf32, #tpu.memory_space<vmem>>, vector<384x128xf32>
    %c0_72 = arith.constant 0 : index
    %c1024_73 = arith.constant 1024 : index
    %81 = vector.load %arg7[%c0_72, %c1024_73] : memref<384x1280xf32, #tpu.memory_space<vmem>>, vector<384x128xf32>
    tpu.vector_store %arg7[%c0_72, %c1024_73], %80 {strides = array<i32>} : memref<384x1280xf32, #tpu.memory_space<vmem>>, vector<384x128xf32>,
    %c0_74 = arith.constant 0 : index
    %c25_75 = arith.constant 25 : index
    %c0_76 = arith.constant 0 : index
    %82 = vector.load %arg1[%c0_74, %c25_75, %c0_76] : memref<1x456x128xf32, #tpu.memory_space<vmem>>, vector<1x384x128xf32>
    %83 = vector.shape_cast %82 : vector<1x384x128xf32> to vector<384x128xf32>
    %c0_77 = arith.constant 0 : index
    %c1152 = arith.constant 1152 : index
    %84 = vector.load %arg7[%c0_77, %c1152] : memref<384x1280xf32, #tpu.memory_space<vmem>>, vector<384x128xf32>
    tpu.vector_store %arg7[%c0_77, %c1152], %83 {strides = array<i32>} : memref<384x1280xf32, #tpu.memory_space<vmem>>, vector<384x128xf32>,
    %c0_78 = arith.constant 0 : index
    %c0_79 = arith.constant 0 : index
    %85 = vector.load %arg7[%c0_78, %c0_79] : memref<384x1280xf32, #tpu.memory_space<vmem>>, vector<384x1280xf32>
    %c0_80 = arith.constant 0 : index
    %c0_81 = arith.constant 0 : index
    %86 = vector.load %arg4[%c0_80, %c0_81] : memref<1280x128xf32, #tpu.memory_space<vmem>>, vector<1280x128xf32>
    %cst_82 = arith.constant dense<0.000000e+00> : vector<384x128xf32>
    %87 = tpu.matmul %85, %86, %cst_82 {dimension_numbers = #tpu.dot_dimension_numbers<[1], [0], [0], [1], [0, 0, 1, 1], [], []>} : vector<384x1280xf32>, vector<1280x128xf32>, vector<384x128xf32> -> vector<384x128xf32>
    %c0_83 = arith.constant 0 : index
    %c0_84 = arith.constant 0 : index
    %88 = vector.load %arg5[%c0_83, %c0_84] : memref<1x128xf32, #tpu.memory_space<vmem>>, vector<1x128xf32>
    %89 = vector.broadcast %88 : vector<1x128xf32> to vector<384x128xf32>
    %90 = arith.addf %87, %89 : vector<384x128xf32>
    %cst_85 = arith.constant 0.000000e+00 : f32
    %91 = vector.broadcast %cst_85 : f32 to vector<384x128xf32>
    %92 = arith.cmpf ogt, %90, %91 : vector<384x128xf32>
    %cst_86 = arith.constant 1.000000e-01 : f32
    %93 = vector.broadcast %cst_86 : f32 to vector<384x128xf32>
    %94 = arith.mulf %93, %90 : vector<384x128xf32>
    %95 = arith.select %92, %90, %94 : vector<384x128xi1>, vector<384x128xf32>
    %c0_87 = arith.constant 0 : index
    %c0_88 = arith.constant 0 : index
    %c0_89 = arith.constant 0 : index
    %96 = vector.load %arg6[%c0_87, %c0_88, %c0_89] : memref<1x384x128xf32, #tpu.memory_space<vmem>>, vector<1x384x128xf32>
    %97 = vector.shape_cast %96 : vector<1x384x128xf32> to vector<384x128xf32>
    %98 = vector.shape_cast %95 : vector<384x128xf32> to vector<1x384x128xf32>
    tpu.vector_store %arg6[%c0_87, %c0_88, %c0_89], %98 {strides = array<i32>} : memref<1x384x128xf32, #tpu.memory_space<vmem>>, vector<1x384x128xf32>,
    return
  }
  func.func @transform_0(%arg0: i32) -> (i32, i32, i32) {
    %c0_i32 = arith.constant 0 : i32
    %c0_i32_0 = arith.constant 0 : i32
    %c0_i32_1 = arith.constant 0 : i32
    return %arg0, %c0_i32, %c0_i32_0 : i32, i32, i32
  }
  func.func @transform_1(%arg0: i32) -> (i32, i32) {
    %c0_i32 = arith.constant 0 : i32
    %c0_i32_0 = arith.constant 0 : i32
    %c0_i32_1 = arith.constant 0 : i32
    return %c0_i32, %c0_i32_0 : i32, i32
  }
  func.func @transform_2(%arg0: i32) -> (i32, i32) {
    %c0_i32 = arith.constant 0 : i32
    %c0_i32_0 = arith.constant 0 : i32
    %c0_i32_1 = arith.constant 0 : i32
    return %c0_i32, %c0_i32_0 : i32, i32
  }
  func.func @transform_3(%arg0: i32) -> (i32, i32) {
    %c0_i32 = arith.constant 0 : i32
    %c0_i32_0 = arith.constant 0 : i32
    %c0_i32_1 = arith.constant 0 : i32
    return %c0_i32, %c0_i32_0 : i32, i32
  }
  func.func @transform_4(%arg0: i32) -> (i32, i32) {
    %c0_i32 = arith.constant 0 : i32
    %c0_i32_0 = arith.constant 0 : i32
    %c0_i32_1 = arith.constant 0 : i32
    return %c0_i32, %c0_i32_0 : i32, i32
  }
  func.func @transform_5(%arg0: i32) -> (i32, i32, i32) {
    %c0_i32 = arith.constant 0 : i32
    %c0_i32_0 = arith.constant 0 : i32
    %c0_i32_1 = arith.constant 0 : i32
    return %arg0, %c0_i32, %c0_i32_0 : i32, i32, i32
  }
}

</mosaic_0001>

<bundles_post_ra>
// kernel: resblock_pallas.1
= control target key start
LH: loop header
LB: loop body
LE: loop exit
PB: predicated region body
PF: predicated region fallthrough
CT: control target
= control target key end

     0   :  { %s8135_s18 = smov 0   ;;  %s13090_s0 = inlined_call_operand.vmem [shape: f32[2,456,128], index: 0, kind: input, shape index: {}]   ;;  %s13091_s1 = inlined_call_operand.vmem [shape: f32[1152,128], index: 1, kind: input, shape index: {}]   ;;  %s13092_s2 = inlined_call_operand.vmem [shape: f32[1,128], index: 2, kind: input, shape index: {}]   ;;  %s13093_s3 = inlined_call_operand.vmem [shape: f32[1280,128], index: 3, kind: input, shape index: {}]   ;;  %s13094_s4 = inlined_call_operand.vmem [shape: f32[1,128], index: 4, kind: input, shape index: {}]   ;;  %s13095_s5 = inlined_call_operand.vmem [shape: f32[2,384,128], index: 5, kind: output, shape index: {}]  }
   0x1 LB: > { %s7689_s19 = sadd.s32 4294967295, %s8102_s18   ;;  %p7693_p0 = scmp.ge.s32.totalorder %s8102_s18, 1  ;;  %s8102_s18 = sphi %s8135_s18, %s15_s18  }
   0x2   : > { %p187_p1 = scmp.lt.s32.totalorder %s8102_s18, 3 }
   0x4   : > { %p188_p2 = pnand %p7693_p0, %p187_p1 }
   0x6   : > { %191 = sbr.rel (%p188_p2) target bundleno = 1511 (0x5e7), region = 40 }
   0xb   : > { %v1536_v0 = vld [vmem:[%s13091_s1 + $0x78] sm:$0xff]  ;;  %v8104_v2 = vmov 0.0   ;;  %v1535_v3 = vld [vmem:[%s13091_s1 + $0x70] sm:$0xff]  ;;  %v1534_v5 = vld [vmem:[%s13091_s1 + $0x68] sm:$0xff]  ;;  %p215_p3 = scmp.lt.s32.totalorder %s7689_s19, 1 }
   0xc   : > { %v1568_v1 = vld [vmem:[%s13091_s1 + $0x178] sm:$0xff]  ;;  %1672 = vmatprep.subr.mxu0 %v8104_v2  ;;  %4254 = vst [vmem:[#allocation3] sm:$0xff] %v8104_v2  ;;  %4255 = vst [vmem:[#allocation3 + $0x8] sm:$0xff] %v8104_v2  ;;  %1977 = vmatprep.subr.mxu1 %v8104_v2  ;;  %v1567_v4 = vld [vmem:[%s13091_s1 + $0x170] sm:$0xff] }
   0xd   : > { %4256 = vst [vmem:[#allocation3 + $0x10] sm:$0xff] %v8104_v2  ;;  %4257 = vst [vmem:[#allocation3 + $0x18] sm:$0xff] %v8104_v2  ;;  %1673 = vmatpush1.msra.mxu0 %v1536_v0  ;;  %1978 = vmatpush1.msra.mxu1 %v1568_v1  ;;  %v1566_v6 = vld [vmem:[%s13091_s1 + $0x168] sm:$0xff]  ;;  %v1533_v7 = vld [vmem:[%s13091_s1 + $0x60] sm:$0xff]  ;;  %s13834_s19 = smov (!%p215_p3, %s7689_s19), 1 }
   0xe   : > { %4258 = vst [vmem:[#allocation3 + $0x1a0] sm:$0xff] %v8104_v2  ;;  %4259 = vst [vmem:[#allocation3 + $0x1a8] sm:$0xff] %v8104_v2  ;;  %1674 = vmatprep.subr.mxu0 %v8104_v2  ;;  %1979 = vmatprep.subr.mxu1 %v8104_v2  ;;  %v1565_v8 = vld [vmem:[%s13091_s1 + $0x160] sm:$0xff]  ;;  %v1532_v9 = vld [vmem:[%s13091_s1 + $0x58] sm:$0xff]  ;;  %s7932_s11 = smul.u32 456, %s13834_s19 }
   0xf   : > { %4260 = vst [vmem:[#allocation3 + $0x1b0] sm:$0xff] %v8104_v2  ;;  %4261 = vst [vmem:[#allocation3 + $0x1b8] sm:$0xff] %v8104_v2  ;;  %1675 = vmatpush1.msra.mxu0 %v1535_v3  ;;  %1980 = vmatpush1.msra.mxu1 %v1567_v4  ;;  %v1564_v10 = vld [vmem:[%s13091_s1 + $0x158] sm:$0xff]  ;;  %v1531_v11 = vld [vmem:[%s13091_s1 + $0x50] sm:$0xff] }
  0x10   : > { %1676 = vmatprep.subr.mxu0 %v8104_v2  ;;  %1981 = vmatprep.subr.mxu1 %v8104_v2  ;;  %v1563_v12 = vld [vmem:[%s13091_s1 + $0x150] sm:$0xff]  ;;  %v1530_v13 = vld [vmem:[%s13091_s1 + $0x48] sm:$0xff]  ;;  %v1529_v15 = vld [vmem:[%s13091_s1 + $0x40] sm:$0xff]  ;;  %s8391_s24 = scalar_lea.vmem %s13090_s0, %s7932_s11 }
  0x11   : > { %1677 = vmatpush1.msra.mxu0 %v1534_v5  ;;  %1982 = vmatpush1.msra.mxu1 %v1566_v6  ;;  %v1562_v14 = vld [vmem:[%s13091_s1 + $0x148] sm:$0xff]  ;;  %v1561_v16 = vld [vmem:[%s13091_s1 + $0x140] sm:$0xff]  ;;  %v1528_v17 = vld [vmem:[%s13091_s1 + $0x38] sm:$0xff] }
  0x12   : > { %1678 = vmatprep.subr.mxu0 %v8104_v2  ;;  %1983 = vmatprep.subr.mxu1 %v8104_v2  ;;  %v1560_v18 = vld [vmem:[%s13091_s1 + $0x138] sm:$0xff]  ;;  %v1527_v19 = vld [vmem:[%s13091_s1 + $0x30] sm:$0xff]  ;;  %v1526_v21 = vld [vmem:[%s13091_s1 + $0x28] sm:$0xff] }
  0x13   : > { %1679 = vmatpush1.msra.mxu0 %v1533_v7  ;;  %1984 = vmatpush1.msra.mxu1 %v1565_v8  ;;  %v1559_v20 = vld [vmem:[%s13091_s1 + $0x130] sm:$0xff]  ;;  %v1558_v22 = vld [vmem:[%s13091_s1 + $0x128] sm:$0xff]  ;;  %v1525_v23 = vld [vmem:[%s13091_s1 + $0x20] sm:$0xff] }
  0x14   : > { %1680 = vmatprep.subr.mxu0 %v8104_v2  ;;  %1985 = vmatprep.subr.mxu1 %v8104_v2  ;;  %v1557_v24 = vld [vmem:[%s13091_s1 + $0x120] sm:$0xff]  ;;  %v1524_v25 = vld [vmem:[%s13091_s1 + $0x18] sm:$0xff]  ;;  %v1523_v27 = vld [vmem:[%s13091_s1 + $0x10] sm:$0xff] }
  0x15   : > { %1681 = vmatpush1.msra.mxu0 %v1532_v9  ;;  %1986 = vmatpush1.msra.mxu1 %v1564_v10  ;;  %v1556_v26 = vld [vmem:[%s13091_s1 + $0x118] sm:$0xff]  ;;  %v1555_v28 = vld [vmem:[%s13091_s1 + $0x110] sm:$0xff]  ;;  %v1522_v29 = vld [vmem:[%s13091_s1 + $0x8] sm:$0xff] }
  0x16   : > { %1682 = vmatprep.subr.mxu0 %v8104_v2  ;;  %1987 = vmatprep.subr.mxu1 %v8104_v2  ;;  %v1554_v30 = vld [vmem:[%s13091_s1 + $0x108] sm:$0xff]  ;;  %v1521_v31 = vld [vmem:[%s13091_s1] sm:$0xff]  ;;  %v1552_v33 = vld [vmem:[%s13091_s1 + $0xf8] sm:$0xff] }
  0x17   : > { %1683 = vmatpush1.msra.mxu0 %v1531_v11  ;;  %1988 = vmatpush1.msra.mxu1 %v1563_v12  ;;  %v1553_v32 = vld [vmem:[%s13091_s1 + $0x100] sm:$0xff]  ;;  %v1584_v34 = vld [vmem:[%s13091_s1 + $0x1f8] sm:$0xff]  ;;  %v1551_v35 = vld [vmem:[%s13091_s1 + $0xf0] sm:$0xff] }
  0x18   : > { %1684 = vmatprep.subr.mxu0 %v8104_v2  ;;  %1989 = vmatprep.subr.mxu1 %v8104_v2  ;;  %v1583_v36 = vld [vmem:[%s13091_s1 + $0x1f0] sm:$0xff]  ;;  %v1550_v37 = vld [vmem:[%s13091_s1 + $0xe8] sm:$0xff]  ;;  %v1549_v39 = vld [vmem:[%s13091_s1 + $0xe0] sm:$0xff] }
  0x19   : > { %1685 = vmatpush1.msra.mxu0 %v1530_v13  ;;  %1990 = vmatpush1.msra.mxu1 %v1562_v14  ;;  %v1582_v38 = vld [vmem:[%s13091_s1 + $0x1e8] sm:$0xff]  ;;  %v1581_v40 = vld [vmem:[%s13091_s1 + $0x1e0] sm:$0xff]  ;;  %v1548_v41 = vld [vmem:[%s13091_s1 + $0xd8] sm:$0xff] }
  0x1a   : > { %1686 = vmatprep.subr.mxu0 %v8104_v2  ;;  %1991 = vmatprep.subr.mxu1 %v8104_v2  ;;  %v1580_v42 = vld [vmem:[%s13091_s1 + $0x1d8] sm:$0xff]  ;;  %v1547_v43 = vld [vmem:[%s13091_s1 + $0xd0] sm:$0xff]  ;;  %v1546_v45 = vld [vmem:[%s13091_s1 + $0xc8] sm:$0xff] }
  0x1b   : > { %1687 = vmatpush1.msra.mxu0 %v1529_v15  ;;  %1992 = vmatpush1.msra.mxu1 %v1561_v16  ;;  %v1579_v44 = vld [vmem:[%s13091_s1 + $0x1d0] sm:$0xff]  ;;  %v1578_v46 = vld [vmem:[%s13091_s1 + $0x1c8] sm:$0xff]  ;;  %v1545_v47 = vld [vmem:[%s13091_s1 + $0xc0] sm:$0xff] }
  0x1c   : > { %1688 = vmatprep.subr.mxu0 %v8104_v2  ;;  %1993 = vmatprep.subr.mxu1 %v8104_v2  ;;  %v1577_v48 = vld [vmem:[%s13091_s1 + $0x1c0] sm:$0xff]  ;;  %v1544_v49 = vld [vmem:[%s13091_s1 + $0xb8] sm:$0xff]  ;;  %v1543_v51 = vld [vmem:[%s13091_s1 + $0xb0] sm:$0xff] }
  0x1d   : > { %1689 = vmatpush1.msra.mxu0 %v1528_v17  ;;  %1994 = vmatpush1.msra.mxu1 %v1560_v18  ;;  %v1576_v50 = vld [vmem:[%s13091_s1 + $0x1b8] sm:$0xff]  ;;  %v1575_v52 = vld [vmem:[%s13091_s1 + $0x1b0] sm:$0xff]  ;;  %v1542_v53 = vld [vmem:[%s13091_s1 + $0xa8] sm:$0xff] }
  0x1e   : > { %1690 = vmatprep.subr.mxu0 %v8104_v2  ;;  %1995 = vmatprep.subr.mxu1 %v8104_v2  ;;  %v1574_v54 = vld [vmem:[%s13091_s1 + $0x1a8] sm:$0xff]  ;;  %v1541_v55 = vld [vmem:[%s13091_s1 + $0xa0] sm:$0xff]  ;;  %v1540_v57 = vld [vmem:[%s13091_s1 + $0x98] sm:$0xff] }
  0x1f   : > { %1691 = vmatpush1.msra.mxu0 %v1527_v19  ;;  %1996 = vmatpush1.msra.mxu1 %v1559_v20  ;;  %v1573_v56 = vld [vmem:[%s13091_s1 + $0x1a0] sm:$0xff]  ;;  %v1572_v58 = vld [vmem:[%s13091_s1 + $0x198] sm:$0xff]  ;;  %v1539_v59 = vld [vmem:[%s13091_s1 + $0x90] sm:$0xff] }
  0x20   : > { %1692 = vmatprep.subr.mxu0 %v8104_v2  ;;  %1997 = vmatprep.subr.mxu1 %v8104_v2  ;;  %v1571_v60 = vld [vmem:[%s13091_s1 + $0x190] sm:$0xff]  ;;  %v321_v61 = vld [vmem:[%s8391_s24 + $0x1] sm:$0xff]  ;;  %v1600_v3 = vld [vmem:[%s13091_s1 + $0x278] sm:$0xff] }
  0x21   : > { %1693 = vmatpush1.msra.mxu0 %v1526_v21  ;;  %1998 = vmatpush1.msra.mxu1 %v1558_v22  ;;  %v1538_v62 = vld [vmem:[%s13091_s1 + $0x88] sm:$0xff]  ;;  %v1537_v0 = vld [vmem:[%s13091_s1 + $0x80] sm:$0xff]  ;;  %v513_v5 = vld [vmem:[%s8391_s24 + $0x18] sm:$0xff] }
  0x22   : > { %1694 = vmatprep.subr.mxu0 %v8104_v2  ;;  %1999 = vmatprep.subr.mxu1 %v8104_v2  ;;  %v1570_v63 = vld [vmem:[%s13091_s1 + $0x188] sm:$0xff]  ;;  %v225_v1 = vld [vmem:[%s8391_s24] sm:$0xff]  ;;  %v323_v10 = vld [vmem:[%s8391_s24 + $0x11] sm:$0xff] }
  0x23   : > { %1695 = vmatpush1.msra.mxu0 %v1525_v23  ;;  %2000 = vmatpush1.msra.mxu1 %v1557_v24  ;;  %v1569_v4 = vld [vmem:[%s13091_s1 + $0x180] sm:$0xff]  ;;  %v322_v6 = vld [vmem:[%s8391_s24 + $0x9] sm:$0xff]  ;;  %v419_v18 = vld [vmem:[%s8391_s24 + $0x12] sm:$0xff] }
  0x24   : > { %1696 = vmatprep.subr.mxu0 %v8104_v2  ;;  %2001 = vmatprep.subr.mxu1 %v8104_v2  ;;  %v417_v7 = vld [vmem:[%s8391_s24 + $0x2] sm:$0xff]  ;;  %v1599_v11 = vld [vmem:[%s13091_s1 + $0x270] sm:$0xff]  ;;  %v8442_v16 = vld [vmem:[%s8391_s24 + $0x19] sm:$0xff] }
  0x25   : > { %1697 = vmatpush1.msra.mxu0 %v1524_v25  ;;  %2002 = vmatpush1.msra.mxu1 %v1556_v26  ;;  %v226_v8 = vld [vmem:[%s8391_s24 + $0x8] sm:$0xff]  ;;  %v514_v9 = vld [vmem:[%s8391_s24 + $0x20] sm:$0xff]  ;;  %v227_v14 = vld [vmem:[%s8391_s24 + $0x10] sm:$0xff] }
  0x26   : > { %1698 = vmatprep.subr.mxu0 %v8104_v2  ;;  %2003 = vmatprep.subr.mxu1 %v8104_v2  ;;  %v418_v12 = vld [vmem:[%s8391_s24 + $0xa] sm:$0xff]  ;;  %v1597_v17 = vld [vmem:[%s13091_s1 + $0x260] sm:$0xff]  ;;  %v1596_v21 = vld [vmem:[%s13091_s1 + $0x258] sm:$0xff] }
  0x27   : > { %1699 = vmatpush1.msra.mxu0 %v1523_v27  ;;  %2004 = vmatpush1.msra.mxu1 %v1555_v28  ;;  %v1598_v13 = vld [vmem:[%s13091_s1 + $0x268] sm:$0xff]  ;;  %v516_v19 = vld [vmem:[%s8391_s24 + $0x30] sm:$0xff]  ;;  %v8459_v22 = vld [vmem:[%s8391_s24 + $0x1a] sm:$0xff] }
  0x28   : > { %1700 = vmatprep.subr.mxu0 %v8104_v2  ;;  %2005 = vmatprep.subr.mxu1 %v8104_v2  ;;  %v515_v15 = vld [vmem:[%s8391_s24 + $0x28] sm:$0xff]  ;;  %v1595_v23 = vld [vmem:[%s13091_s1 + $0x250] sm:$0xff]  ;;  %v517_v24 = vld [vmem:[%s8391_s24 + $0x38] sm:$0xff] }
  0x29   : > { %1701 = vmatpush1.msra.mxu0 %v1522_v29  ;;  %2006 = vmatpush1.msra.mxu1 %v1554_v30  ;;  %v325_v20 = vld [vmem:[%s8391_s24 + $0x21] sm:$0xff]  ;;  %v326_v25 = vld [vmem:[%s8391_s24 + $0x29] sm:$0xff]  ;;  %v327_v29 = vld [vmem:[%s8391_s24 + $0x31] sm:$0xff] }
  0x2a   : > { %1702 = vmatprep.subr.mxu0 %v8104_v2  ;;  %2007 = vmatprep.subr.mxu1 %v8104_v2  ;;  %v1594_v26 = vld [vmem:[%s13091_s1 + $0x248] sm:$0xff]  ;;  %v518_v28 = vld [vmem:[%s8391_s24 + $0x40] sm:$0xff] }
  0x2b   : > { %1703 = vmatpush1.msra.mxu0 %v1521_v31  ;;  %2008 = vmatpush1.msra.mxu1 %v1553_v32  ;;  %v8472_v27 = vld [vmem:[%s8391_s24 + $0x22] sm:$0xff]  ;;  %v8483_v31 = vld [vmem:[%s8391_s24 + $0x2a] sm:$0xff]  ;;  %v1592_v32 = vld [vmem:[%s13091_s1 + $0x238] sm:$0xff] }
  0x2c   : > { %1704 = vmatprep.subr.mxu0 %v8104_v2  ;;  %2009 = vmatprep.subr.mxu1 %v8104_v2  ;;  %v1593_v30 = vld [vmem:[%s13091_s1 + $0x240] sm:$0xff] }
  0x2d   : > { %1705 = vmatpush2.msra.mxu0 %v1552_v33  ;;  %2010 = vmatpush2.msra.mxu1 %v1584_v34  ;;  %v519_v33 = vld [vmem:[%s8391_s24 + $0x48] sm:$0xff]  ;;  %v328_v34 = vld [vmem:[%s8391_s24 + $0x39] sm:$0xff] }
  0x2e   : > { %1706 = vmatprep.subr.mxu0 %v8104_v2  ;;  %2011 = vmatprep.subr.mxu1 %v8104_v2 }
  0x2f   : > { %1707 = vmatpush2.msra.mxu0 %v1551_v35  ;;  %2012 = vmatpush2.msra.mxu1 %v1583_v36  ;;  %v1591_v35 = vld [vmem:[%s13091_s1 + $0x230] sm:$0xff] }
  0x30   : > { %1708 = vmatprep.subr.mxu0 %v8104_v2  ;;  %2013 = vmatprep.subr.mxu1 %v8104_v2  ;;  %v8496_v36 = vld [vmem:[%s8391_s24 + $0x32] sm:$0xff] }
  0x31   : > { %1709 = vmatpush2.msra.mxu0 %v1550_v37  ;;  %2014 = vmatpush2.msra.mxu1 %v1582_v38  ;;  %v520_v37 = vld [vmem:[%s8391_s24 + $0x50] sm:$0xff]  ;;  %v329_v38 = vld [vmem:[%s8391_s24 + $0x41] sm:$0xff] }
  0x32   : > { %1710 = vmatprep.subr.mxu0 %v8104_v2  ;;  %2015 = vmatprep.subr.mxu1 %v8104_v2 }
  0x33   : > { %1711 = vmatpush2.msra.mxu0 %v1549_v39  ;;  %2016 = vmatpush2.msra.mxu1 %v1581_v40  ;;  %v1590_v39 = vld [vmem:[%s13091_s1 + $0x228] sm:$0xff]  ;;  %v8507_v40 = vld [vmem:[%s8391_s24 + $0x3a] sm:$0xff] }
  0x34   : > { %1712 = vmatprep.subr.mxu0 %v8104_v2  ;;  %2017 = vmatprep.subr.mxu1 %v8104_v2 }
  0x35   : > { %1713 = vmatpush2.msra.mxu0 %v1548_v41  ;;  %2018 = vmatpush2.msra.mxu1 %v1580_v42  ;;  %v1589_v41 = vld [vmem:[%s13091_s1 + $0x220] sm:$0xff]  ;;  %v521_v42 = vld [vmem:[%s8391_s24 + $0x58] sm:$0xff] }
  0x36   : > { %1714 = vmatprep.subr.mxu0 %v8104_v2  ;;  %2019 = vmatprep.subr.mxu1 %v8104_v2 }
  0x37   : > { %1715 = vmatpush2.msra.mxu0 %v1547_v43  ;;  %2020 = vmatpush2.msra.mxu1 %v1579_v44  ;;  %v330_v43 = vld [vmem:[%s8391_s24 + $0x49] sm:$0xff]  ;;  %v1588_v44 = vld [vmem:[%s13091_s1 + $0x218] sm:$0xff] }
  0x38   : > { %1716 = vmatprep.subr.mxu0 %v8104_v2  ;;  %2021 = vmatprep.subr.mxu1 %v8104_v2 }
  0x39   : > { %1717 = vmatpush2.msra.mxu0 %v1546_v45  ;;  %2022 = vmatpush2.msra.mxu1 %v1578_v46  ;;  %v8520_v45 = vld [vmem:[%s8391_s24 + $0x42] sm:$0xff] }
  0x3a   : > { %1718 = vmatprep.subr.mxu0 %v8104_v2  ;;  %2023 = vmatprep.subr.mxu1 %v8104_v2  ;;  %v522_v46 = vld [vmem:[%s8391_s24 + $0x60] sm:$0xff] }
  0x3b   : > { %1719 = vmatpush2.msra.mxu0 %v1545_v47  ;;  %2024 = vmatpush2.msra.mxu1 %v1577_v48  ;;  %v331_v47 = vld [vmem:[%s8391_s24 + $0x51] sm:$0xff] }
  0x3c   : > { %1720 = vmatprep.subr.mxu0 %v8104_v2  ;;  %2025 = vmatprep.subr.mxu1 %v8104_v2  ;;  %v1587_v48 = vld [vmem:[%s13091_s1 + $0x210] sm:$0xff] }
  0x3d   : > { %1721 = vmatpush2.msra.mxu0 %v1544_v49  ;;  %2026 = vmatpush2.msra.mxu1 %v1576_v50  ;;  %v8531_v49 = vld [vmem:[%s8391_s24 + $0x4a] sm:$0xff] }
  0x3e   : > { %1722 = vmatprep.subr.mxu0 %v8104_v2  ;;  %2027 = vmatprep.subr.mxu1 %v8104_v2  ;;  %v1586_v50 = vld [vmem:[%s13091_s1 + $0x208] sm:$0xff] }
  0x3f   : > { %1723 = vmatpush2.msra.mxu0 %v1543_v51  ;;  %2028 = vmatpush2.msra.mxu1 %v1575_v52  ;;  %v523_v51 = vld [vmem:[%s8391_s24 + $0x68] sm:$0xff]  ;;  %v332_v52 = vld [vmem:[%s8391_s24 + $0x59] sm:$0xff] }
  0x40   : > { %1724 = vmatprep.subr.mxu0 %v8104_v2  ;;  %2029 = vmatprep.subr.mxu1 %v8104_v2 }
  0x41   : > { %1725 = vmatpush2.msra.mxu0 %v1542_v53  ;;  %2030 = vmatpush2.msra.mxu1 %v1574_v54  ;;  %v1585_v53 = vld [vmem:[%s13091_s1 + $0x200] sm:$0xff]  ;;  %v8544_v54 = vld [vmem:[%s8391_s24 + $0x52] sm:$0xff] }
  0x42   : > { %1726 = vmatprep.subr.mxu0 %v8104_v2  ;;  %2031 = vmatprep.subr.mxu1 %v8104_v2 }
  0x43   : > { %1727 = vmatpush2.msra.mxu0 %v1541_v55  ;;  %2032 = vmatpush2.msra.mxu1 %v1573_v56  ;;  %v524_v55 = vld [vmem:[%s8391_s24 + $0x70] sm:$0xff]  ;;  %v333_v56 = vld [vmem:[%s8391_s24 + $0x61] sm:$0xff] }
  0x44   : > { %1728 = vmatprep.subr.mxu0 %v8104_v2  ;;  %2033 = vmatprep.subr.mxu1 %v8104_v2 }
  0x45   : > { %1729 = vmatpush2.msra.mxu0 %v1540_v57  ;;  %2034 = vmatpush2.msra.mxu1 %v1572_v58  ;;  %v1616_v57 = vld [vmem:[%s13091_s1 + $0x2f8] sm:$0xff] }
  0x46   : > { %1730 = vmatprep.subr.mxu0 %v8104_v2  ;;  %2035 = vmatprep.subr.mxu1 %v8104_v2  ;;  %v428_v58 = vld [vmem:[%s8391_s24 + $0x5a] sm:$0xff] }
  0x47   : > { %1731 = vmatpush2.msra.mxu0 %v1539_v59  ;;  %2036 = vmatpush2.msra.mxu1 %v1571_v60  ;;  %v1615_v59 = vld [vmem:[%s13091_s1 + $0x2f0] sm:$0xff]  ;;  %v525_v60 = vld [vmem:[%s8391_s24 + $0x78] sm:$0xff] }
  0x48   : > { %1732 = vmatprep.subr.mxu0 %v8104_v2  ;;  %1736 = vmatprep.mubr.f32.mxu0 %v321_v61  ;;  %v334_v61 = vld [vmem:[%s8391_s24 + $0x69] sm:$0xff] }
  0x49   : > { %1733 = vmatpush2.msra.mxu0 %v1538_v62  ;;  %2037 = vmatprep.subr.mxu1 %v8104_v2  ;;  %v1614_v62 = vld [vmem:[%s13091_s1 + $0x2e8] sm:$0xff] }
  0x4a   : > { %1734 = vmatprep.subr.mxu0 %v8104_v2  ;;  %2038 = vmatpush2.msra.mxu1 %v1570_v63  ;;  %v429_v63 = vld [vmem:[%s8391_s24 + $0x62] sm:$0xff] }
  0x4b   : > { %1735 = vmatpush2.msra.mxu0 %v1537_v0  ;;  %2039 = vmatprep.subr.mxu1 %v8104_v2  ;;  %v526_v0 = vld [vmem:[%s8391_s24 + $0x80] sm:$0xff] }
  0x4c   : > { %1737 = vmatmul.mubr.f32.vlgmr.msra.gmra.mxu0 %v225_v1  ;;  %2282 = vmatprep.subr.mxu0 %v8104_v2  ;;  %v335_v1 = vld [vmem:[%s8391_s24 + $0x71] sm:$0xff] }
  0x4d   : > { %2283 = vmatpush1.msra.mxu0 %v1600_v3  ;;  %2040 = vmatpush2.msra.mxu1 %v1569_v4  ;;  %v1613_v3 = vld [vmem:[%s13091_s1 + $0x2e0] sm:$0xff]  ;;  %v8575_v4 = vld [vmem:[%s13091_s1 + $0x378] sm:$0xff] }
  0x4e   : > { %2041 = vmatprep.mubr.f32.mxu1 %v513_v5  ;;  %1741 = vmatprep.mubr.f32.mxu0 %v322_v6  ;;  %v1612_v6 = vld [vmem:[%s13091_s1 + $0x2d8] sm:$0xff] }
  0x4f   : > { %2042 = vmatmul.mubr.f32.vlgmr.msra.gmra.mxu1 %v417_v7  ;;  %2284 = vmatprep.subr.mxu0 %v8104_v2  ;;  %v527_v7 = vld [vmem:[%s8391_s24 + $0x88] sm:$0xff] }
  0x50   : > { %1742 = vmatmul.mubr.f32.gmra.mxu0 %v226_v8  ;;  %2046 = vmatprep.mubr.f32.mxu1 %v514_v9  ;;  %v336_v8 = vld [vmem:[%s8391_s24 + $0x79] sm:$0xff] }
  0x51   : > { %1746 = vmatprep.mubr.f32.mxu0 %v323_v10  ;;  %2285 = vmatpush1.msra.mxu0 %v1599_v11  ;;  %v431_v10 = vld [vmem:[%s8391_s24 + $0x72] sm:$0xff] }
  0x52   : > { %2286 = vmatprep.subr.mxu0 %v8104_v2  ;;  %7868 = vmatprep.subr.mxu1 %v8104_v2  ;;  %v528_v11 = vld [vmem:[%s8391_s24 + $0x90] sm:$0xff] }
  0x53   : > { %2047 = vmatmul.mubr.f32.gmra.mxu1 %v418_v12  ;;  %2287 = vmatpush1.msra.mxu0 %v1598_v13  ;;  %v337_v12 = vld [vmem:[%s8391_s24 + $0x81] sm:$0xff] }
  0x54   : > { %1747 = vmatmul.mubr.f32.gmra.mxu0 %v227_v14  ;;  %2051 = vmatprep.mubr.f32.mxu1 %v515_v15  ;;  %v1610_v13 = vld [vmem:[%s13091_s1 + $0x2c8] sm:$0xff]  ;;  %v8600_v14 = vld [vmem:[%s13091_s1 + $0x370] sm:$0xff] }
  0x55   : > { %1751 = vmatprep.mubr.f32.mxu0 %v8442_v16  ;;  %2288 = vmatprep.subr.mxu0 %v8104_v2 }
  0x56   : > { %2289 = vmatpush1.msra.mxu0 %v1597_v17  ;;  %7900 = vmatpush1.msra.mxu1 %v8575_v4  ;;  %v1609_v17 = vld [vmem:[%s13091_s1 + $0x2c0] sm:$0xff] }
  0x57   : > { %2052 = vmatmul.mubr.f32.gmra.mxu1 %v419_v18  ;;  %2290 = vmatprep.subr.mxu0 %v8104_v2  ;;  %v529_v18 = vld [vmem:[%s8391_s24 + $0x98] sm:$0xff] }
  0x58   : > { %1752 = vmatmul.mubr.f32.gmra.mxu0 %v513_v5  ;;  %2056 = vmatprep.mubr.f32.mxu1 %v516_v19  ;;  %v430_v5 = vld [vmem:[%s8391_s24 + $0x6a] sm:$0xff] }
  0x59   : > { %1756 = vmatprep.mubr.f32.mxu0 %v325_v20  ;;  %2291 = vmatpush1.msra.mxu0 %v1596_v21  ;;  %v1608_v20 = vld [vmem:[%s13091_s1 + $0x2b8] sm:$0xff]  ;;  %v433_v21 = vld [vmem:[%s8391_s24 + $0x82] sm:$0xff] }
  0x5a   : > { %2292 = vmatprep.subr.mxu0 %v8104_v2  ;;  %7869 = vmatprep.subr.mxu1 %v8104_v2 }
  0x5b   : > { %2057 = vmatmul.mubr.f32.gmra.mxu1 %v8459_v22  ;;  %2293 = vmatpush1.msra.mxu0 %v1595_v23  ;;  %v530_v23 = vld [vmem:[%s8391_s24 + $0xa0] sm:$0xff] }
  0x5c   : > { %1757 = vmatmul.mubr.f32.gmra.mxu0 %v514_v9  ;;  %2061 = vmatprep.mubr.f32.mxu1 %v517_v24  ;;  %v1611_v9 = vld [vmem:[%s13091_s1 + $0x2d0] sm:$0xff] }
  0x5d   : > { %1761 = vmatprep.mubr.f32.mxu0 %v326_v25  ;;  %2294 = vmatprep.subr.mxu0 %v8104_v2  ;;  %v1607_v25 = vld [vmem:[%s13091_s1 + $0x2b0] sm:$0xff] }
  0x5e   : > { %2295 = vmatpush1.msra.mxu0 %v1594_v26  ;;  %7901 = vmatpush1.msra.mxu1 %v8600_v14  ;;  %v8625_v26 = vld [vmem:[%s13091_s1 + $0x368] sm:$0xff] }
  0x5f   : > { %2062 = vmatmul.mubr.f32.gmra.mxu1 %v8472_v27  ;;  %2296 = vmatprep.subr.mxu0 %v8104_v2 }
  0x60   : > { %1762 = vmatmul.mubr.f32.gmra.mxu0 %v515_v15  ;;  %2066 = vmatprep.mubr.f32.mxu1 %v518_v28  ;;  %v432_v15 = vld [vmem:[%s8391_s24 + $0x7a] sm:$0xff] }
  0x61   : > { %1766 = vmatprep.mubr.f32.mxu0 %v327_v29  ;;  %2297 = vmatpush1.msra.mxu0 %v1593_v30  ;;  %v1606_v29 = vld [vmem:[%s13091_s1 + $0x2a8] sm:$0xff] }
  0x62   : > { %2298 = vmatprep.subr.mxu0 %v8104_v2  ;;  %7870 = vmatprep.subr.mxu1 %v8104_v2  ;;  %v531_v30 = vld [vmem:[%s8391_s24 + $0xa8] sm:$0xff] }
  0x63   : > { %2067 = vmatmul.mubr.f32.gmra.mxu1 %v8483_v31  ;;  %2299 = vmatpush1.msra.mxu0 %v1592_v32  ;;  %v340_v32 = vld [vmem:[%s8391_s24 + $0x99] sm:$0xff] }
  0x64   : > { %1767 = vmatmul.mubr.f32.gmra.mxu0 %v516_v19  ;;  %2071 = vmatprep.mubr.f32.mxu1 %v519_v33  ;;  %v338_v19 = vld [vmem:[%s8391_s24 + $0x89] sm:$0xff] }
  0x65   : > { %1771 = vmatprep.mubr.f32.mxu0 %v328_v34  ;;  %2300 = vmatprep.subr.mxu0 %v8104_v2  ;;  %v435_v34 = vld [vmem:[%s8391_s24 + $0x92] sm:$0xff] }
  0x66   : > { %2301 = vmatpush1.msra.mxu0 %v1591_v35  ;;  %7902 = vmatpush1.msra.mxu1 %v8625_v26  ;;  %v532_v35 = vld [vmem:[%s8391_s24 + $0xb0] sm:$0xff] }
  0x67   : > { %2072 = vmatmul.mubr.f32.gmra.mxu1 %v8496_v36  ;;  %2302 = vmatprep.subr.mxu0 %v8104_v2 }
  0x68   : > { %1772 = vmatmul.mubr.f32.gmra.mxu0 %v517_v24  ;;  %2076 = vmatprep.mubr.f32.mxu1 %v520_v37  ;;  %v339_v24 = vld [vmem:[%s8391_s24 + $0x91] sm:$0xff] }
  0x69   : > { %1776 = vmatprep.mubr.f32.mxu0 %v329_v38  ;;  %2303 = vmatpush1.msra.mxu0 %v1590_v39  ;;  %v1604_v38 = vld [vmem:[%s13091_s1 + $0x298] sm:$0xff]  ;;  %v8650_v39 = vld [vmem:[%s13091_s1 + $0x360] sm:$0xff] }
  0x6a   : > { %2304 = vmatprep.subr.mxu0 %v8104_v2  ;;  %7871 = vmatprep.subr.mxu1 %v8104_v2 }
  0x6b   : > { %2077 = vmatmul.mubr.f32.gmra.mxu1 %v8507_v40  ;;  %2305 = vmatpush1.msra.mxu0 %v1589_v41  ;;  %v436_v41 = vld [vmem:[%s8391_s24 + $0x9a] sm:$0xff] }
  0x6c   : > { %1777 = vmatmul.mubr.f32.gmra.mxu0 %v518_v28  ;;  %2081 = vmatprep.mubr.f32.mxu1 %v521_v42  ;;  %v434_v28 = vld [vmem:[%s8391_s24 + $0x8a] sm:$0xff] }
  0x6d   : > { %1781 = vmatprep.mubr.f32.mxu0 %v330_v43  ;;  %2306 = vmatprep.subr.mxu0 %v8104_v2  ;;  %v533_v43 = vld [vmem:[%s8391_s24 + $0xb8] sm:$0xff] }
  0x6e   : > { %2307 = vmatpush1.msra.mxu0 %v1588_v44  ;;  %v342_v44 = vld [vmem:[%s8391_s24 + $0xa9] sm:$0xff]  ;;  %7903 = vmatpush1.msra.mxu1 %v8650_v39 }
  0x6f   : > { %2082 = vmatmul.mubr.f32.gmra.mxu1 %v8520_v45  ;;  %2308 = vmatprep.subr.mxu0 %v8104_v2 }
  0x70   : > { %1782 = vmatmul.mubr.f32.gmra.mxu0 %v519_v33  ;;  %2086 = vmatprep.mubr.f32.mxu1 %v522_v46  ;;  %v1605_v33 = vld [vmem:[%s13091_s1 + $0x2a0] sm:$0xff] }
  0x71   : > { %1786 = vmatprep.mubr.f32.mxu0 %v331_v47  ;;  %2309 = vmatpush1.msra.mxu0 %v1587_v48  ;;  %v437_v47 = vld [vmem:[%s8391_s24 + $0xa2] sm:$0xff] }
  0x72   : > { %2310 = vmatprep.subr.mxu0 %v8104_v2  ;;  %v534_v48 = vld [vmem:[%s8391_s24 + $0xc0] sm:$0xff]  ;;  %7872 = vmatprep.subr.mxu1 %v8104_v2 }
  0x73   : > { %2087 = vmatmul.mubr.f32.gmra.mxu1 %v8531_v49  ;;  %2311 = vmatpush1.msra.mxu0 %v1586_v50  ;;  %v343_v50 = vld [vmem:[%s8391_s24 + $0xb1] sm:$0xff] }
  0x74   : > { %1787 = vmatmul.mubr.f32.gmra.mxu0 %v520_v37  ;;  %2091 = vmatprep.mubr.f32.mxu1 %v523_v51  ;;  %v341_v37 = vld [vmem:[%s8391_s24 + $0xa1] sm:$0xff] }
  0x75   : > { %1791 = vmatprep.mubr.f32.mxu0 %v332_v52  ;;  %2312 = vmatprep.subr.mxu0 %v8104_v2  ;;  %v8675_v52 = vld [vmem:[%s13091_s1 + $0x358] sm:$0xff] }
  0x76   : > { %2313 = vmatpush1.msra.mxu0 %v1585_v53  ;;  %v438_v53 = vld [vmem:[%s8391_s24 + $0xaa] sm:$0xff]  ;;  %7904 = vmatpush1.msra.mxu1 %v8675_v52 }
  0x77   : > { %2092 = vmatmul.mubr.f32.gmra.mxu1 %v8544_v54  ;;  %2314 = vmatprep.subr.mxu0 %v8104_v2 }
  0x78   : > { %1792 = vmatmul.mubr.f32.gmra.mxu0 %v521_v42  ;;  %2096 = vmatprep.mubr.f32.mxu1 %v524_v55  ;;  %v1603_v42 = vld [vmem:[%s13091_s1 + $0x290] sm:$0xff] }
  0x79   : > { %1796 = vmatprep.mubr.f32.mxu0 %v333_v56  ;;  %2315 = vmatpush2.msra.mxu0 %v1616_v57  ;;  %v344_v56 = vld [vmem:[%s8391_s24 + $0xb9] sm:$0xff]  ;;  %v8684_v57 = vld [vmem:[%s13091_s1 + $0x350] sm:$0xff] }
  0x7a   : > { %2316 = vmatprep.subr.mxu0 %v8104_v2  ;;  %7873 = vmatprep.subr.mxu1 %v8104_v2 }
  0x7b   : > { %2097 = vmatmul.mubr.f32.gmra.mxu1 %v428_v58  ;;  %2317 = vmatpush2.msra.mxu0 %v1615_v59  ;;  %v439_v58 = vld [vmem:[%s8391_s24 + $0xb2] sm:$0xff] }
  0x7c   : > { %1797 = vmatmul.mubr.f32.gmra.mxu0 %v522_v46  ;;  %2101 = vmatprep.mubr.f32.mxu1 %v525_v60  ;;  %v1602_v46 = vld [vmem:[%s13091_s1 + $0x288] sm:$0xff]  ;;  %v536_v59 = vld [vmem:[%s8391_s24 + $0xd0] sm:$0xff] }
  0x7d   : > { %1801 = vmatprep.mubr.f32.mxu0 %v334_v61  ;;  %2318 = vmatprep.subr.mxu0 %v8104_v2  ;;  %v8696_v61 = vld [vmem:[%s13091_s1 + $0x348] sm:$0xff] }
  0x7e   : > { %2319 = vmatpush2.msra.mxu0 %v1614_v62  ;;  %7905 = vmatpush1.msra.mxu1 %v8684_v57  ;;  %v440_v62 = vld [vmem:[%s8391_s24 + $0xba] sm:$0xff] }
  0x7f   : > { %2102 = vmatmul.mubr.f32.gmra.mxu1 %v429_v63  ;;  %2320 = vmatprep.subr.mxu0 %v8104_v2  ;;  %v537_v63 = vld [vmem:[%s8391_s24 + $0xd8] sm:$0xff] }
  0x80   : > { %1802 = vmatmul.mubr.f32.gmra.mxu0 %v523_v51  ;;  %2106 = vmatprep.mubr.f32.mxu1 %v526_v0  ;;  %v1601_v51 = vld [vmem:[%s13091_s1 + $0x280] sm:$0xff] }
  0x81   : > { %1806 = vmatprep.mubr.f32.mxu0 %v335_v1  ;;  %2321 = vmatpush2.msra.mxu0 %v1613_v3  ;;  %v8706_v1 = vld [vmem:[%s13091_s1 + $0x340] sm:$0xff] }
  0x82   : > { %2322 = vmatprep.subr.mxu0 %v8104_v2  ;;  %7874 = vmatprep.subr.mxu1 %v8104_v2  ;;  %v441_v3 = vld [vmem:[%s8391_s24 + $0xc2] sm:$0xff] }
  0x83   : > { %2107 = vmatmul.mubr.f32.gmra.mxu1 %v430_v5  ;;  %2323 = vmatpush2.msra.mxu0 %v1612_v6  ;;  %v538_v5 = vld [vmem:[%s8391_s24 + $0xe0] sm:$0xff]  ;;  %v347_v6 = vld [vmem:[%s8391_s24 + $0xd1] sm:$0xff] }
  0x84   : > { %1807 = vmatmul.mubr.f32.gmra.mxu0 %v524_v55  ;;  %2111 = vmatprep.mubr.f32.mxu1 %v527_v7  ;;  %v535_v55 = vld [vmem:[%s8391_s24 + $0xc8] sm:$0xff] }
  0x85   : > { %1811 = vmatprep.mubr.f32.mxu0 %v336_v8  ;;  %2324 = vmatprep.subr.mxu0 %v8104_v2  ;;  %v442_v8 = vld [vmem:[%s8391_s24 + $0xca] sm:$0xff] }
  0x86   : > { %2325 = vmatpush2.msra.mxu0 %v1611_v9  ;;  %7906 = vmatpush1.msra.mxu1 %v8696_v61  ;;  %v539_v9 = vld [vmem:[%s8391_s24 + $0xe8] sm:$0xff] }
  0x87   : > { %2112 = vmatmul.mubr.f32.gmra.mxu1 %v431_v10  ;;  %2326 = vmatprep.subr.mxu0 %v8104_v2  ;;  %v348_v10 = vld [vmem:[%s8391_s24 + $0xd9] sm:$0xff] }
  0x88   : > { %1812 = vmatmul.mubr.f32.gmra.mxu0 %v525_v60  ;;  %2116 = vmatprep.mubr.f32.mxu1 %v528_v11  ;;  %v345_v60 = vld [vmem:[%s8391_s24 + $0xc1] sm:$0xff] }
  0x89   : > { %1816 = vmatprep.mubr.f32.mxu0 %v337_v12  ;;  %2327 = vmatpush2.msra.mxu0 %v1610_v13  ;;  %v443_v12 = vld [vmem:[%s8391_s24 + $0xd2] sm:$0xff] }
  0x8a   : > { %2328 = vmatprep.subr.mxu0 %v8104_v2  ;;  %7875 = vmatprep.subr.mxu1 %v8104_v2  ;;  %v540_v13 = vld [vmem:[%s8391_s24 + $0xf0] sm:$0xff] }
  0x8b   : > { %2117 = vmatmul.mubr.f32.gmra.mxu1 %v432_v15  ;;  %2329 = vmatpush2.msra.mxu0 %v1609_v17  ;;  %v349_v15 = vld [vmem:[%s8391_s24 + $0xe1] sm:$0xff] }
  0x8c   : > { %1817 = vmatmul.mubr.f32.gmra.mxu0 %v526_v0  ;;  %2121 = vmatprep.mubr.f32.mxu1 %v529_v18  ;;  %v346_v0 = vld [vmem:[%s8391_s24 + $0xc9] sm:$0xff] }
  0x8d   : > { %1821 = vmatprep.mubr.f32.mxu0 %v338_v19  ;;  %2330 = vmatprep.subr.mxu0 %v8104_v2  ;;  %v8738_v17 = vld [vmem:[%s13091_s1 + $0x328] sm:$0xff]  ;;  %v541_v19 = vld [vmem:[%s8391_s24 + $0xf8] sm:$0xff] }
  0x8e   : > { %2331 = vmatpush2.msra.mxu0 %v1608_v20  ;;  %7907 = vmatpush1.msra.mxu1 %v8706_v1  ;;  %v350_v20 = vld [vmem:[%s8391_s24 + $0xe9] sm:$0xff] }
  0x8f   : > { %2122 = vmatmul.mubr.f32.gmra.mxu1 %v433_v21  ;;  %2332 = vmatprep.subr.mxu0 %v8104_v2  ;;  %v8748_v21 = vld [vmem:[%s13091_s1 + $0x320] sm:$0xff] }
  0x90   : > { %1822 = vmatmul.mubr.f32.gmra.mxu0 %v527_v7  ;;  %2126 = vmatprep.mubr.f32.mxu1 %v530_v23  ;;  %v8716_v7 = vld [vmem:[%s13091_s1 + $0x338] sm:$0xff] }
  0x91   : > { %1826 = vmatprep.mubr.f32.mxu0 %v339_v24  ;;  %2333 = vmatpush2.msra.mxu0 %v1607_v25  ;;  %v542_v24 = vld [vmem:[%s8391_s24 + $0x100] sm:$0xff]  ;;  %v351_v25 = vld [vmem:[%s8391_s24 + $0xf1] sm:$0xff] }
  0x92   : > { %2334 = vmatprep.subr.mxu0 %v8104_v2  ;;  %7876 = vmatprep.subr.mxu1 %v8104_v2 }
  0x93   : > { %2127 = vmatmul.mubr.f32.gmra.mxu1 %v434_v28  ;;  %2335 = vmatpush2.msra.mxu0 %v1606_v29  ;;  %v8758_v28 = vld [vmem:[%s13091_s1 + $0x318] sm:$0xff]  ;;  %v446_v29 = vld [vmem:[%s8391_s24 + $0xea] sm:$0xff] }
  0x94   : > { %1827 = vmatmul.mubr.f32.gmra.mxu0 %v528_v11  ;;  %2131 = vmatprep.mubr.f32.mxu1 %v531_v30  ;;  %v8722_v11 = vld [vmem:[#allocation3] sm:$0xff] }
  0x95   : > { %1831 = vmatprep.mubr.f32.mxu0 %v340_v32  ;;  %2336 = vmatprep.subr.mxu0 %v8104_v2  ;;  %v352_v32 = vld [vmem:[%s8391_s24 + $0xf9] sm:$0xff] }
  0x96   : > { %2337 = vmatpush2.msra.mxu0 %v1605_v33  ;;  %7908 = vmatpush1.msra.mxu1 %v8716_v7  ;;  %v8768_v33 = vld [vmem:[%s13091_s1 + $0x310] sm:$0xff] }
  0x97   : > { %2132 = vmatmul.mubr.f32.gmra.mxu1 %v435_v34  ;;  %2338 = vmatprep.subr.mxu0 %v8104_v2  ;;  %v447_v34 = vld [vmem:[%s8391_s24 + $0xf2] sm:$0xff] }
  0x98   : > { %1832 = vmatmul.mubr.f32.gmra.mxu0 %v529_v18  ;;  %2136 = vmatprep.mubr.f32.mxu1 %v532_v35  ;;  %v444_v18 = vld [vmem:[%s8391_s24 + $0xda] sm:$0xff] }
  0x99   : > { %1836 = vmatprep.mubr.f32.mxu0 %v341_v37  ;;  %2339 = vmatpush2.msra.mxu0 %v1604_v38  ;;  %v353_v37 = vld [vmem:[%s8391_s24 + $0x101] sm:$0xff] }
  0x9a   : > { %2340 = vmatprep.subr.mxu0 %v8104_v2  ;;  %7877 = vmatprep.subr.mxu1 %v8722_v11  ;;  %v8778_v38 = vld [vmem:[%s13091_s1 + $0x308] sm:$0xff] }
  0x9b   : > { %2137 = vmatmul.mubr.f32.gmra.mxu1 %v436_v41  ;;  %2341 = vmatpush2.msra.mxu0 %v1603_v42  ;;  %v448_v41 = vld [vmem:[%s8391_s24 + $0xfa] sm:$0xff] }
  0x9c   : > { %1837 = vmatmul.mubr.f32.gmra.mxu0 %v530_v23  ;;  %2141 = vmatprep.mubr.f32.mxu1 %v533_v43  ;;  %v445_v23 = vld [vmem:[%s8391_s24 + $0xe2] sm:$0xff]  ;;  %v545_v42 = vld [vmem:[%s8391_s24 + $0x118] sm:$0xff] }
  0x9d   : > { %1841 = vmatprep.mubr.f32.mxu0 %v342_v44  ;;  %2342 = vmatprep.subr.mxu0 %v8104_v2  ;;  %v8788_v44 = vld [vmem:[%s13091_s1 + $0x300] sm:$0xff] }
  0x9e   : > { %2343 = vmatpush2.msra.mxu0 %v1602_v46  ;;  %v449_v46 = vld [vmem:[%s8391_s24 + $0x102] sm:$0xff] }
  0x9f   : > { %2142 = vmatmul.mubr.f32.gmra.mxu1 %v437_v47  ;;  %2344 = vmatprep.subr.mxu0 %v8104_v2  ;;  %v546_v47 = vld [vmem:[%s8391_s24 + $0x120] sm:$0xff] }
  0xa0   : > { %1842 = vmatmul.mubr.f32.gmra.mxu0 %v531_v30  ;;  %2146 = vmatprep.mubr.f32.mxu1 %v534_v48  ;;  %v543_v30 = vld [vmem:[%s8391_s24 + $0x108] sm:$0xff] }
  0xa1   : > { %1846 = vmatprep.mubr.f32.mxu0 %v343_v50  ;;  %2345 = vmatpush2.msra.mxu0 %v1601_v51  ;;  %v8798_v50 = vld [vmem:[%s13091_s1 + $0x3f8] sm:$0xff]  ;;  %v450_v51 = vld [vmem:[%s8391_s24 + $0x10a] sm:$0xff] }
  0xa2   : > { %2587 = vmatprep.subr.mxu0 %v8104_v2  ;;  %v8728_v2 = vld [vmem:[%s13091_s1 + $0x330] sm:$0xff] }
  0xa3   : > { %2147 = vmatmul.mubr.f32.gmra.mxu1 %v438_v53  ;;  %v547_v53 = vld [vmem:[%s8391_s24 + $0x128] sm:$0xff] }
  0xa4   : > { %1847 = vmatmul.mubr.f32.gmra.mxu0 %v532_v35  ;;  %2151 = vmatprep.mubr.f32.mxu1 %v535_v55  ;;  %v544_v35 = vld [vmem:[%s8391_s24 + $0x110] sm:$0xff] }
  0xa5   : > { %1851 = vmatprep.mubr.f32.mxu0 %v344_v56  ;;  %7909 = vmatpush1.msra.mxu1 %v8728_v2  ;;  %v8808_v56 = vld [vmem:[%s13091_s1 + $0x3f0] sm:$0xff] }
  0xa6   : > { %7878 = vmatprep.subr.mxu1 %v8722_v11 }
  0xa7   : > { %2152 = vmatmul.mubr.f32.gmra.mxu1 %v439_v58  ;;  %v451_v58 = vld [vmem:[%s8391_s24 + $0x112] sm:$0xff] }
  0xa8   : > { %1852 = vmatmul.mubr.f32.gmra.mxu0 %v533_v43  ;;  %2156 = vmatprep.mubr.f32.mxu1 %v536_v59  ;;  %v354_v43 = vld [vmem:[%s8391_s24 + $0x109] sm:$0xff] }
  0xa9   : > { %1856 = vmatprep.mubr.f32.mxu0 %v345_v60  ;;  %7910 = vmatpush1.msra.mxu1 %v8738_v17  ;;  %v357_v60 = vld [vmem:[%s8391_s24 + $0x121] sm:$0xff] }
  0xaa   : > { %7879 = vmatprep.subr.mxu1 %v8722_v11 }
  0xab   : > { %2157 = vmatmul.mubr.f32.gmra.mxu1 %v440_v62  ;;  %v8818_v62 = vld [vmem:[%s13091_s1 + $0x3e8] sm:$0xff] }
  0xac   : > { %1857 = vmatmul.mubr.f32.gmra.mxu0 %v534_v48  ;;  %2161 = vmatprep.mubr.f32.mxu1 %v537_v63  ;;  %v355_v48 = vld [vmem:[%s8391_s24 + $0x111] sm:$0xff] }
  0xad   : > { %1861 = vmatprep.mubr.f32.mxu0 %v346_v0  ;;  %7911 = vmatpush1.msra.mxu1 %v8748_v21  ;;  %v549_v0 = vld [vmem:[%s8391_s24 + $0x138] sm:$0xff] }
  0xae   : > { %7880 = vmatprep.subr.mxu1 %v8722_v11 }
  0xaf   : > { %2162 = vmatmul.mubr.f32.gmra.mxu1 %v441_v3  ;;  %v358_v3 = vld [vmem:[%s8391_s24 + $0x129] sm:$0xff] }
  0xb0   : > { %1862 = vmatmul.mubr.f32.gmra.mxu0 %v535_v55  ;;  %2166 = vmatprep.mubr.f32.mxu1 %v538_v5  ;;  %v356_v55 = vld [vmem:[%s8391_s24 + $0x119] sm:$0xff] }
  0xb1   : > { %1866 = vmatprep.mubr.f32.mxu0 %v347_v6  ;;  %7912 = vmatpush1.msra.mxu1 %v8758_v28  ;;  %v453_v6 = vld [vmem:[%s8391_s24 + $0x122] sm:$0xff] }
  0xb2   : > { %7881 = vmatprep.subr.mxu1 %v8722_v11 }
  0xb3   : > { %2167 = vmatmul.mubr.f32.gmra.mxu1 %v442_v8  ;;  %v550_v8 = vld [vmem:[%s8391_s24 + $0x140] sm:$0xff] }
  0xb4   : > { %1867 = vmatmul.mubr.f32.gmra.mxu0 %v536_v59  ;;  %2171 = vmatprep.mubr.f32.mxu1 %v539_v9  ;;  %v548_v59 = vld [vmem:[%s8391_s24 + $0x130] sm:$0xff] }
  0xb5   : > { %1871 = vmatprep.mubr.f32.mxu0 %v348_v10  ;;  %7913 = vmatpush1.msra.mxu1 %v8768_v33  ;;  %v8838_v10 = vld [vmem:[%s13091_s1 + $0x3d8] sm:$0xff] }
  0xb6   : > { %7882 = vmatprep.subr.mxu1 %v8722_v11 }
  0xb7   : > { %2172 = vmatmul.mubr.f32.gmra.mxu1 %v443_v12  ;;  %v454_v12 = vld [vmem:[%s8391_s24 + $0x12a] sm:$0xff] }
  0xb8   : > { %1872 = vmatmul.mubr.f32.gmra.mxu0 %v537_v63  ;;  %2176 = vmatprep.mubr.f32.mxu1 %v540_v13  ;;  %v452_v63 = vld [vmem:[%s8391_s24 + $0x11a] sm:$0xff] }
  0xb9   : > { %1876 = vmatprep.mubr.f32.mxu0 %v349_v15  ;;  %7914 = vmatpush1.msra.mxu1 %v8778_v38  ;;  %v360_v15 = vld [vmem:[%s8391_s24 + $0x139] sm:$0xff] }
  0xba   : > { %7883 = vmatprep.subr.mxu1 %v8722_v11 }
  0xbb   : > { %2177 = vmatmul.mubr.f32.gmra.mxu1 %v444_v18  ;;  %v8848_v18 = vld [vmem:[%s13091_s1 + $0x3d0] sm:$0xff] }
  0xbc   : > { %1877 = vmatmul.mubr.f32.gmra.mxu0 %v538_v5  ;;  %2181 = vmatprep.mubr.f32.mxu1 %v541_v19  ;;  %v8828_v5 = vld [vmem:[%s13091_s1 + $0x3e0] sm:$0xff] }
  0xbd   : > { %1881 = vmatprep.mubr.f32.mxu0 %v350_v20  ;;  %7915 = vmatpush1.msra.mxu1 %v8788_v44  ;;  %v552_v20 = vld [vmem:[%s8391_s24 + $0x150] sm:$0xff] }
  0xbe   : > { %7884 = vmatprep.subr.mxu1 %v8722_v11 }
  0xbf   : > { %2182 = vmatmul.mubr.f32.gmra.mxu1 %v445_v23  ;;  %v361_v23 = vld [vmem:[%s8391_s24 + $0x141] sm:$0xff] }
  0xc0   : > { %1882 = vmatmul.mubr.f32.gmra.mxu0 %v539_v9  ;;  %2186 = vmatprep.mubr.f32.mxu1 %v542_v24  ;;  %v359_v9 = vld [vmem:[%s8391_s24 + $0x131] sm:$0xff] }
  0xc1   : > { %1886 = vmatprep.mubr.f32.mxu0 %v351_v25  ;;  %7916 = vmatpush2.msra.mxu1 %v8798_v50  ;;  %v456_v25 = vld [vmem:[%s8391_s24 + $0x13a] sm:$0xff] }
  0xc2   : > { %7885 = vmatprep.subr.mxu1 %v8722_v11 }
  0xc3   : > { %2187 = vmatmul.mubr.f32.gmra.mxu1 %v446_v29  ;;  %v553_v29 = vld [vmem:[%s8391_s24 + $0x158] sm:$0xff] }
  0xc4   : > { %1887 = vmatmul.mubr.f32.gmra.mxu0 %v540_v13  ;;  %2191 = vmatprep.mubr.f32.mxu1 %v543_v30  ;;  %v551_v13 = vld [vmem:[%s8391_s24 + $0x148] sm:$0xff] }
  0xc5   : > { %1891 = vmatprep.mubr.f32.mxu0 %v352_v32  ;;  %7917 = vmatpush2.msra.mxu1 %v8808_v56  ;;  %v8868_v32 = vld [vmem:[%s13091_s1 + $0x3c0] sm:$0xff] }
  0xc6   : > { %7886 = vmatprep.subr.mxu1 %v8722_v11 }
  0xc7   : > { %2192 = vmatmul.mubr.f32.gmra.mxu1 %v447_v34  ;;  %v457_v34 = vld [vmem:[%s8391_s24 + $0x142] sm:$0xff] }
  0xc8   : > { %1892 = vmatmul.mubr.f32.gmra.mxu0 %v541_v19  ;;  %2196 = vmatprep.mubr.f32.mxu1 %v544_v35  ;;  %v455_v19 = vld [vmem:[%s8391_s24 + $0x132] sm:$0xff] }
  0xc9   : > { %1896 = vmatprep.mubr.f32.mxu0 %v353_v37  ;;  %7918 = vmatpush2.msra.mxu1 %v8818_v62  ;;  %v363_v37 = vld [vmem:[%s8391_s24 + $0x151] sm:$0xff] }
  0xca   : > { %7887 = vmatprep.subr.mxu1 %v8722_v11 }
  0xcb   : > { %2197 = vmatmul.mubr.f32.gmra.mxu1 %v448_v41  ;;  %v8878_v41 = vld [vmem:[%s13091_s1 + $0x3b8] sm:$0xff] }
  0xcc   : > { %1897 = vmatmul.mubr.f32.gmra.mxu0 %v542_v24  ;;  %2201 = vmatprep.mubr.f32.mxu1 %v545_v42  ;;  %v8858_v24 = vld [vmem:[%s13091_s1 + $0x3c8] sm:$0xff] }
  0xcd   : > { %1901 = vmatprep.mubr.f32.mxu0 %v354_v43  ;;  %7919 = vmatpush2.msra.mxu1 %v8828_v5  ;;  %v555_v43 = vld [vmem:[%s8391_s24 + $0x168] sm:$0xff] }
  0xce   : > { %7888 = vmatprep.subr.mxu1 %v8722_v11 }
  0xcf   : > { %2202 = vmatmul.mubr.f32.gmra.mxu1 %v449_v46  ;;  %v364_v46 = vld [vmem:[%s8391_s24 + $0x159] sm:$0xff] }
  0xd0   : > { %1902 = vmatmul.mubr.f32.gmra.mxu0 %v543_v30  ;;  %2206 = vmatprep.mubr.f32.mxu1 %v546_v47  ;;  %v362_v30 = vld [vmem:[%s8391_s24 + $0x149] sm:$0xff] }
  0xd1   : > { %1906 = vmatprep.mubr.f32.mxu0 %v355_v48  ;;  %7920 = vmatpush2.msra.mxu1 %v8838_v10  ;;  %v459_v48 = vld [vmem:[%s8391_s24 + $0x152] sm:$0xff] }
  0xd2   : > { %7889 = vmatprep.subr.mxu1 %v8722_v11 }
  0xd3   : > { %2207 = vmatmul.mubr.f32.gmra.mxu1 %v450_v51  ;;  %v556_v51 = vld [vmem:[%s8391_s24 + $0x170] sm:$0xff] }
  0xd4   : > { %1907 = vmatmul.mubr.f32.gmra.mxu0 %v544_v35  ;;  %2211 = vmatprep.mubr.f32.mxu1 %v547_v53  ;;  %v554_v35 = vld [vmem:[%s8391_s24 + $0x160] sm:$0xff] }
  0xd5   : > { %1911 = vmatprep.mubr.f32.mxu0 %v356_v55  ;;  %7921 = vmatpush2.msra.mxu1 %v8848_v18  ;;  %v8898_v55 = vld [vmem:[%s13091_s1 + $0x3a8] sm:$0xff] }
  0xd6   : > { %7890 = vmatprep.subr.mxu1 %v8722_v11 }
  0xd7   : > { %2212 = vmatmul.mubr.f32.gmra.mxu1 %v451_v58  ;;  %v460_v58 = vld [vmem:[%s8391_s24 + $0x15a] sm:$0xff] }
  0xd8   : > { %1912 = vmatmul.mubr.f32.gmra.mxu0 %v545_v42  ;;  %2216 = vmatprep.mubr.f32.mxu1 %v548_v59  ;;  %v458_v42 = vld [vmem:[%s8391_s24 + $0x14a] sm:$0xff] }
  0xd9   : > { %1916 = vmatprep.mubr.f32.mxu0 %v357_v60  ;;  %7922 = vmatpush2.msra.mxu1 %v8858_v24  ;;  %v366_v60 = vld [vmem:[%s8391_s24 + $0x169] sm:$0xff] }
  0xda   : > { %7891 = vmatprep.subr.mxu1 %v8722_v11 }
  0xdb   : > { %2217 = vmatmul.mubr.f32.gmra.mxu1 %v452_v63  ;;  %v8908_v63 = vld [vmem:[%s13091_s1 + $0x3a0] sm:$0xff] }
  0xdc   : > { %1917 = vmatmul.mubr.f32.gmra.mxu0 %v546_v47  ;;  %2221 = vmatprep.mubr.f32.mxu1 %v549_v0  ;;  %v8888_v47 = vld [vmem:[%s13091_s1 + $0x3b0] sm:$0xff] }
  0xdd   : > { %1921 = vmatprep.mubr.f32.mxu0 %v358_v3  ;;  %7923 = vmatpush2.msra.mxu1 %v8868_v32  ;;  %v558_v3 = vld [vmem:[%s8391_s24 + $0x180] sm:$0xff] }
  0xde   : > { %7892 = vmatprep.subr.mxu1 %v8722_v11 }
  0xdf   : > { %2222 = vmatmul.mubr.f32.gmra.mxu1 %v453_v6  ;;  %v367_v6 = vld [vmem:[%s8391_s24 + $0x171] sm:$0xff] }
  0xe0   : > { %1922 = vmatmul.mubr.f32.gmra.mxu0 %v547_v53  ;;  %2226 = vmatprep.mubr.f32.mxu1 %v550_v8  ;;  %v365_v53 = vld [vmem:[%s8391_s24 + $0x161] sm:$0xff] }
  0xe1   : > { %1926 = vmatprep.mubr.f32.mxu0 %v359_v9  ;;  %7924 = vmatpush2.msra.mxu1 %v8878_v41  ;;  %v462_v9 = vld [vmem:[%s8391_s24 + $0x16a] sm:$0xff] }
  0xe2   : > { %7893 = vmatprep.subr.mxu1 %v8722_v11 }
  0xe3   : > { %2227 = vmatmul.mubr.f32.gmra.mxu1 %v454_v12  ;;  %v559_v12 = vld [vmem:[%s8391_s24 + $0x188] sm:$0xff] }
  0xe4   : > { %1927 = vmatmul.mubr.f32.gmra.mxu0 %v548_v59  ;;  %2231 = vmatprep.mubr.f32.mxu1 %v551_v13  ;;  %v557_v59 = vld [vmem:[%s8391_s24 + $0x178] sm:$0xff] }
  0xe5   : > { %1931 = vmatprep.mubr.f32.mxu0 %v360_v15  ;;  %7925 = vmatpush2.msra.mxu1 %v8888_v47  ;;  %v8928_v15 = vld [vmem:[%s13091_s1 + $0x390] sm:$0xff] }
  0xe6   : > { %7894 = vmatprep.subr.mxu1 %v8722_v11 }
  0xe7   : > { %2232 = vmatmul.mubr.f32.gmra.mxu1 %v455_v19  ;;  %v463_v19 = vld [vmem:[%s8391_s24 + $0x172] sm:$0xff] }
  0xe8   : > { %1932 = vmatmul.mubr.f32.gmra.mxu0 %v549_v0  ;;  %2236 = vmatprep.mubr.f32.mxu1 %v552_v20  ;;  %v461_v0 = vld [vmem:[%s8391_s24 + $0x162] sm:$0xff] }
  0xe9   : > { %1936 = vmatprep.mubr.f32.mxu0 %v361_v23  ;;  %7926 = vmatpush2.msra.mxu1 %v8898_v55  ;;  %v8937_v23 = vld [vmem:[%s13091_s1 + $0x388] sm:$0xff] }
  0xea   : > { %7895 = vmatprep.subr.mxu1 %v8722_v11 }
  0xeb   : > { %2237 = vmatmul.mubr.f32.gmra.mxu1 %v456_v25  ;;  %v464_v25 = vld [vmem:[%s8391_s24 + $0x17a] sm:$0xff] }
  0xec   : > { %1937 = vmatmul.mubr.f32.gmra.mxu0 %v550_v8  ;;  %2241 = vmatprep.mubr.f32.mxu1 %v553_v29  ;;  %v8918_v8 = vld [vmem:[%s13091_s1 + $0x398] sm:$0xff] }
  0xed   : > { %1941 = vmatprep.mubr.f32.mxu0 %v362_v30  ;;  %7927 = vmatpush2.msra.mxu1 %v8908_v63  ;;  %v8950_v30 = vld [vmem:[%s13092_s2] ss:$0 sm:$0xff] }
  0xee   : > { %7896 = vmatprep.subr.mxu1 %v8722_v11 }
  0xef   : > { %2242 = vmatmul.mubr.f32.gmra.mxu1 %v457_v34  ;;  %v8954_v34 = vld [vmem:[%s8391_s24 + $0x91] sm:$0xff] }
  0xf0   : > { %1942 = vmatmul.mubr.f32.gmra.mxu0 %v551_v13  ;;  %2246 = vmatprep.mubr.f32.mxu1 %v554_v35  ;;  %v368_v13 = vld [vmem:[%s8391_s24 + $0x179] sm:$0xff] }
  0xf1   : > { %1946 = vmatprep.mubr.f32.mxu0 %v363_v37  ;;  %7928 = vmatpush2.msra.mxu1 %v8918_v8 }
  0xf2   : > { %7897 = vmatprep.subr.mxu1 %v8722_v11 }
  0xf3   : > { %2247 = vmatmul.mubr.f32.gmra.mxu1 %v458_v42 }
  0xf4   : > { %1947 = vmatmul.mubr.f32.gmra.mxu0 %v552_v20  ;;  %2251 = vmatprep.mubr.f32.mxu1 %v555_v43  ;;  %v560_v20 = vld [vmem:[%s8391_s24 + $0x190] sm:$0xff] }
  0xf5   : > { %1951 = vmatprep.mubr.f32.mxu0 %v364_v46  ;;  %7929 = vmatpush2.msra.mxu1 %v8928_v15 }
  0xf6   : > { %7898 = vmatprep.subr.mxu1 %v8722_v11 }
  0xf7   : > { %2252 = vmatmul.mubr.f32.gmra.mxu1 %v459_v48 }
  0xf8   : > { %1952 = vmatmul.mubr.f32.gmra.mxu0 %v553_v29  ;;  %2256 = vmatprep.mubr.f32.mxu1 %v556_v51  ;;  %v8945_v29 = vld [vmem:[%s13091_s1 + $0x380] sm:$0xff] }
  0xf9   : > { %1956 = vmatprep.mubr.f32.mxu0 %v365_v53  ;;  %7930 = vmatpush2.msra.mxu1 %v8937_v23 }
  0xfa   : > { %7899 = vmatprep.subr.mxu1 %v8722_v11 }
  0xfb   : > { %2257 = vmatmul.mubr.f32.gmra.mxu1 %v460_v58 }
  0xfc   : > { %1957 = vmatmul.mubr.f32.gmra.mxu0 %v554_v35  ;;  %2261 = vmatprep.mubr.f32.mxu1 %v557_v59 }
  0xfd   : > { %1961 = vmatprep.mubr.f32.mxu0 %v366_v60  ;;  %7931 = vmatpush2.msra.mxu1 %v8945_v29 }
  0xfe   : > { %5917 = vmatprep.subr.mxu1 %v8722_v11 }
  0xff   : > { %2262 = vmatmul.mubr.f32.gmra.mxu1 %v461_v0 }
 0x100   : > { %1962 = vmatmul.mubr.f32.gmra.mxu0 %v555_v43  ;;  %2266 = vmatprep.mubr.f32.mxu1 %v558_v3  ;;  %v8041_v3 = vld [vmem:[%s8391_s24 + $0x29] sm:$0xff] }
 0x101   : > { %1966 = vmatprep.mubr.f32.mxu0 %v367_v6 }
 0x103   : > { %2267 = vmatmul.mubr.f32.gmra.mxu1 %v462_v9 }
 0x104   : > { %1967 = vmatmul.mubr.f32.gmra.mxu0 %v556_v51  ;;  %2271 = vmatprep.mubr.f32.mxu1 %v559_v12  ;;  %v8040_v51 = vld [vmem:[%s8391_s24 + $0x21] sm:$0xff]  ;;  %v8994_v12 = vld [vmem:[%s8391_s24 + $0xa9] sm:$0xff] }
 0x105   : > { %1971 = vmatprep.mubr.f32.mxu0 %v368_v13 }
 0x107   : > { %2272 = vmatmul.mubr.f32.gmra.mxu1 %v463_v19 }
 0x108   : > { %1972 = vmatmul.mubr.f32.gmra.mxu0 %v557_v59  ;;  %2276 = vmatprep.mubr.f32.mxu1 %v560_v20  ;;  %v8980_v59 = vld [vmem:[%s8391_s24 + $0xa1] sm:$0xff]  ;;  %v8042_v20 = vld [vmem:[%s8391_s24 + $0x31] sm:$0xff] }
 0x109   : > { %2346 = vmatprep.mubr.f32.mxu0 %v8459_v22  ;;  %v813_v22 = vld [vmem:[%s8391_s24 + $0x90] sm:$0xff] }
 0x10b   : > { %2277 = vmatmul.mubr.f32.gmra.mxu1 %v464_v25 }
 0x10c   : > { %v1738_v35 = vpop.f32.mrf.mxu0  ;;  %2347 = vmatmul.mubr.f32.vlgmr.msra.gmra.mxu0 %v8442_v16  ;;  %2711 = vmatprep.mubr.f32.mxu1 %v8954_v34  ;;  %v8966_v16 = vld [vmem:[%s8391_s24 + $0x99] sm:$0xff] }
 0x10d   : > { %v1739_v37 = vadd.f32 %v8950_v30, %v1738_v35  ;;  %2588 = vmatpush1.msra.mxu0 %v8575_v4  ;;  %2351 = vmatprep.mubr.f32.mxu0 %v8472_v27  ;;  %v814_v27 = vld [vmem:[%s8391_s24 + $0x98] sm:$0xff] }
 0x10e   : > { %v1740_v42 = vpop.f32.mrf.mxu0  ;;  %2589 = vmatprep.subr.mxu0 %v8722_v11 }
 0x10f   : > { %v2043_v43 = vpop.f32.mrf.mxu1  ;;  %2590 = vmatpush1.msra.mxu0 %v8600_v14  ;;  %2712 = vmatmul.mubr.f32.vlgmr.msra.gmra.mxu1 %v813_v22  ;;  %v9008_v22 = vld [vmem:[%s8391_s24 + $0xb1] sm:$0xff] }
 0x110   : > { %v8968_v46 = vadd.f32 %v2043_v43, %v1739_v37  ;;  %v1743_v48 = vpop.f32.mrf.mxu0  ;;  %2352 = vmatmul.mubr.f32.gmra.mxu0 %v8040_v51  ;;  %2591 = vmatprep.subr.mxu0 %v8722_v11  ;;  %v8043_v43 = vld [vmem:[%s8391_s24 + $0x39] sm:$0xff]  ;;  %v614_v51 = vld [vmem:[%s8391_s24 + $0x41] sm:$0xff] }
 0x111   : > { %v1744_v4 = vadd.f32 %v8950_v30, %v1743_v48  ;;  %v2045_v53 = vpop.f32.mrf.mxu1  ;;  %2356 = vmatprep.mubr.f32.mxu0 %v8483_v31  ;;  %2592 = vmatpush1.msra.mxu0 %v8625_v26  ;;  %v815_v31 = vld [vmem:[%s8391_s24 + $0xa0] sm:$0xff] }
 0x112   : > { %v1745_v14 = vpop.f32.mrf.mxu0  ;;  %2593 = vmatprep.subr.mxu0 %v8722_v11  ;;  %2716 = vmatprep.mubr.f32.mxu1 %v8966_v16 }
 0x113   : > { %v2048_v58 = vpop.f32.mrf.mxu1  ;;  %2594 = vmatpush1.msra.mxu0 %v8650_v39  ;;  %2717 = vmatmul.mubr.f32.gmra.mxu1 %v814_v27 }
 0x114   : > { %v8982_v60 = vadd.f32 %v2048_v58, %v1744_v4  ;;  %v1748_v0 = vpop.f32.mrf.mxu0  ;;  %2357 = vmatmul.mubr.f32.gmra.mxu0 %v8041_v3  ;;  %2595 = vmatprep.subr.mxu0 %v8722_v11  ;;  %v9023_v4 = vld [vmem:[%s8391_s24 + $0xb9] sm:$0xff] }
 0x115   : > { %v1749_v26 = vadd.f32 %v8950_v30, %v1748_v0  ;;  %v2050_v6 = vpop.f32.mrf.mxu1  ;;  %2361 = vmatprep.mubr.f32.mxu0 %v8496_v36  ;;  %2596 = vmatpush1.msra.mxu0 %v8675_v52  ;;  %v816_v36 = vld [vmem:[%s8391_s24 + $0xa8] sm:$0xff] }
 0x116   : > { %v1750_v39 = vpop.f32.mrf.mxu0  ;;  %2597 = vmatprep.subr.mxu0 %v8722_v11  ;;  %2721 = vmatprep.mubr.f32.mxu1 %v8980_v59  ;;  %v615_v0 = vld [vmem:[%s8391_s24 + $0x49] sm:$0xff] }
 0x117   : > { %v2053_v9 = vpop.f32.mrf.mxu1  ;;  %2598 = vmatpush1.msra.mxu0 %v8684_v57  ;;  %2722 = vmatmul.mubr.f32.gmra.mxu1 %v815_v31  ;;  %v9037_v31 = vld [vmem:[%s8391_s24 + $0xc1] sm:$0xff] }
 0x118   : > { %v8996_v13 = vadd.f32 %v2053_v9, %v1749_v26  ;;  %v1753_v19 = vpop.f32.mrf.mxu0  ;;  %2362 = vmatmul.mubr.f32.gmra.mxu0 %v8042_v20  ;;  %2599 = vmatprep.subr.mxu0 %v8722_v11  ;;  %v616_v9 = vld [vmem:[%s8391_s24 + $0x51] sm:$0xff]  ;;  %v713_v20 = vld [vmem:[%s8391_s24 + $0x5a] sm:$0xff] }
 0x119   : > { %v1754_v52 = vadd.f32 %v8950_v30, %v1753_v19  ;;  %v2055_v25 = vpop.f32.mrf.mxu1  ;;  %2366 = vmatprep.mubr.f32.mxu0 %v8507_v40  ;;  %2600 = vmatpush1.msra.mxu0 %v8696_v61  ;;  %v817_v40 = vld [vmem:[%s8391_s24 + $0xb0] sm:$0xff] }
 0x11a   : > { %v1755_v57 = vpop.f32.mrf.mxu0  ;;  %2601 = vmatprep.subr.mxu0 %v8722_v11  ;;  %2726 = vmatprep.mubr.f32.mxu1 %v8994_v12 }
 0x11b   : > { %v2058_v35 = vpop.f32.mrf.mxu1  ;;  %2602 = vmatpush1.msra.mxu0 %v8706_v1  ;;  %2727 = vmatmul.mubr.f32.gmra.mxu1 %v816_v36 }
 0x11c   : > { %v9010_v37 = vadd.f32 %v2058_v35, %v1754_v52  ;;  %v1758_v42 = vpop.f32.mrf.mxu0  ;;  %2367 = vmatmul.mubr.f32.gmra.mxu0 %v8043_v43  ;;  %2603 = vmatprep.subr.mxu0 %v8722_v11  ;;  %v617_v35 = vld [vmem:[%s8391_s24 + $0x59] sm:$0xff] }
 0x11d   : > { %v1759_v61 = vadd.f32 %v8950_v30, %v1758_v42  ;;  %v2060_v48 = vpop.f32.mrf.mxu1  ;;  %2371 = vmatprep.mubr.f32.mxu0 %v8520_v45  ;;  %2604 = vmatpush1.msra.mxu0 %v8716_v7  ;;  %v818_v45 = vld [vmem:[%s8391_s24 + $0xb8] sm:$0xff] }
 0x11e   : > { %v1760_v1 = vpop.f32.mrf.mxu0  ;;  %2605 = vmatprep.subr.mxu0 %v8722_v11  ;;  %2731 = vmatprep.mubr.f32.mxu1 %v9008_v22  ;;  %v9061_v42 = vld [vmem:[%s8391_s24 + $0xd1] sm:$0xff] }
 0x11f   : > { %v2063_v27 = vpop.f32.mrf.mxu1  ;;  %2606 = vmatpush1.msra.mxu0 %v8728_v2  ;;  %2732 = vmatmul.mubr.f32.gmra.mxu1 %v817_v40 }
 0x120   : > { %v9025_v53 = vadd.f32 %v2063_v27, %v1759_v61  ;;  %v1763_v14 = vpop.f32.mrf.mxu0  ;;  %2372 = vmatmul.mubr.f32.gmra.mxu0 %v614_v51  ;;  %2607 = vmatprep.subr.mxu0 %v8722_v11  ;;  %v821_v51 = vld [vmem:[%s8391_s24 + $0xd0] sm:$0xff] }
 0x121   : > { %v1764_v7 = vadd.f32 %v8950_v30, %v1763_v14  ;;  %v2065_v58 = vpop.f32.mrf.mxu1  ;;  %2376 = vmatprep.mubr.f32.mxu0 %v8531_v49  ;;  %2608 = vmatpush1.msra.mxu0 %v8738_v17  ;;  %v819_v17 = vld [vmem:[%s8391_s24 + $0xc0] sm:$0xff] }
 0x122   : > { %v1765_v2 = vpop.f32.mrf.mxu0  ;;  %2609 = vmatprep.subr.mxu0 %v8722_v11  ;;  %2736 = vmatprep.mubr.f32.mxu1 %v9023_v4  ;;  %v9075_v14 = vld [vmem:[%s8391_s24 + $0xd9] sm:$0xff] }
 0x123   : > { %v2068_v3 = vpop.f32.mrf.mxu1  ;;  %2610 = vmatpush1.msra.mxu0 %v8748_v21  ;;  %2737 = vmatmul.mubr.f32.gmra.mxu1 %v818_v45  ;;  %v9048_v21 = vld [vmem:[%s8391_s24 + $0xc9] sm:$0xff] }
 0x124   : > { %v9039_v26 = vadd.f32 %v2068_v3, %v1764_v7  ;;  %v1768_v49 = vpop.f32.mrf.mxu0  ;;  %2377 = vmatmul.mubr.f32.gmra.mxu0 %v615_v0  ;;  %2611 = vmatprep.subr.mxu0 %v8722_v11  ;;  %v715_v7 = vld [vmem:[%s8391_s24 + $0x6a] sm:$0xff]  ;;  %v822_v3 = vld [vmem:[%s8391_s24 + $0xd8] sm:$0xff] }
 0x125   : > { %v1769_v6 = vadd.f32 %v8950_v30, %v1768_v49  ;;  %v2070_v39 = vpop.f32.mrf.mxu1  ;;  %2381 = vmatprep.mubr.f32.mxu0 %v8544_v54  ;;  %2612 = vmatpush1.msra.mxu0 %v8758_v28  ;;  %v820_v28 = vld [vmem:[%s8391_s24 + $0xc8] sm:$0xff] }
 0x126   : > { %v1770_v19 = vpop.f32.mrf.mxu0  ;;  %2741 = vmatprep.mubr.f32.mxu1 %v9037_v31  ;;  %2613 = vmatprep.subr.mxu0 %v8722_v11  ;;  %v716_v39 = vld [vmem:[%s8391_s24 + $0x72] sm:$0xff] }
 0x127   : > { %v2073_v36 = vpop.f32.mrf.mxu1  ;;  %2742 = vmatmul.mubr.f32.gmra.mxu1 %v819_v17  ;;  %2614 = vmatpush1.msra.mxu0 %v8768_v33  ;;  %v714_v33 = vld [vmem:[%s8391_s24 + $0x62] sm:$0xff] }
 0x128   : > { %v9054_v52 = vadd.f32 %v2073_v36, %v1769_v6  ;;  %v1773_v54 = vpop.f32.mrf.mxu0  ;;  %2382 = vmatmul.mubr.f32.gmra.mxu0 %v616_v9  ;;  %2746 = vmatprep.mubr.f32.mxu1 %v9048_v21  ;;  %v619_v17 = vld [vmem:[%s8391_s24 + $0x69] sm:$0xff]  ;;  %v9088_v6 = vld [vmem:[%s8391_s24 + $0xe1] sm:$0xff] }
 0x129   : > { %v1774_v25 = vadd.f32 %v8950_v30, %v1773_v54  ;;  %v2075_v57 = vpop.f32.mrf.mxu1  ;;  %2386 = vmatprep.mubr.f32.mxu0 %v713_v20  ;;  %2615 = vmatprep.subr.mxu0 %v8722_v11  ;;  %v823_v36 = vld [vmem:[%s8391_s24 + $0xe0] sm:$0xff] }
 0x12a   : > { %v1775_v43 = vpop.f32.mrf.mxu0  ;;  %2616 = vmatpush1.msra.mxu0 %v8778_v38  ;;  %v618_v38 = vld [vmem:[%s8391_s24 + $0x61] sm:$0xff]  ;;  %v9101_v57 = vld [vmem:[%s8391_s24 + $0xe9] sm:$0xff] }
 0x12b   : > { %v2078_v40 = vpop.f32.mrf.mxu1  ;;  %2747 = vmatmul.mubr.f32.gmra.mxu1 %v820_v28  ;;  %2617 = vmatprep.subr.mxu0 %v8722_v11 }
 0x12c   : > { %v9068_v61 = vadd.f32 %v2078_v40, %v1774_v25  ;;  %v1778_v48 = vpop.f32.mrf.mxu0  ;;  %2387 = vmatmul.mubr.f32.gmra.mxu0 %v617_v35  ;;  %2751 = vmatprep.mubr.f32.mxu1 %v9061_v42  ;;  %v620_v25 = vld [vmem:[%s8391_s24 + $0x71] sm:$0xff]  ;;  %v717_v35 = vld [vmem:[%s8391_s24 + $0x7a] sm:$0xff] }
 0x12d   : > { %v1779_v1 = vadd.f32 %v8950_v30, %v1778_v48  ;;  %v2080_v27 = vpop.f32.mrf.mxu1  ;;  %2391 = vmatprep.mubr.f32.mxu0 %v714_v33  ;;  %2618 = vmatpush1.msra.mxu0 %v8788_v44  ;;  %v824_v48 = vld [vmem:[%s8391_s24 + $0xe8] sm:$0xff] }
 0x12e   : > { %v1780_v45 = vpop.f32.mrf.mxu0  ;;  %2619 = vmatprep.subr.mxu0 %v8722_v11  ;;  %v9114_v27 = vld [vmem:[%s8391_s24 + $0xf1] sm:$0xff] }
 0x12f   : > { %v2083_v58 = vpop.f32.mrf.mxu1  ;;  %2752 = vmatmul.mubr.f32.gmra.mxu1 %v821_v51  ;;  %2620 = vmatpush2.msra.mxu0 %v8798_v50 }
 0x130   : > { %v9081_v0 = vadd.f32 %v2083_v58, %v1779_v1  ;;  %v1783_v2 = vpop.f32.mrf.mxu0  ;;  %2392 = vmatmul.mubr.f32.gmra.mxu0 %v618_v38  ;;  %2756 = vmatprep.mubr.f32.mxu1 %v9075_v14  ;;  %v621_v1 = vld [vmem:[%s8391_s24 + $0x79] sm:$0xff]  ;;  %v718_v38 = vld [vmem:[%s8391_s24 + $0x82] sm:$0xff] }
 0x131   : > { %v1784_v49 = vadd.f32 %v8950_v30, %v1783_v2  ;;  %v2085_v44 = vpop.f32.mrf.mxu1  ;;  %2396 = vmatprep.mubr.f32.mxu0 %v715_v7  ;;  %2621 = vmatprep.subr.mxu0 %v8722_v11  ;;  %v825_v2 = vld [vmem:[%s8391_s24 + $0xf0] sm:$0xff] }
 0x132   : > { %v1785_v50 = vpop.f32.mrf.mxu0  ;;  %2622 = vmatpush2.msra.mxu0 %v8808_v56  ;;  %v622_v44 = vld [vmem:[%s8391_s24 + $0x81] sm:$0xff] }
 0x133   : > { %v2088_v9 = vpop.f32.mrf.mxu1  ;;  %2757 = vmatmul.mubr.f32.gmra.mxu1 %v822_v3  ;;  %2623 = vmatprep.subr.mxu0 %v8722_v11  ;;  %v719_v50 = vld [vmem:[%s8391_s24 + $0x8a] sm:$0xff] }
 0x134   : > { %v9094_v19 = vadd.f32 %v2088_v9, %v1784_v49  ;;  %v1788_v20 = vpop.f32.mrf.mxu0  ;;  %2397 = vmatmul.mubr.f32.gmra.mxu0 %v619_v17  ;;  %2761 = vmatprep.mubr.f32.mxu1 %v9088_v6  ;;  %v9127_v17 = vld [vmem:[%s8391_s24 + $0xf9] sm:$0xff] }
 0x135   : > { %v1789_v54 = vadd.f32 %v8950_v30, %v1788_v20  ;;  %v2090_v28 = vpop.f32.mrf.mxu1  ;;  %2401 = vmatprep.mubr.f32.mxu0 %v716_v39  ;;  %2624 = vmatpush2.msra.mxu0 %v8818_v62 }
 0x136   : > { %v1790_v56 = vpop.f32.mrf.mxu0  ;;  %2625 = vmatprep.subr.mxu0 %v8722_v11  ;;  %v623_v28 = vld [vmem:[%s8391_s24 + $0x89] sm:$0xff] }
 0x137   : > { %v2093_v43 = vpop.f32.mrf.mxu1  ;;  %2762 = vmatmul.mubr.f32.gmra.mxu1 %v823_v36  ;;  %2626 = vmatpush2.msra.mxu0 %v8828_v5  ;;  %v826_v36 = vld [vmem:[%s8391_s24 + $0xf8] sm:$0xff] }
 0x138   : > { %v9107_v33 = vadd.f32 %v2093_v43, %v1789_v54  ;;  %v1793_v40 = vpop.f32.mrf.mxu0  ;;  %2402 = vmatmul.mubr.f32.gmra.mxu0 %v620_v25  ;;  %2766 = vmatprep.mubr.f32.mxu1 %v9101_v57  ;;  %v9140_v25 = vld [vmem:[%s8391_s24 + $0x101] sm:$0xff] }
 0x139   : > { %v1794_v51 = vadd.f32 %v8950_v30, %v1793_v40  ;;  %v2095_v62 = vpop.f32.mrf.mxu1  ;;  %2406 = vmatprep.mubr.f32.mxu0 %v717_v35  ;;  %2627 = vmatprep.subr.mxu0 %v8722_v11 }
 0x13a   : > { %v1795_v5 = vpop.f32.mrf.mxu0  ;;  %2628 = vmatpush2.msra.mxu0 %v8838_v10 }
 0x13b   : > { %v2098_v45 = vpop.f32.mrf.mxu1  ;;  %2767 = vmatmul.mubr.f32.gmra.mxu1 %v824_v48  ;;  %2629 = vmatprep.subr.mxu0 %v8722_v11  ;;  %v827_v48 = vld [vmem:[%s8391_s24 + $0x100] sm:$0xff] }
 0x13c   : > { %v9120_v7 = vadd.f32 %v2098_v45, %v1794_v51  ;;  %v1798_v58 = vpop.f32.mrf.mxu0  ;;  %2407 = vmatmul.mubr.f32.gmra.mxu0 %v621_v1  ;;  %2771 = vmatprep.mubr.f32.mxu1 %v9114_v27  ;;  %v9152_v1 = vld [vmem:[%s8391_s24 + $0x109] sm:$0xff]  ;;  %v721_v5 = vld [vmem:[%s8391_s24 + $0x9a] sm:$0xff] }
 0x13d   : > { %v1799_v3 = vadd.f32 %v8950_v30, %v1798_v58  ;;  %v2100_v49 = vpop.f32.mrf.mxu1  ;;  %2411 = vmatprep.mubr.f32.mxu0 %v718_v38  ;;  %2630 = vmatpush2.msra.mxu0 %v8848_v18 }
 0x13e   : > { %v1800_v10 = vpop.f32.mrf.mxu0  ;;  %2631 = vmatprep.subr.mxu0 %v8722_v11  ;;  %v9165_v49 = vld [vmem:[%s8391_s24 + $0x111] sm:$0xff] }
 0x13f   : > { %v2103_v39 = vpop.f32.mrf.mxu1  ;;  %2772 = vmatmul.mubr.f32.gmra.mxu1 %v825_v2  ;;  %2632 = vmatpush2.msra.mxu0 %v8858_v24  ;;  %v720_v24 = vld [vmem:[%s8391_s24 + $0x92] sm:$0xff]  ;;  %v828_v2 = vld [vmem:[%s8391_s24 + $0x108] sm:$0xff] }
 0x140   : > { %v9133_v9 = vadd.f32 %v2103_v39, %v1799_v3  ;;  %v1803_v20 = vpop.f32.mrf.mxu0  ;;  %2412 = vmatmul.mubr.f32.gmra.mxu0 %v622_v44  ;;  %2776 = vmatprep.mubr.f32.mxu1 %v9127_v17  ;;  %v829_v39 = vld [vmem:[%s8391_s24 + $0x110] sm:$0xff] }
 0x141   : > { %v1804_v54 = vadd.f32 %v8950_v30, %v1803_v20  ;;  %v2105_v18 = vpop.f32.mrf.mxu1  ;;  %2416 = vmatprep.mubr.f32.mxu0 %v719_v50  ;;  %2633 = vmatprep.subr.mxu0 %v8722_v11 }
 0x142   : > { %v1805_v56 = vpop.f32.mrf.mxu0  ;;  %2634 = vmatpush2.msra.mxu0 %v8868_v32  ;;  %v723_v18 = vld [vmem:[%s8391_s24 + $0xaa] sm:$0xff] }
 0x143   : > { %v2108_v35 = vpop.f32.mrf.mxu1  ;;  %2777 = vmatmul.mubr.f32.gmra.mxu1 %v826_v36  ;;  %2635 = vmatprep.subr.mxu0 %v8722_v11 }
 0x144   : > { %v9146_v43 = vadd.f32 %v2108_v35, %v1804_v54  ;;  %v1808_v40 = vpop.f32.mrf.mxu0  ;;  %2417 = vmatmul.mubr.f32.gmra.mxu0 %v623_v28  ;;  %2781 = vmatprep.mubr.f32.mxu1 %v9140_v25  ;;  %v9178_v54 = vld [vmem:[%s8391_s24 + $0x119] sm:$0xff] }
 0x145   : > { %v1809_v51 = vadd.f32 %v8950_v30, %v1808_v40  ;;  %v2110_v62 = vpop.f32.mrf.mxu1  ;;  %2421 = vmatprep.mubr.f32.mxu0 %v720_v24  ;;  %2636 = vmatpush2.msra.mxu0 %v8878_v41  ;;  %v830_v24 = vld [vmem:[%s8391_s24 + $0x118] sm:$0xff]  ;;  %v9191_v40 = vld [vmem:[%s8391_s24 + $0x121] sm:$0xff] }
 0x146   : > { %v1810_v32 = vpop.f32.mrf.mxu0  ;;  %2637 = vmatprep.subr.mxu0 %v8722_v11 }
 0x147   : > { %v2113_v38 = vpop.f32.mrf.mxu1  ;;  %2782 = vmatmul.mubr.f32.gmra.mxu1 %v827_v48  ;;  %2638 = vmatpush2.msra.mxu0 %v8888_v47  ;;  %v722_v47 = vld [vmem:[%s8391_s24 + $0xa2] sm:$0xff]  ;;  %v724_v48 = vld [vmem:[%s8391_s24 + $0xb2] sm:$0xff] }
 0x148   : > { %v9158_v45 = vadd.f32 %v2113_v38, %v1809_v51  ;;  %v1813_v58 = vpop.f32.mrf.mxu0  ;;  %2422 = vmatmul.mubr.f32.gmra.mxu0 %v8954_v34  ;;  %2786 = vmatprep.mubr.f32.mxu1 %v9152_v1  ;;  %v831_v32 = vld [vmem:[%s8391_s24 + $0x120] sm:$0xff] }
 0x149   : > { %v1814_v41 = vadd.f32 %v8950_v30, %v1813_v58  ;;  %v2115_v3 = vpop.f32.mrf.mxu1  ;;  %2426 = vmatprep.mubr.f32.mxu0 %v721_v5  ;;  %2639 = vmatprep.subr.mxu0 %v8722_v11  ;;  %v9206_v58 = vld [vmem:[%s8391_s24 + $0x129] sm:$0xff] }
 0x14a   : > { %v1815_v44 = vpop.f32.mrf.mxu0  ;;  %2640 = vmatpush2.msra.mxu0 %v8898_v55 }
 0x14b   : > { %v2118_v10 = vpop.f32.mrf.mxu1  ;;  %2787 = vmatmul.mubr.f32.gmra.mxu1 %v828_v2  ;;  %2641 = vmatprep.subr.mxu0 %v8722_v11  ;;  %v725_v2 = vld [vmem:[%s8391_s24 + $0xba] sm:$0xff] }
 0x14c   : > { %v9171_v34 = vadd.f32 %v2118_v10, %v1814_v41  ;;  %v1818_v50 = vpop.f32.mrf.mxu0  ;;  %2427 = vmatmul.mubr.f32.gmra.mxu0 %v8966_v16  ;;  %2791 = vmatprep.mubr.f32.mxu1 %v9165_v49 }
 0x14d   : > { %v1819_v20 = vadd.f32 %v8950_v30, %v1818_v50  ;;  %v2120_v36 = vpop.f32.mrf.mxu1  ;;  %2431 = vmatprep.mubr.f32.mxu0 %v722_v47  ;;  %2642 = vmatpush2.msra.mxu0 %v8908_v63  ;;  %v9224_v50 = vld [vmem:[%s8391_s24 + $0x131] sm:$0xff] }
 0x14e   : > { %v1820_v55 = vpop.f32.mrf.mxu0  ;;  %2643 = vmatprep.subr.mxu0 %v8722_v11  ;;  %v9193_v11 = vld [vmem:[#allocation3] sm:$0xff] }
 0x14f   : > { %v2123_v28 = vpop.f32.mrf.mxu1  ;;  %2792 = vmatmul.mubr.f32.gmra.mxu1 %v829_v39  ;;  %2644 = vmatpush2.msra.mxu0 %v8918_v8  ;;  %v726_v39 = vld [vmem:[%s8391_s24 + $0xc2] sm:$0xff]  ;;  %v833_v55 = vld [vmem:[%s8391_s24 + $0x130] sm:$0xff] }
 0x150   : > { %v9184_v16 = vadd.f32 %v2123_v28, %v1819_v20  ;;  %v1823_v56 = vpop.f32.mrf.mxu0  ;;  %2432 = vmatmul.mubr.f32.gmra.mxu0 %v8980_v59  ;;  %2796 = vmatprep.mubr.f32.mxu1 %v9178_v54 }
 0x151   : > { %v1824_v35 = vadd.f32 %v8950_v30, %v1823_v56  ;;  %v2125_v63 = vpop.f32.mrf.mxu1  ;;  %2436 = vmatprep.mubr.f32.mxu0 %v723_v18  ;;  %2645 = vmatprep.subr.mxu0 %v9193_v11  ;;  %v9235_v56 = vld [vmem:[%s8391_s24 + $0x139] sm:$0xff] }
 0x152   : > { %v1825_v8 = vpop.f32.mrf.mxu0  ;;  %2646 = vmatpush2.msra.mxu0 %v8928_v15 }
 0x153   : > { %v2128_v59 = vpop.f32.mrf.mxu1  ;;  %2797 = vmatmul.mubr.f32.gmra.mxu1 %v830_v24  ;;  %2647 = vmatprep.subr.mxu0 %v9193_v11 }
 0x154   : > { %v9199_v51 = vadd.f32 %v2128_v59, %v1824_v35  ;;  %v1828_v62 = vpop.f32.mrf.mxu0  ;;  %2437 = vmatmul.mubr.f32.gmra.mxu0 %v8994_v12  ;;  %2801 = vmatprep.mubr.f32.mxu1 %v9191_v40  ;;  %v9214_v12 = vld [vmem:[%s13091_s1 + $0x478] sm:$0xff]  ;;  %v727_v35 = vld [vmem:[%s8391_s24 + $0xca] sm:$0xff] }
 0x155   : > { %v1829_v5 = vadd.f32 %v8950_v30, %v1828_v62  ;;  %v2130_v38 = vpop.f32.mrf.mxu1  ;;  %2441 = vmatprep.mubr.f32.mxu0 %v724_v48  ;;  %2648 = vmatpush2.msra.mxu0 %v8937_v23  ;;  %v832_v23 = vld [vmem:[%s8391_s24 + $0x128] sm:$0xff] }
 0x156   : > { %v1830_v15 = vpop.f32.mrf.mxu0  ;;  %2649 = vmatprep.subr.mxu0 %v9193_v11  ;;  %v728_v38 = vld [vmem:[%s8391_s24 + $0xd2] sm:$0xff] }
 0x157   : > { %v2133_v41 = vpop.f32.mrf.mxu1  ;;  %2802 = vmatmul.mubr.f32.gmra.mxu1 %v831_v32  ;;  %2650 = vmatpush2.msra.mxu0 %v8945_v29  ;;  %v9245_v32 = vld [vmem:[%s8391_s24 + $0x141] sm:$0xff] }
 0x158   : > { %v9217_v3 = vadd.f32 %v2133_v41, %v1829_v5  ;;  %v1833_v44 = vpop.f32.mrf.mxu0  ;;  %2442 = vmatmul.mubr.f32.gmra.mxu0 %v9008_v22  ;;  %2806 = vmatprep.mubr.f32.mxu1 %v9206_v58 }
 0x159   : > { %v1834_v47 = vadd.f32 %v8950_v30, %v1833_v44  ;;  %v2135_v10 = vpop.f32.mrf.mxu1  ;;  %2446 = vmatprep.mubr.f32.mxu0 %v725_v2  ;;  %7764 = vmatprep.subr.mxu0 %v9214_v12 }
 0x15a   : > { %v1835_v29 = vpop.f32.mrf.mxu0 }
 0x15b   : > { %v2138_v20 = vpop.f32.mrf.mxu1  ;;  %2807 = vmatmul.mubr.f32.gmra.mxu1 %v832_v23  ;;  %v729_v29 = vld [vmem:[%s8391_s24 + $0xda] sm:$0xff] }
 0x15c   : > { %v9228_v36 = vadd.f32 %v2138_v20, %v1834_v47  ;;  %v1838_v22 = vpop.f32.mrf.mxu0  ;;  %2447 = vmatmul.mubr.f32.gmra.mxu0 %v9023_v4  ;;  %2811 = vmatprep.mubr.f32.mxu1 %v9224_v50  ;;  %v834_v4 = vld [vmem:[%s8391_s24 + $0x138] sm:$0xff]  ;;  %v9255_v47 = vld [vmem:[%s8391_s24 + $0x149] sm:$0xff] }
 0x15d   : > { %v1839_v18 = vadd.f32 %v8950_v30, %v1838_v22  ;;  %v2140_v28 = vpop.f32.mrf.mxu1  ;;  %2451 = vmatprep.mubr.f32.mxu0 %v726_v39 }
 0x15e   : > { %v1840_v24 = vpop.f32.mrf.mxu0  ;;  %v9265_v28 = vld [vmem:[%s8391_s24 + $0x151] sm:$0xff] }
 0x15f   : > { %v2143_v63 = vpop.f32.mrf.mxu1  ;;  %2812 = vmatmul.mubr.f32.gmra.mxu1 %v833_v55 }
 0x160   : > { %v9238_v8 = vadd.f32 %v2143_v63, %v1839_v18  ;;  %v1843_v48 = vpop.f32.mrf.mxu0  ;;  %2452 = vmatmul.mubr.f32.gmra.mxu0 %v9037_v31  ;;  %2816 = vmatprep.mubr.f32.mxu1 %v9235_v56  ;;  %v835_v31 = vld [vmem:[%s8391_s24 + $0x140] sm:$0xff] }
 0x161   : > { %v1844_v59 = vadd.f32 %v8950_v30, %v1843_v48  ;;  %v2145_v62 = vpop.f32.mrf.mxu1  ;;  %2456 = vmatprep.mubr.f32.mxu0 %v727_v35  ;;  %v730_v35 = vld [vmem:[%s8391_s24 + $0xe2] sm:$0xff] }
 0x162   : > { %v1845_v5 = vpop.f32.mrf.mxu0 }
 0x163   : > { %v2148_v15 = vpop.f32.mrf.mxu1  ;;  %2817 = vmatmul.mubr.f32.gmra.mxu1 %v834_v4  ;;  %v9275_v5 = vld [vmem:[%s8391_s24 + $0x159] sm:$0xff] }
 0x164   : > { %v9248_v2 = vadd.f32 %v2148_v15, %v1844_v59  ;;  %v1848_v41 = vpop.f32.mrf.mxu0  ;;  %2457 = vmatmul.mubr.f32.gmra.mxu0 %v9048_v21  ;;  %2821 = vmatprep.mubr.f32.mxu1 %v9245_v32  ;;  %v836_v21 = vld [vmem:[%s8391_s24 + $0x148] sm:$0xff] }
 0x165   : > { %v1849_v44 = vadd.f32 %v8950_v30, %v1848_v41  ;;  %v2150_v23 = vpop.f32.mrf.mxu1  ;;  %2461 = vmatprep.mubr.f32.mxu0 %v728_v38  ;;  %v731_v15 = vld [vmem:[%s8391_s24 + $0xea] sm:$0xff] }
 0x166   : > { %v1850_v10 = vpop.f32.mrf.mxu0 }
 0x167   : > { %v2153_v39 = vpop.f32.mrf.mxu1  ;;  %2822 = vmatmul.mubr.f32.gmra.mxu1 %v835_v31 }
 0x168   : > { %v9258_v20 = vadd.f32 %v2153_v39, %v1849_v44  ;;  %v1853_v22 = vpop.f32.mrf.mxu0  ;;  %2462 = vmatmul.mubr.f32.gmra.mxu0 %v9061_v42  ;;  %2826 = vmatprep.mubr.f32.mxu1 %v9255_v47  ;;  %v837_v42 = vld [vmem:[%s8391_s24 + $0x150] sm:$0xff] }
 0x169   : > { %v1854_v55 = vadd.f32 %v8950_v30, %v1853_v22  ;;  %v2155_v18 = vpop.f32.mrf.mxu1  ;;  %2466 = vmatprep.mubr.f32.mxu0 %v729_v29  ;;  %v9285_v29 = vld [vmem:[%s8391_s24 + $0x161] sm:$0xff]  ;;  %v732_v22 = vld [vmem:[%s8391_s24 + $0xf2] sm:$0xff] }
 0x16a   : > { %v1855_v24 = vpop.f32.mrf.mxu0 }
 0x16b   : > { %v2158_v63 = vpop.f32.mrf.mxu1  ;;  %2827 = vmatmul.mubr.f32.gmra.mxu1 %v836_v21 }
 0x16c   : > { %v9268_v48 = vadd.f32 %v2158_v63, %v1854_v55  ;;  %v1858_v4 = vpop.f32.mrf.mxu0  ;;  %2467 = vmatmul.mubr.f32.gmra.mxu0 %v9075_v14  ;;  %2831 = vmatprep.mubr.f32.mxu1 %v9265_v28  ;;  %v838_v14 = vld [vmem:[%s8391_s24 + $0x158] sm:$0xff]  ;;  %v9295_v63 = vld [vmem:[%s8391_s24 + $0x169] sm:$0xff] }
 0x16d   : > { %v1859_v59 = vadd.f32 %v8950_v30, %v1858_v4  ;;  %v2160_v62 = vpop.f32.mrf.mxu1  ;;  %2471 = vmatprep.mubr.f32.mxu0 %v730_v35 }
 0x16e   : > { %v1860_v38 = vpop.f32.mrf.mxu0 }
 0x16f   : > { %v2163_v41 = vpop.f32.mrf.mxu1  ;;  %2832 = vmatmul.mubr.f32.gmra.mxu1 %v837_v42  ;;  %v733_v42 = vld [vmem:[%s8391_s24 + $0xfa] sm:$0xff] }
 0x170   : > { %v9278_v31 = vadd.f32 %v2163_v41, %v1859_v59  ;;  %v1863_v44 = vpop.f32.mrf.mxu0  ;;  %2472 = vmatmul.mubr.f32.gmra.mxu0 %v9088_v6  ;;  %2836 = vmatprep.mubr.f32.mxu1 %v9275_v5  ;;  %v839_v6 = vld [vmem:[%s8391_s24 + $0x160] sm:$0xff] }
 0x171   : > { %v1864_v23 = vadd.f32 %v8950_v30, %v1863_v44  ;;  %v2165_v10 = vpop.f32.mrf.mxu1  ;;  %2476 = vmatprep.mubr.f32.mxu0 %v731_v15  ;;  %v9305_v44 = vld [vmem:[%s8391_s24 + $0x171] sm:$0xff] }
 0x172   : > { %v1865_v39 = vpop.f32.mrf.mxu0 }
 0x173   : > { %v2168_v21 = vpop.f32.mrf.mxu1  ;;  %2837 = vmatmul.mubr.f32.gmra.mxu1 %v838_v14 }
 0x174   : > { %v9288_v55 = vadd.f32 %v2168_v21, %v1864_v23  ;;  %v1868_v18 = vpop.f32.mrf.mxu0  ;;  %2477 = vmatmul.mubr.f32.gmra.mxu0 %v9101_v57  ;;  %2841 = vmatprep.mubr.f32.mxu1 %v9285_v29  ;;  %v840_v57 = vld [vmem:[%s8391_s24 + $0x168] sm:$0xff] }
 0x175   : > { %v1869_v24 = vadd.f32 %v8950_v30, %v1868_v18  ;;  %v2170_v35 = vpop.f32.mrf.mxu1  ;;  %2481 = vmatprep.mubr.f32.mxu0 %v732_v22  ;;  %v734_v23 = vld [vmem:[%s8391_s24 + $0x102] sm:$0xff] }
 0x176   : > { %v1870_v4 = vpop.f32.mrf.mxu0  ;;  %v735_v35 = vld [vmem:[%s8391_s24 + $0x10a] sm:$0xff] }
 0x177   : > { %v2173_v59 = vpop.f32.mrf.mxu1  ;;  %2842 = vmatmul.mubr.f32.gmra.mxu1 %v839_v6  ;;  %v9315_v6 = vld [vmem:[%s8391_s24 + $0x179] sm:$0xff] }
 0x178   : > { %v9298_v62 = vadd.f32 %v2173_v59, %v1869_v24  ;;  %v1873_v38 = vpop.f32.mrf.mxu0  ;;  %2482 = vmatmul.mubr.f32.gmra.mxu0 %v9114_v27  ;;  %2846 = vmatprep.mubr.f32.mxu1 %v9295_v63  ;;  %v841_v27 = vld [vmem:[%s8391_s24 + $0x170] sm:$0xff] }
 0x179   : > { %v1874_v15 = vadd.f32 %v8950_v30, %v1873_v38  ;;  %v2175_v41 = vpop.f32.mrf.mxu1  ;;  %2486 = vmatprep.mubr.f32.mxu0 %v733_v42 }
 0x17a   : > { %v1875_v14 = vpop.f32.mrf.mxu0 }
 0x17b   : > { %v2178_v10 = vpop.f32.mrf.mxu1  ;;  %2847 = vmatmul.mubr.f32.gmra.mxu1 %v840_v57  ;;  %v736_v14 = vld [vmem:[%s8391_s24 + $0x112] sm:$0xff] }
 0x17c   : > { %v9308_v39 = vadd.f32 %v2178_v10, %v1874_v15  ;;  %v1878_v22 = vpop.f32.mrf.mxu0  ;;  %2487 = vmatmul.mubr.f32.gmra.mxu0 %v9127_v17  ;;  %2851 = vmatprep.mubr.f32.mxu1 %v9305_v44  ;;  %v842_v17 = vld [vmem:[%s8391_s24 + $0x178] sm:$0xff]  ;;  %v9325_v15 = vld [vmem:[%s8391_s24 + $0x181] sm:$0xff] }
 0x17d   : > { %v1879_v21 = vadd.f32 %v8950_v30, %v1878_v22  ;;  %v2180_v18 = vpop.f32.mrf.mxu1  ;;  %2491 = vmatprep.mubr.f32.mxu0 %v734_v23 }
 0x17e   : > { %v1880_v24 = vpop.f32.mrf.mxu0  ;;  %v9335_v18 = vld [vmem:[%s8391_s24 + $0x189] sm:$0xff] }
 0x17f   : > { %v2183_v4 = vpop.f32.mrf.mxu1  ;;  %2852 = vmatmul.mubr.f32.gmra.mxu1 %v841_v27 }
 0x180   : > { %v9318_v42 = vadd.f32 %v2183_v4, %v1879_v21  ;;  %v1883_v59 = vpop.f32.mrf.mxu0  ;;  %2492 = vmatmul.mubr.f32.gmra.mxu0 %v9140_v25  ;;  %2856 = vmatprep.mubr.f32.mxu1 %v9315_v6  ;;  %v843_v25 = vld [vmem:[%s8391_s24 + $0x180] sm:$0xff] }
 0x181   : > { %v1884_v38 = vadd.f32 %v8950_v30, %v1883_v59  ;;  %v2185_v57 = vpop.f32.mrf.mxu1  ;;  %2496 = vmatprep.mubr.f32.mxu0 %v735_v35  ;;  %v737_v35 = vld [vmem:[%s8391_s24 + $0x11a] sm:$0xff] }
 0x182   : > { %v1885_v41 = vpop.f32.mrf.mxu0 }
 0x183   : > { %v2188_v23 = vpop.f32.mrf.mxu1  ;;  %2857 = vmatmul.mubr.f32.gmra.mxu1 %v842_v17  ;;  %v9345_v41 = vld [vmem:[%s8391_s24 + $0x191] sm:$0xff] }
 0x184   : > { %v9328_v10 = vadd.f32 %v2188_v23, %v1884_v38  ;;  %v1888_v22 = vpop.f32.mrf.mxu0  ;;  %2497 = vmatmul.mubr.f32.gmra.mxu0 %v9152_v1  ;;  %2861 = vmatprep.mubr.f32.mxu1 %v9325_v15  ;;  %v844_v1 = vld [vmem:[%s8391_s24 + $0x188] sm:$0xff] }
 0x185   : > { %v1889_v27 = vadd.f32 %v8950_v30, %v1888_v22  ;;  %v2190_v21 = vpop.f32.mrf.mxu1  ;;  %2501 = vmatprep.mubr.f32.mxu0 %v736_v14  ;;  %v738_v23 = vld [vmem:[%s8391_s24 + $0x122] sm:$0xff] }
 0x186   : > { %v1890_v24 = vpop.f32.mrf.mxu0 }
 0x187   : > { %v2193_v4 = vpop.f32.mrf.mxu1  ;;  %2862 = vmatmul.mubr.f32.gmra.mxu1 %v843_v25 }
 0x188   : > { %v9338_v59 = vadd.f32 %v2193_v4, %v1889_v27  ;;  %v1893_v17 = vpop.f32.mrf.mxu0  ;;  %2502 = vmatmul.mubr.f32.gmra.mxu0 %v9165_v49  ;;  %2866 = vmatprep.mubr.f32.mxu1 %v9335_v18  ;;  %v845_v49 = vld [vmem:[%s8391_s24 + $0x190] sm:$0xff] }
 0x189   : > { %v1894_v38 = vadd.f32 %v8950_v30, %v1893_v17  ;;  %v2195_v57 = vpop.f32.mrf.mxu1  ;;  %2506 = vmatprep.mubr.f32.mxu0 %v737_v35  ;;  %v942_v35 = vld [vmem:[%s8391_s24 + $0x199] sm:$0xff]  ;;  %v739_v17 = vld [vmem:[%s8391_s24 + $0x12a] sm:$0xff] }
 0x18a   : > { %v1895_v14 = vpop.f32.mrf.mxu0 }
 0x18b   : > { %v2198_v22 = vpop.f32.mrf.mxu1  ;;  %2867 = vmatmul.mubr.f32.gmra.mxu1 %v844_v1 }
 0x18c   : > { %v9348_v25 = vadd.f32 %v2198_v22, %v1894_v38  ;;  %v1898_v27 = vpop.f32.mrf.mxu0  ;;  %2507 = vmatmul.mubr.f32.gmra.mxu0 %v9178_v54  ;;  %2871 = vmatprep.mubr.f32.mxu1 %v9345_v41  ;;  %v846_v54 = vld [vmem:[%s8391_s24 + $0x198] sm:$0xff] }
 0x18d   : > { %v1899_v21 = vadd.f32 %v8950_v30, %v1898_v27  ;;  %v2200_v24 = vpop.f32.mrf.mxu1  ;;  %2511 = vmatprep.mubr.f32.mxu0 %v738_v23  ;;  %v943_v23 = vld [vmem:[%s8391_s24 + $0x1a1] sm:$0xff] }
 0x18e   : > { %v1900_v4 = vpop.f32.mrf.mxu0  ;;  %v740_v24 = vld [vmem:[%s8391_s24 + $0x132] sm:$0xff] }
 0x18f   : > { %v2203_v57 = vpop.f32.mrf.mxu1  ;;  %2872 = vmatmul.mubr.f32.gmra.mxu1 %v845_v49 }
 0x190   : > { %v9356_v1 = vadd.f32 %v2203_v57, %v1899_v21  ;;  %v1903_v38 = vpop.f32.mrf.mxu0  ;;  %2512 = vmatmul.mubr.f32.gmra.mxu0 %v9191_v40  ;;  %2876 = vmatprep.mubr.f32.mxu1 %v942_v35  ;;  %v847_v40 = vld [vmem:[%s8391_s24 + $0x1a0] sm:$0xff]  ;;  %v944_v57 = vld [vmem:[%s8391_s24 + $0x1a9] sm:$0xff] }
 0x191   : > { %v1904_v14 = vadd.f32 %v8950_v30, %v1903_v38  ;;  %v2205_v22 = vpop.f32.mrf.mxu1  ;;  %2516 = vmatprep.mubr.f32.mxu0 %v739_v17  ;;  %v9370_v30 = vld [vmem:[%s13092_s2] ss:$0 sm:$0xff] }
 0x192   : > { %v1905_v27 = vpop.f32.mrf.mxu0 }
 0x193   : > { %v2208_v4 = vpop.f32.mrf.mxu1  ;;  %2877 = vmatmul.mubr.f32.gmra.mxu1 %v846_v54  ;;  %v741_v54 = vld [vmem:[%s8391_s24 + $0x13a] sm:$0xff] }
 0x194   : > { %v9363_v49 = vadd.f32 %v2208_v4, %v1904_v14  ;;  %v1908_v21 = vpop.f32.mrf.mxu0  ;;  %2517 = vmatmul.mubr.f32.gmra.mxu0 %v9206_v58  ;;  %2881 = vmatprep.mubr.f32.mxu1 %v943_v23  ;;  %v848_v23 = vld [vmem:[%s8391_s24 + $0x1a8] sm:$0xff] }
 0x195   : > { %v1909_v35 = vadd.f32 %v9370_v30, %v1908_v21  ;;  %v2210_v17 = vpop.f32.mrf.mxu1  ;;  %2521 = vmatprep.mubr.f32.mxu0 %v740_v24 }
 0x196   : > { %13226 = vst [vmem:[#allocation4_spill] sm:$0xff] %v9363_v49  ;;  %v1910_v38 = vpop.f32.mrf.mxu0  ;;  %v742_v17 = vld [vmem:[%s8391_s24 + $0x142] sm:$0xff] }
 0x197   : > { %v2213_v14 = vpop.f32.mrf.mxu1  ;;  %2882 = vmatmul.mubr.f32.gmra.mxu1 %v847_v40 }
 0x198   : > { %v9375_v22 = vadd.f32 %v2213_v14, %v1909_v35  ;;  %v1913_v58 = vpop.f32.mrf.mxu0  ;;  %2522 = vmatmul.mubr.f32.gmra.mxu0 %v9224_v50  ;;  %2886 = vmatprep.mubr.f32.mxu1 %v944_v57  ;;  %v743_v57 = vld [vmem:[%s8391_s24 + $0x14a] sm:$0xff] }
 0x199   : > { %v1914_v27 = vadd.f32 %v9370_v30, %v1913_v58  ;;  %v2215_v4 = vpop.f32.mrf.mxu1  ;;  %2526 = vmatprep.mubr.f32.mxu0 %v741_v54 }
 0x19a   : > { %v1915_v21 = vpop.f32.mrf.mxu0  ;;  %v744_v4 = vld [vmem:[%s8391_s24 + $0x152] sm:$0xff] }
 0x19b   : > { %v2218_v24 = vpop.f32.mrf.mxu1  ;;  %2887 = vmatmul.mubr.f32.gmra.mxu1 %v848_v23 }
 0x19c   : > { %v9381_v38 = vadd.f32 %v2218_v24, %v1914_v27  ;;  %v1918_v49 = vpop.f32.mrf.mxu0  ;;  %2527 = vmatmul.mubr.f32.gmra.mxu0 %v9235_v56  ;;  %5981 = vmatprep.mubr.f32.mxu1 %v9193_v11 }
 0x19d   : > { %v1919_v50 = vadd.f32 %v9370_v30, %v1918_v49  ;;  %v2220_v40 = vpop.f32.mrf.mxu1  ;;  %2531 = vmatprep.mubr.f32.mxu0 %v742_v17 }
 0x19e   : > { %v1920_v35 = vpop.f32.mrf.mxu0 }
 0x19f   : > { %v2223_v14 = vpop.f32.mrf.mxu1  ;;  %v745_v35 = vld [vmem:[%s8391_s24 + $0x15a] sm:$0xff] }
 0x1a0   : > { %v9387_v54 = vadd.f32 %v2223_v14, %v1919_v50  ;;  %v1923_v58 = vpop.f32.mrf.mxu0  ;;  %2532 = vmatmul.mubr.f32.gmra.mxu0 %v9245_v32 }
 0x1a1   : > { %v1924_v23 = vadd.f32 %v9370_v30, %v1923_v58  ;;  %v2225_v27 = vpop.f32.mrf.mxu1  ;;  %2536 = vmatprep.mubr.f32.mxu0 %v743_v57 }
 0x1a2   : > { %v1925_v56 = vpop.f32.mrf.mxu0 }
 0x1a3   : > { %v2228_v21 = vpop.f32.mrf.mxu1  ;;  %v746_v56 = vld [vmem:[%s8391_s24 + $0x162] sm:$0xff] }
 0x1a4   : > { %v9392_v24 = vadd.f32 %v2228_v21, %v1924_v23  ;;  %v1928_v49 = vpop.f32.mrf.mxu0  ;;  %2537 = vmatmul.mubr.f32.gmra.mxu0 %v9255_v47 }
 0x1a5   : > { %v1929_v17 = vadd.f32 %v9370_v30, %v1928_v49  ;;  %v2230_v50 = vpop.f32.mrf.mxu1  ;;  %2541 = vmatprep.mubr.f32.mxu0 %v744_v4 }
 0x1a6   : > { %v1930_v40 = vpop.f32.mrf.mxu0 }
 0x1a7   : > { %v2233_v32 = vpop.f32.mrf.mxu1  ;;  %v747_v40 = vld [vmem:[%s8391_s24 + $0x16a] sm:$0xff] }
 0x1a8   : > { %v9397_v14 = vadd.f32 %v2233_v32, %v1929_v17  ;;  %v1933_v57 = vpop.f32.mrf.mxu0  ;;  %2542 = vmatmul.mubr.f32.gmra.mxu0 %v9265_v28 }
 0x1a9   : > { %v1934_v58 = vadd.f32 %v9370_v30, %v1933_v57  ;;  %v2235_v23 = vpop.f32.mrf.mxu1  ;;  %2546 = vmatprep.mubr.f32.mxu0 %v745_v35 }
 0x1aa   : > { %v1935_v27 = vpop.f32.mrf.mxu0 }
 0x1ab   : > { %v2238_v47 = vpop.f32.mrf.mxu1  ;;  %v748_v27 = vld [vmem:[%s8391_s24 + $0x172] sm:$0xff] }
 0x1ac   : > { %v9402_v21 = vadd.f32 %v2238_v47, %v1934_v58  ;;  %v1938_v4 = vpop.f32.mrf.mxu0  ;;  %2547 = vmatmul.mubr.f32.gmra.mxu0 %v9275_v5 }
 0x1ad   : > { %v1939_v49 = vadd.f32 %v9370_v30, %v1938_v4  ;;  %v2240_v17 = vpop.f32.mrf.mxu1  ;;  %2551 = vmatprep.mubr.f32.mxu0 %v746_v56  ;;  %v5765_v56 = vld [vmem:[%s13093_s3 + $0x78] sm:$0xff] }
 0x1ae   : > { %v1940_v50 = vpop.f32.mrf.mxu0  ;;  %5918 = vmatpush1.msra.mxu1 %v5765_v56 }
 0x1af   : > { %v2243_v28 = vpop.f32.mrf.mxu1  ;;  %5919 = vmatprep.subr.mxu1 %v9193_v11  ;;  %v749_v50 = vld [vmem:[%s8391_s24 + $0x17a] sm:$0xff] }
 0x1b0   : > { %v9407_v32 = vadd.f32 %v2243_v28, %v1939_v49  ;;  %v1943_v57 = vpop.f32.mrf.mxu0  ;;  %2552 = vmatmul.mubr.f32.gmra.mxu0 %v9285_v29 }
 0x1b1   : > { %v1944_v35 = vadd.f32 %v9370_v30, %v1943_v57  ;;  %v2245_v58 = vpop.f32.mrf.mxu1  ;;  %2556 = vmatprep.mubr.f32.mxu0 %v747_v40 }
 0x1b2   : > { %v1945_v23 = vpop.f32.mrf.mxu0 }
 0x1b3   : > { %v2248_v5 = vpop.f32.mrf.mxu1 }
 0x1b4   : > { %v9415_v47 = vadd.f32 %v2248_v5, %v1944_v35  ;;  %v1948_v4 = vpop.f32.mrf.mxu0  ;;  %2557 = vmatmul.mubr.f32.gmra.mxu0 %v9295_v63  ;;  %v5764_v63 = vld [vmem:[%s13093_s3 + $0x70] sm:$0xff] }
 0x1b5   : > { %v1949_v29 = vadd.f32 %v9370_v30, %v1948_v4  ;;  %v2250_v49 = vpop.f32.mrf.mxu1  ;;  %2561 = vmatprep.mubr.f32.mxu0 %v748_v27  ;;  %v750_v27 = vld [vmem:[%s8391_s24 + $0x182] sm:$0xff]  ;;  %5920 = vmatpush1.msra.mxu1 %v5764_v63 }
 0x1b6   : > { %v1950_v17 = vpop.f32.mrf.mxu0  ;;  %5921 = vmatprep.subr.mxu1 %v9193_v11  ;;  %v5763_v49 = vld [vmem:[%s13093_s3 + $0x68] sm:$0xff]  ;;  %v5762_v63 = vld [vmem:[%s13093_s3 + $0x60] sm:$0xff] }
 0x1b7   : > { %v2253_v40 = vpop.f32.mrf.mxu1  ;;  %5922 = vmatpush1.msra.mxu1 %v5763_v49  ;;  %v5761_v49 = vld [vmem:[%s13093_s3 + $0x58] sm:$0xff] }
 0x1b8   : > { %v9421_v28 = vadd.f32 %v2253_v40, %v1949_v29  ;;  %v1953_v57 = vpop.f32.mrf.mxu0  ;;  %2562 = vmatmul.mubr.f32.gmra.mxu0 %v9305_v44  ;;  %5923 = vmatprep.subr.mxu1 %v9193_v11 }
 0x1b9   : > { %v1954_v35 = vadd.f32 %v9370_v30, %v1953_v57  ;;  %v2255_v58 = vpop.f32.mrf.mxu1  ;;  %2566 = vmatprep.mubr.f32.mxu0 %v749_v50  ;;  %v751_v50 = vld [vmem:[%s8391_s24 + $0x18a] sm:$0xff]  ;;  %5924 = vmatpush1.msra.mxu1 %v5762_v63 }
 0x1ba   : > { %v1955_v23 = vpop.f32.mrf.mxu0  ;;  %5925 = vmatprep.subr.mxu1 %v9193_v11  ;;  %v801_v63 = vld [vmem:[%s8391_s24 + $0x30] sm:$0xff] }
 0x1bb   : > { %v2258_v5 = vpop.f32.mrf.mxu1  ;;  %5926 = vmatpush1.msra.mxu1 %v5761_v49  ;;  %v802_v49 = vld [vmem:[%s8391_s24 + $0x38] sm:$0xff] }
 0x1bc   : > { %v9430_v56 = vadd.f32 %v2258_v5, %v1954_v35  ;;  %v1958_v4 = vpop.f32.mrf.mxu0  ;;  %2567 = vmatmul.mubr.f32.gmra.mxu0 %v9315_v6  ;;  %5927 = vmatprep.subr.mxu1 %v9193_v11 }
 0x1bd   : > { %v1959_v44 = vadd.f32 %v9370_v30, %v1958_v4  ;;  %v2260_v29 = vpop.f32.mrf.mxu1  ;;  %2571 = vmatprep.mubr.f32.mxu0 %v750_v27  ;;  %v752_v27 = vld [vmem:[%s8391_s24 + $0x192] sm:$0xff] }
 0x1be   : > { %v1960_v17 = vpop.f32.mrf.mxu0 }
 0x1bf   : > { %v2263_v40 = vpop.f32.mrf.mxu1 }
 0x1c0   : > { %v9439_v57 = vadd.f32 %v2263_v40, %v1959_v44  ;;  %v1963_v35 = vpop.f32.mrf.mxu0  ;;  %2572 = vmatmul.mubr.f32.gmra.mxu0 %v9325_v15 }
 0x1c1   : > { %v1964_v6 = vadd.f32 %v9370_v30, %v1963_v35  ;;  %v2265_v58 = vpop.f32.mrf.mxu1  ;;  %2576 = vmatprep.mubr.f32.mxu0 %v751_v50  ;;  %v897_v50 = vld [vmem:[%s8391_s24 + $0x31] sm:$0xff] }
 0x1c2   : > { %v1965_v23 = vpop.f32.mrf.mxu0 }
 0x1c3   : > { %v2268_v5 = vpop.f32.mrf.mxu1 }
 0x1c4   : > { %v9448_v4 = vadd.f32 %v2268_v5, %v1964_v6  ;;  %v1968_v44 = vpop.f32.mrf.mxu0  ;;  %2577 = vmatmul.mubr.f32.gmra.mxu0 %v9335_v18 }
 0x1c5   : > { %v1969_v15 = vadd.f32 %v9370_v30, %v1968_v44  ;;  %v2270_v29 = vpop.f32.mrf.mxu1  ;;  %2581 = vmatprep.mubr.f32.mxu0 %v752_v27  ;;  %v898_v27 = vld [vmem:[%s8391_s24 + $0x39] sm:$0xff]  ;;  %v1663_v44 = vld [vmem:[%s13091_s1 + $0x470] sm:$0xff] }
 0x1c6   : > { %v1970_v17 = vpop.f32.mrf.mxu0 }
 0x1c7   : > { %v2273_v40 = vpop.f32.mrf.mxu1  ;;  %v1662_v17 = vld [vmem:[%s13091_s1 + $0x468] sm:$0xff] }
 0x1c8   : > { %v9457_v35 = vadd.f32 %v2273_v40, %v1969_v15  ;;  %v1973_v6 = vpop.f32.mrf.mxu0  ;;  %2582 = vmatmul.mubr.f32.gmra.mxu0 %v9345_v41  ;;  %v5760_v15 = vld [vmem:[%s13093_s3 + $0x50] sm:$0xff] }
 0x1c9   : > { %v1974_v18 = vadd.f32 %v9370_v30, %v1973_v6  ;;  %v2275_v58 = vpop.f32.mrf.mxu1  ;;  %2651 = vmatprep.mubr.f32.mxu0 %v897_v50  ;;  %5928 = vmatpush1.msra.mxu1 %v5760_v15  ;;  %v899_v6 = vld [vmem:[%s8391_s24 + $0x41] sm:$0xff]  ;;  %v900_v15 = vld [vmem:[%s8391_s24 + $0x49] sm:$0xff] }
 0x1ca   : > { %v1975_v23 = vpop.f32.mrf.mxu0  ;;  %5929 = vmatprep.subr.mxu1 %v9193_v11 }
 0x1cb   : > { %v2278_v5 = vpop.f32.mrf.mxu1  ;;  %v803_v23 = vld [vmem:[%s8391_s24 + $0x40] sm:$0xff] }
 0x1cc   : > { %v9469_v29 = vadd.f32 %v2278_v5, %v1974_v18  ;;  %v2348_v41 = vpop.f32.mrf.mxu0  ;;  %2652 = vmatmul.mubr.f32.vlgmr.msra.gmra.mxu0 %v801_v63  ;;  %v5759_v18 = vld [vmem:[%s13093_s3 + $0x48] sm:$0xff] }
 0x1cd   : > { %v9472_v30 = vadd.f32 %v2348_v41, %v8968_v46  ;;  %7765 = vmatpush3.msra.mxu0 %v9214_v12  ;;  %2656 = vmatprep.mubr.f32.mxu0 %v898_v27  ;;  %v2280_v50 = vpop.f32.mrf.mxu1  ;;  %v1661_v46 = vld [vmem:[%s13091_s1 + $0x460] sm:$0xff]  ;;  %v1660_v27 = vld [vmem:[%s13091_s1 + $0x458] sm:$0xff] }
 0x1ce   : > { %v2350_v40 = vpop.f32.mrf.mxu0  ;;  %7766 = vmatprep.subr.mxu0 %v1663_v44  ;;  %5930 = vmatpush1.msra.mxu1 %v5759_v18 }
 0x1cf   : > { %7767 = vmatpush3.msra.mxu0 %v1663_v44  ;;  %v9484_v12 = vpop.f32.mrf.mxu1  ;;  %5931 = vmatprep.subr.mxu1 %v9193_v11  ;;  %v804_v40 = vld [vmem:[%s8391_s24 + $0x48] sm:$0xff] }
 0x1d0   : > { %v2353_v58 = vpop.f32.mrf.mxu0  ;;  %2657 = vmatmul.mubr.f32.gmra.mxu0 %v802_v49  ;;  %7768 = vmatprep.subr.mxu0 %v1662_v17  ;;  %v5758_v49 = vld [vmem:[%s13093_s3 + $0x40] sm:$0xff] }
 0x1d1   : > { %v9490_v63 = vadd.f32 %v2353_v58, %v8982_v60  ;;  %2661 = vmatprep.mubr.f32.mxu0 %v899_v6  ;;  %7769 = vmatpush3.msra.mxu0 %v1662_v17  ;;  %v2715_v5 = vpop.f32.mrf.mxu1  ;;  %v1659_v60 = vld [vmem:[%s13091_s1 + $0x450] sm:$0xff]  ;;  %v1658_v6 = vld [vmem:[%s13091_s1 + $0x448] sm:$0xff] }
 0x1d2   : > { %v2355_v44 = vpop.f32.mrf.mxu0  ;;  %7770 = vmatprep.subr.mxu0 %v1661_v46  ;;  %v901_v58 = vld [vmem:[%s8391_s24 + $0x51] sm:$0xff]  ;;  %5932 = vmatpush1.msra.mxu1 %v5758_v49 }
 0x1d3   : > { %7771 = vmatpush3.msra.mxu0 %v1661_v46  ;;  %v9500_v41 = vpop.f32.mrf.mxu1  ;;  %5933 = vmatprep.subr.mxu1 %v9193_v11 }
 0x1d4   : > { %v2358_v17 = vpop.f32.mrf.mxu0  ;;  %2662 = vmatmul.mubr.f32.gmra.mxu0 %v803_v23  ;;  %7772 = vmatprep.subr.mxu0 %v1660_v27 }
 0x1d5   : > { %v9507_v50 = vadd.f32 %v2358_v17, %v8996_v13  ;;  %2666 = vmatprep.mubr.f32.mxu0 %v900_v15  ;;  %7773 = vmatpush3.msra.mxu0 %v1660_v27  ;;  %v2720_v46 = vpop.f32.mrf.mxu1  ;;  %v1657_v13 = vld [vmem:[%s13091_s1 + $0x440] sm:$0xff]  ;;  %v5757_v27 = vld [vmem:[%s13093_s3 + $0x38] sm:$0xff]  ;;  %v805_v15 = vld [vmem:[%s8391_s24 + $0x50] sm:$0xff] }
 0x1d6   : > { %v2360_v18 = vpop.f32.mrf.mxu0  ;;  %7774 = vmatprep.subr.mxu0 %v1659_v60  ;;  %v902_v46 = vld [vmem:[%s8391_s24 + $0x59] sm:$0xff]  ;;  %5934 = vmatpush1.msra.mxu1 %v5757_v27 }
 0x1d7   : > { %7775 = vmatpush3.msra.mxu0 %v1659_v60  ;;  %v9517_v23 = vpop.f32.mrf.mxu1  ;;  %v1656_v60 = vld [vmem:[%s13091_s1 + $0x438] sm:$0xff]  ;;  %5935 = vmatprep.subr.mxu1 %v9193_v11 }
 0x1d8   : > { %v2363_v5 = vpop.f32.mrf.mxu0  ;;  %2667 = vmatmul.mubr.f32.gmra.mxu0 %v804_v40  ;;  %7776 = vmatprep.subr.mxu0 %v1658_v6 }
 0x1d9   : > { %v9524_v44 = vadd.f32 %v2363_v5, %v9010_v37  ;;  %2671 = vmatprep.mubr.f32.mxu0 %v901_v58  ;;  %7777 = vmatpush3.msra.mxu0 %v1658_v6  ;;  %v2725_v49 = vpop.f32.mrf.mxu1  ;;  %v1655_v37 = vld [vmem:[%s13091_s1 + $0x430] sm:$0xff]  ;;  %v806_v58 = vld [vmem:[%s8391_s24 + $0x58] sm:$0xff] }
 0x1da   : > { %v2365_v17 = vpop.f32.mrf.mxu0  ;;  %7778 = vmatprep.subr.mxu0 %v1657_v13  ;;  %v5756_v5 = vld [vmem:[%s13093_s3 + $0x30] sm:$0xff] }
 0x1db   : > { %7779 = vmatpush3.msra.mxu0 %v1657_v13  ;;  %v9534_v40 = vpop.f32.mrf.mxu1  ;;  %v1654_v13 = vld [vmem:[%s13091_s1 + $0x428] sm:$0xff]  ;;  %5936 = vmatpush1.msra.mxu1 %v5756_v5 }
 0x1dc   : > { %v2368_v6 = vpop.f32.mrf.mxu0  ;;  %2672 = vmatmul.mubr.f32.gmra.mxu0 %v805_v15  ;;  %7780 = vmatprep.subr.mxu0 %v1656_v60  ;;  %v903_v17 = vld [vmem:[%s8391_s24 + $0x61] sm:$0xff] }
 0x1dd   : > { %v9538_v18 = vadd.f32 %v2368_v6, %v9025_v53  ;;  %2676 = vmatprep.mubr.f32.mxu0 %v902_v46  ;;  %7781 = vmatpush3.msra.mxu0 %v1656_v60  ;;  %v2730_v27 = vpop.f32.mrf.mxu1  ;;  %v1653_v53 = vld [vmem:[%s13091_s1 + $0x420] sm:$0xff]  ;;  %v5755_v5 = vld [vmem:[%s13093_s3 + $0x28] sm:$0xff] }
 0x1de   : > { %v2370_v49 = vpop.f32.mrf.mxu0  ;;  %7782 = vmatprep.subr.mxu0 %v1655_v37  ;;  %5937 = vmatprep.subr.mxu1 %v9193_v11  ;;  %v807_v6 = vld [vmem:[%s8391_s24 + $0x60] sm:$0xff] }
 0x1df   : > { %13227 = vst [vmem:[#allocation5_spill] sm:$0xff] %v9538_v18  ;;  %7783 = vmatpush3.msra.mxu0 %v1655_v37  ;;  %v9551_v15 = vpop.f32.mrf.mxu1  ;;  %v1652_v37 = vld [vmem:[%s13091_s1 + $0x418] sm:$0xff]  ;;  %v904_v18 = vld [vmem:[%s8391_s24 + $0x69] sm:$0xff]  ;;  %5938 = vmatpush1.msra.mxu1 %v5755_v5  ;;  %v5754_v5 = vld [vmem:[%s13093_s3 + $0x20] sm:$0xff] }
 0x1e0   : > { %v2373_v60 = vpop.f32.mrf.mxu0  ;;  %2677 = vmatmul.mubr.f32.gmra.mxu0 %v806_v58  ;;  %7784 = vmatprep.subr.mxu0 %v1654_v13 }
 0x1e1   : > { %v9555_v46 = vadd.f32 %v2373_v60, %v9039_v26  ;;  %2681 = vmatprep.mubr.f32.mxu0 %v903_v17  ;;  %7785 = vmatpush3.msra.mxu0 %v1654_v13  ;;  %v2735_v27 = vpop.f32.mrf.mxu1  ;;  %v1651_v26 = vld [vmem:[%s13091_s1 + $0x410] sm:$0xff]  ;;  %v808_v60 = vld [vmem:[%s8391_s24 + $0x68] sm:$0xff] }
 0x1e2   : > { %v2375_v49 = vpop.f32.mrf.mxu0  ;;  %7786 = vmatprep.subr.mxu0 %v1653_v53  ;;  %5939 = vmatprep.subr.mxu1 %v9193_v11 }
 0x1e3   : > { %13228 = vst [vmem:[#allocation6_spill] sm:$0xff] %v9555_v46  ;;  %7787 = vmatpush3.msra.mxu0 %v1653_v53  ;;  %v9568_v58 = vpop.f32.mrf.mxu1  ;;  %v1650_v53 = vld [vmem:[%s13091_s1 + $0x408] sm:$0xff]  ;;  %v905_v46 = vld [vmem:[%s8391_s24 + $0x71] sm:$0xff]  ;;  %5940 = vmatpush1.msra.mxu1 %v5754_v5 }
 0x1e4   : > { %v2378_v13 = vpop.f32.mrf.mxu0  ;;  %2682 = vmatmul.mubr.f32.gmra.mxu0 %v807_v6  ;;  %7788 = vmatprep.subr.mxu0 %v1652_v37 }
 0x1e5   : > { %v9572_v17 = vadd.f32 %v2378_v13, %v9054_v52  ;;  %2686 = vmatprep.mubr.f32.mxu0 %v904_v18  ;;  %7789 = vmatpush3.msra.mxu0 %v1652_v37  ;;  %v2740_v27 = vpop.f32.mrf.mxu1  ;;  %v1649_v52 = vld [vmem:[%s13091_s1 + $0x400] sm:$0xff]  ;;  %v809_v13 = vld [vmem:[%s8391_s24 + $0x70] sm:$0xff] }
 0x1e6   : > { %v2380_v49 = vpop.f32.mrf.mxu0  ;;  %7790 = vmatprep.subr.mxu0 %v1651_v26  ;;  %5941 = vmatprep.subr.mxu1 %v9193_v11 }
 0x1e7   : > { %13229 = vst [vmem:[#allocation7_spill] sm:$0xff] %v9572_v17  ;;  %7791 = vmatpush3.msra.mxu0 %v1651_v26  ;;  %v9585_v18 = vpop.f32.mrf.mxu1  ;;  %v5753_v26 = vld [vmem:[%s13093_s3 + $0x18] sm:$0xff] }
 0x1e8   : > { %v2383_v6 = vpop.f32.mrf.mxu0  ;;  %2687 = vmatmul.mubr.f32.gmra.mxu0 %v808_v60  ;;  %7792 = vmatprep.subr.mxu0 %v1650_v53  ;;  %v906_v49 = vld [vmem:[%s8391_s24 + $0x79] sm:$0xff] }
 0x1e9   : > { %v9589_v37 = vadd.f32 %v2383_v6, %v9068_v61  ;;  %2691 = vmatprep.mubr.f32.mxu0 %v905_v46  ;;  %7793 = vmatpush3.msra.mxu0 %v1650_v53  ;;  %v2745_v27 = vpop.f32.mrf.mxu1  ;;  %v9598_v60 = vld [vmem:[#allocation3] sm:$0xff]  ;;  %v810_v53 = vld [vmem:[%s8391_s24 + $0x78] sm:$0xff] }
 0x1ea   : > { %v2385_v5 = vpop.f32.mrf.mxu0  ;;  %7794 = vmatprep.subr.mxu0 %v1649_v52  ;;  %5942 = vmatpush1.msra.mxu1 %v5753_v26 }
 0x1eb   : > { %13230 = vst [vmem:[#allocation8_spill] sm:$0xff] %v9589_v37  ;;  %7795 = vmatpush3.msra.mxu0 %v1649_v52  ;;  %v9596_v11 = vpop.f32.mrf.mxu1  ;;  %5943 = vmatprep.subr.mxu1 %v9598_v60  ;;  %v907_v52 = vld [vmem:[%s8391_s24 + $0x81] sm:$0xff]  ;;  %v5752_v5 = vld [vmem:[%s13093_s3 + $0x10] sm:$0xff] }
 0x1ec   : > { %v2388_v61 = vpop.f32.mrf.mxu0  ;;  %2692 = vmatmul.mubr.f32.gmra.mxu0 %v809_v13  ;;  %6222 = vmatprep.subr.mxu0 %v9598_v60 }
 0x1ed   : > { %v9603_v46 = vadd.f32 %v2388_v61, %v9081_v0  ;;  %2696 = vmatprep.mubr.f32.mxu0 %v906_v49  ;;  %v2750_v6 = vpop.f32.mrf.mxu1  ;;  %5944 = vmatpush1.msra.mxu1 %v5752_v5  ;;  %v811_v0 = vld [vmem:[%s8391_s24 + $0x80] sm:$0xff] }
 0x1ee   : > { %v2390_v27 = vpop.f32.mrf.mxu0  ;;  %5945 = vmatprep.subr.mxu1 %v9598_v60  ;;  %v908_v6 = vld [vmem:[%s8391_s24 + $0x89] sm:$0xff] }
 0x1ef   : > { %13231 = vst [vmem:[#allocation9_spill] sm:$0xff] %v9603_v46  ;;  %v9607_v26 = vpop.f32.mrf.mxu1  ;;  %v5751_v46 = vld [vmem:[%s13093_s3 + $0x8] sm:$0xff] }
 0x1f0   : > { %v2393_v37 = vpop.f32.mrf.mxu0  ;;  %2697 = vmatmul.mubr.f32.gmra.mxu0 %v810_v53  ;;  %5946 = vmatpush1.msra.mxu1 %v5751_v46  ;;  %v994_v46 = vld [vmem:[%s8391_s24 + $0x3a] sm:$0xff] }
 0x1f1   : > { %v9613_v13 = vadd.f32 %v2393_v37, %v9094_v19  ;;  %2701 = vmatprep.mubr.f32.mxu0 %v907_v52  ;;  %v2755_v49 = vpop.f32.mrf.mxu1  ;;  %v812_v37 = vld [vmem:[%s8391_s24 + $0x88] sm:$0xff]  ;;  %5947 = vmatprep.subr.mxu1 %v9598_v60 }
 0x1f2   : > { %v2395_v61 = vpop.f32.mrf.mxu0  ;;  %v993_v49 = vld [vmem:[%s8391_s24 + $0x32] sm:$0xff] }
 0x1f3   : > { %13232 = vst [vmem:[#allocation10_spill] sm:$0xff] %v9613_v13  ;;  %v9618_v27 = vpop.f32.mrf.mxu1  ;;  %v5750_v13 = vld [vmem:[%s13093_s3] sm:$0xff] }
 0x1f4   : > { %v2398_v53 = vpop.f32.mrf.mxu0  ;;  %2702 = vmatmul.mubr.f32.gmra.mxu0 %v811_v0  ;;  %5948 = vmatpush1.msra.mxu1 %v5750_v13  ;;  %v996_v13 = vld [vmem:[%s8391_s24 + $0x4a] sm:$0xff] }
 0x1f5   : > { %v9624_v19 = vadd.f32 %v2398_v53, %v9107_v33  ;;  %2706 = vmatprep.mubr.f32.mxu0 %v908_v6  ;;  %v2760_v52 = vpop.f32.mrf.mxu1  ;;  %5949 = vmatprep.subr.mxu1 %v9598_v60 }
 0x1f6   : > { %v2400_v5 = vpop.f32.mrf.mxu0  ;;  %v995_v52 = vld [vmem:[%s8391_s24 + $0x42] sm:$0xff] }
 0x1f7   : > { %13233 = vst [vmem:[#allocation11_spill] sm:$0xff] %v9624_v19  ;;  %v9629_v61 = vpop.f32.mrf.mxu1  ;;  %v5781_v19 = vld [vmem:[%s13093_s3 + $0xf8] sm:$0xff] }
 0x1f8   : > { %v2403_v0 = vpop.f32.mrf.mxu0  ;;  %2707 = vmatmul.mubr.f32.gmra.mxu0 %v812_v37  ;;  %5950 = vmatpush2.msra.mxu1 %v5781_v19 }
 0x1f9   : > { %v9635_v33 = vadd.f32 %v2403_v0, %v9120_v7  ;;  %7796 = vmatprep.mubr.f32.mxu0 %v993_v49  ;;  %v2765_v6 = vpop.f32.mrf.mxu1  ;;  %5951 = vmatprep.subr.mxu1 %v9598_v60 }
 0x1fa   : > { %v2405_v53 = vpop.f32.mrf.mxu0  ;;  %v997_v6 = vld [vmem:[%s8391_s24 + $0x52] sm:$0xff] }
 0x1fb   : > { %13234 = vst [vmem:[#allocation12_spill] sm:$0xff] %v9635_v33  ;;  %v9640_v5 = vpop.f32.mrf.mxu1 }
 0x1fc   : > { %v2408_v37 = vpop.f32.mrf.mxu0  ;;  %7797 = vmatmul.mubr.f32.vlgmr.msra.gmra.mxu0 %v994_v46 }
 0x1fd   : > { %v2409_v7 = vadd.f32 %v2408_v37, %v9133_v9  ;;  %7799 = vmatprep.mubr.f32.mxu0 %v995_v52  ;;  %v2770_v49 = vpop.f32.mrf.mxu1  ;;  %v998_v9 = vld [vmem:[%s8391_s24 + $0x5a] sm:$0xff]  ;;  %v5780_v52 = vld [vmem:[%s13093_s3 + $0xf0] sm:$0xff] }
 0x1fe   : > { %v2410_v0 = vpop.f32.mrf.mxu0  ;;  %v999_v49 = vld [vmem:[%s8391_s24 + $0x62] sm:$0xff]  ;;  %5952 = vmatpush2.msra.mxu1 %v5780_v52 }
 0x1ff   : > { %v9650_v53 = vadd.f32 %v9484_v12, %v2409_v7  ;;  %v9652_v33 = vpop.f32.mrf.mxu1  ;;  %5953 = vmatprep.subr.mxu1 %v9598_v60 }
 0x200   : > { %v2413_v17 = vpop.f32.mrf.mxu0  ;;  %7800 = vmatmul.mubr.f32.gmra.mxu0 %v996_v13 }
 0x201   : > { %13235 = vst [vmem:[#allocation13_spill] sm:$0xff] %v9650_v53  ;;  %v2414_v19 = vadd.f32 %v2413_v17, %v9146_v43  ;;  %7802 = vmatprep.mubr.f32.mxu0 %v997_v6  ;;  %v2775_v46 = vpop.f32.mrf.mxu1  ;;  %v1000_v17 = vld [vmem:[%s8391_s24 + $0x6a] sm:$0xff] }
 0x202   : > { %v2415_v37 = vpop.f32.mrf.mxu0  ;;  %v5779_v6 = vld [vmem:[%s13093_s3 + $0xe8] sm:$0xff] }
 0x203   : > { %v9661_v12 = vadd.f32 %v9500_v41, %v2414_v19  ;;  %v9663_v7 = vpop.f32.mrf.mxu1  ;;  %v1001_v41 = vld [vmem:[%s8391_s24 + $0x72] sm:$0xff]  ;;  %5954 = vmatpush2.msra.mxu1 %v5779_v6  ;;  %v1002_v37 = vld [vmem:[%s8391_s24 + $0x7a] sm:$0xff] }
 0x204   : > { %v2418_v13 = vpop.f32.mrf.mxu0  ;;  %7803 = vmatmul.mubr.f32.gmra.mxu0 %v998_v9  ;;  %5955 = vmatprep.subr.mxu1 %v9598_v60 }
 0x205   : > { %13236 = vst [vmem:[#allocation14_spill] sm:$0xff] %v9661_v12  ;;  %v2419_v43 = vadd.f32 %v2418_v13, %v9158_v45  ;;  %7805 = vmatprep.mubr.f32.mxu0 %v999_v49  ;;  %v2780_v0 = vpop.f32.mrf.mxu1  ;;  %v5778_v13 = vld [vmem:[%s13093_s3 + $0xe0] sm:$0xff]  ;;  %v13307_v12 = vmov 0 }
 0x206   : > { %v2420_v46 = vpop.f32.mrf.mxu0  ;;  %5956 = vmatpush2.msra.mxu1 %v5778_v13  ;;  %v1005_v13 = vld [vmem:[%s8391_s24 + $0x92] sm:$0xff] }
 0x207   : > { %v9673_v19 = vadd.f32 %v9517_v23, %v2419_v43  ;;  %v9675_v52 = vpop.f32.mrf.mxu1  ;;  %v1003_v23 = vld [vmem:[%s8391_s24 + $0x82] sm:$0xff]  ;;  %5957 = vmatprep.subr.mxu1 %v9598_v60  ;;  %v1004_v46 = vld [vmem:[%s8391_s24 + $0x8a] sm:$0xff] }
 0x208   : > { %v2423_v9 = vpop.f32.mrf.mxu0  ;;  %7806 = vmatmul.mubr.f32.gmra.mxu0 %v1000_v17 }
 0x209   : > { %13237 = vst [vmem:[#allocation15_spill] sm:$0xff] %v9673_v19  ;;  %v2424_v45 = vadd.f32 %v2423_v9, %v9171_v34  ;;  %7808 = vmatprep.mubr.f32.mxu0 %v1001_v41  ;;  %v2785_v49 = vpop.f32.mrf.mxu1  ;;  %v5777_v9 = vld [vmem:[%s13093_s3 + $0xd8] sm:$0xff] }
 0x20a   : > { %v2425_v0 = vpop.f32.mrf.mxu0  ;;  %5958 = vmatpush2.msra.mxu1 %v5777_v9  ;;  %v5776_v9 = vld [vmem:[%s13093_s3 + $0xd0] sm:$0xff] }
 0x20b   : > { %v9685_v43 = vadd.f32 %v9534_v40, %v2424_v45  ;;  %v9687_v6 = vpop.f32.mrf.mxu1  ;;  %v5797_v40 = vld [vmem:[%s13093_s3 + $0x178] sm:$0xff]  ;;  %5959 = vmatprep.subr.mxu1 %v9598_v60 }
 0x20c   : > { %v2428_v17 = vpop.f32.mrf.mxu0  ;;  %7809 = vmatmul.mubr.f32.gmra.mxu0 %v1002_v37  ;;  %5960 = vmatpush2.msra.mxu1 %v5776_v9 }
 0x20d   : > { %13238 = vst [vmem:[#allocation16_spill] sm:$0xff] %v9685_v43  ;;  %v2429_v34 = vadd.f32 %v2428_v17, %v9184_v16  ;;  %7811 = vmatprep.mubr.f32.mxu0 %v1003_v23  ;;  %v2790_v41 = vpop.f32.mrf.mxu1  ;;  %6223 = vmatpush1.msra.mxu0 %v5797_v40  ;;  %v1006_v23 = vld [vmem:[%s8391_s24 + $0x9a] sm:$0xff] }
 0x20e   : > { %v2430_v49 = vpop.f32.mrf.mxu0  ;;  %6224 = vmatprep.subr.mxu0 %v9598_v60  ;;  %v1007_v41 = vld [vmem:[%s8391_s24 + $0xa2] sm:$0xff]  ;;  %5961 = vmatprep.subr.mxu1 %v9598_v60 }
 0x20f   : > { %v9700_v45 = vadd.f32 %v9551_v15, %v2429_v34  ;;  %v9702_v16 = vpop.f32.mrf.mxu1  ;;  %v5796_v15 = vld [vmem:[%s13093_s3 + $0x170] sm:$0xff] }
 0x210   : > { %v2433_v37 = vpop.f32.mrf.mxu0  ;;  %7812 = vmatmul.mubr.f32.gmra.mxu0 %v1004_v46 }
 0x211   : > { %13239 = vst [vmem:[#allocation17_spill] sm:$0xff] %v9700_v45  ;;  %v2434_v0 = vadd.f32 %v2433_v37, %v9199_v51  ;;  %7814 = vmatprep.mubr.f32.mxu0 %v1005_v13  ;;  %v2795_v17 = vpop.f32.mrf.mxu1  ;;  %6225 = vmatpush1.msra.mxu0 %v5796_v15  ;;  %v5795_v51 = vld [vmem:[%s13093_s3 + $0x168] sm:$0xff]  ;;  %v1009_v15 = vld [vmem:[%s8391_s24 + $0xb2] sm:$0xff] }
 0x212   : > { %v2435_v34 = vpop.f32.mrf.mxu0  ;;  %6226 = vmatprep.subr.mxu0 %v9598_v60  ;;  %v1008_v37 = vld [vmem:[%s8391_s24 + $0xaa] sm:$0xff] }
 0x213   : > { %v9719_v46 = vadd.f32 %v9568_v58, %v2434_v0  ;;  %v9721_v49 = vpop.f32.mrf.mxu1  ;;  %6227 = vmatpush1.msra.mxu0 %v5795_v51  ;;  %v5794_v58 = vld [vmem:[%s13093_s3 + $0x160] sm:$0xff] }
 0x214   : > { %v2438_v13 = vpop.f32.mrf.mxu0  ;;  %7815 = vmatmul.mubr.f32.gmra.mxu0 %v1006_v23  ;;  %6228 = vmatprep.subr.mxu0 %v9598_v60  ;;  %v5775_v23 = vld [vmem:[%s13093_s3 + $0xc8] sm:$0xff] }
 0x215   : > { %13240 = vst [vmem:[#allocation18_spill] sm:$0xff] %v9719_v46  ;;  %v2439_v40 = vadd.f32 %v2438_v13, %v9217_v3  ;;  %7817 = vmatprep.mubr.f32.mxu0 %v1007_v41  ;;  %v2800_v17 = vpop.f32.mrf.mxu1  ;;  %v5793_v3 = vld [vmem:[%s13093_s3 + $0x158] sm:$0xff]  ;;  %6229 = vmatpush1.msra.mxu0 %v5794_v58  ;;  %v13294_v46 = vmov 0 }
 0x216   : > { %v2440_v0 = vpop.f32.mrf.mxu0  ;;  %5962 = vmatpush2.msra.mxu1 %v5775_v23  ;;  %6230 = vmatprep.subr.mxu0 %v9598_v60  ;;  %v1010_v13 = vld [vmem:[%s8391_s24 + $0xba] sm:$0xff] }
 0x217   : > { %v9739_v34 = vadd.f32 %v9585_v18, %v2439_v40  ;;  %v9741_v41 = vpop.f32.mrf.mxu1  ;;  %6231 = vmatpush1.msra.mxu0 %v5793_v3  ;;  %v5792_v0 = vld [vmem:[%s13093_s3 + $0x150] sm:$0xff]  ;;  %v1011_v40 = vld [vmem:[%s8391_s24 + $0xc2] sm:$0xff]  ;;  %5963 = vmatprep.subr.mxu1 %v9598_v60 }
 0x218   : > { %v2443_v9 = vpop.f32.mrf.mxu0  ;;  %7818 = vmatmul.mubr.f32.gmra.mxu0 %v1008_v37  ;;  %6232 = vmatprep.subr.mxu0 %v9598_v60  ;;  %v5774_v37 = vld [vmem:[%s13093_s3 + $0xc0] sm:$0xff] }
 0x219   : > { %13241 = vst [vmem:[#allocation19_spill] sm:$0xff] %v9739_v34  ;;  %v2444_v51 = vadd.f32 %v2443_v9, %v9228_v36  ;;  %7820 = vmatprep.mubr.f32.mxu0 %v1009_v15  ;;  %v2805_v17 = vpop.f32.mrf.mxu1  ;;  %v5791_v36 = vld [vmem:[%s13093_s3 + $0x148] sm:$0xff]  ;;  %6233 = vmatpush1.msra.mxu0 %v5792_v0 }
 0x21a   : > { %v2445_v18 = vpop.f32.mrf.mxu0  ;;  %5964 = vmatpush2.msra.mxu1 %v5774_v37  ;;  %6234 = vmatprep.subr.mxu0 %v9598_v60  ;;  %v1012_v9 = vld [vmem:[%s8391_s24 + $0xca] sm:$0xff] }
 0x21b   : > { %v9759_v58 = vadd.f32 %v9596_v11, %v2444_v51  ;;  %v9761_v15 = vpop.f32.mrf.mxu1  ;;  %6235 = vmatpush1.msra.mxu0 %v5791_v36  ;;  %v5790_v18 = vld [vmem:[%s13093_s3 + $0x140] sm:$0xff]  ;;  %v1013_v51 = vld [vmem:[%s8391_s24 + $0xd2] sm:$0xff]  ;;  %5965 = vmatprep.subr.mxu1 %v9598_v60 }
 0x21c   : > { %v2448_v23 = vpop.f32.mrf.mxu0  ;;  %7821 = vmatmul.mubr.f32.gmra.mxu0 %v1010_v13  ;;  %6236 = vmatprep.subr.mxu0 %v9598_v60  ;;  %v5773_v13 = vld [vmem:[%s13093_s3 + $0xb8] sm:$0xff] }
 0x21d   : > { %13242 = vst [vmem:[#allocation20_spill] sm:$0xff] %v9759_v58  ;;  %v2449_v3 = vadd.f32 %v2448_v23, %v9238_v8  ;;  %7823 = vmatprep.mubr.f32.mxu0 %v1011_v40  ;;  %v2810_v17 = vpop.f32.mrf.mxu1  ;;  %v5789_v8 = vld [vmem:[%s13093_s3 + $0x138] sm:$0xff]  ;;  %6237 = vmatpush1.msra.mxu0 %v5790_v18 }
 0x21e   : > { %v2450_v11 = vpop.f32.mrf.mxu0  ;;  %5966 = vmatpush2.msra.mxu1 %v5773_v13  ;;  %6238 = vmatprep.subr.mxu0 %v9598_v60  ;;  %v1014_v23 = vld [vmem:[%s8391_s24 + $0xda] sm:$0xff] }
 0x21f   : > { %v9779_v0 = vadd.f32 %v9607_v26, %v2449_v3  ;;  %v9781_v40 = vpop.f32.mrf.mxu1  ;;  %6239 = vmatpush1.msra.mxu0 %v5789_v8  ;;  %v5788_v26 = vld [vmem:[%s13093_s3 + $0x130] sm:$0xff]  ;;  %v1015_v11 = vld [vmem:[%s8391_s24 + $0xe2] sm:$0xff]  ;;  %5967 = vmatprep.subr.mxu1 %v9598_v60 }
 0x220   : > { %v2453_v37 = vpop.f32.mrf.mxu0  ;;  %7824 = vmatmul.mubr.f32.gmra.mxu0 %v1012_v9  ;;  %6240 = vmatprep.subr.mxu0 %v9598_v60  ;;  %v1016_v8 = vld [vmem:[%s8391_s24 + $0xea] sm:$0xff] }
 0x221   : > { %13243 = vst [vmem:[#allocation21_spill] sm:$0xff] %v9779_v0  ;;  %v2454_v36 = vadd.f32 %v2453_v37, %v9248_v2  ;;  %7826 = vmatprep.mubr.f32.mxu0 %v1013_v51  ;;  %v2815_v17 = vpop.f32.mrf.mxu1  ;;  %v5787_v2 = vld [vmem:[%s13093_s3 + $0x128] sm:$0xff]  ;;  %6241 = vmatpush1.msra.mxu0 %v5788_v26  ;;  %v1017_v26 = vld [vmem:[%s8391_s24 + $0xf2] sm:$0xff] }
 0x222   : > { %v2455_v3 = vpop.f32.mrf.mxu0  ;;  %6242 = vmatprep.subr.mxu0 %v9598_v60  ;;  %v5772_v17 = vld [vmem:[%s13093_s3 + $0xb0] sm:$0xff] }
 0x223   : > { %v9796_v9 = vadd.f32 %v9618_v27, %v2454_v36  ;;  %v9798_v18 = vpop.f32.mrf.mxu1  ;;  %6243 = vmatpush1.msra.mxu0 %v5787_v2  ;;  %v5786_v27 = vld [vmem:[%s13093_s3 + $0x120] sm:$0xff]  ;;  %5968 = vmatpush2.msra.mxu1 %v5772_v17 }
 0x224   : > { %v2458_v51 = vpop.f32.mrf.mxu0  ;;  %7827 = vmatmul.mubr.f32.gmra.mxu0 %v1014_v23  ;;  %6244 = vmatprep.subr.mxu0 %v9598_v60 }
 0x225   : > { %13244 = vst [vmem:[#allocation22_spill] sm:$0xff] %v9796_v9  ;;  %v2459_v13 = vadd.f32 %v2458_v51, %v9258_v20  ;;  %7829 = vmatprep.mubr.f32.mxu0 %v1015_v11  ;;  %v2820_v37 = vpop.f32.mrf.mxu1  ;;  %v5785_v20 = vld [vmem:[%s13093_s3 + $0x118] sm:$0xff]  ;;  %6245 = vmatpush1.msra.mxu0 %v5786_v27  ;;  %v1019_v27 = vld [vmem:[%s8391_s24 + $0x102] sm:$0xff] }
 0x226   : > { %v2460_v36 = vpop.f32.mrf.mxu0  ;;  %5969 = vmatprep.subr.mxu1 %v9598_v60  ;;  %6246 = vmatprep.subr.mxu0 %v9598_v60  ;;  %v1018_v51 = vld [vmem:[%s8391_s24 + $0xfa] sm:$0xff] }
 0x227   : > { %v9815_v23 = vadd.f32 %v9629_v61, %v2459_v13  ;;  %v9817_v3 = vpop.f32.mrf.mxu1  ;;  %6247 = vmatpush1.msra.mxu0 %v5785_v20  ;;  %v5771_v61 = vld [vmem:[%s13093_s3 + $0xa8] sm:$0xff]  ;;  %v5784_v13 = vld [vmem:[%s13093_s3 + $0x110] sm:$0xff] }
 0x228   : > { %v2463_v11 = vpop.f32.mrf.mxu0  ;;  %7830 = vmatmul.mubr.f32.gmra.mxu0 %v1016_v8  ;;  %5970 = vmatpush2.msra.mxu1 %v5771_v61 }
 0x229   : > { %13245 = vst [vmem:[#allocation23_spill] sm:$0xff] %v9815_v23  ;;  %v2464_v2 = vadd.f32 %v2463_v11, %v9268_v48  ;;  %7832 = vmatprep.mubr.f32.mxu0 %v1017_v26  ;;  %v2825_v37 = vpop.f32.mrf.mxu1  ;;  %6248 = vmatprep.subr.mxu0 %v9598_v60  ;;  %v5783_v48 = vld [vmem:[%s13093_s3 + $0x108] sm:$0xff] }
 0x22a   : > { %v2465_v17 = vpop.f32.mrf.mxu0  ;;  %6249 = vmatpush1.msra.mxu0 %v5784_v13  ;;  %5971 = vmatprep.subr.mxu1 %v9598_v60  ;;  %v1020_v11 = vld [vmem:[%s8391_s24 + $0x10a] sm:$0xff]  ;;  %v1021_v13 = vld [vmem:[%s8391_s24 + $0x112] sm:$0xff] }
 0x22b   : > { %v9835_v8 = vadd.f32 %v9640_v5, %v2464_v2  ;;  %v9837_v36 = vpop.f32.mrf.mxu1  ;;  %6250 = vmatprep.subr.mxu0 %v9598_v60  ;;  %v5770_v5 = vld [vmem:[%s13093_s3 + $0xa0] sm:$0xff] }
 0x22c   : > { %v2468_v26 = vpop.f32.mrf.mxu0  ;;  %7833 = vmatmul.mubr.f32.gmra.mxu0 %v1018_v51  ;;  %v5782_v2 = vld [vmem:[%s13093_s3 + $0x100] sm:$0xff]  ;;  %5972 = vmatpush2.msra.mxu1 %v5770_v5 }
 0x22d   : > { %13246 = vst [vmem:[#allocation24_spill] sm:$0xff] %v9835_v8  ;;  %v2469_v20 = vadd.f32 %v2468_v26, %v9278_v31  ;;  %7835 = vmatprep.mubr.f32.mxu0 %v1019_v27  ;;  %v2830_v37 = vpop.f32.mrf.mxu1  ;;  %6251 = vmatpush1.msra.mxu0 %v5783_v48  ;;  %v5813_v31 = vld [vmem:[%s13093_s3 + $0x1f8] sm:$0xff] }
 0x22e   : > { %v2470_v61 = vpop.f32.mrf.mxu0  ;;  %6252 = vmatprep.subr.mxu0 %v9598_v60  ;;  %5973 = vmatprep.subr.mxu1 %v9598_v60  ;;  %v1022_v26 = vld [vmem:[%s8391_s24 + $0x11a] sm:$0xff] }
 0x22f   : > { %v9855_v51 = vadd.f32 %v9652_v33, %v2469_v20  ;;  %v9857_v17 = vpop.f32.mrf.mxu1  ;;  %6253 = vmatpush1.msra.mxu0 %v5782_v2  ;;  %v5769_v33 = vld [vmem:[%s13093_s3 + $0x98] sm:$0xff]  ;;  %v5812_v20 = vld [vmem:[%s13093_s3 + $0x1f0] sm:$0xff]  ;;  %v1023_v2 = vld [vmem:[%s8391_s24 + $0x122] sm:$0xff] }
 0x230   : > { %v2473_v27 = vpop.f32.mrf.mxu0  ;;  %7836 = vmatmul.mubr.f32.gmra.mxu0 %v1020_v11  ;;  %6254 = vmatprep.subr.mxu0 %v9598_v60 }
 0x231   : > { %13247 = vst [vmem:[#allocation25_spill] sm:$0xff] %v9855_v51  ;;  %v2474_v48 = vadd.f32 %v2473_v27, %v9288_v55  ;;  %7838 = vmatprep.mubr.f32.mxu0 %v1021_v13  ;;  %v2835_v37 = vpop.f32.mrf.mxu1  ;;  %6255 = vmatpush2.msra.mxu0 %v5813_v31  ;;  %v5811_v55 = vld [vmem:[%s13093_s3 + $0x1e8] sm:$0xff] }
 0x232   : > { %v2475_v5 = vpop.f32.mrf.mxu0  ;;  %6256 = vmatprep.subr.mxu0 %v9598_v60  ;;  %5974 = vmatpush2.msra.mxu1 %v5769_v33  ;;  %v5809_v37 = vld [vmem:[%s13093_s3 + $0x1d8] sm:$0xff] }
 0x233   : > { %v9875_v11 = vadd.f32 %v9663_v7, %v2474_v48  ;;  %v9877_v61 = vpop.f32.mrf.mxu1  ;;  %6257 = vmatpush2.msra.mxu0 %v5812_v20  ;;  %5975 = vmatprep.subr.mxu1 %v9598_v60  ;;  %v5810_v7 = vld [vmem:[%s13093_s3 + $0x1e0] sm:$0xff]  ;;  %v8047_v5 = vld [vmem:[%s8391_s24 + $0x12a] sm:$0xff] }
 0x234   : > { %v2478_v13 = vpop.f32.mrf.mxu0  ;;  %7839 = vmatmul.mubr.f32.gmra.mxu0 %v1022_v26  ;;  %6258 = vmatprep.subr.mxu0 %v9598_v60  ;;  %v5768_v26 = vld [vmem:[%s13093_s3 + $0x90] sm:$0xff] }
 0x235   : > { %13248 = vst [vmem:[#allocation26_spill] sm:$0xff] %v9875_v11  ;;  %v2479_v31 = vadd.f32 %v2478_v13, %v9298_v62  ;;  %7841 = vmatprep.mubr.f32.mxu0 %v1023_v2  ;;  %v2840_v27 = vpop.f32.mrf.mxu1  ;;  %6259 = vmatpush2.msra.mxu0 %v5811_v55  ;;  %v8048_v55 = vld [vmem:[%s8391_s24 + $0x132] sm:$0xff] }
 0x236   : > { %v2480_v48 = vpop.f32.mrf.mxu0  ;;  %6260 = vmatprep.subr.mxu0 %v9598_v60  ;;  %5976 = vmatpush2.msra.mxu1 %v5768_v26 }
 0x237   : > { %v9893_v62 = vadd.f32 %v9675_v52, %v2479_v31  ;;  %v9895_v33 = vpop.f32.mrf.mxu1  ;;  %6261 = vmatpush2.msra.mxu0 %v5810_v7  ;;  %v5808_v52 = vld [vmem:[%s13093_s3 + $0x1d0] sm:$0xff]  ;;  %v5767_v31 = vld [vmem:[%s13093_s3 + $0x88] sm:$0xff]  ;;  %5977 = vmatprep.subr.mxu1 %v9598_v60 }
 0x238   : > { %v2483_v20 = vpop.f32.mrf.mxu0  ;;  %7842 = vmatmul.mubr.f32.gmra.mxu0 %v8047_v5  ;;  %6262 = vmatprep.subr.mxu0 %v9598_v60 }
 0x239   : > { %13249 = vst [vmem:[#allocation27_spill] sm:$0xff] %v9893_v62  ;;  %v2484_v2 = vadd.f32 %v2483_v20, %v9308_v39  ;;  %7844 = vmatprep.mubr.f32.mxu0 %v8048_v55  ;;  %v2845_v13 = vpop.f32.mrf.mxu1  ;;  %6263 = vmatpush2.msra.mxu0 %v5809_v37  ;;  %v5807_v39 = vld [vmem:[%s13093_s3 + $0x1c8] sm:$0xff]  ;;  %v8049_v37 = vld [vmem:[%s8391_s24 + $0x13a] sm:$0xff] }
 0x23a   : > { %v2485_v27 = vpop.f32.mrf.mxu0  ;;  %6264 = vmatprep.subr.mxu0 %v9598_v60  ;;  %5978 = vmatpush2.msra.mxu1 %v5767_v31  ;;  %v5766_v20 = vld [vmem:[%s13093_s3 + $0x80] sm:$0xff] }
 0x23b   : > { %v9913_v7 = vadd.f32 %v9687_v6, %v2484_v2  ;;  %v9915_v48 = vpop.f32.mrf.mxu1  ;;  %6265 = vmatpush2.msra.mxu0 %v5808_v52  ;;  %v8050_v55 = vld [vmem:[%s8391_s24 + $0x142] sm:$0xff]  ;;  %5979 = vmatprep.subr.mxu1 %v9598_v60 }
 0x23c   : > { %v2488_v26 = vpop.f32.mrf.mxu0  ;;  %7845 = vmatmul.mubr.f32.gmra.mxu0 %v8049_v37  ;;  %6266 = vmatprep.subr.mxu0 %v9598_v60  ;;  %v5806_v2 = vld [vmem:[%s13093_s3 + $0x1c0] sm:$0xff] }
 0x23d   : > { %13250 = vst [vmem:[#allocation28_spill] sm:$0xff] %v9913_v7  ;;  %v2489_v5 = vadd.f32 %v2488_v26, %v9318_v42  ;;  %7847 = vmatprep.mubr.f32.mxu0 %v8050_v55  ;;  %v2850_v6 = vpop.f32.mrf.mxu1  ;;  %6267 = vmatpush2.msra.mxu0 %v5807_v39  ;;  %v5805_v42 = vld [vmem:[%s13093_s3 + $0x1b8] sm:$0xff]  ;;  %v4310_v27 = vld [vmem:[#allocation3 + $0x7] sm:$0xff] }
 0x23e   : > { %v2490_v13 = vpop.f32.mrf.mxu0  ;;  %6268 = vmatprep.subr.mxu0 %v9598_v60  ;;  %5980 = vmatpush2.msra.mxu1 %v5766_v20  ;;  %v8051_v26 = vld [vmem:[%s8391_s24 + $0x14a] sm:$0xff]  ;;  %v8052_v55 = vld [vmem:[%s8391_s24 + $0x152] sm:$0xff] }
 0x23f   : > { %v9930_v52 = vadd.f32 %v9702_v16, %v2489_v5  ;;  %v9932_v31 = vpop.f32.mrf.mxu1  ;;  %6269 = vmatpush2.msra.mxu0 %v5806_v2  ;;  %v5804_v20 = vld [vmem:[%s13093_s3 + $0x1b0] sm:$0xff]  ;;  %5982 = vmatmul.mubr.f32.vlgmr.msra.gmra.mxu1 %v4310_v27 }
 0x240   : > { %v2493_v39 = vpop.f32.mrf.mxu0  ;;  %7848 = vmatmul.mubr.f32.gmra.mxu0 %v8051_v26  ;;  %6270 = vmatprep.subr.mxu0 %v9598_v60 }
 0x241   : > { %13251 = vst [vmem:[#allocation29_spill] sm:$0xff] %v9930_v52  ;;  %v2494_v37 = vadd.f32 %v2493_v39, %v9328_v10  ;;  %7850 = vmatprep.mubr.f32.mxu0 %v8052_v55  ;;  %v2855_v16 = vpop.f32.mrf.mxu1  ;;  %6271 = vmatpush2.msra.mxu0 %v5805_v42  ;;  %v5803_v10 = vld [vmem:[%s13093_s3 + $0x1a8] sm:$0xff]  ;;  %v8053_v42 = vld [vmem:[%s8391_s24 + $0x15a] sm:$0xff] }
 0x242   : > { %v2495_v5 = vpop.f32.mrf.mxu0  ;;  %6272 = vmatprep.subr.mxu0 %v9598_v60  ;;  %6527 = vmatprep.subr.mxu1 %v9598_v60  ;;  %v4311_v39 = vld [vmem:[#allocation3 + $0xf] sm:$0xff] }
 0x243   : > { %v9946_v6 = vadd.f32 %v9721_v49, %v2494_v37  ;;  %v9948_v2 = vpop.f32.mrf.mxu1  ;;  %6273 = vmatpush2.msra.mxu0 %v5804_v20  ;;  %v8054_v49 = vld [vmem:[%s8391_s24 + $0x162] sm:$0xff]  ;;  %5986 = vmatprep.mubr.f32.mxu1 %v9598_v60 }
 0x244   : > { %v2498_v13 = vpop.f32.mrf.mxu0  ;;  %7851 = vmatmul.mubr.f32.gmra.mxu0 %v8053_v42  ;;  %6274 = vmatprep.subr.mxu0 %v9598_v60  ;;  %v5802_v37 = vld [vmem:[%s13093_s3 + $0x1a0] sm:$0xff] }
 0x245   : > { %13252 = vst [vmem:[#allocation30_spill] sm:$0xff] %v9946_v6  ;;  %v2499_v27 = vadd.f32 %v2498_v13, %v9338_v59  ;;  %7853 = vmatprep.mubr.f32.mxu0 %v8054_v49  ;;  %v2860_v26 = vpop.f32.mrf.mxu1  ;;  %6275 = vmatpush2.msra.mxu0 %v5803_v10  ;;  %v5801_v59 = vld [vmem:[%s13093_s3 + $0x198] sm:$0xff]  ;;  %v8055_v10 = vld [vmem:[%s8391_s24 + $0x16a] sm:$0xff]  ;;  %v3341_v13 = vlaneseq }
 0x246   : > { %v2500_v55 = vpop.f32.mrf.mxu0  ;;  %6276 = vmatprep.subr.mxu0 %v9598_v60  ;;  %5987 = vmatmul.mubr.f32.gmra.mxu1 %v4311_v39  ;;  %v8056_v49 = vld [vmem:[%s8391_s24 + $0x172] sm:$0xff] }
 0x247   : > { %v9964_v16 = vadd.f32 %v9741_v41, %v2499_v27  ;;  %v9966_v20 = vpop.f32.mrf.mxu1  ;;  %6277 = vmatpush2.msra.mxu0 %v5802_v37  ;;  %v5829_v39 = vld [vmem:[%s13093_s3 + $0x278] sm:$0xff]  ;;  %5991 = vmatprep.mubr.f32.mxu1 %v9598_v60  ;;  %v5800_v37 = vld [vmem:[%s13093_s3 + $0x190] sm:$0xff] }
 0x248   : > { %v2503_v5 = vpop.f32.mrf.mxu0  ;;  %7854 = vmatmul.mubr.f32.gmra.mxu0 %v8055_v10  ;;  %6278 = vmatprep.subr.mxu0 %v9598_v60  ;;  %v4312_v27 = vld [vmem:[#allocation3 + $0x17] sm:$0xff]  ;;  %v9990_v10 = vshrl.u32 %v3341_v13, 7 }
 0x249   : > { %13253 = vst [vmem:[#allocation31_spill] sm:$0xff] %v9964_v16  ;;  %v2504_v42 = vadd.f32 %v2503_v5, %v9348_v25  ;;  %7856 = vmatprep.mubr.f32.mxu0 %v8056_v49  ;;  %v2865_v41 = vpop.f32.mrf.mxu1  ;;  %6279 = vmatpush2.msra.mxu0 %v5801_v59  ;;  %v8057_v5 = vld [vmem:[%s8391_s24 + $0x17a] sm:$0xff]  ;;  %v5799_v49 = vld [vmem:[%s13093_s3 + $0x188] sm:$0xff] }
 0x24a   : > { %v2505_v26 = vpop.f32.mrf.mxu0  ;;  %6528 = vmatpush1.msra.mxu1 %v5829_v39  ;;  %6280 = vmatprep.subr.mxu0 %v9598_v60  ;;  %v10019_v16 = vadd.s32 24, %v9990_v10  ;;  %v10313_v58 = vadd.s32 136, %v9990_v10 }
 0x24b   : > { %v9983_v25 = vadd.f32 %v9761_v15, %v2504_v42  ;;  %v9985_v55 = vpop.f32.mrf.mxu1  ;;  %6529 = vmatprep.subr.mxu1 %v9598_v60  ;;  %5992 = vmatmul.mubr.f32.gmra.mxu1 %v4312_v27  ;;  %v8058_v42 = vld [vmem:[%s8391_s24 + $0x182] sm:$0xff]  ;;  %v5828_v27 = vld [vmem:[%s13093_s3 + $0x270] sm:$0xff] }
 0x24c   : > { %v2508_v59 = vpop.f32.mrf.mxu0  ;;  %7857 = vmatmul.mubr.f32.gmra.mxu0 %v8057_v5  ;;  %v10011_v5 = vadd.s32 8, %v9990_v10  ;;  %6530 = vmatpush1.msra.mxu1 %v5828_v27 }
 0x24d   : > { %13254 = vst [vmem:[#allocation32_spill] sm:$0xff] %v9983_v25  ;;  %v2509_v15 = vadd.f32 %v2508_v59, %v9356_v1  ;;  %7859 = vmatprep.mubr.f32.mxu0 %v8058_v42  ;;  %v2870_v41 = vpop.f32.mrf.mxu1  ;;  %6281 = vmatpush2.msra.mxu0 %v5800_v37  ;;  %v5798_v1 = vld [vmem:[%s13093_s3 + $0x180] sm:$0xff]  ;;  %v8059_v59 = vld [vmem:[%s8391_s24 + $0x18a] sm:$0xff]  ;;  %v8060_v42 = vld [vmem:[%s8391_s24 + $0x192] sm:$0xff] }
 0x24e   : > { %v2510_v39 = vpop.f32.mrf.mxu0  ;;  %6282 = vmatprep.subr.mxu0 %v9598_v60  ;;  %v1038_v41 = vld [vmem:[%s8391_s24 + $0x19a] sm:$0xff]  ;;  %6531 = vmatprep.subr.mxu1 %v9598_v60 }
 0x24f   : > { %v9999_v13 = vadd.f32 %v9781_v40, %v2509_v15  ;;  %v10001_v26 = vpop.f32.mrf.mxu1  ;;  %6283 = vmatpush2.msra.mxu0 %v5799_v49  ;;  %v13256_v40 = vld [vmem:[#allocation4_spill] sm:$0xff] }
 0x250   : > { %v2513_v37 = vpop.f32.mrf.mxu0  ;;  %7860 = vmatmul.mubr.f32.gmra.mxu0 %v8059_v59  ;;  %6284 = vmatprep.subr.mxu0 %v9598_v60 }
 0x251   : > { %13255 = vst [vmem:[#allocation33_spill] sm:$0xff] %v9999_v13  ;;  %v2514_v15 = vadd.f32 %v2513_v37, %v13256_v40  ;;  %7862 = vmatprep.mubr.f32.mxu0 %v8060_v42  ;;  %v2875_v39 = vpop.f32.mrf.mxu1  ;;  %v1039_v13 = vld [vmem:[%s8391_s24 + $0x1a2] sm:$0xff]  ;;  %6285 = vmatpush2.msra.mxu0 %v5798_v1  ;;  %v10029_v40 = vmul.u32.u64.low 2863311531, %v10011_v5  ;;  %v10030_v42 = vmul.u32.u64.high 2863311531, %v10011_v5, %v10029_v40 }
 0x252   : > { %v2515_v49 = vpop.f32.mrf.mxu0  ;;  %6832 = vmatprep.subr.mxu0 %v9598_v60  ;;  %v10033_v39 = vadd.s32 16, %v9990_v10  ;;  %v10045_v52 = vmul.u32.u64.low 2863311531, %v10019_v16  ;;  %v10046_v40 = vmul.u32.u64.high 2863311531, %v10019_v16, %v10045_v52 }
 0x253   : > { %v10023_v59 = vadd.f32 %v9798_v18, %v2514_v15  ;;  %v10025_v27 = vpop.f32.mrf.mxu1  ;;  %v1040_v49 = vld [vmem:[%s8391_s24 + $0x1aa] sm:$0xff]  ;;  %v10038_v18 = vmul.u32.u64.low 2863311531, %v9990_v10  ;;  %v10039_v15 = vmul.u32.u64.high 2863311531, %v9990_v10, %v10038_v18  ;;  %v10060_v52 = vadd.s32 40, %v9990_v10 }
 0x254   : > { %v2518_v37 = vpop.f32.mrf.mxu0  ;;  %7863 = vmatmul.mubr.f32.gmra.mxu0 %v1038_v41  ;;  %v5827_v41 = vld [vmem:[%s13093_s3 + $0x268] sm:$0xff] }
 0x255   : > { %13257 = vst [vmem:[#allocation4_spill] sm:$0xff] %v10023_v59  ;;  %v2519_v1 = vadd.f32 %v2518_v37, %v9375_v22  ;;  %7865 = vmatprep.mubr.f32.mxu0 %v1039_v13  ;;  %v2880_v25 = vpop.f32.mrf.mxu1  ;;  %6532 = vmatpush1.msra.mxu1 %v5827_v41  ;;  %v10055_v13 = vmul.u32.u64.low 2863311531, %v10033_v39  ;;  %v10056_v37 = vmul.u32.u64.high 2863311531, %v10033_v39, %v10055_v13 }
 0x256   : > { %v2520_v59 = vpop.f32.mrf.mxu0  ;;  %6533 = vmatprep.subr.mxu1 %v9598_v60 }
 0x257   : > { %v10049_v6 = vadd.f32 %v9817_v3, %v2519_v1  ;;  %v10051_v22 = vpop.f32.mrf.mxu1 }
 0x258   : > { %v2523_v25 = vpop.f32.mrf.mxu0  ;;  %7866 = vmatmul.mubr.f32.gmra.mxu0 %v1040_v49  ;;  %v5826_v49 = vld [vmem:[%s13093_s3 + $0x260] sm:$0xff] }
 0x259   : > { %13258 = vst [vmem:[#allocation34_spill] sm:$0xff] %v10049_v6  ;;  %v2524_v59 = vadd.f32 %v2523_v25, %v9381_v38  ;;  %v2885_v18 = vpop.f32.mrf.mxu1  ;;  %6534 = vmatpush1.msra.mxu1 %v5826_v49  ;;  %v3407_v38 = vshrl.u32 %v10030_v42, 4 }
 0x25a   : > { %v2525_v62 = vpop.f32.mrf.mxu0  ;;  %6535 = vmatprep.subr.mxu1 %v9598_v60 }
 0x25b   : > { %v10063_v3 = vadd.f32 %v9837_v36, %v2524_v59  ;;  %v10065_v1 = vpop.f32.mrf.mxu1  ;;  %v3396_v62 = vshrl.u32 %v10039_v15, 4  ;;  %v3429_v36 = vshrl.u32 %v10046_v40, 4  ;;  %v3418_v15 = vshrl.u32 %v10056_v37, 4 }
 0x25c   : > { %v2528_v41 = vpop.f32.mrf.mxu0  ;;  %v10076_v59 = vmul.u32.u64.low 2863311531, %v10060_v52  ;;  %v10077_v6 = vmul.u32.u64.high 2863311531, %v10060_v52, %v10076_v59 }
 0x25d   : > { %13259 = vst [vmem:[#allocation35_spill] sm:$0xff] %v10063_v3  ;;  %v2529_v13 = vadd.f32 %v2528_v41, %v9387_v54  ;;  %v2890_v25 = vpop.f32.mrf.mxu1  ;;  %v10080_v3 = vadd.s32 32, %v9990_v10  ;;  %v10086_v54 = vadd.s32 56, %v9990_v10  ;;  %v3397_v40 = vmul.u32 24, %v3396_v62 }
 0x25e   : > { %v2530_v18 = vpop.f32.mrf.mxu0  ;;  %v3408_v25 = vmul.u32 24, %v3407_v38  ;;  %v3430_v7 = vmul.u32 24, %v3429_v36  ;;  %v10109_v36 = vadd.s32 72, %v9990_v10 }
 0x25f   : > { %v10083_v49 = vadd.f32 %v9857_v17, %v2529_v13  ;;  %v5825_v18 = vld [vmem:[%s13093_s3 + $0x258] sm:$0xff]  ;;  %v10094_v51 = vmul.u32.u64.low 2863311531, %v10080_v3  ;;  %v10095_v17 = vmul.u32.u64.high 2863311531, %v10080_v3, %v10094_v51  ;;  %v3419_v62 = vmul.u32 24, %v3418_v15 }
 0x260   : > { %v2533_v42 = vpop.f32.mrf.mxu0  ;;  %6536 = vmatpush1.msra.mxu1 %v5825_v18  ;;  %v3451_v18 = vshrl.u32 %v10077_v6, 4 }
 0x261   : > { %13260 = vst [vmem:[#allocation36_spill] sm:$0xff] %v10083_v49  ;;  %v2534_v41 = vadd.f32 %v2533_v42, %v9392_v24  ;;  %v10101_v37 = vmul.u32.u64.low 2863311531, %v10086_v54  ;;  %v10102_v49 = vmul.u32.u64.high 2863311531, %v10086_v54, %v10101_v37  ;;  %v10105_v24 = vadd.s32 48, %v9990_v10  ;;  %6537 = vmatprep.subr.mxu1 %v9598_v60 }
 0x262   : > { %v2535_v59 = vpop.f32.mrf.mxu0  ;;  %v10113_v42 = vsub.s32 %v10011_v5, %v3408_v25  ;;  %v10123_v37 = vsub.s32 %v10019_v16, %v3430_v7  ;;  %v10133_v25 = vsub.s32 %v10033_v39, %v3419_v62  ;;  %v3452_v16 = vmul.u32 24, %v3451_v18 }
 0x263   : > { %v10098_v13 = vadd.f32 %v9877_v61, %v2534_v41  ;;  %v10116_v61 = vsub.s32 %v9990_v10, %v3397_v40  ;;  %v10136_v6 = vmul.u32.u64.low 2863311531, %v10109_v36  ;;  %v10137_v40 = vmul.u32.u64.high 2863311531, %v10109_v36, %v10136_v6 }
 0x264   : > { %v2538_v38 = vpop.f32.mrf.mxu0  ;;  %13263 = vst [vmem:[#allocation39_spill] sm:$0xff] %v10133_v25  ;;  %vm3919_vm0 = vcmp.ne.s32.totalorder %v10113_v42, 0  ;;  %vm3967_vm1 = vcmp.lt.s32.totalorder %v10113_v42, 0  ;;  %v3440_v39 = vshrl.u32 %v10095_v17, 4  ;;  %vm3921_vm4 = vcmp.ne.s32.totalorder %v10123_v37, 0 }
 0x265   : > { %13261 = vst [vmem:[#allocation37_spill] sm:$0xff] %v10098_v13  ;;  %v2539_v51 = vadd.f32 %v2538_v38, %v9397_v14  ;;  %v10126_v15 = vmul.u32.u64.low 2863311531, %v10105_v24  ;;  %v10127_v13 = vmul.u32.u64.high 2863311531, %v10105_v24, %v10126_v15  ;;  %v5824_v14 = vld [vmem:[%s13093_s3 + $0x250] sm:$0xff]  ;;  %vm3918_vm2 = vcmp.ne.s32.totalorder %v10116_v61, 0  ;;  %vm10157_vm6 = vmand %vm3967_vm1, %vm3919_vm0 }
 0x266   : > { %v2540_v41 = vpop.f32.mrf.mxu0  ;;  %6538 = vmatpush1.msra.mxu1 %v5824_v14  ;;  %vm3966_vm3 = vcmp.lt.s32.totalorder %v10116_v61, 0  ;;  %v10147_v38 = vadd.s32 64, %v9990_v10  ;;  %vm3969_vm5 = vcmp.lt.s32.totalorder %v10123_v37, 0  ;;  %v10162_v17 = vadd.s32 24, %v10113_v42 }
 0x267   : > { %v10120_v59 = vadd.f32 %v9895_v33, %v2539_v51  ;;  %6539 = vmatprep.subr.mxu1 %v9598_v60  ;;  %vm3920_vm7 = vcmp.ne.s32.totalorder %v10133_v25, 0  ;;  %vm3968_vm8 = vcmp.lt.s32.totalorder %v10133_v25, 0  ;;  %vm10171_vm9 = vmand %vm3966_vm3, %vm3918_vm2  ;;  %v10176_v41 = vadd.s32 24, %v10116_v61 }
 0x268   : > { %v2543_v5 = vpop.f32.mrf.mxu0  ;;  %v10179_v18 = vadd.s32 24, %v10123_v37  ;;  %v10182_v15 = vadd.s32 24, %v10133_v25  ;;  %vm10191_vm10 = vmand %vm3969_vm5, %vm3921_vm4  ;;  %v10196_v6 = vsub.s32 %v10060_v52, %v3452_v16  ;;  %v3462_v52 = vshrl.u32 %v10127_v13, 4  ;;  %v10214_v16 = vld [vmem:[#allocation3] sm:$0xff] }
 0x269   : > { %13262 = vst [vmem:[#allocation38_spill] sm:$0xff] %v10120_v59  ;;  %v2544_v33 = vadd.f32 %v2543_v5, %v9402_v21  ;;  %v3473_v21 = vshrl.u32 %v10102_v49, 4  ;;  %vm10209_vm11 = vmand %vm3968_vm8, %vm3920_vm7  ;;  %v11125_v49 = vadd.s32 312, %v9990_v10 }
 0x26a   : > { %v2545_v7 = vpop.f32.mrf.mxu0  ;;  %13271 = vst [vmem:[#allocation41_spill] sm:$0xff] %v10196_v6  ;;  %vm3923_vm12 = vcmp.ne.s32.totalorder %v10196_v6, 0  ;;  %vm3971_vm13 = vcmp.lt.s32.totalorder %v10196_v6, 0 }
 0x26b   : > { %v10150_v62 = vadd.f32 %v9915_v48, %v2544_v33  ;;  %v3441_v33 = vmul.u32 24, %v3440_v39  ;;  %vm10330_vm2 = vmand %vm3971_vm13, %vm3923_vm12 }
 0x26c   : > { %v2548_v51 = vpop.f32.mrf.mxu0 }
 0x26d   : > { %13264 = vst [vmem:[#allocation40_spill] sm:$0xff] %v10150_v62  ;;  %v2549_v48 = vadd.f32 %v2548_v51, %v9407_v32  ;;  %v5823_v32 = vld [vmem:[%s13093_s3 + $0x248] sm:$0xff]  ;;  %v10199_v7 = vmul.u32.u64.low 2863311531, %v10147_v38  ;;  %v10200_v51 = vmul.u32.u64.high 2863311531, %v10147_v38, %v10199_v7  ;;  %v3474_v62 = vmul.u32 24, %v3473_v21 }
 0x26e   : > { %v2550_v14 = vpop.f32.mrf.mxu0  ;;  %6540 = vmatpush1.msra.mxu1 %v5823_v32  ;;  %v3495_v32 = vshrl.u32 %v10137_v40, 4  ;;  %v10231_v21 = vadd.s32 80, %v9990_v10  ;;  %v3463_v7 = vmul.u32 24, %v3462_v52  ;;  %v5822_v40 = vld [vmem:[%s13093_s3 + $0x240] sm:$0xff] }
 0x26f   : > { %v10203_v59 = vadd.f32 %v9932_v31, %v2549_v48  ;;  %6541 = vmatprep.subr.mxu1 %v10214_v16  ;;  %v10219_v31 = vadd.s32 88, %v9990_v10 }
 0x270   : > { %v2553_v39 = vpop.f32.mrf.mxu0  ;;  %6542 = vmatpush1.msra.mxu1 %v5822_v40 }
 0x271   : > { %13272 = vst [vmem:[#allocation42_spill] sm:$0xff] %v10203_v59  ;;  %v2554_v48 = vadd.f32 %v2553_v39, %v9415_v47  ;;  %v10243_v39 = vsub.s32 %v10080_v3, %v3441_v33  ;;  %v3496_v47 = vmul.u32 24, %v3495_v32  ;;  %v10260_v3 = vadd.s32 104, %v9990_v10  ;;  %6543 = vmatprep.subr.mxu1 %v10214_v16 }
 0x272   : > { %v2555_v59 = vpop.f32.mrf.mxu0  ;;  %v10256_v23 = vmul.u32.u64.low 2863311531, %v10219_v31  ;;  %v10257_v8 = vmul.u32.u64.high 2863311531, %v10219_v31, %v10256_v23  ;;  %v10268_v33 = vadd.s32 96, %v9990_v10  ;;  %v10272_v32 = vadd.s32 24, %v10196_v6 }
 0x273   : > { %13275 = vst [vmem:[#allocation43_spill] sm:$0xff] %v10243_v39  ;;  %v10246_v13 = vadd.f32 %v9948_v2, %v2554_v48  ;;  %v10250_v59 = vsub.s32 %v10086_v54, %v3474_v62  ;;  %v10264_v54 = vmul.u32.u64.low 2863311531, %v10231_v21  ;;  %v10265_v62 = vmul.u32.u64.high 2863311531, %v10231_v21, %v10264_v54 }
 0x274   : > { %v2558_v11 = vpop.f32.mrf.mxu0  ;;  %13278 = vst [vmem:[#allocation46_spill] sm:$0xff] %v10272_v32  ;;  %vm3922_vm14 = vcmp.ne.s32.totalorder %v10243_v39, 0  ;;  %v3484_v23 = vshrl.u32 %v10200_v51, 4  ;;  %v10277_v48 = vadd.s32 120, %v9990_v10  ;;  %vm3970_vm15 = vcmp.lt.s32.totalorder %v10243_v39, 0 }
 0x275   : > { %13276 = vst [vmem:[#allocation44_spill] sm:$0xff] %v10246_v13  ;;  %13277 = vst [vmem:[#allocation45_spill] sm:$0xff] %v10250_v59  ;;  %v2559_v2 = vadd.f32 %v2558_v11, %v9421_v28  ;;  %v10284_v11 = vadd.s32 24, %v10243_v39  ;;  %vm3925_vm0 = vcmp.ne.s32.totalorder %v10250_v59, 0  ;;  %v10288_v54 = vsub.s32 %v10105_v24, %v3463_v7  ;;  %v5821_v24 = vld [vmem:[%s13093_s3 + $0x238] sm:$0xff] }
 0x276   : > { %v2560_v52 = vpop.f32.mrf.mxu0  ;;  %v10295_v13 = vadd.s32 112, %v9990_v10  ;;  %v3485_v9 = vmul.u32 24, %v3484_v23  ;;  %6544 = vmatpush1.msra.mxu1 %v5821_v24  ;;  %vm3973_vm1 = vcmp.lt.s32.totalorder %v10250_v59, 0  ;;  %vm10345_vm4 = vmand %vm3970_vm15, %vm3922_vm14  ;;  %v13359_v32 = vmov 0 }
 0x277   : > { %v10280_v28 = vadd.f32 %v9966_v20, %v2559_v2  ;;  %13280 = vst [vmem:[#allocation48_spill] sm:$0xff] %v10284_v11  ;;  %13281 = vst [vmem:[#allocation49_spill] sm:$0xff] %v10288_v54  ;;  %v10291_v52 = vmul.u32.u64.low 2863311531, %v10260_v3  ;;  %v10292_v51 = vmul.u32.u64.high 2863311531, %v10260_v3, %v10291_v52  ;;  %v10299_v2 = vsub.s32 %v10109_v36, %v3496_v47  ;;  %6545 = vmatprep.subr.mxu1 %v10214_v16 }
 0x278   : > { %v2563_v40 = vpop.f32.mrf.mxu0  ;;  %v10309_v52 = vmul.u32.u64.low 2863311531, %v10277_v48  ;;  %v10310_v34 = vmul.u32.u64.high 2863311531, %v10277_v48, %v10309_v52  ;;  %v10320_v36 = vadd.s32 24, %v10250_v59  ;;  %v10323_v47 = vadd.s32 128, %v9990_v10  ;;  %vm10369_vm8 = vmand %vm3973_vm1, %vm3925_vm0 }
 0x279   : > { %13279 = vst [vmem:[#allocation47_spill] sm:$0xff] %v10280_v28  ;;  %v2564_v20 = vadd.f32 %v2563_v40, %v9430_v56  ;;  %13282 = vst [vmem:[#allocation50_spill] sm:$0xff] %v10299_v2  ;;  %v10302_v28 = vmul.u32.u64.low 2863311531, %v10268_v33  ;;  %v10303_v0 = vmul.u32.u64.high 2863311531, %v10268_v33, %v10302_v28  ;;  %vm3924_vm3 = vcmp.ne.s32.totalorder %v10288_v54, 0 }
 0x27a   : > { %v2565_v7 = vpop.f32.mrf.mxu0  ;;  %13284 = vst [vmem:[#allocation52_spill] sm:$0xff] %v10320_v36  ;;  %v13285_v28 = vmov 0  ;;  %vm3972_vm5 = vcmp.lt.s32.totalorder %v10288_v54, 0  ;;  %v10351_v52 = vadd.s32 24, %v10288_v54  ;;  %vm3927_vm7 = vcmp.ne.s32.totalorder %v10299_v2, 0 }
 0x27b   : > { %v10316_v56 = vadd.f32 %v9985_v55, %v2564_v20  ;;  %v13286_v28 = vsel %vm10330_vm2, 4294967295, %v13285_v28  ;;  %v3517_v55 = vshrl.u32 %v10257_v8, 4  ;;  %v13288_v7 = vmov 0  ;;  %vm10393_vm13 = vmand %vm3972_vm5, %vm3924_vm3 }
 0x27c   : > { %v2568_v23 = vpop.f32.mrf.mxu0  ;;  %13287 = vst [vmem:[#allocation53_spill] sm:$0xff] %v13286_v28  ;;  %v10337_v40 = vmul.u32.u64.low 2863311531, %v10295_v13  ;;  %v10338_v20 = vmul.u32.u64.high 2863311531, %v10295_v13, %v10337_v40  ;;  %v13289_v7 = vsel %vm10345_vm4, 4294967295, %v13288_v7  ;;  %13291 = vst [vmem:[#allocation55_spill] sm:$0xff] %v10351_v52  ;;  %v3506_v8 = vshrl.u32 %v10265_v62, 4 }
 0x27d   : > { %13283 = vst [vmem:[#allocation51_spill] sm:$0xff] %v10316_v56  ;;  %v2569_v24 = vadd.f32 %v2568_v23, %v9439_v57  ;;  %13290 = vst [vmem:[#allocation54_spill] sm:$0xff] %v13289_v7  ;;  %v10356_v57 = vsub.s32 %v10147_v38, %v3485_v9  ;;  %v10359_v23 = vmul.u32.u64.low 2863311531, %v10313_v58  ;;  %v10360_v40 = vmul.u32.u64.high 2863311531, %v10313_v58, %v10359_v23  ;;  %v5820_v62 = vld [vmem:[%s13093_s3 + $0x230] sm:$0xff] }
 0x27e   : > { %v2570_v56 = vpop.f32.mrf.mxu0  ;;  %v13295_v46 = vsel %vm10369_vm8, 4294967295, %v13294_v46  ;;  %vm3975_vm12 = vcmp.lt.s32.totalorder %v10299_v2, 0  ;;  %v10375_v9 = vmul.u32.u64.low 2863311531, %v10323_v47  ;;  %v10376_v38 = vmul.u32.u64.high 2863311531, %v10323_v47, %v10375_v9  ;;  %6546 = vmatpush1.msra.mxu1 %v5820_v62 }
 0x27f   : > { %13292 = vst [vmem:[#allocation56_spill] sm:$0xff] %v10356_v57  ;;  %v10363_v45 = vadd.f32 %v10001_v26, %v2569_v24  ;;  %13296 = vst [vmem:[#allocation58_spill] sm:$0xff] %v13295_v46  ;;  %v13297_v23 = vmov 0  ;;  %v3518_v9 = vmul.u32 24, %v3517_v55  ;;  %v10400_v56 = vadd.s32 24, %v10299_v2  ;;  %6547 = vmatprep.subr.mxu1 %v10214_v16 }
 0x280   : > { %v2573_v26 = vpop.f32.mrf.mxu0  ;;  %v13298_v23 = vsel %vm10393_vm13, 4294967295, %v13297_v23  ;;  %v3507_v43 = vmul.u32 24, %v3506_v8  ;;  %v3528_v24 = vshrl.u32 %v10303_v0, 4  ;;  %vm10408_vm14 = vmand %vm3975_vm12, %vm3927_vm7  ;;  %v13301_v55 = vmov 0 }
 0x281   : > { %13293 = vst [vmem:[#allocation57_spill] sm:$0xff] %v10363_v45  ;;  %13299 = vst [vmem:[#allocation59_spill] sm:$0xff] %v13298_v23  ;;  %v3539_v45 = vshrl.u32 %v10292_v51, 4  ;;  %v2574_v19 = vadd.f32 %v2573_v26, %v9448_v4  ;;  %v13302_v55 = vsel %vm10408_vm14, 4294967295, %v13301_v55  ;;  %vm3926_vm15 = vcmp.ne.s32.totalorder %v10356_v57, 0 }
 0x282   : > { %13300 = vst [vmem:[#allocation60_spill] sm:$0xff] %v10400_v56  ;;  %v2575_v53 = vpop.f32.mrf.mxu0  ;;  %13303 = vst [vmem:[#allocation61_spill] sm:$0xff] %v13302_v55  ;;  %vm3974_vm0 = vcmp.lt.s32.totalorder %v10356_v57, 0  ;;  %v3561_v4 = vshrl.u32 %v10310_v34, 4  ;;  %v10416_v51 = vadd.s32 152, %v9990_v10  ;;  %v10430_v62 = vadd.s32 144, %v9990_v10 }
 0x283   : > { %v10419_v0 = vadd.f32 %v10025_v27, %v2574_v19  ;;  %v10433_v26 = vadd.s32 24, %v10356_v57  ;;  %v10436_v19 = vsub.s32 %v10219_v31, %v3518_v9  ;;  %v3540_v27 = vmul.u32 24, %v3539_v45  ;;  %vm10448_vm1 = vmand %vm3974_vm0, %vm3926_vm15  ;;  %v5817_v57 = vld [vmem:[%s13093_s3 + $0x218] sm:$0xff] }
 0x284   : > { %v2578_v34 = vpop.f32.mrf.mxu0  ;;  %v13308_v12 = vsel %vm10448_vm1, 4294967295, %v13307_v12  ;;  %v10453_v31 = vsub.s32 %v10231_v21, %v3507_v43  ;;  %v3529_v45 = vmul.u32 24, %v3528_v24  ;;  %v3562_v9 = vmul.u32 24, %v3561_v4 }
 0x285   : > { %13304 = vst [vmem:[#allocation62_spill] sm:$0xff] %v10419_v0  ;;  %13305 = vst [vmem:[#allocation63_spill] sm:$0xff] %v10433_v26  ;;  %v3550_v0 = vshrl.u32 %v10338_v20, 4  ;;  %v2579_v53 = vadd.f32 %v2578_v34, %v9457_v35  ;;  %v5819_v35 = vld [vmem:[%s13093_s3 + $0x228] sm:$0xff]  ;;  %v3583_v34 = vshrl.u32 %v10360_v40, 4  ;;  %v3572_v43 = vshrl.u32 %v10376_v38, 4 }
 0x286   : > { %13306 = vst [vmem:[#allocation64_spill] sm:$0xff] %v10436_v19  ;;  %13309 = vst [vmem:[#allocation65_spill] sm:$0xff] %v13308_v12  ;;  %v2580_v20 = vpop.f32.mrf.mxu0  ;;  %v10460_v8 = vmul.u32.u64.low 2863311531, %v10416_v51  ;;  %v10461_v2 = vmul.u32.u64.high 2863311531, %v10416_v51, %v10460_v8  ;;  %6548 = vmatpush1.msra.mxu1 %v5819_v35  ;;  %v10468_v21 = vmul.u32.u64.low 2863311531, %v10430_v62  ;;  %v10469_v24 = vmul.u32.u64.high 2863311531, %v10430_v62, %v10468_v21 }
 0x287   : > { %13310 = vst [vmem:[#allocation66_spill] sm:$0xff] %v10453_v31  ;;  %v10464_v56 = vadd.f32 %v10051_v22, %v2579_v53  ;;  %6549 = vmatprep.subr.mxu1 %v10214_v16  ;;  %vm3929_vm3 = vcmp.ne.s32.totalorder %v10436_v19, 0  ;;  %v10478_v4 = vsub.s32 %v10260_v3, %v3540_v27  ;;  %v3551_v22 = vmul.u32 24, %v3550_v0 }
 0x288   : > { %v2583_v20 = vpop.f32.mrf.mxu0  ;;  %vm3977_vm5 = vcmp.lt.s32.totalorder %v10436_v19, 0  ;;  %v10483_v53 = vadd.s32 24, %v10436_v19  ;;  %v10486_v8 = vsub.s32 %v10268_v33, %v3529_v45  ;;  %v10491_v21 = vsub.s32 %v10277_v48, %v3562_v9  ;;  %v5818_v33 = vld [vmem:[%s13093_s3 + $0x220] sm:$0xff] }
 0x289   : > { %13311 = vst [vmem:[#allocation67_spill] sm:$0xff] %v10464_v56  ;;  %13312 = vst [vmem:[#allocation68_spill] sm:$0xff] %v10478_v4  ;;  %v2584_v38 = vadd.f32 %v2583_v20, %v9469_v29  ;;  %v3584_v3 = vmul.u32 24, %v3583_v34  ;;  %v10497_v29 = vadd.s32 24, %v10453_v31  ;;  %v3573_v27 = vmul.u32 24, %v3572_v43  ;;  %6550 = vmatpush1.msra.mxu1 %v5818_v33 }
 0x28a   : > { %13313 = vst [vmem:[#allocation69_spill] sm:$0xff] %v10486_v8  ;;  %v2585_v35 = vpop.f32.mrf.mxu0  ;;  %13314 = vst [vmem:[#allocation70_spill] sm:$0xff] %v10491_v21  ;;  %v10500_v20 = vadd.s32 168, %v9990_v10  ;;  %v10513_v48 = vsub.s32 %v10295_v13, %v3551_v22  ;;  %v10518_v9 = vadd.s32 160, %v9990_v10  ;;  %v10521_v34 = vadd.s32 184, %v9990_v10  ;;  %6551 = vmatprep.subr.mxu1 %v10214_v16 }
 0x28b   : > { %v10494_v0 = vadd.f32 %v10065_v1, %v2584_v38  ;;  %13316 = vst [vmem:[#allocation72_spill] sm:$0xff] %v10497_v29  ;;  %v10510_v1 = vadd.s32 24, %v10478_v4  ;;  %v10527_v13 = vsub.s32 %v10313_v58, %v3584_v3  ;;  %v3605_v22 = vshrl.u32 %v10461_v2, 4  ;;  %vm10534_vm7 = vmand %vm3977_vm5, %vm3929_vm3  ;;  %6552 = vmatpush1.msra.mxu1 %v5817_v57 }
 0x28c   : > { %v10505_v45 = vpop.f32.mrf.mxu0  ;;  %13318 = vst [vmem:[#allocation74_spill] sm:$0xff] %v10513_v48  ;;  %v10539_v35 = vsub.s32 %v10323_v47, %v3573_v27  ;;  %v3594_v33 = vshrl.u32 %v10469_v24, 4  ;;  %vm13323_vm15 = vcmp.ne.s32.totalorder %v10453_v31, 0  ;;  %vm13324_vm0 = vcmp.lt.s32.totalorder %v10453_v31, 0  ;;  %6553 = vmatprep.subr.mxu1 %v10214_v16 }
 0x28d   : > { %13315 = vst [vmem:[#allocation71_spill] sm:$0xff] %v10494_v0  ;;  %13317 = vst [vmem:[#allocation73_spill] sm:$0xff] %v10510_v1  ;;  %v10559_v47 = vadd.s32 176, %v9990_v10  ;;  %v10562_v24 = vadd.s32 200, %v9990_v10  ;;  %vm13327_vm1 = vcmp.ne.s32.totalorder %v10478_v4, 0  ;;  %vm13328_vm14 = vcmp.lt.s32.totalorder %v10478_v4, 0 }
 0x28e   : > { %v2655_v43 = vpop.f32.mrf.mxu0  ;;  %13319 = vst [vmem:[#allocation75_spill] sm:$0xff] %v10527_v13  ;;  %13322 = vst [vmem:[#allocation76_spill] sm:$0xff] %v10539_v35  ;;  %v13329_v3 = vmov 0  ;;  %v10577_v56 = vmul.u32.u64.low 2863311531, %v10521_v34  ;;  %v10578_v0 = vmul.u32.u64.high 2863311531, %v10521_v34, %v10577_v56  ;;  %v13334_v12 = vmov 0 }
 0x28f   : > { %v10543_v43 = vmul.u32.u64.low 2863311531, %v10500_v20  ;;  %v10544_v40 = vmul.u32.u64.high 2863311531, %v10500_v20, %v10543_v43  ;;  %vm10552_vm12 = vmand %vm13324_vm0, %vm13323_vm15  ;;  %vm13332_vm15 = vcmp.ne.s32.totalorder %v10486_v8, 0  ;;  %v10594_v56 = vadd.s32 192, %v9990_v10  ;;  %v5814_v1 = vld [vmem:[%s13093_s3 + $0x200] sm:$0xff] }
 0x290   : > { %v10546_v58 = vpop.f32.mrf.mxu0  ;;  %vm10568_vm13 = vmand %vm13328_vm14, %vm13327_vm1  ;;  %v10573_v27 = vmul.u32.u64.low 2863311531, %v10518_v9  ;;  %v10574_v43 = vmul.u32.u64.high 2863311531, %v10518_v9, %v10573_v27  ;;  %vm13333_vm14 = vcmp.lt.s32.totalorder %v10486_v8, 0  ;;  %v10597_v55 = vadd.s32 24, %v10486_v8 }
 0x291   : > { %v13330_v3 = vsel %vm10568_vm13, 4294967295, %v13329_v3  ;;  %vm10587_vm1 = vmand %vm13333_vm14, %vm13332_vm15  ;;  %v3606_v27 = vmul.u32 24, %v3605_v22  ;;  %vm13338_vm3 = vcmp.ne.s32.totalorder %v10491_v21, 0  ;;  %vm13339_vm8 = vcmp.lt.s32.totalorder %v10491_v21, 0 }
 0x292   : > { %13331 = vst [vmem:[#allocation77_spill] sm:$0xff] %v13330_v3  ;;  %v2660_v26 = vpop.f32.mrf.mxu0  ;;  %v13335_v12 = vsel %vm10587_vm1, 4294967295, %v13334_v12  ;;  %13337 = vst [vmem:[#allocation79_spill] sm:$0xff] %v10597_v55  ;;  %v3595_v22 = vmul.u32 24, %v3594_v33  ;;  %v10613_v57 = vadd.s32 24, %v10491_v21  ;;  %vm13344_vm0 = vcmp.ne.s32.totalorder %v10513_v48, 0 }
 0x293   : > { %13336 = vst [vmem:[#allocation78_spill] sm:$0xff] %v13335_v12  ;;  %vm10603_vm15 = vmand %vm13339_vm8, %vm13338_vm3  ;;  %v13340_v26 = vmov 0  ;;  %vm13345_vm4 = vcmp.lt.s32.totalorder %v10513_v48, 0  ;;  %v13346_v52 = vmov 0  ;;  %v10624_v23 = vadd.s32 24, %v10513_v48  ;;  %v5815_v48 = vld [vmem:[%s13093_s3 + $0x208] sm:$0xff] }
 0x294   : > { %v13341_v26 = vsel %vm10603_vm15, 4294967295, %v13340_v26  ;;  %v10610_v54 = vpop.f32.mrf.mxu0  ;;  %13343 = vst [vmem:[#allocation81_spill] sm:$0xff] %v10613_v57  ;;  %vm10619_vm8 = vmand %vm13345_vm4, %vm13344_vm0  ;;  %v10627_v33 = vmul.u32.u64.low 2863311531, %v10559_v47  ;;  %v10628_v59 = vmul.u32.u64.high 2863311531, %v10559_v47, %v10627_v33  ;;  %vm13350_vm3 = vcmp.ne.s32.totalorder %v10527_v13, 0 }
 0x295   : > { %13342 = vst [vmem:[#allocation80_spill] sm:$0xff] %v13341_v26  ;;  %v13347_v52 = vsel %vm10619_vm8, 4294967295, %v13346_v52  ;;  %13349 = vst [vmem:[#allocation83_spill] sm:$0xff] %v10624_v23  ;;  %vm13351_vm5 = vcmp.lt.s32.totalorder %v10527_v13, 0  ;;  %v13352_v36 = vmov 0  ;;  %v10639_v46 = vadd.s32 24, %v10527_v13 }
 0x296   : > { %13348 = vst [vmem:[#allocation82_spill] sm:$0xff] %v13347_v52  ;;  %vm10634_vm14 = vmand %vm13351_vm5, %vm13350_vm3  ;;  %v10642_v39 = vadd.s32 24, %v10539_v35  ;;  %v10645_v11 = vmul.u32.u64.low 2863311531, %v10562_v24  ;;  %v10646_v7 = vmul.u32.u64.high 2863311531, %v10562_v24, %v10645_v11  ;;  %v2665_v6 = vpop.f32.mrf.mxu0  ;;  %vm13357_vm4 = vcmp.ne.s32.totalorder %v10539_v35, 0 }
 0x297   : > { %v13353_v36 = vsel %vm10634_vm14, 4294967295, %v13352_v36  ;;  %13355 = vst [vmem:[#allocation85_spill] sm:$0xff] %v10639_v46  ;;  %vm13358_vm5 = vcmp.lt.s32.totalorder %v10539_v35, 0  ;;  %v10661_v28 = vsub.s32 %v10416_v51, %v3606_v27  ;;  %v10676_v19 = vsub.s32 %v10430_v62, %v3595_v22  ;;  %v5816_v27 = vld [vmem:[%s13093_s3 + $0x210] sm:$0xff] }
 0x298   : > { %13354 = vst [vmem:[#allocation84_spill] sm:$0xff] %v13353_v36  ;;  %13356 = vst [vmem:[#allocation86_spill] sm:$0xff] %v10642_v39  ;;  %v10664_v25 = vmul.u32.u64.low 2863311531, %v10594_v56  ;;  %v10665_v11 = vmul.u32.u64.high 2863311531, %v10594_v56, %v10664_v25  ;;  %v3627_v51 = vshrl.u32 %v10544_v40, 4  ;;  %v10697_v40 = vadd.s32 216, %v9990_v10  ;;  %6554 = vmatpush1.msra.mxu1 %v5816_v27 }
 0x299   : > { %vm10656_vm0 = vmand %vm13358_vm5, %vm13357_vm4  ;;  %13362 = vst [vmem:[#allocation88_spill] sm:$0xff] %v10661_v28  ;;  %v10682_v25 = vpop.f32.mrf.mxu0  ;;  %v3616_v33 = vshrl.u32 %v10574_v43, 4  ;;  %v3649_v21 = vshrl.u32 %v10578_v0, 4  ;;  %6555 = vmatprep.subr.mxu1 %v10214_v16  ;;  %vm3937_vm3 = vcmp.ne.s32.totalorder %v10661_v28, 0  ;;  %vm3985_vm4 = vcmp.lt.s32.totalorder %v10661_v28, 0 }
 0x29a   : > { %v13360_v32 = vsel %vm10656_vm0, 4294967295, %v13359_v32  ;;  %13363 = vst [vmem:[#allocation89_spill] sm:$0xff] %v10676_v19  ;;  %v10713_v27 = vadd.s32 24, %v10661_v28  ;;  %v10716_v22 = vadd.s32 208, %v9990_v10  ;;  %vm3936_vm5 = vcmp.ne.s32.totalorder %v10676_v19, 0  ;;  %6556 = vmatpush1.msra.mxu1 %v5815_v48  ;;  %vm10752_vm0 = vmand %vm3985_vm4, %vm3937_vm3 }
 0x29b   : > { %13361 = vst [vmem:[#allocation87_spill] sm:$0xff] %v13360_v32  ;;  %v2670_v62 = vpop.f32.mrf.mxu0  ;;  %v3628_v43 = vmul.u32 24, %v3627_v51  ;;  %v10721_v0 = vadd.s32 232, %v9990_v10  ;;  %v10727_v35 = vmul.u32.u64.low 2863311531, %v10697_v40  ;;  %v10728_v39 = vmul.u32.u64.high 2863311531, %v10697_v40, %v10727_v35  ;;  %6557 = vmatprep.subr.mxu1 %v10214_v16 }
 0x29c   : > { %13364 = vst [vmem:[#allocation90_spill] sm:$0xff] %v10713_v27  ;;  %v3638_v62 = vshrl.u32 %v10628_v59, 4  ;;  %v10731_v32 = vadd.s32 224, %v9990_v10  ;;  %v3617_v13 = vmul.u32 24, %v3616_v33  ;;  %v3650_v46 = vmul.u32 24, %v3649_v21  ;;  %6558 = vmatpush1.msra.mxu1 %v5814_v1 }
 0x29d   : > { %v10723_v6 = vpop.f32.mrf.mxu0  ;;  %v3671_v36 = vshrl.u32 %v10646_v7, 4  ;;  %v10735_v51 = vadd.s32 248, %v9990_v10  ;;  %v3660_v59 = vshrl.u32 %v10665_v11, 4  ;;  %v10746_v57 = vadd.s32 240, %v9990_v10  ;;  %6559 = vmatprep.subr.mxu1 %v10214_v16 }
 0x29e   : > { %v10742_v52 = vmul.u32.u64.low 2863311531, %v10716_v22  ;;  %v10743_v35 = vmul.u32.u64.high 2863311531, %v10716_v22, %v10742_v52  ;;  %v13365_v7 = vmov 0  ;;  %v10760_v21 = vsub.s32 %v10500_v20, %v3628_v43 }
 0x29f   : > { %v2675_v23 = vpop.f32.mrf.mxu0  ;;  %v13366_v7 = vsel %vm10752_vm0, 4294967295, %v13365_v7  ;;  %v10763_v52 = vmul.u32.u64.low 2863311531, %v10721_v0  ;;  %v10764_v33 = vmul.u32.u64.high 2863311531, %v10721_v0, %v10763_v52  ;;  %vm13370_vm3 = vcmp.lt.s32.totalorder %v10676_v19, 0 }
 0x2a0   : > { %13367 = vst [vmem:[#allocation91_spill] sm:$0xff] %v13366_v7  ;;  %v10757_v23 = vadd.s32 24, %v10676_v19  ;;  %13369 = vst [vmem:[#allocation93_spill] sm:$0xff] %v10760_v21  ;;  %v13371_v11 = vmov 0  ;;  %v3639_v26 = vmul.u32 24, %v3638_v62  ;;  %v10782_v8 = vadd.s32 264, %v9990_v10 }
 0x2a1   : > { %v10767_v48 = vpop.f32.mrf.mxu0  ;;  %vm10773_vm4 = vmand %vm13370_vm3, %vm3936_vm5  ;;  %v10778_v20 = vmul.u32.u64.low 2863311531, %v10731_v32  ;;  %v10779_v43 = vmul.u32.u64.high 2863311531, %v10731_v32, %v10778_v20  ;;  %v10785_v52 = vsub.s32 %v10518_v9, %v3617_v13  ;;  %v3672_v55 = vmul.u32 24, %v3671_v36 }
 0x2a2   : > { %13368 = vst [vmem:[#allocation92_spill] sm:$0xff] %v10757_v23  ;;  %v13372_v11 = vsel %vm10773_vm4, 4294967295, %v13371_v11  ;;  %v10788_v12 = vmul.u32.u64.low 2863311531, %v10735_v51  ;;  %v10789_v4 = vmul.u32.u64.high 2863311531, %v10735_v51, %v10788_v12  ;;  %v10795_v3 = vsub.s32 %v10521_v34, %v3650_v46  ;;  %v5845_v46 = vld [vmem:[%s13093_s3 + $0x2f8] sm:$0xff] }
 0x2a3   : > { %13373 = vst [vmem:[#allocation94_spill] sm:$0xff] %v13372_v11  ;;  %13374 = vst [vmem:[#allocation95_spill] sm:$0xff] %v10785_v52  ;;  %v2680_v62 = vpop.f32.mrf.mxu0  ;;  %v3661_v20 = vmul.u32 24, %v3660_v59  ;;  %v10798_v31 = vmul.u32.u64.low 2863311531, %v10746_v57  ;;  %v10799_v29 = vmul.u32.u64.high 2863311531, %v10746_v57, %v10798_v31  ;;  %v10818_v1 = vsub.s32 %v10559_v47, %v3639_v26  ;;  %6560 = vmatpush2.msra.mxu1 %v5845_v46 }
 0x2a4   : > { %v3693_v9 = vshrl.u32 %v10728_v39, 4  ;;  %v10822_v34 = vmul.u32.u64.low 2863311531, %v10782_v8  ;;  %v10823_v13 = vmul.u32.u64.high 2863311531, %v10782_v8, %v10822_v34  ;;  %v10826_v59 = vadd.s32 24, %v10760_v21  ;;  %6561 = vmatprep.subr.mxu1 %v10214_v16 }
 0x2a5   : > { %v10815_v31 = vpop.f32.mrf.mxu0  ;;  %v10831_v62 = vsub.s32 %v10562_v24, %v3672_v55  ;;  %v10835_v39 = vadd.s32 24, %v10785_v52  ;;  %v10839_v26 = vsub.s32 %v10594_v56, %v3661_v20  ;;  %v3682_v46 = vshrl.u32 %v10743_v35, 4 }
 0x2a6   : > { %v10844_v34 = vadd.s32 24, %v10795_v3  ;;  %v3715_v55 = vshrl.u32 %v10764_v33, 4  ;;  %v10848_v24 = vadd.s32 256, %v9990_v10  ;;  %v3694_v56 = vmul.u32 24, %v3693_v9 }
 0x2a7   : > { %13375 = vst [vmem:[#allocation96_spill] sm:$0xff] %v10831_v62  ;;  %v2685_v47 = vpop.f32.mrf.mxu0  ;;  %13376 = vst [vmem:[#allocation97_spill] sm:$0xff] %v10835_v39  ;;  %v3704_v35 = vshrl.u32 %v10779_v43, 4  ;;  %vm13378_vm3 = vcmp.ne.s32.totalorder %v10760_v21, 0  ;;  %vm13379_vm0 = vcmp.lt.s32.totalorder %v10760_v21, 0  ;;  %v13380_v33 = vmov 0 }
 0x2a8   : > { %13377 = vst [vmem:[#allocation98_spill] sm:$0xff] %v10839_v26  ;;  %v5844_v47 = vld [vmem:[%s13093_s3 + $0x2f0] sm:$0xff]  ;;  %vm10862_vm14 = vmand %vm13379_vm0, %vm13378_vm3  ;;  %v10867_v20 = vadd.s32 24, %v10818_v1  ;;  %v3737_v36 = vshrl.u32 %v10789_v4, 4  ;;  %v10872_v9 = vadd.s32 280, %v9990_v10  ;;  %vm13383_vm5 = vcmp.ne.s32.totalorder %v10785_v52, 0 }
 0x2a9   : > { %v10853_v12 = vpop.f32.mrf.mxu0  ;;  %6562 = vmatpush2.msra.mxu1 %v5844_v47  ;;  %v13381_v33 = vsel %vm10862_vm14, 4294967295, %v13380_v33  ;;  %vm13384_vm0 = vcmp.lt.s32.totalorder %v10785_v52, 0  ;;  %v13385_v47 = vmov 0  ;;  %vm3991_vm4 = vcmp.lt.s32.totalorder %v10831_v62, 0 }
 0x2aa   : > { %13382 = vst [vmem:[#allocation99_spill] sm:$0xff] %v13381_v33  ;;  %6563 = vmatprep.subr.mxu1 %v10214_v16  ;;  %vm10879_vm3 = vmand %vm13384_vm0, %vm13383_vm5  ;;  %v3683_v19 = vmul.u32 24, %v3682_v46  ;;  %v3726_v4 = vshrl.u32 %v10799_v29, 4  ;;  %vm13388_vm15 = vcmp.ne.s32.totalorder %v10795_v3, 0  ;;  %vm13389_vm1 = vcmp.lt.s32.totalorder %v10795_v3, 0 }
 0x2ab   : > { %v2690_v43 = vpop.f32.mrf.mxu0  ;;  %v13386_v47 = vsel %vm10879_vm3, 4294967295, %v13385_v47  ;;  %vm10890_vm13 = vmand %vm13389_vm1, %vm13388_vm15  ;;  %v3716_v23 = vmul.u32 24, %v3715_v55  ;;  %v10896_v11 = vmul.u32.u64.low 2863311531, %v10848_v24  ;;  %v10897_v28 = vmul.u32.u64.high 2863311531, %v10848_v24, %v10896_v11 }
 0x2ac   : > { %13387 = vst [vmem:[#allocation100_spill] sm:$0xff] %v13386_v47  ;;  %v13390_v43 = vmov 0  ;;  %vm13392_vm0 = vcmp.ne.s32.totalorder %v10818_v1, 0  ;;  %vm13393_vm1 = vcmp.lt.s32.totalorder %v10818_v1, 0  ;;  %v13394_v46 = vmov 0 }
 0x2ad   : > { %v13391_v43 = vsel %vm10890_vm13, 4294967295, %v13390_v43  ;;  %v10899_v27 = vpop.f32.mrf.mxu0  ;;  %vm10909_vm15 = vmand %vm13393_vm1, %vm13392_vm0  ;;  %v10914_v55 = vsub.s32 %v10697_v40, %v3694_v56  ;;  %v3705_v7 = vmul.u32 24, %v3704_v35  ;;  %v3759_v11 = vshrl.u32 %v10823_v13, 4 }
 0x2ae   : > { %v13395_v46 = vsel %vm10909_vm15, 4294967295, %v13394_v46  ;;  %vm13397_vm5 = vcmp.ne.s32.totalorder %v10831_v62, 0  ;;  %v13398_v29 = vmov 0  ;;  %v10930_v21 = vadd.s32 24, %v10831_v62  ;;  %v13573_v62 = vld [vmem:[#allocation84_spill] sm:$0xff] }
 0x2af   : > { %13396 = vst [vmem:[#allocation101_spill] sm:$0xff] %v10914_v55  ;;  %vm10925_vm8 = vmand %vm3991_vm4, %vm13397_vm5  ;;  %v10933_v40 = vadd.s32 24, %v10839_v26  ;;  %v3738_v13 = vmul.u32 24, %v3737_v36  ;;  %v2695_v56 = vpop.f32.mrf.mxu0  ;;  %vm13401_vm0 = vcmp.ne.s32.totalorder %v10839_v26, 0  ;;  %vm13402_vm1 = vcmp.lt.s32.totalorder %v10839_v26, 0  ;;  %v5839_v26 = vld [vmem:[%s13093_s3 + $0x2c8] sm:$0xff] }
 0x2b0   : > { %v13399_v29 = vsel %vm10925_vm8, 4294967295, %v13398_v29  ;;  %vm10939_vm3 = vmand %vm13402_vm1, %vm13401_vm0  ;;  %v13403_v35 = vmov 0  ;;  %v10944_v33 = vsub.s32 %v10716_v22, %v3683_v19  ;;  %v3727_v52 = vmul.u32 24, %v3726_v4 }
 0x2b1   : > { %13400 = vst [vmem:[#allocation102_spill] sm:$0xff] %v10933_v40  ;;  %v13404_v35 = vsel %vm10939_vm3, 4294967295, %v13403_v35  ;;  %v10947_v39 = vmul.u32.u64.low 2863311531, %v10872_v9  ;;  %v10948_v47 = vmul.u32.u64.high 2863311531, %v10872_v9, %v10947_v39  ;;  %v10952_v36 = vadd.f32 %v10505_v45, %v9472_v30  ;;  %v10968_v4 = vpop.f32.mrf.mxu0 }
 0x2b2   : > { %13405 = vst [vmem:[#allocation103_spill] sm:$0xff] %v13404_v35  ;;  %13406 = vst [vmem:[#allocation104_spill] sm:$0xff] %v10944_v33  ;;  %v10963_v22 = vsub.s32 %v10721_v0, %v3716_v23  ;;  %v5843_v39 = vld [vmem:[%s13093_s3 + $0x2e8] sm:$0xff]  ;;  %vm3945_vm4 = vcmp.ne.s32.totalorder %v10914_v55, 0  ;;  %vm3993_vm5 = vcmp.lt.s32.totalorder %v10914_v55, 0  ;;  %v10973_v30 = vsub.s32 %v10731_v32, %v3705_v7 }
 0x2b3   : > { %v3760_v45 = vmul.u32 24, %v3759_v11  ;;  %6564 = vmatpush2.msra.mxu1 %v5843_v39  ;;  %v10984_v19 = vsub.s32 %v10735_v51, %v3738_v13  ;;  %v10987_v56 = vadd.s32 272, %v9990_v10  ;;  %v2700_v32 = vpop.f32.mrf.mxu0  ;;  %v10991_v7 = vadd.s32 24, %v10914_v55  ;;  %vm11002_vm3 = vmand %vm3993_vm5, %vm3945_vm4 }
 0x2b4   : > { %13407 = vst [vmem:[#allocation105_spill] sm:$0xff] %v10963_v22  ;;  %13408 = vst [vmem:[#allocation106_spill] sm:$0xff] %v10973_v30  ;;  %6565 = vmatprep.subr.mxu1 %v10214_v16  ;;  %vm3944_vm0 = vcmp.ne.s32.totalorder %v10944_v33, 0  ;;  %vm3992_vm1 = vcmp.lt.s32.totalorder %v10944_v33, 0  ;;  %v10996_v11 = vsub.s32 %v10746_v57, %v3727_v52  ;;  %v13412_v51 = vmov 0  ;;  %v5842_v57 = vld [vmem:[%s13093_s3 + $0x2e0] sm:$0xff] }
 0x2b5   : > { %13409 = vst [vmem:[#allocation107_spill] sm:$0xff] %v10984_v19  ;;  %13410 = vst [vmem:[#allocation108_spill] sm:$0xff] %v10991_v7  ;;  %v13413_v51 = vsel %vm11002_vm3, 4294967295, %v13412_v51  ;;  %v3748_v13 = vshrl.u32 %v10897_v28, 4  ;;  %v11010_v39 = vadd.s32 296, %v9990_v10  ;;  %v2659_v52 = vadd.f32 %v10546_v58, %v9490_v63  ;;  %v11017_v32 = vpop.f32.mrf.mxu0  ;;  %6566 = vmatpush2.msra.mxu1 %v5842_v57 }
 0x2b6   : > { %13411 = vst [vmem:[#allocation109_spill] sm:$0xff] %v10996_v11  ;;  %13414 = vst [vmem:[#allocation110_spill] sm:$0xff] %v13413_v51  ;;  %v11022_v23 = vsub.s32 %v10782_v8, %v3760_v45  ;;  %v13416_v28 = vmov 0  ;;  %v11033_v63 = vadd.s32 24, %v10944_v33  ;;  %v11038_v58 = vadd.s32 288, %v9990_v10  ;;  %6567 = vmatprep.subr.mxu1 %v10214_v16 }
 0x2b7   : > { %vm11028_vm15 = vmand %vm3992_vm1, %vm3944_vm0  ;;  %v2705_v8 = vpop.f32.mrf.mxu0  ;;  %vm13420_vm0 = vcmp.ne.s32.totalorder %v10963_v22, 0  ;;  %vm13421_vm1 = vcmp.lt.s32.totalorder %v10963_v22, 0  ;;  %v13422_v57 = vmov 0  ;;  %v3781_v0 = vshrl.u32 %v10948_v47, 4 }
 0x2b8   : > { %13415 = vst [vmem:[#allocation111_spill] sm:$0xff] %v11022_v23  ;;  %v13417_v28 = vsel %vm11028_vm15, 4294967295, %v13416_v28  ;;  %13419 = vst [vmem:[#allocation113_spill] sm:$0xff] %v11033_v63  ;;  %v11058_v8 = vadd.f32 %v10610_v54, %v9507_v50  ;;  %v13425_v45 = vsel %vm10157_vm6, %v10162_v17, %v10113_v42  ;;  %v11070_v7 = vadd.s32 24, %v10963_v22  ;;  %v13451_v63 = vld [vmem:[#allocation5_spill] sm:$0xff] }
 0x2b9   : > { %13418 = vst [vmem:[#allocation112_spill] sm:$0xff] %v13417_v28  ;;  %vm11049_vm5 = vmand %vm13421_vm1, %vm13420_vm0  ;;  %vm11065_vm3 = vcmp.lt.s32.totalorder %v13425_v45, 16  ;;  %vm13429_vm0 = vcmp.ne.s32.totalorder %v10973_v30, 0  ;;  %vm13430_vm1 = vcmp.lt.s32.totalorder %v10973_v30, 0  ;;  %v13431_v47 = vmov 0  ;;  %v11083_v42 = vpop.f32.mrf.mxu0 }
 0x2ba   : > { %v13423_v57 = vsel %vm11049_vm5, 4294967295, %v13422_v57  ;;  %13428 = vst [vmem:[#allocation115_spill] sm:$0xff] %v11070_v7  ;;  %vm11076_vm8 = vmand %vm13430_vm1, %vm13429_vm0  ;;  %v11081_v50 = vadd.s32 24, %v10973_v30  ;;  %v3749_v60 = vmul.u32 24, %v3748_v13  ;;  %vm13435_vm6 = vcmp.ne.s32.totalorder %v10984_v19, 0  ;;  %v13497_v30 = vld [vmem:[#allocation49_spill] sm:$0xff] }
 0x2bb   : > { %13424 = vst [vmem:[#allocation114_spill] sm:$0xff] %v13423_v57  ;;  %v13432_v47 = vsel %vm11076_vm8, 4294967295, %v13431_v47  ;;  %vm13436_vm4 = vcmp.lt.s32.totalorder %v10984_v19, 0  ;;  %v13437_v17 = vmov 0  ;;  %v11094_v54 = vadd.s32 24, %v10984_v19  ;;  %v13645_v19 = vld [vmem:[#allocation96_spill] sm:$0xff] }
 0x2bc   : > { %13433 = vst [vmem:[#allocation116_spill] sm:$0xff] %v13432_v47  ;;  %13434 = vst [vmem:[#allocation117_spill] sm:$0xff] %v11081_v50  ;;  %v11097_v45 = vadd.s32 24, %v10996_v11  ;;  %vm3999_vm1 = vcmp.lt.s32.totalorder %v11022_v23, 0  ;;  %v2669_v13 = vadd.f32 %v10682_v25, %v9524_v44  ;;  %v13442_v51 = vsel %vm10171_vm9, %v10176_v41, %v10116_v61  ;;  %v2710_v41 = vpop.f32.mrf.mxu0 }
 0x2bd   : > { %vm11089_vm13 = vmand %vm13436_vm4, %vm13435_vm6  ;;  %13440 = vst [vmem:[#allocation119_spill] sm:$0xff] %v11094_v54  ;;  %vm11108_vm4 = vcmp.lt.s32.totalorder %v13442_v51, 16  ;;  %vm13445_vm6 = vcmp.ne.s32.totalorder %v10996_v11, 0  ;;  %vm13446_vm0 = vcmp.lt.s32.totalorder %v10996_v11, 0  ;;  %v13447_v44 = vmov 0  ;;  %v13496_v54 = vld [vmem:[#allocation55_spill] sm:$0xff] }
 0x2be   : > { %v13438_v17 = vsel %vm11089_vm13, 4294967295, %v13437_v17  ;;  %13441 = vst [vmem:[#allocation120_spill] sm:$0xff] %v11097_v45  ;;  %vm11120_vm14 = vmand %vm13446_vm0, %vm13445_vm6  ;;  %v11128_v61 = vadd.s32 304, %v9990_v10  ;;  %v11131_v25 = vadd.s32 24, %v11022_v23  ;;  %v3782_v51 = vmul.u32 24, %v3781_v0 }
 0x2bf   : > { %13439 = vst [vmem:[#allocation118_spill] sm:$0xff] %v13438_v17  ;;  %v13448_v44 = vsel %vm11120_vm14, 4294967295, %v13447_v44  ;;  %v11134_v40 = vmul.u32.u64.low 2863311531, %v10987_v56  ;;  %v11135_v33 = vmul.u32.u64.high 2863311531, %v10987_v56, %v11134_v40  ;;  %v11139_v28 = vadd.f32 %v10723_v6, %v13451_v63  ;;  %v13460_v6 = vld [vmem:[#allocation6_spill] sm:$0xff]  ;;  %v7798_v63 = vpop.f32.mrf.mxu0 }
 0x2c0   : > { %13449 = vst [vmem:[#allocation121_spill] sm:$0xff] %v13448_v44  ;;  %13450 = vst [vmem:[#allocation122_spill] sm:$0xff] %v11131_v25  ;;  %v13452_v35 = vsel %vm10191_vm10, %v10179_v18, %v10123_v37  ;;  %vm13455_vm0 = vcmp.ne.s32.totalorder %v11022_v23, 0  ;;  %v13456_v40 = vmov 0  ;;  %v11161_v5 = vsub.s32 %v10848_v24, %v3749_v60  ;;  %v5841_v18 = vld [vmem:[%s13093_s3 + $0x2d8] sm:$0xff]  ;;  %v13476_v23 = vld [vmem:[#allocation48_spill] sm:$0xff] }
 0x2c1   : > { %vm11146_vm9 = vcmp.lt.s32.totalorder %v13452_v35, 16  ;;  %vm11156_vm6 = vmand %vm3999_vm1, %vm13455_vm0  ;;  %v11164_v37 = vadd.s32 328, %v9990_v10  ;;  %v2679_v35 = vadd.f32 %v10767_v48, %v13460_v6  ;;  %6568 = vmatpush2.msra.mxu1 %v5841_v18  ;;  %v2964_v0 = vadd.f32 %v7798_v63, %v2659_v52  ;;  %v13461_v48 = vld [vmem:[#allocation39_spill] sm:$0xff]  ;;  %v2958_v14 = vpop.f32.mrf.mxu0 }
 0x2c2   : > { %v13457_v40 = vsel %vm11156_vm6, 4294967295, %v13456_v40  ;;  %13459 = vst [vmem:[#allocation123_spill] sm:$0xff] %v11161_v5  ;;  %v13462_v6 = vsel %vm10209_vm11, %v10182_v15, %v13461_v48  ;;  %v11193_v41 = vmul.u32.u64.low 2863311531, %v11010_v39  ;;  %v11194_v17 = vmul.u32.u64.high 2863311531, %v11010_v39, %v11193_v41  ;;  %6569 = vmatprep.subr.mxu1 %v10214_v16  ;;  %v13465_v18 = vld [vmem:[#allocation7_spill] sm:$0xff]  ;;  %v13474_v15 = vld [vmem:[#allocation54_spill] sm:$0xff] }
 0x2c3   : > { %13458 = vst [vmem:[#allocation5_spill] sm:$0xff] %v13457_v40  ;;  %vm11188_vm10 = vcmp.lt.s32.totalorder %v13462_v6, 16  ;;  %v11197_v24 = vadd.s32 320, %v9990_v10  ;;  %v11202_v52 = vadd.f32 %v10815_v31, %v13465_v18  ;;  %v11209_v63 = vsub.s32 %v10872_v9, %v3782_v51  ;;  %v13468_v31 = vld [vmem:[#allocation46_spill] sm:$0xff]  ;;  %v13469_v18 = vld [vmem:[#allocation41_spill] sm:$0xff]  ;;  %v7801_v51 = vpop.f32.mrf.mxu0  ;;  %v13477_v25 = vld [vmem:[#allocation43_spill] sm:$0xff] }
 0x2c4   : > { %v11212_v41 = vadd.s32 344, %v9990_v10  ;;  %vm3198_vm11 = vcmp.gt.f32.partialorder %v2964_v0, 0.0  ;;  %v3246_v48 = vmul.f32 0.1, %v2964_v0  ;;  %v2959_v6 = vadd.f32 %v2958_v14, %v10952_v36  ;;  %v5840_v9 = vld [vmem:[%s13093_s3 + $0x2d0] sm:$0xff]  ;;  %v13589_v44 = vld [vmem:[#allocation15_spill] sm:$0xff] }
 0x2c5   : > { %13466 = vst [vmem:[#allocation6_spill] sm:$0xff] %v11209_v63  ;;  %v13470_v11 = vsel %vm10330_vm2, %v13468_v31, %v13469_v18  ;;  %v11230_v36 = vadd.s32 24, %v11161_v5  ;;  %v11233_v60 = vmul.u32.u64.low 2863311531, %v11038_v58  ;;  %v11234_v14 = vmul.u32.u64.high 2863311531, %v11038_v58, %v11233_v60  ;;  %6570 = vmatpush2.msra.mxu1 %v5840_v9 }
 0x2c6   : > { %vm11220_vm1 = vcmp.lt.s32.totalorder %v13470_v11, 16  ;;  %v11236_v11 = vsel %vm3198_vm11, %v2964_v0, %v3246_v48  ;;  %vm3197_vm2 = vcmp.gt.f32.partialorder %v2959_v6, 0.0  ;;  %v3245_v31 = vmul.f32 0.1, %v2959_v6  ;;  %6571 = vmatprep.subr.mxu1 %v10214_v16  ;;  %v2968_v0 = vpop.f32.mrf.mxu0  ;;  %v13483_v48 = vld [vmem:[#allocation52_spill] sm:$0xff] }
 0x2c7   : > { %13473 = vst [vmem:[#allocation39_spill] sm:$0xff] %v11230_v36  ;;  %v2974_v18 = vadd.f32 %v7801_v51, %v2669_v13  ;;  %vm13475_vm0 = vnez %v13474_v15  ;;  %v4207_v9 = vsel %vm11065_vm3, %v11236_v11, 0.0  ;;  %v3770_v13 = vshrl.u32 %v11135_v33, 4  ;;  %v13484_v51 = vld [vmem:[#allocation45_spill] sm:$0xff]  ;;  %6572 = vmatpush2.msra.mxu1 %v5839_v26  ;;  %v13517_v36 = vld [vmem:[#allocation56_spill] sm:$0xff] }
 0x2c8   : > { %v13478_v40 = vsel %vm13475_vm0, %v13476_v23, %v13477_v25  ;;  %4263 = vst [vmem:[#allocation3 + $0x28] sm:$0xff] %v4207_v9  ;;  %v3293_v15 = vsel %vm3197_vm2, %v2959_v6, %v3245_v31  ;;  %v2969_v25 = vadd.f32 %v2968_v0, %v11058_v8  ;;  %vm13488_vm11 = vcmp.ne.s32.totalorder %v11161_v5, 0  ;;  %v7804_v6 = vpop.f32.mrf.mxu0  ;;  %6573 = vmatprep.subr.mxu1 %v10214_v16 }
 0x2c9   : > { %vm11243_vm14 = vcmp.lt.s32.totalorder %v13478_v40, 16  ;;  %vm3200_vm0 = vcmp.gt.f32.partialorder %v2974_v18, 0.0  ;;  %v3248_v23 = vmul.f32 0.1, %v2974_v18  ;;  %v13481_v40 = vld [vmem:[#allocation58_spill] sm:$0xff]  ;;  %vm13489_vm6 = vcmp.lt.s32.totalorder %v11161_v5, 0  ;;  %8067 = vmatprep.mubr.msk.f32.mxu1 %vm11108_vm4, %v3293_v15 }
 0x2ca   : > { %vm13482_vm13 = vnez %v13481_v40  ;;  %vm11268_vm5 = vmand %vm13489_vm6, %vm13488_vm11  ;;  %v13490_v33 = vmov 0  ;;  %v4206_v8 = vsel %vm11108_vm4, %v3293_v15, 0.0  ;;  %v11275_v31 = vadd.s32 24, %v11209_v63  ;;  %v13516_v5 = vld [vmem:[#allocation63_spill] sm:$0xff] }
 0x2cb   : > { %v13485_v60 = vsel %vm13482_vm13, %v13483_v48, %v13484_v51  ;;  %v13491_v33 = vsel %vm11268_vm5, 4294967295, %v13490_v33  ;;  %v11278_v9 = vmul.u32.u64.low 2863311531, %v11125_v49  ;;  %v11279_v0 = vmul.u32.u64.high 2863311531, %v11125_v49, %v11278_v9  ;;  %4262 = vst [vmem:[#allocation3 + $0x20] sm:$0xff] %v4206_v8 }
 0x2cc   : > { %vm11260_vm8 = vcmp.lt.s32.totalorder %v13485_v60, 16  ;;  %13492 = vst [vmem:[#allocation7_spill] sm:$0xff] %v13491_v33  ;;  %13493 = vst [vmem:[#allocation53_spill] sm:$0xff] %v11275_v31  ;;  %v11281_v40 = vsel %vm3200_vm0, %v2974_v18, %v3248_v23  ;;  %vm3199_vm13 = vcmp.gt.f32.partialorder %v2969_v25, 0.0  ;;  %v3247_v48 = vmul.f32 0.1, %v2969_v25 }
 0x2cd   : > { %v2984_v51 = vadd.f32 %v7804_v6, %v2679_v35  ;;  %v13494_v60 = vld [vmem:[#allocation59_spill] sm:$0xff]  ;;  %vm13501_vm11 = vcmp.ne.s32.totalorder %v11209_v63, 0  ;;  %vm13502_vm0 = vcmp.lt.s32.totalorder %v11209_v63, 0  ;;  %v13503_v18 = vmov 0  ;;  %v13506_v35 = vld [vmem:[#allocation8_spill] sm:$0xff]  ;;  %v13507_v6 = vld [vmem:[#allocation61_spill] sm:$0xff] }
 0x2ce   : > { %vm13495_vm6 = vnez %v13494_v60  ;;  %vm11298_vm15 = vmand %vm13502_vm0, %vm13501_vm11  ;;  %v2689_v23 = vadd.f32 %v10853_v12, %v13506_v35  ;;  %v11314_v15 = vsel %vm3199_vm13, %v2969_v25, %v3247_v48  ;;  %v13509_v9 = vld [vmem:[#allocation60_spill] sm:$0xff]  ;;  %v13510_v60 = vld [vmem:[#allocation50_spill] sm:$0xff]  ;;  %v13512_v7 = vmov 0 }
 0x2cf   : > { %v13498_v50 = vsel %vm13495_vm6, %v13496_v54, %v13497_v30  ;;  %v13504_v18 = vsel %vm11298_vm15, 4294967295, %v13503_v18  ;;  %v4209_v30 = vsel %vm11146_vm9, %v11281_v40, 0.0  ;;  %v11312_v54 = vadd.s32 336, %v9990_v10 }
 0x2d0   : > { %vm11288_vm2 = vcmp.lt.s32.totalorder %v13498_v50, 16  ;;  %13505 = vst [vmem:[#allocation46_spill] sm:$0xff] %v13504_v18  ;;  %v2978_v50 = vpop.f32.mrf.mxu0  ;;  %4265 = vst [vmem:[#allocation3 + $0x38] sm:$0xff] %v4209_v30  ;;  %vm3202_vm4 = vcmp.gt.f32.partialorder %v2984_v51, 0.0  ;;  %v3250_v8 = vmul.f32 0.1, %v2984_v51  ;;  %vm13508_vm6 = vnez %v13507_v6 }
 0x2d1   : > { %v2979_v12 = vadd.f32 %v2978_v50, %v11139_v28  ;;  %v13511_v35 = vsel %vm13508_vm6, %v13509_v9, %v13510_v60  ;;  %v4208_v25 = vsel %vm11188_vm10, %v11314_v15, 0.0  ;;  %v3771_v30 = vmul.u32 24, %v3770_v13  ;;  %v13521_v13 = vld [vmem:[#allocation10_spill] sm:$0xff]  ;;  %v13576_v18 = vld [vmem:[#allocation75_spill] sm:$0xff] }
 0x2d2   : > { %vm11322_vm11 = vcmp.lt.s32.totalorder %v13511_v35, 16  ;;  %v7807_v48 = vpop.f32.mrf.mxu0  ;;  %v3803_v50 = vshrl.u32 %v11194_v17, 4  ;;  %4264 = vst [vmem:[#allocation3 + $0x30] sm:$0xff] %v4208_v25  ;;  %v11337_v6 = vsel %vm3202_vm4, %v2984_v51, %v3250_v8  ;;  %v13514_v35 = vld [vmem:[#allocation65_spill] sm:$0xff]  ;;  %v13519_v57 = vmov 0  ;;  %v4598_v38 = vld [vmem:[#allocation3 + $0x1f] sm:$0xff] }
 0x2d3   : > { %v13513_v7 = vsel %vm11322_vm11, 4294967295, %v13512_v7  ;;  %vm3201_vm13 = vcmp.gt.f32.partialorder %v2979_v12, 0.0  ;;  %v3249_v9 = vmul.f32 0.1, %v2979_v12  ;;  %v2994_v60 = vadd.f32 %v7807_v48, %v2689_v23  ;;  %6286 = vmatprep.mubr.f32.mxu0 %v4598_v38  ;;  %5997 = vmatmul.mubr.f32.gmra.mxu1 %v4598_v38  ;;  %v4599_v2 = vld [vmem:[#allocation3 + $0x27] sm:$0xff]  ;;  %v13694_v28 = vld [vmem:[#allocation118_spill] sm:$0xff] }
 0x2d4   : > { %vm13515_vm0 = vnez %v13514_v35  ;;  %v2699_v17 = vadd.f32 %v10968_v4, %v13521_v13  ;;  %v4211_v51 = vsel %vm11220_vm1, %v11337_v6, 0.0  ;;  %v2988_v26 = vpop.f32.mrf.mxu0  ;;  %v13522_v4 = vld [vmem:[#allocation64_spill] sm:$0xff]  ;;  %8068 = vmatprep.mubr.msk.f32.mxu1 %vm11065_vm3, %v11236_v11  ;;  %v13534_v38 = vld [vmem:[#allocation77_spill] sm:$0xff]  ;;  %v13539_v55 = vmov 0  ;;  %v5861_v11 = vld [vmem:[%s13093_s3 + $0x378] sm:$0xff] }
 0x2d5   : > { %v13518_v33 = vsel %vm13515_vm0, %v13516_v5, %v13517_v36  ;;  %v11355_v23 = vmul.u32.u64.low 2863311531, %v11128_v61  ;;  %v11356_v8 = vmul.u32.u64.high 2863311531, %v11128_v61, %v11355_v23  ;;  %4267 = vst [vmem:[#allocation3 + $0x48] sm:$0xff] %v4211_v51  ;;  %v11359_v5 = vsel %vm3201_vm13, %v2979_v12, %v3249_v9  ;;  %v5838_v35 = vld [vmem:[%s13093_s3 + $0x2c0] sm:$0xff]  ;;  %v13526_v12 = vld [vmem:[#allocation9_spill] sm:$0xff] }
 0x2d6   : > { %vm11344_vm6 = vcmp.lt.s32.totalorder %v13518_v33, 16  ;;  %vm3204_vm4 = vcmp.gt.f32.partialorder %v2994_v60, 0.0  ;;  %v3252_v36 = vmul.f32 0.1, %v2994_v60  ;;  %v2989_v16 = vadd.f32 %v2988_v26, %v11202_v52  ;;  %v4502_v33 = vld [vmem:[#allocation3 + $0x9] sm:$0xff]  ;;  %v7810_v13 = vpop.f32.mrf.mxu0  ;;  %6574 = vmatpush2.msra.mxu1 %v5838_v35 }
 0x2d7   : > { %v13520_v57 = vsel %vm11344_vm6, 4294967295, %v13519_v57  ;;  %v13523_v25 = vsel %vm10534_vm7, %v10483_v53, %v13522_v4  ;;  %v2694_v9 = vadd.f32 %v10899_v27, %v13526_v12  ;;  %v4210_v52 = vsel %vm11243_vm14, %v11359_v5, 0.0  ;;  %v13528_v27 = vld [vmem:[#allocation72_spill] sm:$0xff]  ;;  %6287 = vmatmul.mubr.f32.vlgmr.msra.gmra.mxu0 %v4502_v33  ;;  %6002 = vmatmul.mubr.f32.gmra.mxu1 %v4599_v2 }
 0x2d8   : > { %vm11367_vm0 = vcmp.lt.s32.totalorder %v13523_v25, 16  ;;  %v11380_v51 = vsub.s32 %v10987_v56, %v3771_v30  ;;  %v3792_v53 = vshrl.u32 %v11234_v14, 4  ;;  %4266 = vst [vmem:[#allocation3 + $0x40] sm:$0xff] %v4210_v52  ;;  %v11383_v26 = vsel %vm3204_vm4, %v2994_v60, %v3252_v36  ;;  %v13529_v25 = vld [vmem:[#allocation66_spill] sm:$0xff]  ;;  %v13533_v56 = vld [vmem:[#allocation12_spill] sm:$0xff]  ;;  %v2998_v60 = vpop.f32.mrf.mxu0  ;;  %6291 = vmatprep.mubr.f32.mxu0 %v4599_v2  ;;  %6833 = vmatpush1.msra.mxu0 %v5861_v11 }
 0x2d9   : > { %vm3203_vm7 = vcmp.gt.f32.partialorder %v2989_v16, 0.0  ;;  %v3251_v23 = vmul.f32 0.1, %v2989_v16  ;;  %v3004_v4 = vadd.f32 %v7810_v13, %v2699_v17  ;;  %v13530_v12 = vsel %vm10552_vm12, %v13528_v27, %v13529_v25  ;;  %v4503_v13 = vld [vmem:[#allocation3 + $0x11] sm:$0xff]  ;;  %v13536_v27 = vld [vmem:[#allocation73_spill] sm:$0xff]  ;;  %v13537_v33 = vld [vmem:[#allocation68_spill] sm:$0xff]  ;;  %8069 = vmatprep.mubr.msk.f32.mxu1 %vm11188_vm10, %v11314_v15 }
 0x2da   : > { %13527 = vst [vmem:[#allocation41_spill] sm:$0xff] %v11380_v51  ;;  %vm11390_vm13 = vcmp.lt.s32.totalorder %v13530_v12, 16  ;;  %v2709_v14 = vadd.f32 %v11083_v42, %v13533_v56  ;;  %v4213_v30 = vsel %vm11260_vm8, %v11383_v26, 0.0  ;;  %v3804_v17 = vmul.u32 24, %v3803_v50  ;;  %v11417_v50 = vld [vmem:[#allocation3] sm:$0xff]  ;;  %v7813_v12 = vpop.f32.mrf.mxu0 }
 0x2db   : > { %4269 = vst [vmem:[#allocation3 + $0x58] sm:$0xff] %v4213_v30  ;;  %v11403_v35 = vsel %vm3203_vm7, %v2989_v16, %v3251_v23  ;;  %vm3206_vm12 = vcmp.gt.f32.partialorder %v3004_v4, 0.0  ;;  %v3254_v52 = vmul.f32 0.1, %v3004_v4  ;;  %v2999_v42 = vadd.f32 %v2998_v60, %v2694_v9  ;;  %6575 = vmatprep.subr.mxu1 %v11417_v50  ;;  %v13542_v16 = vld [vmem:[#allocation11_spill] sm:$0xff]  ;;  %v5860_v60 = vld [vmem:[%s13093_s3 + $0x370] sm:$0xff]  ;;  %6834 = vmatprep.subr.mxu0 %v11417_v50 }
 0x2dc   : > { %vm13535_vm4 = vnez %v13534_v38  ;;  %v2704_v9 = vadd.f32 %v11017_v32, %v13542_v16  ;;  %v4212_v23 = vsel %vm11288_vm2, %v11403_v35, 0.0  ;;  %v13546_v16 = vld [vmem:[#allocation69_spill] sm:$0xff]  ;;  %6292 = vmatmul.mubr.f32.gmra.mxu0 %v4503_v13  ;;  %v3793_v2 = vmul.u32 24, %v3792_v53  ;;  %v5837_v53 = vld [vmem:[%s13093_s3 + $0x2b8] sm:$0xff] }
 0x2dd   : > { %v13538_v25 = vsel %vm13535_vm4, %v13536_v27, %v13537_v33  ;;  %v11426_v56 = vmul.u32.u64.low 2863311531, %v11164_v37  ;;  %v11427_v30 = vmul.u32.u64.high 2863311531, %v11164_v37, %v11426_v56  ;;  %4268 = vst [vmem:[#allocation3 + $0x50] sm:$0xff] %v4212_v23  ;;  %v11434_v38 = vsel %vm3206_vm12, %v3004_v4, %v3254_v52  ;;  %v13543_v33 = vld [vmem:[#allocation78_spill] sm:$0xff]  ;;  %v3008_v52 = vpop.f32.mrf.mxu0  ;;  %v13553_v13 = vld [vmem:[#allocation81_spill] sm:$0xff]  ;;  %6835 = vmatpush1.msra.mxu0 %v5860_v60  ;;  %6576 = vmatpush2.msra.mxu1 %v5837_v53 }
 0x2de   : > { %vm11410_vm15 = vcmp.lt.s32.totalorder %v13538_v25, 16  ;;  %vm3205_vm3 = vcmp.gt.f32.partialorder %v2999_v42, 0.0  ;;  %v3253_v32 = vmul.f32 0.1, %v2999_v42  ;;  %v3014_v27 = vadd.f32 %v7813_v12, %v2709_v14  ;;  %v13545_v25 = vld [vmem:[#allocation79_spill] sm:$0xff]  ;;  %v4600_v14 = vld [vmem:[#allocation3 + $0x2f] sm:$0xff]  ;;  %6836 = vmatprep.subr.mxu0 %v11417_v50  ;;  %6577 = vmatprep.subr.mxu1 %v11417_v50 }
 0x2df   : > { %v13540_v55 = vsel %vm11410_vm15, 4294967295, %v13539_v55  ;;  %vm13544_vm7 = vnez %v13543_v33  ;;  %v13548_v56 = vmov 0  ;;  %v4215_v4 = vsel %vm11322_vm11, %v11434_v38, 0.0  ;;  %6296 = vmatprep.mubr.f32.mxu0 %v4600_v14  ;;  %v13551_v12 = vld [vmem:[#allocation80_spill] sm:$0xff]  ;;  %v13554_v33 = vld [vmem:[#allocation70_spill] sm:$0xff]  ;;  %6007 = vmatmul.mubr.f32.gmra.mxu1 %v4600_v14 }
 0x2e0   : > { %13541 = vst [vmem:[#allocation54_spill] sm:$0xff] %v13540_v55  ;;  %v13547_v36 = vsel %vm13544_vm7, %v13545_v25, %v13546_v16  ;;  %vm3952_vm12 = vcmp.ne.s32.totalorder %v11380_v51, 0  ;;  %4271 = vst [vmem:[#allocation3 + $0x68] sm:$0xff] %v4215_v4  ;;  %vm3208_vm5 = vcmp.gt.f32.partialorder %v3014_v27, 0.0  ;;  %v3256_v11 = vmul.f32 0.1, %v3014_v27  ;;  %8070 = vmatprep.mubr.msk.f32.mxu1 %vm11146_vm9, %v11281_v40 }
 0x2e1   : > { %vm11441_vm4 = vcmp.lt.s32.totalorder %v13547_v36, 16  ;;  %v11455_v36 = vsel %vm3205_vm3, %v2999_v42, %v3253_v32  ;;  %v3009_v23 = vadd.f32 %v3008_v52, %v2704_v9  ;;  %vm13552_vm11 = vnez %v13551_v12  ;;  %v5859_v42 = vld [vmem:[%s13093_s3 + $0x368] sm:$0xff]  ;;  %v7816_v32 = vpop.f32.mrf.mxu0  ;;  %v13559_v12 = vld [vmem:[#allocation14_spill] sm:$0xff]  ;;  %v5858_v14 = vld [vmem:[%s13093_s3 + $0x360] sm:$0xff] }
 0x2e2   : > { %v13549_v56 = vsel %vm11441_vm4, 4294967295, %v13548_v56  ;;  %v13555_v47 = vsel %vm13552_vm11, %v13553_v13, %v13554_v33  ;;  %v4214_v9 = vsel %vm11344_vm6, %v11455_v36, 0.0  ;;  %v11476_v25 = vadd.s32 24, %v11380_v51  ;;  %v4504_v33 = vld [vmem:[#allocation3 + $0x19] sm:$0xff]  ;;  %6837 = vmatpush1.msra.mxu0 %v5859_v42  ;;  %v13575_v40 = vld [vmem:[#allocation85_spill] sm:$0xff]  ;;  %v13592_v55 = vld [vmem:[#allocation90_spill] sm:$0xff] }
 0x2e3   : > { %13550 = vst [vmem:[#allocation48_spill] sm:$0xff] %v13549_v56  ;;  %vm11462_vm10 = vcmp.lt.s32.totalorder %v13555_v47, 16  ;;  %v11479_v16 = vsub.s32 %v11010_v39, %v3804_v17  ;;  %v11482_v60 = vadd.s32 360, %v9990_v10  ;;  %4270 = vst [vmem:[#allocation3 + $0x60] sm:$0xff] %v4214_v9  ;;  %v11486_v4 = vsel %vm3208_vm5, %v3014_v27, %v3256_v11  ;;  %v13560_v47 = vld [vmem:[#allocation82_spill] sm:$0xff]  ;;  %v13562_v39 = vld [vmem:[#allocation83_spill] sm:$0xff]  ;;  %v3018_v11 = vpop.f32.mrf.mxu0  ;;  %6297 = vmatmul.mubr.f32.gmra.mxu0 %v4504_v33 }
 0x2e4   : > { %13558 = vst [vmem:[#allocation43_spill] sm:$0xff] %v11476_v25  ;;  %vm3207_vm11 = vcmp.gt.f32.partialorder %v3009_v23, 0.0  ;;  %v3255_v52 = vmul.f32 0.1, %v3009_v23  ;;  %v3024_v13 = vadd.f32 %v7816_v32, %v13559_v12  ;;  %vm13561_vm3 = vnez %v13560_v47  ;;  %v13563_v17 = vld [vmem:[#allocation74_spill] sm:$0xff]  ;;  %v13572_v33 = vld [vmem:[#allocation13_spill] sm:$0xff]  ;;  %6838 = vmatprep.subr.mxu0 %v11417_v50 }
 0x2e5   : > { %v13564_v63 = vsel %vm13561_vm3, %v13562_v39, %v13563_v17  ;;  %v13565_v31 = vmov 0  ;;  %vm13567_vm5 = vcmp.lt.s32.totalorder %v11380_v51, 0  ;;  %v13568_v27 = vmov 0  ;;  %v4601_v53 = vld [vmem:[#allocation3 + $0x37] sm:$0xff]  ;;  %6839 = vmatpush1.msra.mxu0 %v5858_v14  ;;  %v13605_v56 = vld [vmem:[#allocation89_spill] sm:$0xff] }
 0x2e6   : > { %vm11494_vm7 = vcmp.lt.s32.totalorder %v13564_v63, 16  ;;  %vm11502_vm6 = vmand %vm13567_vm5, %vm3952_vm12  ;;  %v4217_v63 = vsel %vm11367_vm0, %v11486_v4, 0.0  ;;  %v11516_v9 = vsub.s32 %v11038_v58, %v3793_v2  ;;  %v13571_v42 = vshrl.u32 %v11279_v0, 4  ;;  %6301 = vmatprep.mubr.f32.mxu0 %v4601_v53  ;;  %6012 = vmatmul.mubr.f32.gmra.mxu1 %v4601_v53  ;;  %v13602_v25 = vld [vmem:[#allocation94_spill] sm:$0xff] }
 0x2e7   : > { %v13566_v31 = vsel %vm11494_vm7, 4294967295, %v13565_v31  ;;  %v13569_v27 = vsel %vm11502_vm6, 4294967295, %v13568_v27  ;;  %4273 = vst [vmem:[#allocation3 + $0x78] sm:$0xff] %v4217_v63  ;;  %v11522_v47 = vsel %vm3207_vm11, %v3009_v23, %v3255_v52  ;;  %vm3210_vm12 = vcmp.gt.f32.partialorder %v3024_v13, 0.0  ;;  %v7819_v23 = vpop.f32.mrf.mxu0  ;;  %v13585_v52 = vld [vmem:[#allocation76_spill] sm:$0xff]  ;;  %6840 = vmatprep.subr.mxu0 %v11417_v50  ;;  %8071 = vmatprep.mubr.msk.f32.mxu1 %vm11243_vm14, %v11359_v5 }
 0x2e8   : > { %13570 = vst [vmem:[#allocation58_spill] sm:$0xff] %v13569_v27  ;;  %v3826_v32 = vmul.u32 24, %v13571_v42  ;;  %v3258_v39 = vmul.f32 0.1, %v3024_v13  ;;  %v3019_v17 = vadd.f32 %v3018_v11, %v13572_v33  ;;  %vm13574_vm9 = vnez %v13573_v62  ;;  %v13581_v42 = vld [vmem:[#allocation16_spill] sm:$0xff] }
 0x2e9   : > { %v13577_v58 = vsel %vm13574_vm9, %v13575_v40, %v13576_v18  ;;  %v4216_v0 = vsel %vm11390_vm13, %v11522_v47, 0.0  ;;  %v5857_v18 = vld [vmem:[%s13093_s3 + $0x358] sm:$0xff]  ;;  %v3034_v33 = vadd.f32 %v7819_v23, %v13581_v42  ;;  %v4505_v62 = vld [vmem:[#allocation3 + $0x21] sm:$0xff]  ;;  %v11571_v23 = vadd.s32 24, %v11479_v16 }
 0x2ea   : > { %vm11530_vm3 = vcmp.lt.s32.totalorder %v13577_v58, 16  ;;  %4272 = vst [vmem:[#allocation3 + $0x70] sm:$0xff] %v4216_v0  ;;  %v11548_v63 = vsel %vm3210_vm12, %v3024_v13, %v3258_v39  ;;  %vm3209_vm9 = vcmp.gt.f32.partialorder %v3019_v17, 0.0  ;;  %v3257_v11 = vmul.f32 0.1, %v3019_v17  ;;  %v13582_v40 = vld [vmem:[#allocation87_spill] sm:$0xff]  ;;  %v3028_v39 = vpop.f32.mrf.mxu0  ;;  %6302 = vmatmul.mubr.f32.gmra.mxu0 %v4505_v62 }
 0x2eb   : > { %13580 = vst [vmem:[#allocation52_spill] sm:$0xff] %v11548_v63  ;;  %vm13583_vm11 = vnez %v13582_v40  ;;  %v13584_v58 = vld [vmem:[#allocation86_spill] sm:$0xff]  ;;  %v4219_v53 = vsel %vm11410_vm15, %v11548_v63, 0.0  ;;  %v4602_v0 = vld [vmem:[#allocation3 + $0x3f] sm:$0xff]  ;;  %vm3212_vm12 = vcmp.gt.f32.partialorder %v3034_v33, 0.0  ;;  %v3029_v5 = vadd.f32 %v3028_v39, %v13589_v44  ;;  %6841 = vmatpush1.msra.mxu0 %v5857_v18 }
 0x2ec   : > { %v13586_v14 = vsel %vm13583_vm11, %v13584_v58, %v13585_v52  ;;  %v5836_v13 = vld [vmem:[%s13093_s3 + $0x2b0] sm:$0xff]  ;;  %v11574_v52 = vmul.u32.u64.low 2863311531, %v11197_v24  ;;  %v11575_v42 = vmul.u32.u64.high 2863311531, %v11197_v24, %v11574_v52  ;;  %4275 = vst [vmem:[#allocation3 + $0x88] sm:$0xff] %v4219_v53  ;;  %v11581_v58 = vsel %vm3209_vm9, %v3019_v17, %v3257_v11  ;;  %6306 = vmatprep.mubr.f32.mxu0 %v4602_v0  ;;  %v13593_v63 = vld [vmem:[#allocation88_spill] sm:$0xff]  ;;  %v7822_v53 = vpop.f32.mrf.mxu0  ;;  %6842 = vmatprep.subr.mxu0 %v11417_v50 }
 0x2ed   : > { %vm11556_vm5 = vcmp.lt.s32.totalorder %v13586_v14, 16  ;;  %v5856_v40 = vld [vmem:[%s13093_s3 + $0x350] sm:$0xff]  ;;  %v3260_v62 = vmul.f32 0.1, %v3034_v33  ;;  %v13590_v14 = vld [vmem:[#allocation91_spill] sm:$0xff]  ;;  %vm13597_vm15 = vcmp.ne.s32.totalorder %v11479_v16, 0  ;;  %6578 = vmatpush2.msra.mxu1 %v5836_v13 }
 0x2ee   : > { %vm13591_vm14 = vnez %v13590_v14  ;;  %vm13598_vm6 = vcmp.lt.s32.totalorder %v11479_v16, 0  ;;  %v4218_v11 = vsel %vm11441_vm4, %v11581_v58, 0.0  ;;  %v3259_v18 = vmul.f32 0.1, %v3029_v5  ;;  %v13601_v39 = vld [vmem:[#allocation18_spill] sm:$0xff]  ;;  %6017 = vmatmul.mubr.f32.gmra.mxu1 %v4602_v0  ;;  %v13604_v27 = vld [vmem:[#allocation92_spill] sm:$0xff]  ;;  %6843 = vmatpush1.msra.mxu0 %v5856_v40 }
 0x2ef   : > { %v13594_v51 = vsel %vm13591_vm14, %v13592_v55, %v13593_v63  ;;  %vm11597_vm9 = vmand %vm13598_vm6, %vm13597_vm15  ;;  %v11609_v55 = vadd.s32 352, %v9990_v10  ;;  %4274 = vst [vmem:[#allocation3 + $0x80] sm:$0xff] %v4218_v11  ;;  %v3308_v63 = vsel %vm3212_vm12, %v3034_v33, %v3260_v62  ;;  %vm3211_vm15 = vcmp.gt.f32.partialorder %v3029_v5, 0.0  ;;  %v4506_v14 = vld [vmem:[#allocation3 + $0x29] sm:$0xff]  ;;  %v3038_v62 = vpop.f32.mrf.mxu0  ;;  %8072 = vmatprep.mubr.msk.f32.mxu1 %vm11220_vm1, %v11337_v6  ;;  %v13610_v6 = vld [vmem:[#allocation99_spill] sm:$0xff]  ;;  %6844 = vmatprep.subr.mxu0 %v11417_v50 }
 0x2f0   : > { %vm11589_vm11 = vcmp.lt.s32.totalorder %v13594_v51, 16  ;;  %v11606_v51 = vsub.s32 %v11125_v49, %v3826_v32  ;;  %v3044_v44 = vadd.f32 %v7822_v53, %v13601_v39  ;;  %vm13603_vm6 = vnez %v13602_v25  ;;  %v5855_v33 = vld [vmem:[%s13093_s3 + $0x348] sm:$0xff]  ;;  %6307 = vmatmul.mubr.f32.gmra.mxu0 %v4506_v14  ;;  %6579 = vmatprep.subr.mxu1 %v11417_v50 }
 0x2f1   : > { %v13606_v49 = vsel %vm13603_vm6, %v13604_v27, %v13605_v56  ;;  %v4221_v13 = vsel %vm11462_vm10, %v3308_v63, 0.0  ;;  %v4603_v25 = vld [vmem:[#allocation3 + $0x47] sm:$0xff]  ;;  %v4147_v56 = vsel %vm11597_vm9, %v11571_v23, %v11479_v16  ;;  %v11636_v27 = vadd.s32 24, %v11516_v9  ;;  %6845 = vmatpush1.msra.mxu0 %v5855_v33 }
 0x2f2   : > { %vm11618_vm14 = vcmp.lt.s32.totalorder %v13606_v49, 16  ;;  %4277 = vst [vmem:[#allocation3 + $0x98] sm:$0xff] %v4221_v13  ;;  %v11639_v15 = vsel %vm3211_vm15, %v3029_v5, %v3259_v18  ;;  %vm3214_vm10 = vcmp.gt.f32.partialorder %v3044_v44, 0.0  ;;  %v3262_v0 = vmul.f32 0.1, %v3044_v44  ;;  %v13609_v40 = vld [vmem:[#allocation17_spill] sm:$0xff]  ;;  %6311 = vmatprep.mubr.f32.mxu0 %v4603_v25  ;;  %v7825_v18 = vpop.f32.mrf.mxu0  ;;  %6022 = vmatmul.mubr.f32.gmra.mxu1 %v4603_v25 }
 0x2f3   : > { %v3039_v45 = vadd.f32 %v3038_v62, %v13609_v40  ;;  %vm13611_vm1 = vnez %v13610_v6  ;;  %v13612_v11 = vld [vmem:[#allocation93_spill] sm:$0xff]  ;;  %v4220_v5 = vsel %vm11494_vm7, %v11639_v15, 0.0  ;;  %v13616_v39 = vshrl.u32 %v11356_v8, 4  ;;  %v13617_v62 = vld [vmem:[#allocation20_spill] sm:$0xff]  ;;  %v4507_v6 = vld [vmem:[#allocation3 + $0x31] sm:$0xff]  ;;  %6846 = vmatprep.subr.mxu0 %v11417_v50  ;;  %8073 = vmatprep.mubr.msk.f32.mxu1 %vm11288_vm2, %v11403_v35 }
 0x2f4   : > { %v13613_v53 = vsel %vm13611_vm1, %v10826_v59, %v13612_v11  ;;  %v5854_v59 = vld [vmem:[%s13093_s3 + $0x340] sm:$0xff]  ;;  %4276 = vst [vmem:[#allocation3 + $0x90] sm:$0xff] %v4220_v5  ;;  %v3310_v49 = vsel %vm3214_vm10, %v3044_v44, %v3262_v0  ;;  %v3054_v40 = vadd.f32 %v7825_v18, %v13617_v62  ;;  %v13621_v8 = vld [vmem:[#allocation95_spill] sm:$0xff]  ;;  %vm13625_vm7 = vcmp.ne.s32.totalorder %v11516_v9, 0  ;;  %v5835_v25 = vld [vmem:[%s13093_s3 + $0x2a8] sm:$0xff]  ;;  %v3048_v5 = vpop.f32.mrf.mxu0  ;;  %6312 = vmatmul.mubr.f32.gmra.mxu0 %v4507_v6 }
 0x2f5   : > { %vm11647_vm6 = vcmp.lt.s32.totalorder %v13613_v53, 16  ;;  %v3815_v14 = vmul.u32 24, %v13616_v39  ;;  %vm3213_vm1 = vcmp.gt.f32.partialorder %v3039_v45, 0.0  ;;  %v3261_v13 = vmul.f32 0.1, %v3039_v45  ;;  %v13618_v11 = vld [vmem:[#allocation100_spill] sm:$0xff]  ;;  %6847 = vmatpush1.msra.mxu0 %v5854_v59  ;;  %6580 = vmatpush2.msra.mxu1 %v5835_v25 }
 0x2f6   : > { %vm13619_vm12 = vnez %v13618_v11  ;;  %v13620_v53 = vld [vmem:[#allocation97_spill] sm:$0xff]  ;;  %vm13626_vm9 = vcmp.lt.s32.totalorder %v11516_v9, 0  ;;  %v4223_v0 = vsel %vm11530_vm3, %v3310_v49, 0.0  ;;  %v11691_v62 = vadd.s32 24, %v11606_v51  ;;  %v13629_v6 = vld [vmem:[#allocation19_spill] sm:$0xff]  ;;  %6848 = vmatprep.subr.mxu0 %v11417_v50  ;;  %6581 = vmatprep.subr.mxu1 %v11417_v50  ;;  %v5874_v16 = vld [vmem:[%s13093_s3 + $0x3e0] sm:$0xff] }
 0x2f7   : > { %v13622_v39 = vsel %vm13619_vm12, %v13620_v53, %v13621_v8  ;;  %vm11677_vm10 = vmand %vm13626_vm9, %vm13625_vm7  ;;  %v4604_v18 = vld [vmem:[#allocation3 + $0x4f] sm:$0xff]  ;;  %v3847_v11 = vshrl.u32 %v11427_v30, 4  ;;  %v3836_v53 = vshrl.u32 %v11575_v42, 4  ;;  %v5853_v8 = vld [vmem:[%s13093_s3 + $0x338] sm:$0xff]  ;;  %4279 = vst [vmem:[#allocation3 + $0xa8] sm:$0xff] %v4223_v0  ;;  %v3309_v2 = vsel %vm3213_vm1, %v3039_v45, %v3261_v13 }
 0x2f8   : > { %vm11669_vm15 = vcmp.lt.s32.totalorder %v13622_v39, 16  ;;  %vm3216_vm7 = vcmp.gt.f32.partialorder %v3054_v40, 0.0  ;;  %v3264_v49 = vmul.f32 0.1, %v3054_v40  ;;  %v3049_v22 = vadd.f32 %v3048_v5, %v13629_v6  ;;  %6316 = vmatprep.mubr.f32.mxu0 %v4604_v18  ;;  %v13638_v39 = vld [vmem:[#allocation22_spill] sm:$0xff]  ;;  %6027 = vmatmul.mubr.f32.gmra.mxu1 %v4604_v18  ;;  %v4508_v5 = vld [vmem:[#allocation3 + $0x39] sm:$0xff] }
 0x2f9   : > { %vm13630_vm2 = vnez %v13391_v43  ;;  %vm13634_vm9 = vcmp.ne.s32.totalorder %v11606_v51, 0  ;;  %vm13635_vm12 = vcmp.lt.s32.totalorder %v11606_v51, 0  ;;  %v4222_v45 = vsel %vm11556_vm5, %v3309_v2, 0.0  ;;  %v7828_v43 = vpop.f32.mrf.mxu0  ;;  %6849 = vmatpush1.msra.mxu0 %v5853_v8  ;;  %8074 = vmatprep.mubr.msk.f32.mxu1 %vm11260_vm8, %v11383_v26  ;;  %v4510_v33 = vld [vmem:[#allocation3 + $0x49] sm:$0xff] }
 0x2fa   : > { %v13631_v35 = vsel %vm13630_vm2, %v10844_v34, %v10795_v3  ;;  %vm11713_vm4 = vmand %vm13635_vm12, %vm13634_vm9  ;;  %v4146_v3 = vsel %vm11677_vm10, %v11636_v27, %v11516_v9  ;;  %v11724_v34 = vsub.s32 %v11128_v61, %v3815_v14  ;;  %v11727_v13 = vadd.s32 376, %v9990_v10  ;;  %4278 = vst [vmem:[#allocation3 + $0xa0] sm:$0xff] %v4222_v45  ;;  %6317 = vmatmul.mubr.f32.gmra.mxu0 %v4508_v5  ;;  %v13650_v5 = vld [vmem:[#allocation103_spill] sm:$0xff] }
 0x2fb   : > { %vm11705_vm3 = vcmp.lt.s32.totalorder %v13631_v35, 16  ;;  %v3312_v59 = vsel %vm3216_vm7, %v3054_v40, %v3264_v49  ;;  %vm3215_vm1 = vcmp.gt.f32.partialorder %v3049_v22, 0.0  ;;  %v3263_v12 = vmul.f32 0.1, %v3049_v22  ;;  %v5852_v40 = vld [vmem:[%s13093_s3 + $0x330] sm:$0xff]  ;;  %v3058_v2 = vpop.f32.mrf.mxu0  ;;  %v13643_v49 = vld [vmem:[#allocation21_spill] sm:$0xff]  ;;  %6850 = vmatprep.subr.mxu0 %v11417_v50 }
 0x2fc   : > { %v3064_v0 = vadd.f32 %v7828_v43, %v13638_v39  ;;  %vm13639_vm5 = vnez %v13395_v46  ;;  %v4225_v25 = vsel %vm11589_vm11, %v3312_v59, 0.0  ;;  %v4605_v46 = vld [vmem:[#allocation3 + $0x57] sm:$0xff]  ;;  %v11752_v18 = vmul.u32 24, %v3836_v53  ;;  %6851 = vmatpush1.msra.mxu0 %v5852_v40  ;;  %v13649_v59 = vld [vmem:[#allocation24_spill] sm:$0xff]  ;;  %v4612_v9 = vld [vmem:[#allocation3 + $0x8f] sm:$0xff] }
 0x2fd   : > { %v13640_v61 = vsel %vm13639_vm5, %v10867_v20, %v10818_v1  ;;  %v4149_v1 = vsel %vm11713_vm4, %v11691_v62, %v11606_v51  ;;  %v3848_v20 = vmul.u32 24, %v3847_v11  ;;  %4281 = vst [vmem:[#allocation3 + $0xb8] sm:$0xff] %v4225_v25  ;;  %v3311_v8 = vsel %vm3215_vm1, %v3049_v22, %v3263_v12  ;;  %6321 = vmatprep.mubr.f32.mxu0 %v4605_v46  ;;  %v7831_v53 = vpop.f32.mrf.mxu0  ;;  %v4509_v39 = vld [vmem:[#allocation3 + $0x41] sm:$0xff] }
 0x2fe   : > { %vm11736_vm2 = vcmp.lt.s32.totalorder %v13640_v61, 16  ;;  %vm3218_vm7 = vcmp.gt.f32.partialorder %v3064_v0, 0.0  ;;  %v3266_v52 = vmul.f32 0.1, %v3064_v0  ;;  %v3059_v6 = vadd.f32 %v3058_v2, %v13643_v49  ;;  %6032 = vmatmul.mubr.f32.gmra.mxu1 %v4605_v46  ;;  %v13652_v61 = vld [vmem:[#allocation102_spill] sm:$0xff]  ;;  %6852 = vmatprep.subr.mxu0 %v11417_v50  ;;  %v5850_v49 = vld [vmem:[%s13093_s3 + $0x320] sm:$0xff] }
 0x2ff   : > { %vm13644_vm11 = vnez %v13399_v29  ;;  %v4224_v11 = vsel %vm11618_vm14, %v3311_v8, 0.0  ;;  %v11769_v22 = vmul.u32.u64.low 2863311531, %v11212_v41  ;;  %v11770_v45 = vmul.u32.u64.high 2863311531, %v11212_v41, %v11769_v22  ;;  %v3068_v46 = vpop.f32.mrf.mxu0  ;;  %6322 = vmatmul.mubr.f32.gmra.mxu0 %v4509_v39  ;;  %v4606_v8 = vld [vmem:[#allocation3 + $0x5f] sm:$0xff] }
 0x300   : > { %v13646_v26 = vsel %vm13644_vm11, %v10930_v21, %v13645_v19  ;;  %v11773_v43 = vadd.s32 368, %v9990_v10  ;;  %v5851_v21 = vld [vmem:[%s13093_s3 + $0x328] sm:$0xff]  ;;  %4280 = vst [vmem:[#allocation3 + $0xb0] sm:$0xff] %v4224_v11  ;;  %v3314_v29 = vsel %vm3218_vm7, %v3064_v0, %v3266_v52  ;;  %vm3217_vm9 = vcmp.gt.f32.partialorder %v3059_v6, 0.0  ;;  %v13653_v10 = vld [vmem:[#allocation98_spill] sm:$0xff]  ;;  %v5834_v0 = vld [vmem:[%s13093_s3 + $0x2a0] sm:$0xff]  ;;  %6326 = vmatprep.mubr.f32.mxu0 %v4606_v8 }
 0x301   : > { %vm11761_vm8 = vcmp.lt.s32.totalorder %v13646_v26, 16  ;;  %v3265_v32 = vmul.f32 0.1, %v3059_v6  ;;  %v3074_v12 = vadd.f32 %v7831_v53, %v13649_v59  ;;  %vm13651_vm14 = vnez %v13650_v5  ;;  %v13658_v26 = vld [vmem:[#allocation23_spill] sm:$0xff]  ;;  %v13661_v11 = vld [vmem:[#allocation108_spill] sm:$0xff]  ;;  %v13662_v53 = vld [vmem:[#allocation101_spill] sm:$0xff]  ;;  %6853 = vmatpush1.msra.mxu0 %v5851_v21  ;;  %v7834_v39 = vpop.f32.mrf.mxu0  ;;  %6582 = vmatpush2.msra.mxu1 %v5834_v0 }
 0x302   : > { %v13654_v25 = vsel %vm13651_vm14, %v13652_v61, %v13653_v10  ;;  %v4227_v2 = vsel %vm11647_vm6, %v3314_v29, 0.0  ;;  %vm13657_vm1 = vnez %v13520_v57  ;;  %vm3956_vm5 = vcmp.ne.s32.totalorder %v11724_v34, 0  ;;  %6854 = vmatprep.subr.mxu0 %v11417_v50  ;;  %v5849_v0 = vld [vmem:[%s13093_s3 + $0x318] sm:$0xff]  ;;  %6583 = vmatprep.subr.mxu1 %v11417_v50 }
 0x303   : > { %vm11785_vm12 = vcmp.lt.s32.totalorder %v13654_v25, 16  ;;  %8075 = vmatprep.mubr.msk.f32.mxu1 %vm13657_vm1, %v11455_v36  ;;  %vm4004_vm7 = vcmp.lt.s32.totalorder %v11724_v34, 0  ;;  %v11801_v52 = vadd.s32 24, %v11724_v34  ;;  %4283 = vst [vmem:[#allocation3 + $0xc8] sm:$0xff] %v4227_v2  ;;  %v3313_v63 = vsel %vm3217_vm9, %v3059_v6, %v3265_v32  ;;  %v13659_v36 = vld [vmem:[#allocation110_spill] sm:$0xff]  ;;  %v13667_v2 = vld [vmem:[#allocation112_spill] sm:$0xff]  ;;  %6855 = vmatpush1.msra.mxu0 %v5850_v49 }
 0x304   : > { %vm3220_vm6 = vcmp.gt.f32.partialorder %v3074_v12, 0.0  ;;  %v3268_v19 = vmul.f32 0.1, %v3074_v12  ;;  %v3069_v57 = vadd.f32 %v3068_v46, %v13658_v26  ;;  %vm13660_vm11 = vnez %v13659_v36  ;;  %v13666_v25 = vld [vmem:[#allocation26_spill] sm:$0xff]  ;;  %6037 = vmatmul.mubr.f32.gmra.mxu1 %v4606_v8  ;;  %v13669_v46 = vld [vmem:[#allocation113_spill] sm:$0xff]  ;;  %6327 = vmatmul.mubr.f32.gmra.mxu0 %v4510_v33  ;;  %v13685_v33 = vld [vmem:[#allocation28_spill] sm:$0xff] }
 0x305   : > { %v13663_v22 = vsel %vm13660_vm11, %v13661_v11, %v13662_v53  ;;  %v4226_v59 = vsel %vm11669_vm15, %v3313_v63, 0.0  ;;  %v11820_v6 = vsub.s32 %v11164_v37, %v3848_v20  ;;  %v3084_v21 = vadd.f32 %v7834_v39, %v13666_v25  ;;  %v13670_v37 = vld [vmem:[#allocation104_spill] sm:$0xff]  ;;  %v13681_v39 = vld [vmem:[#allocation105_spill] sm:$0xff]  ;;  %6856 = vmatprep.subr.mxu0 %v11417_v50 }
 0x306   : > { %vm11813_vm14 = vcmp.lt.s32.totalorder %v13663_v22, 16  ;;  %v11823_v32 = vmul.u32.u64.low 2863311531, %v11312_v54  ;;  %v11824_v5 = vmul.u32.u64.high 2863311531, %v11312_v54, %v11823_v32  ;;  %4282 = vst [vmem:[#allocation3 + $0xc0] sm:$0xff] %v4226_v59  ;;  %v3316_v61 = vsel %vm3220_vm6, %v3074_v12, %v3268_v19  ;;  %vm11841_vm6 = vmand %vm4004_vm7, %vm3956_vm5  ;;  %v3078_v19 = vpop.f32.mrf.mxu0  ;;  %v4607_v26 = vld [vmem:[#allocation3 + $0x67] sm:$0xff]  ;;  %6857 = vmatpush1.msra.mxu0 %v5849_v0  ;;  %v4613_v12 = vld [vmem:[#allocation3 + $0x97] sm:$0xff] }
 0x307   : > { %vm3219_vm9 = vcmp.gt.f32.partialorder %v3069_v57, 0.0  ;;  %v3267_v10 = vmul.f32 0.1, %v3069_v57  ;;  %vm13668_vm15 = vnez %v13667_v2  ;;  %v4229_v8 = vsel %vm11705_vm3, %v3316_v61, 0.0  ;;  %v13677_v22 = vld [vmem:[#allocation25_spill] sm:$0xff]  ;;  %6331 = vmatprep.mubr.f32.mxu0 %v4607_v26  ;;  %6858 = vmatprep.subr.mxu0 %v11417_v50 }
 0x308   : > { %v13671_v20 = vsel %vm13668_vm15, %v13669_v46, %v13670_v37  ;;  %vm13676_vm11 = vnez %v13513_v7  ;;  %v11855_v36 = vsub.s32 %v11197_v24, %v11752_v18  ;;  %4285 = vst [vmem:[#allocation3 + $0xd8] sm:$0xff] %v4229_v8  ;;  %vm3222_vm3 = vcmp.gt.f32.partialorder %v3084_v21, 0.0  ;;  %v13678_v7 = vld [vmem:[#allocation114_spill] sm:$0xff]  ;;  %v13686_v37 = vld [vmem:[#allocation116_spill] sm:$0xff] }
 0x309   : > { %vm11833_vm1 = vcmp.lt.s32.totalorder %v13671_v20, 16  ;;  %8076 = vmatprep.mubr.msk.f32.mxu1 %vm13676_vm11, %v11434_v38  ;;  %v11858_v49 = vmul.u32.u64.low 2863311531, %v11482_v60  ;;  %v11859_v11 = vmul.u32.u64.high 2863311531, %v11482_v60, %v11858_v49  ;;  %v3315_v30 = vsel %vm3219_vm9, %v3069_v57, %v3267_v10  ;;  %v13680_v38 = vld [vmem:[#allocation115_spill] sm:$0xff]  ;;  %v7837_v57 = vpop.f32.mrf.mxu0  ;;  %v5848_v10 = vld [vmem:[%s13093_s3 + $0x310] sm:$0xff]  ;;  %v13688_v20 = vld [vmem:[#allocation117_spill] sm:$0xff] }
 0x30a   : > { %v3270_v53 = vmul.f32 0.1, %v3084_v21  ;;  %v3079_v59 = vadd.f32 %v3078_v19, %v13677_v22  ;;  %vm13679_vm5 = vnez %v13678_v7  ;;  %v4228_v18 = vsel %vm11736_vm2, %v3315_v30, 0.0  ;;  %6042 = vmatmul.mubr.f32.gmra.mxu1 %v4607_v26  ;;  %v4511_v46 = vld [vmem:[#allocation3 + $0x51] sm:$0xff]  ;;  %v5847_v22 = vld [vmem:[%s13093_s3 + $0x308] sm:$0xff]  ;;  %6859 = vmatpush1.msra.mxu0 %v5848_v10 }
 0x30b   : > { %v13682_v32 = vsel %vm13679_vm5, %v13680_v38, %v13681_v39  ;;  %v4148_v61 = vsel %vm11841_vm6, %v11801_v52, %v11724_v34  ;;  %vm3959_vm9 = vcmp.ne.s32.totalorder %v11820_v6, 0  ;;  %vm4007_vm15 = vcmp.lt.s32.totalorder %v11820_v6, 0  ;;  %4284 = vst [vmem:[#allocation3 + $0xd0] sm:$0xff] %v4228_v18  ;;  %v13689_v8 = vld [vmem:[#allocation106_spill] sm:$0xff]  ;;  %v3088_v26 = vpop.f32.mrf.mxu0  ;;  %6332 = vmatmul.mubr.f32.gmra.mxu0 %v4511_v46  ;;  %8077 = vmatprep.mubr.msk.f32.mxu1 %vm11390_vm13, %v11522_v47  ;;  %v13693_v38 = vld [vmem:[#allocation27_spill] sm:$0xff] }
 0x30c   : > { %vm11869_vm7 = vcmp.lt.s32.totalorder %v13682_v32, 16  ;;  %v3318_v14 = vsel %vm3222_vm3, %v3084_v21, %v3270_v53  ;;  %vm3221_vm2 = vcmp.gt.f32.partialorder %v3079_v59, 0.0  ;;  %v3269_v25 = vmul.f32 0.1, %v3079_v59  ;;  %v5833_v21 = vld [vmem:[%s13093_s3 + $0x298] sm:$0xff]  ;;  %v4608_v30 = vld [vmem:[#allocation3 + $0x6f] sm:$0xff]  ;;  %6860 = vmatprep.subr.mxu0 %v11417_v50 }
 0x30d   : > { %v3094_v2 = vadd.f32 %v7837_v57, %v13685_v33  ;;  %vm13687_vm11 = vnez %v13686_v37  ;;  %v4231_v49 = vsel %vm11761_vm8, %v3318_v14, 0.0  ;;  %vm3958_vm3 = vcmp.ne.s32.totalorder %v11855_v36, 0  ;;  %6336 = vmatprep.mubr.f32.mxu0 %v4608_v30  ;;  %v13696_v47 = vld [vmem:[#allocation119_spill] sm:$0xff]  ;;  %v7840_v14 = vpop.f32.mrf.mxu0  ;;  %6584 = vmatpush2.msra.mxu1 %v5833_v21  ;;  %v13703_v37 = vld [vmem:[#allocation30_spill] sm:$0xff] }
 0x30e   : > { %v13690_v0 = vsel %vm13687_vm11, %v13688_v20, %v13689_v8  ;;  %v3869_v53 = vshrl.u32 %v11770_v45, 4  ;;  %4287 = vst [vmem:[#allocation3 + $0xe8] sm:$0xff] %v4231_v49  ;;  %v3317_v35 = vsel %vm3221_vm2, %v3079_v59, %v3269_v25  ;;  %v3089_v39 = vadd.f32 %v3088_v26, %v13693_v38  ;;  %v13697_v32 = vld [vmem:[#allocation107_spill] sm:$0xff]  ;;  %vm11929_vm2 = vmand %vm4007_vm15, %vm3959_vm9  ;;  %6047 = vmatmul.mubr.f32.gmra.mxu1 %v4608_v30  ;;  %v13706_v49 = vld [vmem:[#allocation120_spill] sm:$0xff] }
 0x30f   : > { %vm11893_vm5 = vcmp.lt.s32.totalorder %v13690_v0, 16  ;;  %vm3224_vm8 = vcmp.gt.f32.partialorder %v3094_v2, 0.0  ;;  %v3272_v7 = vmul.f32 0.1, %v3094_v2  ;;  %vm13695_vm13 = vnez %v13694_v28  ;;  %v4512_v8 = vld [vmem:[#allocation3 + $0x59] sm:$0xff]  ;;  %v13704_v0 = vld [vmem:[#allocation121_spill] sm:$0xff]  ;;  %6861 = vmatpush1.msra.mxu0 %v5847_v22  ;;  %v3098_v30 = vpop.f32.mrf.mxu0  ;;  %8078 = vmatprep.mubr.msk.f32.mxu1 %vm11367_vm0, %v11486_v4 }
 0x310   : > { %v13698_v18 = vsel %vm13695_vm13, %v13696_v47, %v13697_v32  ;;  %v4230_v45 = vsel %vm11785_vm12, %v3317_v35, 0.0  ;;  %v11934_v25 = vadd.s32 24, %v11820_v6  ;;  %v11937_v33 = vadd.s32 24, %v11855_v36  ;;  %v13707_v26 = vld [vmem:[#allocation109_spill] sm:$0xff]  ;;  %6337 = vmatmul.mubr.f32.gmra.mxu0 %v4512_v8  ;;  %6862 = vmatprep.subr.mxu0 %v11417_v50 }
 0x311   : > { %vm11919_vm11 = vcmp.lt.s32.totalorder %v13698_v18, 16  ;;  %v3858_v10 = vshrl.u32 %v11824_v5, 4  ;;  %4286 = vst [vmem:[#allocation3 + $0xe0] sm:$0xff] %v4230_v45  ;;  %v3320_v40 = vsel %vm3224_vm8, %v3094_v2, %v3272_v7  ;;  %vm3223_vm12 = vcmp.gt.f32.partialorder %v3089_v39, 0.0  ;;  %v5846_v2 = vld [vmem:[%s13093_s3 + $0x300] sm:$0xff]  ;;  %v4609_v7 = vld [vmem:[#allocation3 + $0x77] sm:$0xff]  ;;  %6585 = vmatprep.subr.mxu1 %v11417_v50 }
 0x312   : > { %v3271_v46 = vmul.f32 0.1, %v3089_v39  ;;  %v3104_v20 = vadd.f32 %v7840_v14, %v13703_v37  ;;  %vm13705_vm9 = vnez %v13704_v0  ;;  %vm13711_vm13 = vcmp.lt.s32.totalorder %v11855_v36, 0  ;;  %v13714_v45 = vld [vmem:[#allocation29_spill] sm:$0xff]  ;;  %6341 = vmatprep.mubr.f32.mxu0 %v4609_v7  ;;  %v13718_v37 = vld [vmem:[#allocation111_spill] sm:$0xff]  ;;  %6863 = vmatpush1.msra.mxu0 %v5846_v2 }
 0x313   : > { %v13708_v35 = vsel %vm13705_vm9, %v13706_v49, %v13707_v26  ;;  %vm11955_vm8 = vmand %vm13711_vm13, %vm3958_vm3  ;;  %v4233_v21 = vsel %vm11813_vm14, %v3320_v40, 0.0  ;;  %v3870_v28 = vmul.u32 24, %v3869_v53  ;;  %v3099_v29 = vadd.f32 %v3098_v30, %v13714_v45  ;;  %v13715_v14 = vld [vmem:[#allocation5_spill] sm:$0xff]  ;;  %v13717_v40 = vld [vmem:[#allocation122_spill] sm:$0xff]  ;;  %6052 = vmatmul.mubr.f32.gmra.mxu1 %v4609_v7  ;;  %6864 = vmatprep.subr.mxu0 %v11417_v50 }
 0x314   : > { %vm11947_vm15 = vcmp.lt.s32.totalorder %v13708_v35, 16  ;;  %v11968_v47 = vmul.u32.u64.low 2863311531, %v11609_v55  ;;  %v11969_v32 = vmul.u32.u64.high 2863311531, %v11609_v55, %v11968_v47  ;;  %4289 = vst [vmem:[#allocation3 + $0xf8] sm:$0xff] %v4233_v21  ;;  %v3319_v22 = vsel %vm3223_vm12, %v3089_v39, %v3271_v46  ;;  %v7843_v39 = vpop.f32.mrf.mxu0  ;;  %v5877_v49 = vld [vmem:[%s13093_s3 + $0x3f8] sm:$0xff]  ;;  %v13722_v35 = vld [vmem:[#allocation32_spill] sm:$0xff] }
 0x315   : > { %vm3226_vm3 = vcmp.gt.f32.partialorder %v3104_v20, 0.0  ;;  %v3274_v18 = vmul.f32 0.1, %v3104_v20  ;;  %vm13716_vm14 = vnez %v13715_v14  ;;  %v13720_v4 = vmov 0  ;;  %v4513_v30 = vld [vmem:[#allocation3 + $0x61] sm:$0xff]  ;;  %v13723_v47 = vld [vmem:[#allocation7_spill] sm:$0xff]  ;;  %6865 = vmatpush2.msra.mxu0 %v5877_v49 }
 0x316   : > { %v13719_v48 = vsel %vm13716_vm14, %v13717_v40, %v13718_v37  ;;  %v4232_v53 = vsel %vm11833_vm1, %v3319_v22, 0.0  ;;  %v4151_v46 = vsel %vm11929_vm2, %v11934_v25, %v11820_v6  ;;  %v4150_v8 = vsel %vm11955_vm8, %v11937_v33, %v11855_v36  ;;  %v13725_v22 = vld [vmem:[#allocation39_spill] sm:$0xff]  ;;  %v3108_v7 = vpop.f32.mrf.mxu0  ;;  %6342 = vmatmul.mubr.f32.gmra.mxu0 %v4513_v30  ;;  %v13730_v14 = vld [vmem:[#allocation48_spill] sm:$0xff]  ;;  %6866 = vmatprep.subr.mxu0 %v11417_v50  ;;  %v4514_v19 = vld [vmem:[#allocation3 + $0x69] sm:$0xff] }
 0x317   : > { %vm11978_vm0 = vcmp.lt.s32.totalorder %v13719_v48, 16  ;;  %v3859_v0 = vmul.u32 24, %v3858_v10  ;;  %4288 = vst [vmem:[#allocation3 + $0xf0] sm:$0xff] %v4232_v53  ;;  %v3322_v63 = vsel %vm3226_vm3, %v3104_v20, %v3274_v18  ;;  %vm3225_vm1 = vcmp.gt.f32.partialorder %v3099_v29, 0.0  ;;  %v13726_v45 = vld [vmem:[#allocation123_spill] sm:$0xff]  ;;  %v5832_v20 = vld [vmem:[%s13093_s3 + $0x290] sm:$0xff] }
 0x318   : > { %v13721_v4 = vsel %vm11978_vm0, 4294967295, %v13720_v4  ;;  %v3273_v26 = vmul.f32 0.1, %v3099_v29  ;;  %v3114_v21 = vadd.f32 %v7843_v39, %v13722_v35  ;;  %vm13724_vm12 = vnez %v13723_v47  ;;  %v4610_v40 = vld [vmem:[#allocation3 + $0x7f] sm:$0xff]  ;;  %v5876_v39 = vld [vmem:[%s13093_s3 + $0x3f0] sm:$0xff]  ;;  %6586 = vmatpush2.msra.mxu1 %v5832_v20 }
 0x319   : > { %v13727_v10 = vsel %vm13724_vm12, %v13725_v22, %v13726_v45  ;;  %v4235_v18 = vsel %vm11869_vm7, %v3322_v63, 0.0  ;;  %vm13731_vm13 = vnez %v13730_v14  ;;  %v12017_v37 = vsub.s32 %v11212_v41, %v3870_v28  ;;  %v13732_v35 = vld [vmem:[#allocation31_spill] sm:$0xff]  ;;  %6346 = vmatprep.mubr.f32.mxu0 %v4610_v40  ;;  %v13735_v41 = vld [vmem:[#allocation53_spill] sm:$0xff]  ;;  %v13736_v28 = vld [vmem:[#allocation6_spill] sm:$0xff]  ;;  %6867 = vmatpush2.msra.mxu0 %v5876_v39 }
 0x31a   : > { %vm12003_vm9 = vcmp.lt.s32.totalorder %v13727_v10, 16  ;;  %8079 = vmatprep.mubr.msk.f32.mxu1 %vm13731_vm13, %v11581_v58  ;;  %v12020_v48 = vmul.u32.u64.low 2863311531, %v11727_v13  ;;  %v12021_v53 = vmul.u32.u64.high 2863311531, %v11727_v13, %v12020_v48  ;;  %4291 = vst [vmem:[#allocation3 + $0x108] sm:$0xff] %v4235_v18  ;;  %v3321_v24 = vsel %vm3225_vm1, %v3099_v29, %v3273_v26  ;;  %v13733_v58 = vld [vmem:[#allocation46_spill] sm:$0xff]  ;;  %v7846_v10 = vpop.f32.mrf.mxu0  ;;  %6347 = vmatmul.mubr.f32.gmra.mxu0 %v4514_v19  ;;  %v4614_v5 = vld [vmem:[#allocation3 + $0x9f] sm:$0xff] }
 0x31b   : > { %vm3228_vm7 = vcmp.gt.f32.partialorder %v3114_v21, 0.0  ;;  %v3276_v63 = vmul.f32 0.1, %v3114_v21  ;;  %v3109_v30 = vadd.f32 %v3108_v7, %v13732_v35  ;;  %vm13734_vm3 = vnez %v13733_v58  ;;  %v13740_v48 = vld [vmem:[#allocation4_spill] sm:$0xff]  ;;  %6057 = vmatmul.mubr.f32.gmra.mxu1 %v4610_v40  ;;  %v13743_v35 = vld [vmem:[#allocation43_spill] sm:$0xff]  ;;  %6868 = vmatprep.subr.mxu0 %v11417_v50 }
 0x31c   : > { %v13737_v47 = vsel %vm13734_vm3, %v13735_v41, %v13736_v28  ;;  %v4234_v45 = vsel %vm11893_vm5, %v3321_v24, 0.0  ;;  %v12040_v29 = vsub.s32 %v11312_v54, %v3859_v0  ;;  %v3124_v49 = vadd.f32 %v7846_v10, %v13740_v48  ;;  %v13741_v24 = vld [vmem:[#allocation58_spill] sm:$0xff]  ;;  %v13744_v54 = vld [vmem:[#allocation41_spill] sm:$0xff]  ;;  %v13748_v40 = vld [vmem:[#allocation52_spill] sm:$0xff]  ;;  %6587 = vmatprep.subr.mxu1 %v11417_v50 }
 0x31d   : > { %vm12033_vm14 = vcmp.lt.s32.totalorder %v13737_v47, 16  ;;  %v12043_v26 = vmul.u32.u64.low 2863311531, %v11773_v43  ;;  %v12044_v18 = vmul.u32.u64.high 2863311531, %v11773_v43, %v12043_v26  ;;  %4290 = vst [vmem:[#allocation3 + $0x100] sm:$0xff] %v4234_v45  ;;  %v3324_v7 = vsel %vm3228_vm7, %v3114_v21, %v3276_v63  ;;  %v5875_v21 = vld [vmem:[%s13093_s3 + $0x3e8] sm:$0xff]  ;;  %v3118_v63 = vpop.f32.mrf.mxu0  ;;  %v13749_v41 = vld [vmem:[#allocation54_spill] sm:$0xff] }
 0x31e   : > { %vm3227_vm1 = vcmp.gt.f32.partialorder %v3109_v30, 0.0  ;;  %v3275_v14 = vmul.f32 0.1, %v3109_v30  ;;  %vm13742_vm5 = vnez %v13741_v24  ;;  %v4237_v20 = vsel %vm11919_vm11, %v3324_v7, 0.0  ;;  %v4611_v28 = vld [vmem:[#allocation3 + $0x87] sm:$0xff]  ;;  %6869 = vmatpush2.msra.mxu0 %v5875_v21 }
 0x31f   : > { %v13745_v0 = vsel %vm13742_vm5, %v13743_v35, %v13744_v54  ;;  %vm13750_vm13 = vnez %v13749_v41  ;;  %v3891_v47 = vshrl.u32 %v11859_v11, 4  ;;  %v3880_v39 = vshrl.u32 %v11969_v32, 4  ;;  %4293 = vst [vmem:[#allocation3 + $0x118] sm:$0xff] %v4237_v20  ;;  %v13751_v10 = vld [vmem:[#allocation33_spill] sm:$0xff]  ;;  %6351 = vmatprep.mubr.f32.mxu0 %v4611_v28  ;;  %v7849_v32 = vpop.f32.mrf.mxu0  ;;  %6870 = vmatprep.subr.mxu0 %v11417_v50  ;;  %v5873_v35 = vld [vmem:[%s13093_s3 + $0x3d8] sm:$0xff]  ;;  %v12122_v54 = vpop.f32.mrf.mxu1 }
 0x320   : > { %vm12053_vm12 = vcmp.lt.s32.totalorder %v13745_v0, 16  ;;  %8080 = vmatprep.mubr.msk.f32.mxu1 %vm13750_vm13, %v13748_v40  ;;  %v12069_v45 = vsel %vm3227_vm1, %v3109_v30, %v3275_v14  ;;  %vm3230_vm3 = vcmp.gt.f32.partialorder %v3124_v49, 0.0  ;;  %v3278_v57 = vmul.f32 0.1, %v3124_v49  ;;  %v4515_v14 = vld [vmem:[#allocation3 + $0x71] sm:$0xff]  ;;  %6871 = vmatpush2.msra.mxu0 %v5874_v16  ;;  %v5867_v20 = vld [vmem:[%s13093_s3 + $0x3a8] sm:$0xff] }
 0x321   : > { %v3119_v26 = vadd.f32 %v3118_v63, %v13751_v10  ;;  %vm12077_vm5 = vcmp.lt.s32.totalorder %v4147_v56, 16  ;;  %v13753_v7 = vmov 0  ;;  %v4236_v11 = vsel %vm11947_vm15, %v12069_v45, 0.0  ;;  %v13755_v56 = vld [vmem:[#allocation35_spill] sm:$0xff]  ;;  %6062 = vmatmul.mubr.f32.gmra.mxu1 %v4611_v28  ;;  %v3128_v24 = vpop.f32.mrf.mxu0  ;;  %6352 = vmatmul.mubr.f32.gmra.mxu0 %v4515_v14  ;;  %v5985_v41 = vpop.f32.mrf.mxu1 }
 0x322   : > { %v13754_v7 = vsel %vm12077_vm5, 4294967295, %v13753_v7  ;;  %vm4009_vm1 = vcmp.lt.s32.totalorder %v12017_v37, 0  ;;  %4292 = vst [vmem:[#allocation3 + $0x110] sm:$0xff] %v4236_v11  ;;  %v12093_v23 = vsel %vm3230_vm3, %v3124_v49, %v3278_v57  ;;  %v3134_v30 = vadd.f32 %v7849_v32, %v13755_v56  ;;  %v5831_v49 = vld [vmem:[%s13093_s3 + $0x288] sm:$0xff]  ;;  %6356 = vmatprep.mubr.f32.mxu0 %v4612_v9  ;;  %6872 = vmatprep.subr.mxu0 %v11417_v50  ;;  %v4424_v11 = vld [vmem:[#allocation3 + $0x98] sm:$0xff] }
 0x323   : > { %vm3229_vm11 = vcmp.gt.f32.partialorder %v3119_v26, 0.0  ;;  %v3277_v17 = vmul.f32 0.1, %v3119_v26  ;;  %vm12101_vm7 = vcmp.lt.s32.totalorder %v4146_v3, 16  ;;  %v13756_v48 = vmov 0  ;;  %v7852_v63 = vpop.f32.mrf.mxu0  ;;  %6588 = vmatpush2.msra.mxu1 %v5831_v49  ;;  %v13770_v57 = vld [vmem:[#allocation37_spill] sm:$0xff]  ;;  %6873 = vmatpush2.msra.mxu0 %v5873_v35 }
 0x324   : > { %v13757_v48 = vsel %vm12101_vm7, 4294967295, %v13756_v48  ;;  %v4239_v19 = vsel %vm11978_vm0, %v12093_v23, 0.0  ;;  %vm13758_vm3 = vnez %v13566_v31  ;;  %v12116_v27 = vadd.s32 24, %v12017_v37  ;;  %6874 = vmatprep.subr.mxu0 %v11417_v50  ;;  %6589 = vmatprep.subr.mxu1 %v11417_v50 }
 0x325   : > { %8081 = vmatprep.mubr.msk.f32.mxu1 %vm13758_vm3, %v11639_v15  ;;  %v3892_v44 = vmul.u32 24, %v3891_v47  ;;  %v3913_v3 = vshrl.u32 %v12021_v53, 4  ;;  %4295 = vst [vmem:[#allocation3 + $0x128] sm:$0xff] %v4239_v19  ;;  %v12125_v0 = vsel %vm3229_vm11, %v3119_v26, %v3277_v17  ;;  %v3280_v31 = vmul.f32 0.1, %v3134_v30  ;;  %v13759_v15 = vld [vmem:[#allocation34_spill] sm:$0xff]  ;;  %v3138_v16 = vpop.f32.mrf.mxu0 }
 0x326   : > { %v3129_v21 = vadd.f32 %v3128_v24, %v13759_v15  ;;  %vm12133_vm3 = vcmp.lt.s32.totalorder %v4149_v1, 16  ;;  %v13760_v53 = vmov 0  ;;  %vm13762_vm13 = vcmp.ne.s32.totalorder %v12017_v37, 0  ;;  %6067 = vmatmul.mubr.f32.gmra.mxu1 %v4612_v9  ;;  %v4516_v26 = vld [vmem:[#allocation3 + $0x79] sm:$0xff] }
 0x327   : > { %v13761_v53 = vsel %vm12133_vm3, 4294967295, %v13760_v53  ;;  %vm12141_vm11 = vmand %vm4009_vm1, %vm13762_vm13  ;;  %v4238_v42 = vsel %vm12003_vm9, %v12125_v0, 0.0  ;;  %vm13765_vm4 = vcmp.ne.s32.totalorder %v12040_v29, 0  ;;  %vm13766_vm10 = vcmp.lt.s32.totalorder %v12040_v29, 0  ;;  %6357 = vmatmul.mubr.f32.gmra.mxu0 %v4516_v26  ;;  %6071 = vmatprep.mubr.f32.mxu1 %v4424_v11  ;;  %v7855_v24 = vpop.f32.mrf.mxu0  ;;  %v12259_v26 = vld [vmem:[#allocation3] sm:$0xff] }
 0x328   : > { %vm12152_vm0 = vmand %vm13766_vm10, %vm13765_vm4  ;;  %v12157_v62 = vadd.s32 24, %v12040_v29  ;;  %v3881_v1 = vmul.u32 24, %v3880_v39  ;;  %v3902_v40 = vshrl.u32 %v12044_v18, 4  ;;  %4294 = vst [vmem:[#allocation3 + $0x120] sm:$0xff] %v4238_v42  ;;  %vm13769_vm1 = vcmp.gt.f32.partialorder %v3134_v30, 0.0  ;;  %v5872_v39 = vld [vmem:[%s13093_s3 + $0x3d0] sm:$0xff]  ;;  %6361 = vmatprep.mubr.f32.mxu0 %v4613_v12 }
 0x329   : > { %v12162_v28 = vsel %vm13769_vm1, %v3134_v30, %v3280_v31  ;;  %vm3231_vm13 = vcmp.gt.f32.partialorder %v3129_v21, 0.0  ;;  %v3279_v47 = vmul.f32 0.1, %v3129_v21  ;;  %v3144_v10 = vadd.f32 %v7852_v63, %v13770_v57  ;;  %v13773_v30 = vld [vmem:[#allocation36_spill] sm:$0xff]  ;;  %6875 = vmatpush2.msra.mxu0 %v5872_v39  ;;  %v4534_v38 = vld [vmem:[#allocation3 + $0x109] sm:$0xff] }
 0x32a   : > { %vm12170_vm10 = vcmp.lt.s32.totalorder %v4148_v61, 16  ;;  %v4241_v32 = vsel %vm12033_vm14, %v12162_v28, 0.0  ;;  %v4153_v34 = vsel %vm12141_vm11, %v12116_v27, %v12017_v37  ;;  %v12185_v52 = vsub.s32 %v11482_v60, %v3892_v44  ;;  %v12201_v60 = vpop.f32.mrf.mxu1  ;;  %6072 = vmatmul.mubr.f32.gmra.mxu1 %v4613_v12  ;;  %v4517_v31 = vld [vmem:[#allocation3 + $0x81] sm:$0xff]  ;;  %6876 = vmatprep.subr.mxu0 %v11417_v50 }
 0x32b   : > { %v3914_v61 = vmul.u32 24, %v3913_v3  ;;  %4297 = vst [vmem:[#allocation3 + $0x138] sm:$0xff] %v4241_v32  ;;  %v12188_v17 = vsel %vm3231_vm13, %v3129_v21, %v3279_v47  ;;  %vm3234_vm6 = vcmp.gt.f32.partialorder %v3144_v10, 0.0  ;;  %v3282_v56 = vmul.f32 0.1, %v3144_v10  ;;  %v13776_v3 = vld [vmem:[#allocation40_spill] sm:$0xff]  ;;  %6362 = vmatmul.mubr.f32.gmra.mxu0 %v4517_v31 }
 0x32c   : > { %v3139_v14 = vadd.f32 %v3138_v16, %v13773_v30  ;;  %vm12196_vm4 = vcmp.lt.s32.totalorder %v4151_v46, 16  ;;  %v4240_v19 = vsel %vm12053_vm12, %v12188_v17, 0.0  ;;  %v4152_v59 = vsel %vm12152_vm0, %v12157_v62, %v12040_v29  ;;  %v5871_v46 = vld [vmem:[%s13093_s3 + $0x3c8] sm:$0xff]  ;;  %v5830_v21 = vld [vmem:[%s13093_s3 + $0x280] sm:$0xff]  ;;  %v5990_v42 = vpop.f32.mrf.mxu1  ;;  %6366 = vmatprep.mubr.f32.mxu0 %v4614_v5 }
 0x32d   : > { %v12211_v6 = vsub.s32 %v11609_v55, %v3881_v1  ;;  %v3903_v25 = vmul.u32 24, %v3902_v40  ;;  %4296 = vst [vmem:[#allocation3 + $0x130] sm:$0xff] %v4240_v19  ;;  %v12218_v9 = vsel %vm3234_vm6, %v3144_v10, %v3282_v56  ;;  %v3154_v35 = vadd.f32 %v7855_v24, %v13776_v3  ;;  %v4425_v55 = vld [vmem:[#allocation3 + $0xa0] sm:$0xff]  ;;  %v3148_v1 = vpop.f32.mrf.mxu0  ;;  %v13779_v40 = vld [vmem:[#allocation38_spill] sm:$0xff]  ;;  %6877 = vmatpush2.msra.mxu0 %v5871_v46  ;;  %v4426_v56 = vld [vmem:[#allocation3 + $0xa8] sm:$0xff] }
 0x32e   : > { %vm3233_vm2 = vcmp.gt.f32.partialorder %v3139_v14, 0.0  ;;  %v3281_v44 = vmul.f32 0.1, %v3139_v14  ;;  %vm12226_vm1 = vcmp.lt.s32.totalorder %v4150_v8, 16  ;;  %v4243_v63 = vsel %vm12077_vm5, %v12218_v9, 0.0  ;;  %6076 = vmatprep.mubr.f32.mxu1 %v4425_v55  ;;  %v5870_v50 = vld [vmem:[%s13093_s3 + $0x3c0] sm:$0xff]  ;;  %6878 = vmatprep.subr.mxu0 %v12259_v26  ;;  %v12262_v11 = vpop.f32.mrf.mxu1 }
 0x32f   : > { %v12240_v36 = vsub.s32 %v11727_v13, %v3914_v61  ;;  %4299 = vst [vmem:[#allocation3 + $0x148] sm:$0xff] %v4243_v63  ;;  %vm3236_vm6 = vcmp.gt.f32.partialorder %v3154_v35, 0.0  ;;  %v3284_v8 = vmul.f32 0.1, %v3154_v35  ;;  %v3149_v41 = vadd.f32 %v3148_v1, %v13779_v40  ;;  %v7858_v13 = vpop.f32.mrf.mxu0  ;;  %6590 = vmatpush2.msra.mxu1 %v5830_v21  ;;  %v13780_v16 = vld [vmem:[#allocation44_spill] sm:$0xff]  ;;  %v4518_v61 = vld [vmem:[#allocation3 + $0x89] sm:$0xff]  ;;  %6879 = vmatpush2.msra.mxu0 %v5870_v50 }
 0x330   : > { %v12246_v33 = vsel %vm3233_vm2, %v3139_v14, %v3281_v44  ;;  %v12253_v57 = vadd.s32 24, %v12185_v52  ;;  %v12257_v10 = vsub.s32 %v11773_v43, %v3903_v25  ;;  %v3164_v12 = vadd.f32 %v7858_v13, %v13780_v16  ;;  %6077 = vmatmul.mubr.f32.gmra.mxu1 %v4614_v5  ;;  %v5869_v43 = vld [vmem:[%s13093_s3 + $0x3b8] sm:$0xff]  ;;  %6367 = vmatmul.mubr.f32.gmra.mxu0 %v4518_v61  ;;  %v4615_v19 = vld [vmem:[#allocation3 + $0xa7] sm:$0xff]  ;;  %v5995_v25 = vpop.f32.mrf.mxu1  ;;  %v13781_v3 = vld [vmem:[#allocation42_spill] sm:$0xff] }
 0x331   : > { %v4242_v47 = vsel %vm12101_vm7, %v12246_v33, 0.0  ;;  %v12264_v39 = vsel %vm3236_vm6, %v3154_v35, %v3284_v8  ;;  %vm3235_vm2 = vcmp.gt.f32.partialorder %v3149_v41, 0.0  ;;  %v3283_v32 = vmul.f32 0.1, %v3149_v41  ;;  %v3158_v14 = vpop.f32.mrf.mxu0  ;;  %6081 = vmatprep.mubr.f32.mxu1 %v4426_v56  ;;  %6371 = vmatprep.mubr.f32.mxu0 %v4615_v19  ;;  %v5868_v42 = vld [vmem:[%s13093_s3 + $0x3b0] sm:$0xff]  ;;  %v13786_v5 = vld [vmem:[#allocation51_spill] sm:$0xff] }
 0x332   : > { %4298 = vst [vmem:[#allocation3 + $0x140] sm:$0xff] %v4242_v47  ;;  %v4245_v30 = vsel %vm12133_vm3, %v12264_v39, 0.0  ;;  %v12275_v24 = vadd.s32 24, %v12211_v6  ;;  %vm3238_vm8 = vcmp.gt.f32.partialorder %v3164_v12, 0.0  ;;  %v3286_v44 = vmul.f32 0.1, %v3164_v12  ;;  %6880 = vmatprep.subr.mxu0 %v12259_v26  ;;  %7137 = vmatprep.subr.mxu1 %v12259_v26 }
 0x333   : > { %4301 = vst [vmem:[#allocation3 + $0x158] sm:$0xff] %v4245_v30  ;;  %v12279_v46 = vsel %vm3235_vm2, %v3149_v41, %v3283_v32  ;;  %v3159_v35 = vadd.f32 %v3158_v14, %v13781_v3  ;;  %vm13782_vm3 = vcmp.ne.s32.totalorder %v12185_v52, 0  ;;  %vm13783_vm5 = vcmp.lt.s32.totalorder %v12185_v52, 0  ;;  %v7861_v21 = vpop.f32.mrf.mxu0  ;;  %6881 = vmatpush2.msra.mxu0 %v5869_v43  ;;  %v4519_v8 = vld [vmem:[#allocation3 + $0x91] sm:$0xff]  ;;  %v4694_v13 = vld [vmem:[#allocation3 + $0x20] sm:$0xff] }
 0x334   : > { %vm12286_vm6 = vmand %vm13783_vm5, %vm13782_vm3  ;;  %v4244_v55 = vsel %vm12170_vm10, %v12279_v46, 0.0  ;;  %vm4013_vm2 = vcmp.lt.s32.totalorder %v12240_v36, 0  ;;  %v12301_v63 = vsel %vm3238_vm8, %v3164_v12, %v3286_v44  ;;  %v3174_v50 = vadd.f32 %v7861_v21, %v13786_v5  ;;  %6082 = vmatmul.mubr.f32.gmra.mxu1 %v4615_v19  ;;  %v4427_v40 = vld [vmem:[#allocation3 + $0xb0] sm:$0xff]  ;;  %6882 = vmatprep.subr.mxu0 %v12259_v26  ;;  %v5866_v44 = vld [vmem:[%s13093_s3 + $0x3a0] sm:$0xff] }
 0x335   : > { %4300 = vst [vmem:[#allocation3 + $0x150] sm:$0xff] %v4244_v55  ;;  %vm3237_vm5 = vcmp.gt.f32.partialorder %v3159_v35, 0.0  ;;  %v3285_v1 = vmul.f32 0.1, %v3159_v35  ;;  %vm13787_vm3 = vcmp.ne.s32.totalorder %v12211_v6, 0  ;;  %vm13788_vm7 = vcmp.lt.s32.totalorder %v12211_v6, 0  ;;  %v3168_v32 = vpop.f32.mrf.mxu0  ;;  %6372 = vmatmul.mubr.f32.gmra.mxu0 %v4519_v8  ;;  %6086 = vmatprep.mubr.f32.mxu1 %v4427_v40 }
 0x336   : > { %vm12308_vm13 = vmand %vm13788_vm7, %vm13787_vm3  ;;  %v4247_v47 = vsel %vm12196_vm4, %v12301_v63, 0.0  ;;  %vm12321_vm8 = vcmp.lt.s32.totalorder %v4153_v34, 16  ;;  %v4616_v16 = vld [vmem:[#allocation3 + $0xaf] sm:$0xff]  ;;  %v4155_v12 = vsel %vm12286_vm6, %v12253_v57, %v12185_v52  ;;  %v4109_v61 = vadd.s32 24, %v12240_v36  ;;  %v13793_v34 = vld [vmem:[#allocation47_spill] sm:$0xff]  ;;  %6883 = vmatpush2.msra.mxu0 %v5868_v42 }
 0x337   : > { %4303 = vst [vmem:[#allocation3 + $0x168] sm:$0xff] %v4247_v47  ;;  %v12334_v37 = vsel %vm3237_vm5, %v3159_v35, %v3285_v1  ;;  %vm3240_vm7 = vcmp.gt.f32.partialorder %v3174_v50, 0.0  ;;  %v3288_v27 = vmul.f32 0.1, %v3174_v50  ;;  %v3169_v56 = vadd.f32 %v3168_v32, %v13793_v34  ;;  %6376 = vmatprep.mubr.f32.mxu0 %v4616_v16  ;;  %v7864_v30 = vpop.f32.mrf.mxu0  ;;  %6884 = vmatprep.subr.mxu0 %v12259_v26  ;;  %v4617_v55 = vld [vmem:[#allocation3 + $0xb7] sm:$0xff]  ;;  %v13806_v5 = vld [vmem:[#allocation57_spill] sm:$0xff] }
 0x338   : > { %vm13794_vm11 = vcmp.ne.s32.totalorder %v12240_v36, 0  ;;  %v4246_v57 = vsel %vm12226_vm1, %v12334_v37, 0.0  ;;  %vm12353_vm5 = vcmp.lt.s32.totalorder %v4152_v59, 16  ;;  %v4154_v14 = vsel %vm12308_vm13, %v12275_v24, %v12211_v6  ;;  %v13803_v59 = vld [vmem:[#allocation62_spill] sm:$0xff]  ;;  %6087 = vmatmul.mubr.f32.gmra.mxu1 %v4616_v16  ;;  %v4520_v6 = vld [vmem:[#allocation3 + $0x99] sm:$0xff]  ;;  %6885 = vmatpush2.msra.mxu0 %v5867_v20  ;;  %v4521_v20 = vld [vmem:[#allocation3 + $0xa1] sm:$0xff] }
 0x339   : > { %vm12341_vm6 = vmand %vm4013_vm2, %vm13794_vm11  ;;  %vm13799_vm2 = vcmp.ne.s32.totalorder %v12257_v10, 0  ;;  %vm13800_vm3 = vcmp.lt.s32.totalorder %v12257_v10, 0  ;;  %v4108_v29 = vadd.s32 24, %v12257_v10  ;;  %4302 = vst [vmem:[#allocation3 + $0x160] sm:$0xff] %v4246_v57  ;;  %v12371_v51 = vsel %vm3240_vm7, %v3174_v50, %v3288_v27  ;;  %v4428_v24 = vld [vmem:[#allocation3 + $0xb8] sm:$0xff]  ;;  %v3178_v31 = vpop.f32.mrf.mxu0  ;;  %6377 = vmatmul.mubr.f32.gmra.mxu0 %v4520_v6  ;;  %6886 = vmatprep.subr.mxu0 %v12259_v26  ;;  %v4429_v27 = vld [vmem:[#allocation3 + $0xc0] sm:$0xff] }
 0x33a   : > { %vm12365_vm11 = vmand %vm13800_vm3, %vm13799_vm2  ;;  %vm3239_vm0 = vcmp.gt.f32.partialorder %v3169_v56, 0.0  ;;  %v3287_v62 = vmul.f32 0.1, %v3169_v56  ;;  %v3184_v25 = vadd.f32 %v7864_v30, %v13803_v59  ;;  %v4249_v3 = vsel %vm12321_vm8, %v12371_v51, 0.0  ;;  %6091 = vmatprep.mubr.f32.mxu1 %v4428_v24  ;;  %6381 = vmatprep.mubr.f32.mxu0 %v4617_v55  ;;  %v5865_v47 = vld [vmem:[%s13093_s3 + $0x398] sm:$0xff]  ;;  %v5864_v57 = vld [vmem:[%s13093_s3 + $0x390] sm:$0xff] }
 0x33b   : > { %vm12380_vm13 = vcmp.lt.s32.totalorder %v4155_v12, 16  ;;  %v4157_v21 = vsel %vm12341_vm6, %v4109_v61, %v12240_v36  ;;  %4305 = vst [vmem:[#allocation3 + $0x178] sm:$0xff] %v4249_v3  ;;  %v3179_v50 = vadd.f32 %v3178_v31, %v13806_v5  ;;  %vm12395_vm2 = vcmp.lt.s32.totalorder %v4154_v14, 16  ;;  %v7867_v36 = vpop.f32.mrf.mxu0  ;;  %6887 = vmatpush2.msra.mxu0 %v5866_v44  ;;  %v13809_v12 = vld [vmem:[#allocation71_spill] sm:$0xff]  ;;  %v4522_v24 = vld [vmem:[#allocation3 + $0xa9] sm:$0xff] }
 0x33c   : > { %v12388_v42 = vsel %vm3239_vm0, %v3169_v56, %v3287_v62  ;;  %vm3242_vm7 = vcmp.gt.f32.partialorder %v3184_v25, 0.0  ;;  %v3290_v1 = vmul.f32 0.1, %v3184_v25  ;;  %v4156_v41 = vsel %vm12365_vm11, %v4108_v29, %v12257_v10  ;;  %6092 = vmatmul.mubr.f32.gmra.mxu1 %v4617_v55  ;;  %6888 = vmatprep.subr.mxu0 %v12259_v26  ;;  %v4618_v52 = vld [vmem:[#allocation3 + $0xbf] sm:$0xff]  ;;  %v4430_v44 = vld [vmem:[#allocation3 + $0xc8] sm:$0xff]  ;;  %v4523_v5 = vld [vmem:[#allocation3 + $0xb1] sm:$0xff] }
 0x33d   : > { %v4248_v8 = vsel %vm12353_vm5, %v12388_v42, 0.0  ;;  %vm3241_vm6 = vcmp.gt.f32.partialorder %v3179_v50, 0.0  ;;  %v3289_v16 = vmul.f32 0.1, %v3179_v50  ;;  %v3194_v61 = vadd.f32 %v7867_v36, %v13809_v12  ;;  %v3188_v56 = vpop.f32.mrf.mxu0  ;;  %6382 = vmatmul.mubr.f32.gmra.mxu0 %v4521_v20  ;;  %6096 = vmatprep.mubr.f32.mxu1 %v4429_v27  ;;  %v13812_v19 = vld [vmem:[#allocation67_spill] sm:$0xff]  ;;  %v5863_v3 = vld [vmem:[%s13093_s3 + $0x388] sm:$0xff] }
 0x33e   : > { %4304 = vst [vmem:[#allocation3 + $0x170] sm:$0xff] %v4248_v8  ;;  %v3338_v32 = vsel %vm3242_vm7, %v3184_v25, %v3290_v1  ;;  %vm12409_vm3 = vcmp.lt.s32.totalorder %v4157_v21, 16  ;;  %v3189_v29 = vadd.f32 %v3188_v56, %v13812_v19  ;;  %6386 = vmatprep.mubr.f32.mxu0 %v4618_v52  ;;  %6889 = vmatpush2.msra.mxu0 %v5865_v47  ;;  %vm12422_vm0 = vcmp.lt.s32.totalorder %v4156_v41, 16  ;;  %v4619_v31 = vld [vmem:[#allocation3 + $0xc7] sm:$0xff]  ;;  %v4620_v8 = vld [vmem:[#allocation3 + $0xcf] sm:$0xff]  ;;  %v4524_v36 = vld [vmem:[#allocation3 + $0xb9] sm:$0xff] }
 0x33f   : > { %v4251_v34 = vsel %vm12380_vm13, %v3338_v32, 0.0  ;;  %v12416_v30 = vsel %vm3241_vm6, %v3179_v50, %v3289_v16  ;;  %vm3244_vm11 = vcmp.gt.f32.partialorder %v3194_v61, 0.0  ;;  %v3292_v14 = vmul.f32 0.1, %v3194_v61  ;;  %6890 = vmatprep.subr.mxu0 %v12259_v26  ;;  %v5862_v1 = vld [vmem:[%s13093_s3 + $0x380] sm:$0xff]  ;;  %v4431_v50 = vld [vmem:[#allocation3 + $0xd0] sm:$0xff] }
 0x340   : > { %4307 = vst [vmem:[#allocation3 + $0x188] sm:$0xff] %v4251_v34  ;;  %v4250_v62 = vsel %vm12395_vm2, %v12416_v30, 0.0  ;;  %vm3243_vm13 = vcmp.gt.f32.partialorder %v3189_v29, 0.0  ;;  %v3291_v6 = vmul.f32 0.1, %v3189_v29  ;;  %6097 = vmatmul.mubr.f32.gmra.mxu1 %v4618_v52  ;;  %6891 = vmatpush2.msra.mxu0 %v5864_v57  ;;  %v4432_v41 = vld [vmem:[#allocation3 + $0xd8] sm:$0xff] }
 0x341   : > { %4306 = vst [vmem:[#allocation3 + $0x180] sm:$0xff] %v4250_v62  ;;  %v3340_v25 = vsel %vm3244_vm11, %v3194_v61, %v3292_v14  ;;  %6387 = vmatmul.mubr.f32.gmra.mxu0 %v4522_v24  ;;  %6101 = vmatprep.mubr.f32.mxu1 %v4430_v44  ;;  %v4621_v47 = vld [vmem:[#allocation3 + $0xd7] sm:$0xff]  ;;  %v4525_v32 = vld [vmem:[#allocation3 + $0xc1] sm:$0xff]  ;;  %v4526_v61 = vld [vmem:[#allocation3 + $0xc9] sm:$0xff] }
 0x342   : > { %v4253_v35 = vsel %vm12409_vm3, %v3340_v25, 0.0  ;;  %v3339_v55 = vsel %vm3243_vm13, %v3189_v29, %v3291_v6  ;;  %6391 = vmatprep.mubr.f32.mxu0 %v4619_v31  ;;  %6892 = vmatprep.subr.mxu0 %v12259_v26  ;;  %v4433_v16 = vld [vmem:[#allocation3 + $0xe0] sm:$0xff]  ;;  %v4434_v20 = vld [vmem:[#allocation3 + $0xe8] sm:$0xff]  ;;  %v4527_v34 = vld [vmem:[#allocation3 + $0xd1] sm:$0xff] }
 0x343   : > { %4309 = vst [vmem:[#allocation3 + $0x198] sm:$0xff] %v4253_v35  ;;  %v4252_v21 = vsel %vm12422_vm0, %v3339_v55, 0.0  ;;  %6893 = vmatpush2.msra.mxu0 %v5863_v3  ;;  %v4622_v12 = vld [vmem:[#allocation3 + $0xdf] sm:$0xff]  ;;  %v4623_v27 = vld [vmem:[#allocation3 + $0xe7] sm:$0xff]  ;;  %v4435_v10 = vld [vmem:[#allocation3 + $0xf0] sm:$0xff] }
 0x344   : > { %4308 = vst [vmem:[#allocation3 + $0x190] sm:$0xff] %v4252_v21  ;;  %6102 = vmatmul.mubr.f32.gmra.mxu1 %v4619_v31  ;;  %6894 = vmatprep.subr.mxu0 %v12259_v26  ;;  %v4624_v56 = vld [vmem:[#allocation3 + $0xef] sm:$0xff]  ;;  %v4528_v52 = vld [vmem:[#allocation3 + $0xd9] sm:$0xff]  ;;  %v4529_v19 = vld [vmem:[#allocation3 + $0xe1] sm:$0xff] }
 0x345   : > { %6392 = vmatmul.mubr.f32.gmra.mxu0 %v4523_v5  ;;  %6106 = vmatprep.mubr.f32.mxu1 %v4431_v50  ;;  %v4436_v57 = vld [vmem:[#allocation3 + $0xf8] sm:$0xff]  ;;  %v4437_v29 = vld [vmem:[#allocation3 + $0x100] sm:$0xff]  ;;  %v4530_v59 = vld [vmem:[#allocation3 + $0xe9] sm:$0xff] }
 0x346   : > { %6396 = vmatprep.mubr.f32.mxu0 %v4620_v8  ;;  %6895 = vmatpush2.msra.mxu0 %v5862_v1  ;;  %v4625_v14 = vld [vmem:[#allocation3 + $0xf7] sm:$0xff]  ;;  %v4626_v62 = vld [vmem:[#allocation3 + $0xff] sm:$0xff]  ;;  %v4438_v25 = vld [vmem:[#allocation3 + $0x108] sm:$0xff] }
 0x347   : > { %v4627_v6 = vld [vmem:[#allocation3 + $0x107] sm:$0xff]  ;;  %v4531_v24 = vld [vmem:[#allocation3 + $0xf1] sm:$0xff]  ;;  %v4532_v3 = vld [vmem:[#allocation3 + $0xf9] sm:$0xff] }
 0x348   : > { %6107 = vmatmul.mubr.f32.gmra.mxu1 %v4620_v8  ;;  %v4628_v44 = vld [vmem:[#allocation3 + $0x10f] sm:$0xff]  ;;  %v4440_v35 = vld [vmem:[#allocation3 + $0x118] sm:$0xff]  ;;  %v4533_v55 = vld [vmem:[#allocation3 + $0x101] sm:$0xff] }
 0x349   : > { %6397 = vmatmul.mubr.f32.gmra.mxu0 %v4524_v36  ;;  %6111 = vmatprep.mubr.f32.mxu1 %v4432_v41  ;;  %v4629_v31 = vld [vmem:[#allocation3 + $0x117] sm:$0xff]  ;;  %v4630_v21 = vld [vmem:[#allocation3 + $0x11f] sm:$0xff]  ;;  %v4632_v2 = vld [vmem:[#allocation3 + $0x12f] sm:$0xff] }
 0x34a   : > { %6401 = vmatprep.mubr.f32.mxu0 %v4621_v47  ;;  %v4535_v1 = vld [vmem:[#allocation3 + $0x111] sm:$0xff]  ;;  %v4634_v58 = vld [vmem:[#allocation3 + $0x13f] sm:$0xff]  ;;  %v4635_v22 = vld [vmem:[#allocation3 + $0x147] sm:$0xff] }
 0x34b   : > { %v4638_v18 = vld [vmem:[#allocation3 + $0x15f] sm:$0xff]  ;;  %v4640_v15 = vld [vmem:[#allocation3 + $0x16f] sm:$0xff]  ;;  %v4641_v49 = vld [vmem:[#allocation3 + $0x177] sm:$0xff] }
 0x34c   : > { %6112 = vmatmul.mubr.f32.gmra.mxu1 %v4621_v47  ;;  %v4642_v43 = vld [vmem:[#allocation3 + $0x17f] sm:$0xff]  ;;  %v4643_v50 = vld [vmem:[#allocation3 + $0x187] sm:$0xff]  ;;  %v4547_v8 = vld [vmem:[#allocation3 + $0x171] sm:$0xff] }
 0x34d   : > { %6402 = vmatmul.mubr.f32.gmra.mxu0 %v4525_v32  ;;  %6116 = vmatprep.mubr.f32.mxu1 %v4433_v16  ;;  %v4790_v5 = vld [vmem:[#allocation3 + $0x21] sm:$0xff]  ;;  %v4791_v36 = vld [vmem:[#allocation3 + $0x29] sm:$0xff]  ;;  %v4548_v47 = vld [vmem:[#allocation3 + $0x179] sm:$0xff] }
 0x34e   : > { %6406 = vmatprep.mubr.f32.mxu0 %v4622_v12  ;;  %v4644_v40 = vld [vmem:[#allocation3 + $0x18f] sm:$0xff]  ;;  %v4645_v16 = vld [vmem:[#allocation3 + $0x197] sm:$0xff] }
 0x34f   : > { %v5892_v41 = vld [vmem:[%s13093_s3 + $0x470] sm:$0xff] }
 0x350   : > { %6117 = vmatmul.mubr.f32.gmra.mxu1 %v4622_v12  ;;  %v4792_v32 = vld [vmem:[#allocation3 + $0x31] sm:$0xff] }
 0x351   : > { %6407 = vmatmul.mubr.f32.gmra.mxu0 %v4526_v61  ;;  %6121 = vmatprep.mubr.f32.mxu1 %v4434_v20  ;;  %v4696_v12 = vld [vmem:[#allocation3 + $0x30] sm:$0xff]  ;;  %v5891_v61 = vld [vmem:[%s13093_s3 + $0x468] sm:$0xff] }
 0x352   : > { %6411 = vmatprep.mubr.f32.mxu0 %v4623_v27  ;;  %v4549_v20 = vld [vmem:[#allocation3 + $0x181] sm:$0xff] }
 0x354   : > { %6122 = vmatmul.mubr.f32.gmra.mxu1 %v4623_v27  ;;  %v4793_v27 = vld [vmem:[#allocation3 + $0x39] sm:$0xff] }
 0x355   : > { %6412 = vmatmul.mubr.f32.gmra.mxu0 %v4527_v34  ;;  %6126 = vmatprep.mubr.f32.mxu1 %v4435_v10  ;;  %v12495_v34 = vld [vmem:[%s13094_s4] ss:$0 sm:$0xff]  ;;  %v4982_v10 = vld [vmem:[#allocation3 + $0x38] sm:$0xff] }
 0x356   : > { %6416 = vmatprep.mubr.f32.mxu0 %v4624_v56 }
 0x358   : > { %6127 = vmatmul.mubr.f32.gmra.mxu1 %v4624_v56  ;;  %v5890_v56 = vld [vmem:[%s13093_s3 + $0x460] sm:$0xff] }
 0x359   : > { %6417 = vmatmul.mubr.f32.gmra.mxu0 %v4528_v52  ;;  %6131 = vmatprep.mubr.f32.mxu1 %v4436_v57  ;;  %v5984_v52 = vadd.f32 %v12495_v34, %v12122_v54  ;;  %v5889_v54 = vld [vmem:[%s13093_s3 + $0x458] sm:$0xff] }
 0x35a   : > { %6421 = vmatprep.mubr.f32.mxu0 %v4625_v14 }
 0x35c   : > { %6132 = vmatmul.mubr.f32.gmra.mxu1 %v4625_v14  ;;  %v4886_v14 = vld [vmem:[#allocation3 + $0x37] sm:$0xff] }
 0x35d   : > { %6422 = vmatmul.mubr.f32.gmra.mxu0 %v4529_v19  ;;  %6136 = vmatprep.mubr.f32.mxu1 %v4437_v29  ;;  %v4794_v19 = vld [vmem:[#allocation3 + $0x41] sm:$0xff] }
 0x35e   : > { %6426 = vmatprep.mubr.f32.mxu0 %v4626_v62 }
 0x360   : > { %6137 = vmatmul.mubr.f32.gmra.mxu1 %v4626_v62  ;;  %v4983_v62 = vld [vmem:[#allocation3 + $0x40] sm:$0xff] }
 0x361   : > { %6427 = vmatmul.mubr.f32.gmra.mxu0 %v4530_v59  ;;  %6141 = vmatprep.mubr.f32.mxu1 %v4438_v25 }
 0x362   : > { %6431 = vmatprep.mubr.f32.mxu0 %v4627_v6 }
 0x364   : > { %6142 = vmatmul.mubr.f32.gmra.mxu1 %v4627_v6 }
 0x365   : > { %6432 = vmatmul.mubr.f32.gmra.mxu0 %v4531_v24  ;;  %8082 = vmatprep.mubr.msk.f32.mxu1 %vm11947_vm15, %v12069_v45  ;;  %vm13815_vm15 = vnez %v13721_v4  ;;  %v4631_v45 = vld [vmem:[#allocation3 + $0x127] sm:$0xff]  ;;  %v4633_v4 = vld [vmem:[#allocation3 + $0x137] sm:$0xff]  ;;  %v5989_v24 = vadd.f32 %v12495_v34, %v12201_v60 }
 0x366   : > { %6436 = vmatprep.mubr.f32.mxu0 %v4628_v44  ;;  %v5888_v60 = vld [vmem:[%s13093_s3 + $0x450] sm:$0xff] }
 0x368   : > { %6147 = vmatmul.mubr.f32.gmra.mxu1 %v4628_v44 }
 0x369   : > { %6437 = vmatmul.mubr.f32.gmra.mxu0 %v4532_v3  ;;  %6151 = vmatprep.mubr.f32.mxu1 %v4440_v35  ;;  %v4887_v3 = vld [vmem:[#allocation3 + $0x3f] sm:$0xff]  ;;  %v4795_v35 = vld [vmem:[#allocation3 + $0x49] sm:$0xff] }
 0x36a   : > { %6441 = vmatprep.mubr.f32.mxu0 %v4629_v31 }
 0x36c   : > { %6152 = vmatmul.mubr.f32.gmra.mxu1 %v4629_v31 }
 0x36d   : > { %6442 = vmatmul.mubr.f32.gmra.mxu0 %v4533_v55  ;;  %8083 = vmatprep.mubr.msk.f32.mxu1 %vm12003_vm9, %v12125_v0  ;;  %v4536_v0 = vld [vmem:[#allocation3 + $0x119] sm:$0xff]  ;;  %vm13816_vm9 = vnez %v13757_v48  ;;  %v4636_v48 = vld [vmem:[#allocation3 + $0x14f] sm:$0xff] }
 0x36e   : > { %6446 = vmatprep.mubr.f32.mxu0 %v4630_v21  ;;  %v4984_v55 = vld [vmem:[#allocation3 + $0x48] sm:$0xff] }
 0x370   : > { %6157 = vmatmul.mubr.f32.gmra.mxu1 %v4630_v21 }
 0x371   : > { %6447 = vmatmul.mubr.f32.gmra.mxu0 %v4534_v38  ;;  %8084 = vmatprep.mubr.msk.f32.mxu1 %vm13815_vm15, %v12093_v23  ;;  %v4537_v23 = vld [vmem:[#allocation3 + $0x121] sm:$0xff] }
 0x372   : > { %6451 = vmatprep.mubr.f32.mxu0 %v4631_v45 }
 0x374   : > { %6162 = vmatmul.mubr.f32.gmra.mxu1 %v4631_v45 }
 0x375   : > { %6452 = vmatmul.mubr.f32.gmra.mxu0 %v4535_v1  ;;  %8085 = vmatprep.mubr.msk.f32.mxu1 %vm12053_vm12, %v12188_v17  ;;  %v4538_v17 = vld [vmem:[#allocation3 + $0x129] sm:$0xff]  ;;  %vm13817_vm12 = vnez %v13754_v7  ;;  %v4637_v7 = vld [vmem:[#allocation3 + $0x157] sm:$0xff]  ;;  %v5994_v1 = vadd.f32 %v12495_v34, %v12262_v11 }
 0x376   : > { %6456 = vmatprep.mubr.f32.mxu0 %v4632_v2  ;;  %v5887_v11 = vld [vmem:[%s13093_s3 + $0x448] sm:$0xff] }
 0x378   : > { %6167 = vmatmul.mubr.f32.gmra.mxu1 %v4632_v2 }
 0x379   : > { %6457 = vmatmul.mubr.f32.gmra.mxu0 %v4536_v0  ;;  %8086 = vmatprep.mubr.msk.f32.mxu1 %vm12033_vm14, %v12162_v28  ;;  %v4539_v28 = vld [vmem:[#allocation3 + $0x131] sm:$0xff]  ;;  %vm13818_vm14 = vnez %v13761_v53  ;;  %v4639_v53 = vld [vmem:[#allocation3 + $0x167] sm:$0xff] }
 0x37a   : > { %6461 = vmatprep.mubr.f32.mxu0 %v4633_v4  ;;  %v4888_v0 = vld [vmem:[#allocation3 + $0x47] sm:$0xff] }
 0x37c   : > { %6172 = vmatmul.mubr.f32.gmra.mxu1 %v4633_v4  ;;  %v4796_v4 = vld [vmem:[#allocation3 + $0x51] sm:$0xff] }
 0x37d   : > { %6462 = vmatmul.mubr.f32.gmra.mxu0 %v4537_v23  ;;  %8087 = vmatprep.mubr.msk.f32.mxu1 %vm13816_vm9, %v12246_v33  ;;  %v4540_v33 = vld [vmem:[#allocation3 + $0x139] sm:$0xff] }
 0x37e   : > { %6466 = vmatprep.mubr.f32.mxu0 %v4634_v58 }
 0x380   : > { %6177 = vmatmul.mubr.f32.gmra.mxu1 %v4634_v58  ;;  %v4985_v58 = vld [vmem:[#allocation3 + $0x50] sm:$0xff] }
 0x381   : > { %6467 = vmatmul.mubr.f32.gmra.mxu0 %v4538_v17  ;;  %8088 = vmatprep.mubr.msk.f32.mxu1 %vm13817_vm12, %v12218_v9  ;;  %v4541_v9 = vld [vmem:[#allocation3 + $0x141] sm:$0xff] }
 0x382   : > { %6471 = vmatprep.mubr.f32.mxu0 %v4635_v22 }
 0x384   : > { %6182 = vmatmul.mubr.f32.gmra.mxu1 %v4635_v22 }
 0x385   : > { %6472 = vmatmul.mubr.f32.gmra.mxu0 %v4539_v28  ;;  %8089 = vmatprep.mubr.msk.f32.mxu1 %vm12170_vm10, %v12279_v46  ;;  %v4542_v46 = vld [vmem:[#allocation3 + $0x149] sm:$0xff] }
 0x386   : > { %6476 = vmatprep.mubr.f32.mxu0 %v4636_v48 }
 0x388   : > { %6187 = vmatmul.mubr.f32.gmra.mxu1 %v4636_v48 }
 0x389   : > { %6477 = vmatmul.mubr.f32.gmra.mxu0 %v4540_v33  ;;  %8090 = vmatprep.mubr.msk.f32.mxu1 %vm13818_vm14, %v12264_v39  ;;  %v4543_v39 = vld [vmem:[#allocation3 + $0x151] sm:$0xff] }
 0x38a   : > { %6481 = vmatprep.mubr.f32.mxu0 %v4637_v7 }
 0x38c   : > { %6192 = vmatmul.mubr.f32.gmra.mxu1 %v4637_v7  ;;  %v4889_v7 = vld [vmem:[#allocation3 + $0x4f] sm:$0xff] }
 0x38d   : > { %6482 = vmatmul.mubr.f32.gmra.mxu0 %v4541_v9  ;;  %8091 = vmatprep.mubr.msk.f32.mxu1 %vm12226_vm1, %v12334_v37  ;;  %v4544_v37 = vld [vmem:[#allocation3 + $0x159] sm:$0xff] }
 0x38e   : > { %6486 = vmatprep.mubr.f32.mxu0 %v4638_v18  ;;  %v4797_v9 = vld [vmem:[#allocation3 + $0x59] sm:$0xff] }
 0x390   : > { %6197 = vmatmul.mubr.f32.gmra.mxu1 %v4638_v18 }
 0x391   : > { %6487 = vmatmul.mubr.f32.gmra.mxu0 %v4542_v46  ;;  %8092 = vmatprep.mubr.msk.f32.mxu1 %vm12196_vm4, %v12301_v63  ;;  %v4545_v63 = vld [vmem:[#allocation3 + $0x161] sm:$0xff]  ;;  %v4986_v46 = vld [vmem:[#allocation3 + $0x58] sm:$0xff] }
 0x392   : > { %6491 = vmatprep.mubr.f32.mxu0 %v4639_v53 }
 0x393   : > { %v5998_v57 = vpop.f32.mrf.mxu1 }
 0x394   : > { %6202 = vmatmul.mubr.f32.gmra.mxu1 %v4639_v53  ;;  %v5999_v48 = vadd.f32 %v12495_v34, %v5998_v57  ;;  %v4800_v57 = vld [vmem:[#allocation3 + $0x71] sm:$0xff] }
 0x395   : > { %6492 = vmatmul.mubr.f32.gmra.mxu0 %v4543_v39  ;;  %8093 = vmatprep.mubr.msk.f32.mxu1 %vm12353_vm5, %v12388_v42  ;;  %v4546_v42 = vld [vmem:[#allocation3 + $0x169] sm:$0xff]  ;;  %v6000_v25 = vpop.f32.mrf.mxu1 }
 0x396   : > { %6496 = vmatprep.mubr.f32.mxu0 %v4640_v15 }
 0x397   : > { %v6288_v29 = vpop.f32.mrf.mxu0  ;;  %v6003_v44 = vpop.f32.mrf.mxu1 }
 0x398   : > { %6207 = vmatmul.mubr.f32.gmra.mxu1 %v4640_v15  ;;  %v12503_v59 = vadd.f32 %v6288_v29, %v5984_v52  ;;  %v4892_v52 = vld [vmem:[#allocation3 + $0x67] sm:$0xff] }
 0x399   : > { %6497 = vmatmul.mubr.f32.gmra.mxu0 %v4544_v37  ;;  %8094 = vmatprep.mubr.msk.f32.mxu1 %vm12321_vm8, %v12371_v51  ;;  %v5893_v51 = vld [vmem:[%s13093_s3 + $0x478] sm:$0xff]  ;;  %v6290_v6 = vpop.f32.mrf.mxu0  ;;  %v6005_v38 = vpop.f32.mrf.mxu1  ;;  %v5886_v37 = vld [vmem:[%s13093_s3 + $0x440] sm:$0xff] }
 0x39a   : > { %6501 = vmatprep.mubr.f32.mxu0 %v4641_v49  ;;  %v5883_v6 = vld [vmem:[%s13093_s3 + $0x428] sm:$0xff] }
 0x39c   : > { %6212 = vmatmul.mubr.f32.gmra.mxu1 %v4641_v49  ;;  %v6293_v31 = vpop.f32.mrf.mxu0  ;;  %v6004_v49 = vadd.f32 %v12495_v34, %v6003_v44  ;;  %v4893_v44 = vld [vmem:[#allocation3 + $0x6f] sm:$0xff] }
 0x39d   : > { %6502 = vmatmul.mubr.f32.gmra.mxu0 %v4545_v63  ;;  %8095 = vmatprep.mubr.msk.f32.mxu1 %vm12395_vm2, %v12416_v30  ;;  %v4695_v30 = vld [vmem:[#allocation3 + $0x28] sm:$0xff]  ;;  %v12511_v21 = vadd.f32 %v6293_v31, %v5989_v24  ;;  %v4990_v31 = vld [vmem:[#allocation3 + $0x78] sm:$0xff] }
 0x39e   : > { %6506 = vmatprep.mubr.f32.mxu0 %v4642_v43  ;;  %v6295_v45 = vpop.f32.mrf.mxu0 }
 0x39f   : > { %v6008_v2 = vpop.f32.mrf.mxu1 }
 0x3a0   : > { %6217 = vmatmul.mubr.f32.gmra.mxu1 %v4642_v43  ;;  %v4890_v43 = vld [vmem:[#allocation3 + $0x57] sm:$0xff] }
 0x3a1   : > { %6507 = vmatmul.mubr.f32.gmra.mxu0 %v4546_v42  ;;  %6591 = vmatprep.mubr.f32.mxu1 %v4790_v5  ;;  %v6010_v22 = vpop.f32.mrf.mxu1  ;;  %v4798_v42 = vld [vmem:[#allocation3 + $0x61] sm:$0xff] }
 0x3a2   : > { %6511 = vmatprep.mubr.f32.mxu0 %v4643_v50  ;;  %v4987_v50 = vld [vmem:[#allocation3 + $0x60] sm:$0xff] }
 0x3a3   : > { %v6298_v23 = vpop.f32.mrf.mxu0 }
 0x3a4   : > { %6592 = vmatmul.mubr.f32.vlgmr.msra.gmra.mxu1 %v4694_v13  ;;  %v12519_v17 = vadd.f32 %v6298_v23, %v5994_v1 }
 0x3a5   : > { %6512 = vmatmul.mubr.f32.gmra.mxu0 %v4547_v8  ;;  %6596 = vmatprep.mubr.f32.mxu1 %v4791_v36  ;;  %v6300_v28 = vpop.f32.mrf.mxu0  ;;  %v5885_v36 = vld [vmem:[%s13093_s3 + $0x438] sm:$0xff] }
 0x3a6   : > { %6516 = vmatprep.mubr.f32.mxu0 %v4644_v40  ;;  %7138 = vmatpush1.msra.mxu1 %v5893_v51  ;;  %v6013_v33 = vpop.f32.mrf.mxu1  ;;  %v6009_v40 = vadd.f32 %v12495_v34, %v6008_v2 }
 0x3a7   : > { %7139 = vmatprep.subr.mxu1 %v12259_v26 }
 0x3a8   : > { %6597 = vmatmul.mubr.f32.gmra.mxu1 %v4695_v30  ;;  %v6015_v39 = vpop.f32.mrf.mxu1 }
 0x3a9   : > { %6517 = vmatmul.mubr.f32.gmra.mxu0 %v4548_v47  ;;  %6601 = vmatprep.mubr.f32.mxu1 %v4792_v32  ;;  %v4799_v47 = vld [vmem:[#allocation3 + $0x69] sm:$0xff] }
 0x3aa   : > { %6521 = vmatprep.mubr.f32.mxu0 %v4645_v16  ;;  %7140 = vmatpush1.msra.mxu1 %v5892_v41  ;;  %v6303_v18 = vpop.f32.mrf.mxu0  ;;  %v4891_v41 = vld [vmem:[#allocation3 + $0x5f] sm:$0xff]  ;;  %v4988_v16 = vld [vmem:[#allocation3 + $0x68] sm:$0xff] }
 0x3ab   : > { %7141 = vmatprep.subr.mxu1 %v12259_v26  ;;  %v12526_v53 = vadd.f32 %v6303_v18, %v5999_v48  ;;  %v5881_v48 = vld [vmem:[%s13093_s3 + $0x418] sm:$0xff]  ;;  %v4803_v18 = vld [vmem:[#allocation3 + $0x89] sm:$0xff] }
 0x3ac   : > { %6602 = vmatmul.mubr.f32.gmra.mxu1 %v4696_v12  ;;  %v6305_v15 = vpop.f32.mrf.mxu0  ;;  %v4992_v39 = vld [vmem:[#allocation3 + $0x88] sm:$0xff] }
 0x3ad   : > { %6522 = vmatmul.mubr.f32.gmra.mxu0 %v4549_v20  ;;  %6606 = vmatprep.mubr.f32.mxu1 %v4793_v27  ;;  %v5884_v27 = vld [vmem:[%s13093_s3 + $0x430] sm:$0xff] }
 0x3ae   : > { %6896 = vmatprep.mubr.f32.mxu0 %v4982_v10  ;;  %7142 = vmatpush1.msra.mxu1 %v5891_v61  ;;  %v6018_v63 = vpop.f32.mrf.mxu1 }
 0x3af   : > { %7143 = vmatprep.subr.mxu1 %v12259_v26 }
 0x3b0   : > { %6607 = vmatmul.mubr.f32.gmra.mxu1 %v4982_v10  ;;  %v6308_v5 = vpop.f32.mrf.mxu0  ;;  %v6020_v51 = vpop.f32.mrf.mxu1  ;;  %v6014_v10 = vadd.f32 %v12495_v34, %v6013_v33 }
 0x3b1   : > { %6897 = vmatmul.mubr.f32.vlgmr.msra.gmra.mxu0 %v4886_v14  ;;  %6611 = vmatprep.mubr.f32.mxu1 %v4794_v19  ;;  %v12533_v13 = vadd.f32 %v6308_v5, %v6004_v49  ;;  %v4989_v19 = vld [vmem:[#allocation3 + $0x70] sm:$0xff]  ;;  %v4896_v5 = vld [vmem:[#allocation3 + $0x87] sm:$0xff] }
 0x3b2   : > { %6901 = vmatprep.mubr.f32.mxu0 %v4983_v62  ;;  %7144 = vmatpush1.msra.mxu1 %v5890_v56  ;;  %v6310_v8 = vpop.f32.mrf.mxu0  ;;  %v6023_v30 = vpop.f32.mrf.mxu1 }
 0x3b3   : > { %7145 = vmatprep.subr.mxu1 %v12259_v26  ;;  %v6024_v1 = vadd.f32 %v12495_v34, %v6023_v30  ;;  %v4993_v8 = vld [vmem:[#allocation3 + $0x90] sm:$0xff]  ;;  %v12577_v30 = vld [vmem:[#allocation3] sm:$0xff] }
 0x3b4   : > { %6612 = vmatmul.mubr.f32.gmra.mxu1 %v4983_v62  ;;  %v6313_v32 = vpop.f32.mrf.mxu0  ;;  %v6025_v61 = vpop.f32.mrf.mxu1 }
 0x3b5   : > { %6902 = vmatmul.mubr.f32.gmra.mxu0 %v4887_v3  ;;  %6616 = vmatprep.mubr.f32.mxu1 %v4795_v35  ;;  %v12540_v12 = vadd.f32 %v6313_v32, %v6009_v40  ;;  %v4801_v3 = vld [vmem:[#allocation3 + $0x79] sm:$0xff] }
 0x3b6   : > { %6906 = vmatprep.mubr.f32.mxu0 %v4984_v55  ;;  %7146 = vmatpush1.msra.mxu1 %v5889_v54  ;;  %v6315_v20 = vpop.f32.mrf.mxu0  ;;  %v6019_v54 = vadd.f32 %v12495_v34, %v6018_v63  ;;  %v5880_v63 = vld [vmem:[%s13093_s3 + $0x410] sm:$0xff]  ;;  %v4805_v61 = vld [vmem:[#allocation3 + $0x99] sm:$0xff] }
 0x3b7   : > { %7147 = vmatprep.subr.mxu1 %v12259_v26 }
 0x3b8   : > { %6617 = vmatmul.mubr.f32.gmra.mxu1 %v4984_v55  ;;  %v6028_v56 = vpop.f32.mrf.mxu1 }
 0x3b9   : > { %6907 = vmatmul.mubr.f32.gmra.mxu0 %v4888_v0  ;;  %6621 = vmatprep.mubr.f32.mxu1 %v4796_v4  ;;  %v4894_v0 = vld [vmem:[#allocation3 + $0x77] sm:$0xff]  ;;  %v4802_v4 = vld [vmem:[#allocation3 + $0x81] sm:$0xff]  ;;  %v6029_v33 = vadd.f32 %v12495_v34, %v6028_v56 }
 0x3ba   : > { %6911 = vmatprep.mubr.f32.mxu0 %v4985_v58  ;;  %7148 = vmatpush1.msra.mxu1 %v5888_v60  ;;  %v6318_v14 = vpop.f32.mrf.mxu0  ;;  %v6030_v62 = vpop.f32.mrf.mxu1  ;;  %v5882_v60 = vld [vmem:[%s13093_s3 + $0x420] sm:$0xff] }
 0x3bb   : > { %7149 = vmatprep.subr.mxu1 %v12259_v26  ;;  %v12547_v29 = vadd.f32 %v6318_v14, %v6014_v10  ;;  %v4898_v62 = vld [vmem:[#allocation3 + $0x97] sm:$0xff] }
 0x3bc   : > { %6622 = vmatmul.mubr.f32.gmra.mxu1 %v4985_v58  ;;  %v6320_v25 = vpop.f32.mrf.mxu0  ;;  %v4991_v58 = vld [vmem:[#allocation3 + $0x80] sm:$0xff] }
 0x3bd   : > { %6912 = vmatmul.mubr.f32.gmra.mxu0 %v4889_v7  ;;  %6626 = vmatprep.mubr.f32.mxu1 %v4797_v9  ;;  %v4895_v9 = vld [vmem:[#allocation3 + $0x7f] sm:$0xff] }
 0x3be   : > { %6916 = vmatprep.mubr.f32.mxu0 %v4986_v46  ;;  %7150 = vmatpush1.msra.mxu1 %v5887_v11  ;;  %v6033_v24 = vpop.f32.mrf.mxu1  ;;  %v4806_v25 = vld [vmem:[#allocation3 + $0xa1] sm:$0xff] }
 0x3bf   : > { %7151 = vmatprep.subr.mxu1 %v12259_v26  ;;  %v6323_v35 = vpop.f32.mrf.mxu0 }
 0x3c0   : > { %6627 = vmatmul.mubr.f32.gmra.mxu1 %v4986_v46  ;;  %v12554_v55 = vadd.f32 %v6323_v35, %v6019_v54  ;;  %v6035_v38 = vpop.f32.mrf.mxu1  ;;  %v4995_v54 = vld [vmem:[#allocation3 + $0xa0] sm:$0xff]  ;;  %v5909_v35 = vld [vmem:[%s13093_s3 + $0x4f8] sm:$0xff] }
 0x3c1   : > { %6917 = vmatmul.mubr.f32.gmra.mxu0 %v4890_v43  ;;  %6631 = vmatprep.mubr.f32.mxu1 %v4798_v42  ;;  %v6325_v45 = vpop.f32.mrf.mxu0  ;;  %v6034_v43 = vadd.f32 %v12495_v34, %v6033_v24 }
 0x3c2   : > { %6921 = vmatprep.mubr.f32.mxu0 %v4987_v50  ;;  %7152 = vmatpush1.msra.mxu1 %v5886_v37  ;;  %v4899_v45 = vld [vmem:[#allocation3 + $0x9f] sm:$0xff] }
 0x3c3   : > { %7153 = vmatprep.subr.mxu1 %v12259_v26 }
 0x3c4   : > { %6632 = vmatmul.mubr.f32.gmra.mxu1 %v4987_v50  ;;  %v6038_v2 = vpop.f32.mrf.mxu1  ;;  %v6328_v23 = vpop.f32.mrf.mxu0  ;;  %v4804_v50 = vld [vmem:[#allocation3 + $0x91] sm:$0xff] }
 0x3c5   : > { %6922 = vmatmul.mubr.f32.gmra.mxu0 %v4891_v41  ;;  %6636 = vmatprep.mubr.f32.mxu1 %v4799_v47  ;;  %v12561_v22 = vadd.f32 %v6328_v23, %v6024_v1  ;;  %v5879_v41 = vld [vmem:[%s13093_s3 + $0x408] sm:$0xff]  ;;  %v6039_v47 = vadd.f32 %v12495_v34, %v6038_v2 }
 0x3c6   : > { %6926 = vmatprep.mubr.f32.mxu0 %v4988_v16  ;;  %7154 = vmatpush1.msra.mxu1 %v5885_v36  ;;  %v6040_v28 = vpop.f32.mrf.mxu1  ;;  %v6330_v11 = vpop.f32.mrf.mxu0  ;;  %v4996_v2 = vld [vmem:[#allocation3 + $0xa8] sm:$0xff] }
 0x3c7   : > { %7155 = vmatprep.subr.mxu1 %v12259_v26 }
 0x3c8   : > { %6637 = vmatmul.mubr.f32.gmra.mxu1 %v4988_v16  ;;  %v4897_v16 = vld [vmem:[#allocation3 + $0x8f] sm:$0xff] }
 0x3c9   : > { %6927 = vmatmul.mubr.f32.gmra.mxu0 %v4892_v52  ;;  %6641 = vmatprep.mubr.f32.mxu1 %v4800_v57  ;;  %v5878_v57 = vld [vmem:[%s13093_s3 + $0x400] sm:$0xff] }
 0x3ca   : > { %6931 = vmatprep.mubr.f32.mxu0 %v4989_v19  ;;  %7156 = vmatpush1.msra.mxu1 %v5884_v27  ;;  %v6043_v7 = vpop.f32.mrf.mxu1  ;;  %v4994_v27 = vld [vmem:[#allocation3 + $0x98] sm:$0xff] }
 0x3cb   : > { %7157 = vmatprep.subr.mxu1 %v12259_v26  ;;  %v6333_v46 = vpop.f32.mrf.mxu0  ;;  %v6044_v14 = vadd.f32 %v12495_v34, %v6043_v7 }
 0x3cc   : > { %6642 = vmatmul.mubr.f32.gmra.mxu1 %v4989_v19  ;;  %v12568_v15 = vadd.f32 %v6333_v46, %v6029_v33  ;;  %v6045_v37 = vpop.f32.mrf.mxu1  ;;  %v4808_v33 = vld [vmem:[#allocation3 + $0xb1] sm:$0xff] }
 0x3cd   : > { %6932 = vmatmul.mubr.f32.gmra.mxu0 %v4893_v44  ;;  %6646 = vmatprep.mubr.f32.mxu1 %v4801_v3  ;;  %v6335_v49 = vpop.f32.mrf.mxu0  ;;  %v5907_v37 = vld [vmem:[%s13093_s3 + $0x4e8] sm:$0xff] }
 0x3ce   : > { %6936 = vmatprep.mubr.f32.mxu0 %v4990_v31  ;;  %7158 = vmatpush1.msra.mxu1 %v5883_v6  ;;  %v6048_v42 = vpop.f32.mrf.mxu1 }
 0x3cf   : > { %7159 = vmatprep.subr.mxu1 %v12259_v26 }
 0x3d0   : > { %6647 = vmatmul.mubr.f32.gmra.mxu1 %v4990_v31  ;;  %v6338_v51 = vpop.f32.mrf.mxu0  ;;  %v6050_v40 = vpop.f32.mrf.mxu1  ;;  %v6049_v31 = vadd.f32 %v12495_v34, %v6048_v42  ;;  %v4809_v42 = vld [vmem:[#allocation3 + $0xb9] sm:$0xff] }
 0x3d1   : > { %6937 = vmatmul.mubr.f32.gmra.mxu0 %v4894_v0  ;;  %6651 = vmatprep.mubr.f32.mxu1 %v4802_v4  ;;  %v12575_v36 = vadd.f32 %v6338_v51, %v6034_v43  ;;  %v4901_v43 = vld [vmem:[#allocation3 + $0xaf] sm:$0xff] }
 0x3d2   : > { %6941 = vmatprep.mubr.f32.mxu0 %v4991_v58  ;;  %7160 = vmatpush1.msra.mxu1 %v5882_v60  ;;  %v4807_v60 = vld [vmem:[#allocation3 + $0xa9] sm:$0xff] }
 0x3d3   : > { %7161 = vmatprep.subr.mxu1 %v12259_v26  ;;  %v6053_v32 = vpop.f32.mrf.mxu1 }
 0x3d4   : > { %6652 = vmatmul.mubr.f32.gmra.mxu1 %v4991_v58  ;;  %v5908_v58 = vld [vmem:[%s13093_s3 + $0x4f0] sm:$0xff]  ;;  %v6054_v28 = vadd.f32 %v12495_v34, %v6053_v32 }
 0x3d5   : > { %6942 = vmatmul.mubr.f32.gmra.mxu0 %v4895_v9  ;;  %6656 = vmatprep.mubr.f32.mxu1 %v4803_v18  ;;  %v6055_v56 = vpop.f32.mrf.mxu1  ;;  %v4997_v9 = vld [vmem:[#allocation3 + $0xb0] sm:$0xff] }
 0x3d6   : > { %6946 = vmatprep.mubr.f32.mxu0 %v4992_v39  ;;  %7162 = vmatpush1.msra.mxu1 %v5881_v48  ;;  %v4900_v48 = vld [vmem:[#allocation3 + $0xa7] sm:$0xff]  ;;  %v4902_v32 = vld [vmem:[#allocation3 + $0xb7] sm:$0xff] }
 0x3d7   : > { %7163 = vmatprep.subr.mxu1 %v12259_v26  ;;  %v6340_v26 = vpop.f32.mrf.mxu0 }
 0x3d8   : > { %6657 = vmatmul.mubr.f32.gmra.mxu1 %v4992_v39  ;;  %v5906_v26 = vld [vmem:[%s13093_s3 + $0x4e0] sm:$0xff] }
 0x3d9   : > { %6947 = vmatmul.mubr.f32.gmra.mxu0 %v4896_v5  ;;  %6661 = vmatprep.mubr.f32.mxu1 %v4804_v50  ;;  %v6343_v20 = vpop.f32.mrf.mxu0  ;;  %v4998_v50 = vld [vmem:[#allocation3 + $0xb8] sm:$0xff] }
 0x3da   : > { %6951 = vmatprep.mubr.f32.mxu0 %v4993_v8  ;;  %7164 = vmatpush1.msra.mxu1 %v5880_v63  ;;  %v12584_v10 = vadd.f32 %v6343_v20, %v6039_v47  ;;  %v4999_v20 = vld [vmem:[#allocation3 + $0xc0] sm:$0xff] }
 0x3db   : > { %7165 = vmatprep.subr.mxu1 %v12577_v30  ;;  %v6345_v52 = vpop.f32.mrf.mxu0  ;;  %v6058_v19 = vpop.f32.mrf.mxu1 }
 0x3dc   : > { %6662 = vmatmul.mubr.f32.gmra.mxu1 %v4993_v8  ;;  %v6059_v49 = vadd.f32 %v12495_v34, %v6058_v19 }
 0x3dd   : > { %6952 = vmatmul.mubr.f32.gmra.mxu0 %v4897_v16  ;;  %6666 = vmatprep.mubr.f32.mxu1 %v4805_v61  ;;  %v6348_v6 = vpop.f32.mrf.mxu0  ;;  %v6060_v44 = vpop.f32.mrf.mxu1  ;;  %v4810_v16 = vld [vmem:[#allocation3 + $0xc1] sm:$0xff] }
 0x3de   : > { %6956 = vmatprep.mubr.f32.mxu0 %v4994_v27  ;;  %7166 = vmatpush1.msra.mxu1 %v5879_v41  ;;  %v12591_v24 = vadd.f32 %v6348_v6, %v6044_v14 }
 0x3df   : > { %7167 = vmatprep.subr.mxu1 %v12577_v30  ;;  %v6350_v3 = vpop.f32.mrf.mxu0 }
 0x3e0   : > { %6667 = vmatmul.mubr.f32.gmra.mxu1 %v4994_v27 }
 0x3e1   : > { %6957 = vmatmul.mubr.f32.gmra.mxu0 %v4898_v62  ;;  %6671 = vmatprep.mubr.f32.mxu1 %v4806_v25  ;;  %v6063_v38 = vpop.f32.mrf.mxu1  ;;  %v6353_v1 = vpop.f32.mrf.mxu0  ;;  %v4903_v62 = vld [vmem:[#allocation3 + $0xbf] sm:$0xff]  ;;  %v4811_v25 = vld [vmem:[#allocation3 + $0xc9] sm:$0xff] }
 0x3e2   : > { %6961 = vmatprep.mubr.f32.mxu0 %v4995_v54  ;;  %7168 = vmatpush1.msra.mxu1 %v5878_v57  ;;  %v12598_v0 = vadd.f32 %v6353_v1, %v6049_v31  ;;  %v6064_v41 = vadd.f32 %v12495_v34, %v6063_v38  ;;  %v5905_v57 = vld [vmem:[%s13093_s3 + $0x4d8] sm:$0xff]  ;;  %v5904_v31 = vld [vmem:[%s13093_s3 + $0x4d0] sm:$0xff] }
 0x3e3   : > { %7169 = vmatprep.subr.mxu1 %v12577_v30  ;;  %v6065_v4 = vpop.f32.mrf.mxu1  ;;  %v6355_v23 = vpop.f32.mrf.mxu0  ;;  %v4812_v1 = vld [vmem:[#allocation3 + $0xd1] sm:$0xff] }
 0x3e4   : > { %6672 = vmatmul.mubr.f32.gmra.mxu1 %v4995_v54  ;;  %v5000_v54 = vld [vmem:[#allocation3 + $0xc8] sm:$0xff]  ;;  %v5001_v4 = vld [vmem:[#allocation3 + $0xd0] sm:$0xff] }
 0x3e5   : > { %6962 = vmatmul.mubr.f32.gmra.mxu0 %v4899_v45  ;;  %6676 = vmatprep.mubr.f32.mxu1 %v4807_v60  ;;  %v4904_v60 = vld [vmem:[#allocation3 + $0xc7] sm:$0xff] }
 0x3e6   : > { %6966 = vmatprep.mubr.f32.mxu0 %v4996_v2  ;;  %7170 = vmatpush2.msra.mxu1 %v5909_v35  ;;  %v6068_v11 = vpop.f32.mrf.mxu1 }
 0x3e7   : > { %7171 = vmatprep.subr.mxu1 %v12577_v30  ;;  %v6358_v7 = vpop.f32.mrf.mxu0  ;;  %v6069_v14 = vadd.f32 %v12495_v34, %v6068_v11  ;;  %v5903_v11 = vld [vmem:[%s13093_s3 + $0x4c8] sm:$0xff] }
 0x3e8   : > { %6677 = vmatmul.mubr.f32.gmra.mxu1 %v4996_v2  ;;  %v12605_v18 = vadd.f32 %v6358_v7, %v6054_v28  ;;  %v6070_v46 = vpop.f32.mrf.mxu1  ;;  %v4905_v7 = vld [vmem:[#allocation3 + $0xcf] sm:$0xff] }
 0x3e9   : > { %6967 = vmatmul.mubr.f32.gmra.mxu0 %v4900_v48  ;;  %6681 = vmatprep.mubr.f32.mxu1 %v4808_v33  ;;  %v6360_v39 = vpop.f32.mrf.mxu0 }
 0x3ea   : > { %6971 = vmatprep.mubr.f32.mxu0 %v4997_v9  ;;  %7172 = vmatpush2.msra.mxu1 %v5908_v58  ;;  %v6073_v63 = vpop.f32.mrf.mxu1  ;;  %v5002_v39 = vld [vmem:[#allocation3 + $0xd8] sm:$0xff] }
 0x3eb   : > { %7173 = vmatprep.subr.mxu1 %v12577_v30  ;;  %v6363_v5 = vpop.f32.mrf.mxu0  ;;  %v6074_v38 = vadd.f32 %v12495_v34, %v6073_v63 }
 0x3ec   : > { %6682 = vmatmul.mubr.f32.gmra.mxu1 %v4997_v9  ;;  %v12612_v51 = vadd.f32 %v6363_v5, %v6059_v49  ;;  %v6075_v8 = vpop.f32.mrf.mxu1  ;;  %v4813_v9 = vld [vmem:[#allocation3 + $0xd9] sm:$0xff] }
 0x3ed   : > { %6972 = vmatmul.mubr.f32.gmra.mxu0 %v4901_v43  ;;  %6686 = vmatprep.mubr.f32.mxu1 %v4809_v42  ;;  %v6365_v40 = vpop.f32.mrf.mxu0  ;;  %v5902_v43 = vld [vmem:[%s13093_s3 + $0x4c0] sm:$0xff] }
 0x3ee   : > { %6976 = vmatprep.mubr.f32.mxu0 %v4998_v50  ;;  %7174 = vmatpush2.msra.mxu1 %v5907_v37  ;;  %v4814_v8 = vld [vmem:[#allocation3 + $0xe1] sm:$0xff] }
 0x3ef   : > { %7175 = vmatprep.subr.mxu1 %v12577_v30 }
 0x3f0   : > { %v6078_v47 = vpop.f32.mrf.mxu1  ;;  %6687 = vmatmul.mubr.f32.gmra.mxu1 %v4998_v50  ;;  %v6368_v61 = vpop.f32.mrf.mxu0  ;;  %v4906_v50 = vld [vmem:[#allocation3 + $0xd7] sm:$0xff] }
 0x3f1   : > { %6977 = vmatmul.mubr.f32.gmra.mxu0 %v4902_v32  ;;  %6691 = vmatprep.mubr.f32.mxu1 %v4810_v16  ;;  %v12619_v27 = vadd.f32 %v6368_v61, %v6064_v41  ;;  %v6079_v48 = vadd.f32 %v12495_v34, %v6078_v47  ;;  %v5901_v16 = vld [vmem:[%s13093_s3 + $0x4b8] sm:$0xff] }
 0x3f2   : > { %6981 = vmatprep.mubr.f32.mxu0 %v4999_v20  ;;  %v6080_v56 = vpop.f32.mrf.mxu1  ;;  %7176 = vmatpush2.msra.mxu1 %v5906_v26  ;;  %v6370_v52 = vpop.f32.mrf.mxu0  ;;  %v5003_v26 = vld [vmem:[#allocation3 + $0xe0] sm:$0xff] }
 0x3f3   : > { %7177 = vmatprep.subr.mxu1 %v12577_v30  ;;  %v4907_v56 = vld [vmem:[#allocation3 + $0xdf] sm:$0xff]  ;;  %v4815_v52 = vld [vmem:[#allocation3 + $0xe9] sm:$0xff] }
 0x3f4   : > { %v6083_v19 = vpop.f32.mrf.mxu1  ;;  %6692 = vmatmul.mubr.f32.gmra.mxu1 %v4999_v20 }
 0x3f5   : > { %v6373_v6 = vpop.f32.mrf.mxu0  ;;  %6982 = vmatmul.mubr.f32.gmra.mxu0 %v4903_v62  ;;  %6696 = vmatprep.mubr.f32.mxu1 %v4811_v25  ;;  %v6084_v42 = vadd.f32 %v12495_v34, %v6083_v19 }
 0x3f6   : > { %v12626_v44 = vadd.f32 %v6373_v6, %v6069_v14  ;;  %6986 = vmatprep.mubr.f32.mxu0 %v5000_v54  ;;  %v6085_v3 = vpop.f32.mrf.mxu1  ;;  %7178 = vmatpush2.msra.mxu1 %v5905_v57  ;;  %v5004_v14 = vld [vmem:[#allocation3 + $0xe8] sm:$0xff]  ;;  %v5900_v6 = vld [vmem:[%s13093_s3 + $0x4b0] sm:$0xff] }
 0x3f7   : > { %v6375_v35 = vpop.f32.mrf.mxu0  ;;  %7179 = vmatprep.subr.mxu1 %v12577_v30 }
 0x3f8   : > { %v6088_v45 = vpop.f32.mrf.mxu1  ;;  %6697 = vmatmul.mubr.f32.gmra.mxu1 %v5000_v54  ;;  %v4908_v35 = vld [vmem:[#allocation3 + $0xe7] sm:$0xff] }
 0x3f9   : > { %v6378_v2 = vpop.f32.mrf.mxu0  ;;  %6987 = vmatmul.mubr.f32.gmra.mxu0 %v4904_v60  ;;  %6701 = vmatprep.mubr.f32.mxu1 %v4812_v1  ;;  %v6089_v61 = vadd.f32 %v12495_v34, %v6088_v45  ;;  %v5005_v45 = vld [vmem:[#allocation3 + $0xf0] sm:$0xff] }
 0x3fa   : > { %v12633_v23 = vadd.f32 %v6378_v2, %v6074_v38  ;;  %6991 = vmatprep.mubr.f32.mxu0 %v5001_v4  ;;  %v6090_v58 = vpop.f32.mrf.mxu1  ;;  %7180 = vmatpush2.msra.mxu1 %v5904_v31  ;;  %v4816_v31 = vld [vmem:[#allocation3 + $0xf1] sm:$0xff] }
 0x3fb   : > { %v6380_v28 = vpop.f32.mrf.mxu0  ;;  %7181 = vmatprep.subr.mxu1 %v12577_v30 }
 0x3fc   : > { %v6093_v33 = vpop.f32.mrf.mxu1  ;;  %6702 = vmatmul.mubr.f32.gmra.mxu1 %v5001_v4  ;;  %v5899_v4 = vld [vmem:[%s13093_s3 + $0x4a8] sm:$0xff] }
 0x3fd   : > { %v6383_v46 = vpop.f32.mrf.mxu0  ;;  %6992 = vmatmul.mubr.f32.gmra.mxu0 %v4905_v7  ;;  %6706 = vmatprep.mubr.f32.mxu1 %v4813_v9  ;;  %v6094_v54 = vadd.f32 %v12495_v34, %v6093_v33  ;;  %v5006_v7 = vld [vmem:[#allocation3 + $0xf8] sm:$0xff] }
 0x3fe   : > { %v12640_v37 = vadd.f32 %v6383_v46, %v6079_v48  ;;  %6996 = vmatprep.mubr.f32.mxu0 %v5002_v39  ;;  %v6095_v49 = vpop.f32.mrf.mxu1  ;;  %7182 = vmatpush2.msra.mxu1 %v5903_v11  ;;  %v4909_v11 = vld [vmem:[#allocation3 + $0xef] sm:$0xff]  ;;  %v4817_v48 = vld [vmem:[#allocation3 + $0xf9] sm:$0xff] }
 0x3ff   : > { %v6385_v63 = vpop.f32.mrf.mxu0  ;;  %7183 = vmatprep.subr.mxu1 %v12577_v30  ;;  %v5898_v49 = vld [vmem:[%s13093_s3 + $0x4a0] sm:$0xff] }
 0x400   : > { %v6098_v5 = vpop.f32.mrf.mxu1  ;;  %6707 = vmatmul.mubr.f32.gmra.mxu1 %v5002_v39 }
 0x401   : > { %v6388_v40 = vpop.f32.mrf.mxu0  ;;  %6997 = vmatmul.mubr.f32.gmra.mxu0 %v4906_v50  ;;  %6711 = vmatprep.mubr.f32.mxu1 %v4814_v8  ;;  %v6099_v58 = vadd.f32 %v12495_v34, %v6098_v5  ;;  %v4818_v5 = vld [vmem:[#allocation3 + $0x101] sm:$0xff] }
 0x402   : > { %v12647_v41 = vadd.f32 %v6388_v40, %v6084_v42  ;;  %7001 = vmatprep.mubr.f32.mxu0 %v5003_v26  ;;  %v6100_v47 = vpop.f32.mrf.mxu1  ;;  %7184 = vmatpush2.msra.mxu1 %v5902_v43  ;;  %v4910_v42 = vld [vmem:[#allocation3 + $0xf7] sm:$0xff]  ;;  %v5007_v8 = vld [vmem:[#allocation3 + $0x100] sm:$0xff] }
 0x403   : > { %v6390_v32 = vpop.f32.mrf.mxu0  ;;  %7185 = vmatprep.subr.mxu1 %v12577_v30 }
 0x404   : > { %v6103_v20 = vpop.f32.mrf.mxu1  ;;  %6712 = vmatmul.mubr.f32.gmra.mxu1 %v5003_v26  ;;  %v5897_v32 = vld [vmem:[%s13093_s3 + $0x498] sm:$0xff] }
 0x405   : > { %v6393_v57 = vpop.f32.mrf.mxu0  ;;  %7002 = vmatmul.mubr.f32.gmra.mxu0 %v4907_v56  ;;  %6716 = vmatprep.mubr.f32.mxu1 %v4815_v52  ;;  %v6104_v63 = vadd.f32 %v12495_v34, %v6103_v20  ;;  %v4911_v20 = vld [vmem:[#allocation3 + $0xff] sm:$0xff]  ;;  %v4819_v56 = vld [vmem:[#allocation3 + $0x109] sm:$0xff] }
 0x406   : > { %v12654_v19 = vadd.f32 %v6393_v57, %v6089_v61  ;;  %7006 = vmatprep.mubr.f32.mxu0 %v5004_v14  ;;  %v6105_v62 = vpop.f32.mrf.mxu1  ;;  %7186 = vmatpush2.msra.mxu1 %v5901_v16  ;;  %v5008_v57 = vld [vmem:[#allocation3 + $0x108] sm:$0xff] }
 0x407   : > { %v6395_v25 = vpop.f32.mrf.mxu0  ;;  %7187 = vmatprep.subr.mxu1 %v12577_v30 }
 0x408   : > { %v6108_v3 = vpop.f32.mrf.mxu1  ;;  %6717 = vmatmul.mubr.f32.gmra.mxu1 %v5004_v14 }
 0x409   : > { %v6398_v38 = vpop.f32.mrf.mxu0  ;;  %7007 = vmatmul.mubr.f32.gmra.mxu0 %v4908_v35  ;;  %6721 = vmatprep.mubr.f32.mxu1 %v4816_v31  ;;  %v6109_v16 = vadd.f32 %v12495_v34, %v6108_v3  ;;  %v4912_v35 = vld [vmem:[#allocation3 + $0x107] sm:$0xff]  ;;  %v4820_v31 = vld [vmem:[#allocation3 + $0x111] sm:$0xff] }
 0x40a   : > { %v12661_v60 = vadd.f32 %v6398_v38, %v6094_v54  ;;  %7011 = vmatprep.mubr.f32.mxu0 %v5005_v45  ;;  %v6110_v1 = vpop.f32.mrf.mxu1  ;;  %7188 = vmatpush2.msra.mxu1 %v5900_v6  ;;  %v5896_v6 = vld [vmem:[%s13093_s3 + $0x490] sm:$0xff] }
 0x40b   : > { %v6400_v2 = vpop.f32.mrf.mxu0  ;;  %7189 = vmatprep.subr.mxu1 %v12577_v30 }
 0x40c   : > { %v6113_v28 = vpop.f32.mrf.mxu1  ;;  %6722 = vmatmul.mubr.f32.gmra.mxu1 %v5005_v45  ;;  %v5009_v45 = vld [vmem:[#allocation3 + $0x110] sm:$0xff] }
 0x40d   : > { %v6403_v33 = vpop.f32.mrf.mxu0  ;;  %7012 = vmatmul.mubr.f32.gmra.mxu0 %v4909_v11  ;;  %6726 = vmatprep.mubr.f32.mxu1 %v4817_v48  ;;  %v6114_v54 = vadd.f32 %v12495_v34, %v6113_v28  ;;  %v4913_v48 = vld [vmem:[#allocation3 + $0x10f] sm:$0xff] }
 0x40e   : > { %v12668_v9 = vadd.f32 %v6403_v33, %v6099_v58  ;;  %7016 = vmatprep.mubr.f32.mxu0 %v5006_v7  ;;  %v6115_v46 = vpop.f32.mrf.mxu1  ;;  %7190 = vmatpush2.msra.mxu1 %v5899_v4  ;;  %v5895_v58 = vld [vmem:[%s13093_s3 + $0x488] sm:$0xff]  ;;  %v4821_v33 = vld [vmem:[#allocation3 + $0x119] sm:$0xff] }
 0x40f   : > { %v6405_v39 = vpop.f32.mrf.mxu0  ;;  %7191 = vmatprep.subr.mxu1 %v12577_v30  ;;  %v5010_v46 = vld [vmem:[#allocation3 + $0x118] sm:$0xff] }
 0x410   : > { %v6118_v43 = vpop.f32.mrf.mxu1  ;;  %6727 = vmatmul.mubr.f32.gmra.mxu1 %v5006_v7 }
 0x411   : > { %v6408_v50 = vpop.f32.mrf.mxu0  ;;  %7017 = vmatmul.mubr.f32.gmra.mxu0 %v4910_v42  ;;  %6731 = vmatprep.mubr.f32.mxu1 %v4818_v5  ;;  %v6119_v28 = vadd.f32 %v12495_v34, %v6118_v43  ;;  %v5894_v43 = vld [vmem:[%s13093_s3 + $0x480] sm:$0xff] }
 0x412   : > { %v12675_v40 = vadd.f32 %v6408_v50, %v6104_v63  ;;  %7021 = vmatprep.mubr.f32.mxu0 %v5007_v8  ;;  %v6120_v26 = vpop.f32.mrf.mxu1  ;;  %7192 = vmatpush2.msra.mxu1 %v5898_v49  ;;  %v4914_v50 = vld [vmem:[#allocation3 + $0x117] sm:$0xff] }
 0x413   : > { %v6410_v47 = vpop.f32.mrf.mxu0  ;;  %7193 = vmatprep.subr.mxu1 %v12577_v30 }
 0x414   : > { %v6123_v61 = vpop.f32.mrf.mxu1  ;;  %6732 = vmatmul.mubr.f32.gmra.mxu1 %v5007_v8  ;;  %v4822_v8 = vld [vmem:[#allocation3 + $0x121] sm:$0xff] }
 0x415   : > { %v6413_v52 = vpop.f32.mrf.mxu0  ;;  %7022 = vmatmul.mubr.f32.gmra.mxu0 %v4911_v20  ;;  %6736 = vmatprep.mubr.f32.mxu1 %v4819_v56  ;;  %v6124_v42 = vadd.f32 %v12495_v34, %v6123_v61  ;;  %v5011_v47 = vld [vmem:[#allocation3 + $0x120] sm:$0xff]  ;;  %v4823_v61 = vld [vmem:[#allocation3 + $0x129] sm:$0xff] }
 0x416   : > { %v12682_v14 = vadd.f32 %v6413_v52, %v6109_v16  ;;  %7026 = vmatprep.mubr.f32.mxu0 %v5008_v57  ;;  %v6125_v62 = vpop.f32.mrf.mxu1  ;;  %7194 = vmatpush2.msra.mxu1 %v5897_v32 }
 0x417   : > { %v6415_v25 = vpop.f32.mrf.mxu0  ;;  %7195 = vmatprep.subr.mxu1 %v12577_v30 }
 0x418   : > { %v6128_v3 = vpop.f32.mrf.mxu1  ;;  %6737 = vmatmul.mubr.f32.gmra.mxu1 %v5008_v57  ;;  %v4915_v57 = vld [vmem:[#allocation3 + $0x11f] sm:$0xff]  ;;  %v5012_v25 = vld [vmem:[#allocation3 + $0x128] sm:$0xff] }
 0x419   : > { %v6418_v38 = vpop.f32.mrf.mxu0  ;;  %7027 = vmatmul.mubr.f32.gmra.mxu0 %v4912_v35  ;;  %6741 = vmatprep.mubr.f32.mxu1 %v4820_v31  ;;  %v6129_v56 = vadd.f32 %v12495_v34, %v6128_v3 }
 0x41a   : > { %v12689_v1 = vadd.f32 %v6418_v38, %v6114_v54  ;;  %7031 = vmatprep.mubr.f32.mxu0 %v5009_v45  ;;  %v6130_v2 = vpop.f32.mrf.mxu1  ;;  %7196 = vmatpush2.msra.mxu1 %v5896_v6 }
 0x41b   : > { %v6420_v4 = vpop.f32.mrf.mxu0  ;;  %7197 = vmatprep.subr.mxu1 %v12577_v30  ;;  %v4824_v2 = vld [vmem:[#allocation3 + $0x131] sm:$0xff] }
 0x41c   : > { %v6133_v11 = vpop.f32.mrf.mxu1  ;;  %6742 = vmatmul.mubr.f32.gmra.mxu1 %v5009_v45  ;;  %v4916_v45 = vld [vmem:[#allocation3 + $0x127] sm:$0xff]  ;;  %v5013_v4 = vld [vmem:[#allocation3 + $0x130] sm:$0xff] }
 0x41d   : > { %v6423_v7 = vpop.f32.mrf.mxu0  ;;  %7032 = vmatmul.mubr.f32.gmra.mxu0 %v4913_v48  ;;  %6746 = vmatprep.mubr.f32.mxu1 %v4821_v33  ;;  %v6134_v31 = vadd.f32 %v12495_v34, %v6133_v11 }
 0x41e   : > { %v12696_v39 = vadd.f32 %v6423_v7, %v6119_v28  ;;  %7036 = vmatprep.mubr.f32.mxu0 %v5010_v46  ;;  %v6135_v49 = vpop.f32.mrf.mxu1  ;;  %7198 = vmatpush2.msra.mxu1 %v5895_v58 }
 0x41f   : > { %v6425_v63 = vpop.f32.mrf.mxu0  ;;  %7199 = vmatprep.subr.mxu1 %v12577_v30  ;;  %v4825_v49 = vld [vmem:[#allocation3 + $0x139] sm:$0xff] }
 0x420   : > { %v6138_v5 = vpop.f32.mrf.mxu1  ;;  %6747 = vmatmul.mubr.f32.gmra.mxu1 %v5010_v46  ;;  %v4917_v46 = vld [vmem:[#allocation3 + $0x12f] sm:$0xff]  ;;  %v5014_v63 = vld [vmem:[#allocation3 + $0x138] sm:$0xff] }
 0x421   : > { %v6428_v26 = vpop.f32.mrf.mxu0  ;;  %7037 = vmatmul.mubr.f32.gmra.mxu0 %v4914_v50  ;;  %6751 = vmatprep.mubr.f32.mxu1 %v4822_v8  ;;  %v6139_v33 = vadd.f32 %v12495_v34, %v6138_v5 }
 0x422   : > { %v12703_v32 = vadd.f32 %v6428_v26, %v6124_v42  ;;  %7041 = vmatprep.mubr.f32.mxu0 %v5011_v47  ;;  %v6140_v16 = vpop.f32.mrf.mxu1  ;;  %7200 = vmatpush2.msra.mxu1 %v5894_v43 }
 0x423   : > { %v6430_v20 = vpop.f32.mrf.mxu0  ;;  %v4826_v16 = vld [vmem:[#allocation3 + $0x141] sm:$0xff] }
 0x424   : > { %v6143_v52 = vpop.f32.mrf.mxu1  ;;  %6752 = vmatmul.mubr.f32.gmra.mxu1 %v5011_v47  ;;  %v4918_v47 = vld [vmem:[#allocation3 + $0x137] sm:$0xff]  ;;  %v5015_v20 = vld [vmem:[#allocation3 + $0x140] sm:$0xff] }
 0x425   : > { %v6433_v62 = vpop.f32.mrf.mxu0  ;;  %7042 = vmatmul.mubr.f32.gmra.mxu0 %v4915_v57  ;;  %6756 = vmatprep.mubr.f32.mxu1 %v4823_v61  ;;  %v6144_v8 = vadd.f32 %v12495_v34, %v6143_v52 }
 0x426   : > { %v12706_v6 = vadd.f32 %v6433_v62, %v6129_v56  ;;  %7046 = vmatprep.mubr.f32.mxu0 %v5012_v25  ;;  %v6145_v54 = vpop.f32.mrf.mxu1  ;;  %v12720_v62 = vld [vmem:[%s13094_s4] ss:$0 sm:$0xff] }
 0x427   : > { %v6435_v35 = vpop.f32.mrf.mxu0  ;;  %v4827_v54 = vld [vmem:[#allocation3 + $0x149] sm:$0xff] }
 0x428   : > { %v6148_v38 = vpop.f32.mrf.mxu1  ;;  %6757 = vmatmul.mubr.f32.gmra.mxu1 %v5012_v25  ;;  %v4919_v25 = vld [vmem:[#allocation3 + $0x13f] sm:$0xff] }
 0x429   : > { %v6438_v3 = vpop.f32.mrf.mxu0  ;;  %7047 = vmatmul.mubr.f32.gmra.mxu0 %v4916_v45  ;;  %6761 = vmatprep.mubr.f32.mxu1 %v4824_v2  ;;  %v6149_v34 = vadd.f32 %v12720_v62, %v6148_v38 }
 0x42a   : > { %v12709_v58 = vadd.f32 %v6438_v3, %v6134_v31  ;;  %7051 = vmatprep.mubr.f32.mxu0 %v5013_v4  ;;  %v6150_v28 = vpop.f32.mrf.mxu1  ;;  %v5016_v31 = vld [vmem:[#allocation3 + $0x148] sm:$0xff] }
 0x42b   : > { %v6440_v48 = vpop.f32.mrf.mxu0 }
 0x42c   : > { %v6153_v7 = vpop.f32.mrf.mxu1  ;;  %6762 = vmatmul.mubr.f32.gmra.mxu1 %v5013_v4  ;;  %v4920_v48 = vld [vmem:[#allocation3 + $0x147] sm:$0xff] }
 0x42d   : > { %v6443_v11 = vpop.f32.mrf.mxu0  ;;  %7052 = vmatmul.mubr.f32.gmra.mxu0 %v4917_v46  ;;  %6766 = vmatprep.mubr.f32.mxu1 %v4825_v49  ;;  %v6154_v4 = vadd.f32 %v12720_v62, %v6153_v7  ;;  %v5017_v46 = vld [vmem:[#allocation3 + $0x150] sm:$0xff] }
 0x42e   : > { %v12712_v43 = vadd.f32 %v6443_v11, %v6139_v33  ;;  %7056 = vmatprep.mubr.f32.mxu0 %v5014_v63  ;;  %v6155_v42 = vpop.f32.mrf.mxu1  ;;  %v4828_v33 = vld [vmem:[#allocation3 + $0x151] sm:$0xff] }
 0x42f   : > { %v6445_v50 = vpop.f32.mrf.mxu0 }
 0x430   : > { %v6158_v26 = vpop.f32.mrf.mxu1  ;;  %6767 = vmatmul.mubr.f32.gmra.mxu1 %v5014_v63 }
 0x431   : > { %v6448_v5 = vpop.f32.mrf.mxu0  ;;  %7057 = vmatmul.mubr.f32.gmra.mxu0 %v4918_v47  ;;  %6771 = vmatprep.mubr.f32.mxu1 %v4826_v16  ;;  %v6159_v42 = vadd.f32 %v12720_v62, %v6158_v26  ;;  %v4829_v47 = vld [vmem:[#allocation3 + $0x159] sm:$0xff] }
 0x432   : > { %v12715_v56 = vadd.f32 %v6448_v5, %v6144_v8  ;;  %7061 = vmatprep.mubr.f32.mxu0 %v5015_v20  ;;  %v6160_v57 = vpop.f32.mrf.mxu1  ;;  %v4921_v8 = vld [vmem:[#allocation3 + $0x14f] sm:$0xff]  ;;  %v5018_v16 = vld [vmem:[#allocation3 + $0x158] sm:$0xff] }
 0x433   : > { %v6450_v61 = vpop.f32.mrf.mxu0 }
 0x434   : > { %v6163_v52 = vpop.f32.mrf.mxu1  ;;  %6772 = vmatmul.mubr.f32.gmra.mxu1 %v5015_v20 }
 0x435   : > { %v6453_v35 = vpop.f32.mrf.mxu0  ;;  %7062 = vmatmul.mubr.f32.gmra.mxu0 %v4919_v25  ;;  %6776 = vmatprep.mubr.f32.mxu1 %v4827_v54  ;;  %v6164_v61 = vadd.f32 %v12720_v62, %v6163_v52  ;;  %v4922_v25 = vld [vmem:[#allocation3 + $0x157] sm:$0xff]  ;;  %v4830_v54 = vld [vmem:[#allocation3 + $0x161] sm:$0xff] }
 0x436   : > { %v12723_v45 = vadd.f32 %v6453_v35, %v6149_v34  ;;  %7066 = vmatprep.mubr.f32.mxu0 %v5016_v31  ;;  %v6165_v2 = vpop.f32.mrf.mxu1  ;;  %v5019_v35 = vld [vmem:[#allocation3 + $0x160] sm:$0xff] }
 0x437   : > { %v6455_v3 = vpop.f32.mrf.mxu0 }
 0x438   : > { %v6168_v28 = vpop.f32.mrf.mxu1  ;;  %6777 = vmatmul.mubr.f32.gmra.mxu1 %v5016_v31 }
 0x439   : > { %v6458_v38 = vpop.f32.mrf.mxu0  ;;  %7067 = vmatmul.mubr.f32.gmra.mxu0 %v4920_v48  ;;  %6781 = vmatprep.mubr.f32.mxu1 %v4828_v33  ;;  %v4923_v33 = vld [vmem:[#allocation3 + $0x15f] sm:$0xff] }
 0x43a   : > { %v12726_v49 = vadd.f32 %v6458_v38, %v6154_v4  ;;  %7071 = vmatprep.mubr.f32.mxu0 %v5017_v46  ;;  %v6170_v11 = vpop.f32.mrf.mxu1  ;;  %v6169_v4 = vadd.f32 %v12720_v62, %v6168_v28  ;;  %v4831_v38 = vld [vmem:[#allocation3 + $0x169] sm:$0xff] }
 0x43b   : > { %v6460_v63 = vpop.f32.mrf.mxu0 }
 0x43c   : > { %v6173_v50 = vpop.f32.mrf.mxu1  ;;  %6782 = vmatmul.mubr.f32.gmra.mxu1 %v5017_v46  ;;  %v5020_v46 = vld [vmem:[#allocation3 + $0x168] sm:$0xff] }
 0x43d   : > { %v6463_v7 = vpop.f32.mrf.mxu0  ;;  %7072 = vmatmul.mubr.f32.gmra.mxu0 %v4921_v8  ;;  %6786 = vmatprep.mubr.f32.mxu1 %v4829_v47  ;;  %v6174_v8 = vadd.f32 %v12720_v62, %v6173_v50  ;;  %v4925_v50 = vld [vmem:[#allocation3 + $0x16f] sm:$0xff] }
 0x43e   : > { %v12729_v5 = vadd.f32 %v6463_v7, %v6159_v42  ;;  %7076 = vmatprep.mubr.f32.mxu0 %v5018_v16  ;;  %v6175_v20 = vpop.f32.mrf.mxu1  ;;  %v4924_v7 = vld [vmem:[#allocation3 + $0x167] sm:$0xff] }
 0x43f   : > { %v6465_v57 = vpop.f32.mrf.mxu0  ;;  %v5021_v20 = vld [vmem:[#allocation3 + $0x170] sm:$0xff] }
 0x440   : > { %v6178_v34 = vpop.f32.mrf.mxu1  ;;  %6787 = vmatmul.mubr.f32.gmra.mxu1 %v5018_v16  ;;  %v12738_v16 = vld [vmem:[#allocation3 + $0x171] sm:$0xff] }
 0x441   : > { %v6468_v26 = vpop.f32.mrf.mxu0  ;;  %7077 = vmatmul.mubr.f32.gmra.mxu0 %v4922_v25  ;;  %6791 = vmatprep.mubr.f32.mxu1 %v4830_v54  ;;  %v6179_v54 = vadd.f32 %v12720_v62, %v6178_v34  ;;  %v4926_v34 = vld [vmem:[#allocation3 + $0x177] sm:$0xff] }
 0x442   : > { %v12732_v31 = vadd.f32 %v6468_v26, %v6164_v61  ;;  %7081 = vmatprep.mubr.f32.mxu0 %v5019_v35  ;;  %v6180_v2 = vpop.f32.mrf.mxu1 }
 0x443   : > { %v6470_v3 = vpop.f32.mrf.mxu0 }
 0x444   : > { %v6183_v48 = vpop.f32.mrf.mxu1  ;;  %6792 = vmatmul.mubr.f32.gmra.mxu1 %v5019_v35  ;;  %v12744_v35 = vld [vmem:[#allocation3 + $0x179] sm:$0xff] }
 0x445   : > { %v6473_v52 = vpop.f32.mrf.mxu0  ;;  %7082 = vmatmul.mubr.f32.gmra.mxu0 %v4923_v33  ;;  %6796 = vmatprep.mubr.f32.mxu1 %v4831_v38  ;;  %v5022_v3 = vld [vmem:[#allocation3 + $0x178] sm:$0xff] }
 0x446   : > { %v12735_v11 = vadd.f32 %v6473_v52, %v6169_v4  ;;  %7086 = vmatprep.mubr.f32.mxu0 %v5020_v46  ;;  %v6185_v63 = vpop.f32.mrf.mxu1  ;;  %v6184_v52 = vadd.f32 %v12720_v62, %v6183_v48  ;;  %v4927_v48 = vld [vmem:[#allocation3 + $0x17f] sm:$0xff] }
 0x447   : > { %v6475_v42 = vpop.f32.mrf.mxu0  ;;  %v12750_v63 = vld [vmem:[#allocation3 + $0x181] sm:$0xff] }
 0x448   : > { %v6188_v47 = vpop.f32.mrf.mxu1  ;;  %6797 = vmatmul.mubr.f32.gmra.mxu1 %v5020_v46 }
 0x449   : > { %v6478_v28 = vpop.f32.mrf.mxu0  ;;  %7087 = vmatmul.mubr.f32.gmra.mxu0 %v4924_v7  ;;  %6801 = vmatprep.mubr.f32.mxu1 %v12738_v16 }
 0x44a   : > { %v12741_v57 = vadd.f32 %v6478_v28, %v6174_v8  ;;  %7091 = vmatprep.mubr.f32.mxu0 %v5021_v20  ;;  %v6190_v61 = vpop.f32.mrf.mxu1  ;;  %v5023_v8 = vld [vmem:[#allocation3 + $0x180] sm:$0xff] }
 0x44b   : > { %v6480_v25 = vpop.f32.mrf.mxu0  ;;  %v6189_v61 = vadd.f32 %v12720_v62, %v6188_v47  ;;  %v4928_v47 = vld [vmem:[#allocation3 + $0x187] sm:$0xff] }
 0x44c   : > { %v6193_v26 = vpop.f32.mrf.mxu1  ;;  %6802 = vmatmul.mubr.f32.gmra.mxu1 %v5021_v20 }
 0x44d   : > { %v6483_v2 = vpop.f32.mrf.mxu0  ;;  %7092 = vmatmul.mubr.f32.gmra.mxu0 %v4925_v50  ;;  %6806 = vmatprep.mubr.f32.mxu1 %v12744_v35 }
 0x44e   : > { %v12747_v4 = vadd.f32 %v6483_v2, %v6179_v54  ;;  %7096 = vmatprep.mubr.f32.mxu0 %v5022_v3  ;;  %v6195_v33 = vpop.f32.mrf.mxu1  ;;  %v12756_v54 = vld [vmem:[#allocation3 + $0x189] sm:$0xff] }
 0x44f   : > { %v6485_v38 = vpop.f32.mrf.mxu0  ;;  %13819 = vst [vmem:[#allocation45_spill] sm:$0xff] %v12756_v54  ;;  %v5024_v2 = vld [vmem:[#allocation3 + $0x188] sm:$0xff] }
 0x450   : > { %v6198_v46 = vpop.f32.mrf.mxu1  ;;  %6807 = vmatmul.mubr.f32.gmra.mxu1 %v5022_v3 }
 0x451   : > { %v6488_v42 = vpop.f32.mrf.mxu0  ;;  %7097 = vmatmul.mubr.f32.gmra.mxu0 %v4926_v34  ;;  %6811 = vmatprep.mubr.f32.mxu1 %v12750_v63 }
 0x452   : > { %v12753_v7 = vadd.f32 %v6488_v42, %v6184_v52  ;;  %7101 = vmatprep.mubr.f32.mxu0 %v5023_v8  ;;  %v6200_v28 = vpop.f32.mrf.mxu1  ;;  %v6194_v52 = vadd.f32 %v12720_v62, %v6193_v26  ;;  %v12762_v42 = vld [vmem:[#allocation3 + $0x191] sm:$0xff] }
 0x453   : > { %v6490_v20 = vpop.f32.mrf.mxu0  ;;  %13821 = vst [vmem:[#allocation55_spill] sm:$0xff] %v12762_v42  ;;  %v5025_v28 = vld [vmem:[#allocation3 + $0x190] sm:$0xff] }
 0x454   : > { %v6203_v25 = vpop.f32.mrf.mxu1  ;;  %6812 = vmatmul.mubr.f32.gmra.mxu1 %v5023_v8  ;;  %v4929_v26 = vld [vmem:[#allocation3 + $0x18f] sm:$0xff] }
 0x455   : > { %v6493_v50 = vpop.f32.mrf.mxu0  ;;  %7102 = vmatmul.mubr.f32.gmra.mxu0 %v4927_v48  ;;  %6816 = vmatprep.mubr.f32.mxu1 %v12756_v54 }
 0x456   : > { %v12759_v3 = vadd.f32 %v6493_v50, %v6189_v61  ;;  %7106 = vmatprep.mubr.f32.mxu0 %v5024_v2  ;;  %v6205_v33 = vpop.f32.mrf.mxu1  ;;  %v6199_v50 = vadd.f32 %v12720_v62, %v6198_v46 }
 0x457   : > { %v6495_v38 = vpop.f32.mrf.mxu0 }
 0x458   : > { %13820 = vst [vmem:[#allocation59_spill] sm:$0xff] %v12759_v3  ;;  %v6208_v34 = vpop.f32.mrf.mxu1  ;;  %6817 = vmatmul.mubr.f32.gmra.mxu1 %v5024_v2  ;;  %v12768_v2 = vld [vmem:[#allocation3 + $0x199] sm:$0xff] }
 0x459   : > { %v6498_v8 = vpop.f32.mrf.mxu0  ;;  %7107 = vmatmul.mubr.f32.gmra.mxu0 %v4928_v47  ;;  %6821 = vmatprep.mubr.f32.mxu1 %v12762_v42  ;;  %13823 = vst [vmem:[#allocation8_spill] sm:$0xff] %v12768_v2  ;;  %v5026_v47 = vld [vmem:[#allocation3 + $0x198] sm:$0xff] }
 0x45a   : > { %v12765_v20 = vadd.f32 %v6498_v8, %v6194_v52  ;;  %7111 = vmatprep.mubr.f32.mxu0 %v5025_v28  ;;  %v6210_v61 = vpop.f32.mrf.mxu1  ;;  %v5174_v8 = vld [vmem:[%s8391_s24 + $0x19] sm:$0xff] }
 0x45b   : > { %v6500_v48 = vpop.f32.mrf.mxu0 }
 0x45c   : > { %13822 = vst [vmem:[#allocation49_spill] sm:$0xff] %v12765_v20  ;;  %v6213_v33 = vpop.f32.mrf.mxu1  ;;  %6822 = vmatmul.mubr.f32.gmra.mxu1 %v5025_v28  ;;  %v6204_v48 = vadd.f32 %v12720_v62, %v6203_v25  ;;  %v4930_v28 = vld [vmem:[#allocation3 + $0x197] sm:$0xff] }
 0x45d   : > { %v6503_v38 = vpop.f32.mrf.mxu0  ;;  %7112 = vmatmul.mubr.f32.gmra.mxu0 %v4929_v26  ;;  %6826 = vmatprep.mubr.f32.mxu1 %v12768_v2  ;;  %v5078_v2 = vld [vmem:[#allocation3 + $0x39] sm:$0xff] }
 0x45e   : > { %v12771_v42 = vadd.f32 %v6503_v38, %v6199_v50  ;;  %7116 = vmatprep.mubr.f32.mxu0 %v5026_v47  ;;  %v6215_v52 = vpop.f32.mrf.mxu1  ;;  %v5175_v50 = vld [vmem:[%s8391_s24 + $0x21] sm:$0xff] }
 0x45f   : > { %v6505_v61 = vpop.f32.mrf.mxu0  ;;  %v6209_v52 = vadd.f32 %v12720_v62, %v6208_v34  ;;  %v6214_v34 = vadd.f32 %v12720_v62, %v6213_v33 }
 0x460   : > { %13824 = vst [vmem:[#allocation61_spill] sm:$0xff] %v12771_v42  ;;  %v6218_v46 = vpop.f32.mrf.mxu1  ;;  %6827 = vmatmul.mubr.f32.gmra.mxu1 %v5026_v47  ;;  %v4931_v42 = vld [vmem:[#allocation3 + $0x19f] sm:$0xff] }
 0x461   : > { %v6508_v20 = vpop.f32.mrf.mxu0  ;;  %7117 = vmatmul.mubr.f32.gmra.mxu0 %v4930_v28  ;;  %7201 = vmatprep.mubr.f32.mxu1 %v5174_v8  ;;  %v5176_v28 = vld [vmem:[%s8391_s24 + $0x29] sm:$0xff] }
 0x462   : > { %v12775_v54 = vadd.f32 %v6508_v20, %v6204_v48  ;;  %v6220_v26 = vpop.f32.mrf.mxu1  ;;  %7121 = vmatprep.mubr.f32.mxu0 %v12577_v30  ;;  %v4932_v48 = vld [vmem:[#allocation3 + $0x1a7] sm:$0xff] }
 0x463   : > { %v6510_v38 = vpop.f32.mrf.mxu0 }
 0x464   : > { %13825 = vst [vmem:[#allocation60_spill] sm:$0xff] %v12775_v54  ;;  %v6593_v61 = vpop.f32.mrf.mxu1  ;;  %7202 = vmatmul.mubr.f32.vlgmr.msra.gmra.mxu1 %v5078_v2  ;;  %v5079_v38 = vld [vmem:[#allocation3 + $0x41] sm:$0xff] }
 0x465   : > { %v6513_v25 = vpop.f32.mrf.mxu0  ;;  %v6594_v47 = vadd.f32 %v6593_v61, %v12503_v59  ;;  %7122 = vmatmul.mubr.f32.gmra.mxu0 %v4931_v42  ;;  %7206 = vmatprep.mubr.f32.mxu1 %v5175_v50  ;;  %v8066_v50 = vld [vmem:[#allocation3] sm:$0xff] }
 0x466   : > { %v12781_v8 = vadd.f32 %v6513_v25, %v6209_v52  ;;  %v6595_v20 = vpop.f32.mrf.mxu1  ;;  %7126 = vmatprep.mubr.f32.mxu0 %v12577_v30  ;;  %v4933_v30 = vld [vmem:[#allocation3 + $0x1af] sm:$0xff] }
 0x467   : > { %v6515_v26 = vpop.f32.mrf.mxu0  ;;  %v5177_v52 = vld [vmem:[%s8391_s24 + $0x31] sm:$0xff]  ;;  %v5080_v25 = vld [vmem:[#allocation3 + $0x49] sm:$0xff]  ;;  %v6219_v20 = vadd.f32 %v12720_v62, %v6218_v46 }
 0x468   : > { %v6598_v54 = vpop.f32.mrf.mxu1  ;;  %7207 = vmatmul.mubr.f32.gmra.mxu1 %v5079_v38 }
 0x469   : > { %v6518_v2 = vpop.f32.mrf.mxu0  ;;  %v6599_v3 = vadd.f32 %v6598_v54, %v12511_v21  ;;  %7127 = vmatmul.mubr.f32.gmra.mxu0 %v4932_v48  ;;  %7211 = vmatprep.mubr.f32.mxu1 %v5176_v28  ;;  %v5178_v28 = vld [vmem:[%s8391_s24 + $0x39] sm:$0xff] }
 0x46a   : > { %v12787_v59 = vadd.f32 %v6518_v2, %v6214_v34  ;;  %v6600_v42 = vpop.f32.mrf.mxu1  ;;  %7131 = vmatprep.mubr.f32.mxu0 %v8066_v50  ;;  %v5081_v34 = vld [vmem:[#allocation3 + $0x51] sm:$0xff] }
 0x46b   : > { %v6520_v61 = vpop.f32.mrf.mxu0 }
 0x46c   : > { %v6603_v33 = vpop.f32.mrf.mxu1  ;;  %7212 = vmatmul.mubr.f32.gmra.mxu1 %v5080_v25  ;;  %v5179_v61 = vld [vmem:[%s8391_s24 + $0x41] sm:$0xff] }
 0x46d   : > { %v6523_v26 = vpop.f32.mrf.mxu0  ;;  %v6604_v21 = vadd.f32 %v6603_v33, %v12519_v17  ;;  %7132 = vmatmul.mubr.f32.gmra.mxu0 %v4933_v30  ;;  %7216 = vmatprep.mubr.f32.mxu1 %v5177_v52  ;;  %v5082_v30 = vld [vmem:[#allocation3 + $0x59] sm:$0xff] }
 0x46e   : > { %v12792_v54 = vadd.f32 %v6523_v26, %v6219_v20  ;;  %v6605_v48 = vpop.f32.mrf.mxu1 }
 0x46f   : > { %v6525_v38 = vpop.f32.mrf.mxu0  ;;  %v5180_v48 = vld [vmem:[%s8391_s24 + $0x49] sm:$0xff] }
 0x470   : > { %v6608_v2 = vpop.f32.mrf.mxu1  ;;  %7217 = vmatmul.mubr.f32.gmra.mxu1 %v5081_v34  ;;  %v5083_v38 = vld [vmem:[#allocation3 + $0x61] sm:$0xff] }
 0x471   : > { %v6609_v42 = vadd.f32 %v6608_v2, %v12526_v53  ;;  %v6898_v62 = vpop.f32.mrf.mxu0  ;;  %7221 = vmatprep.mubr.f32.mxu1 %v5178_v28 }
 0x472   : > { %v12796_v46 = vadd.f32 %v6898_v62, %v6594_v47  ;;  %v6610_v50 = vpop.f32.mrf.mxu1 }
 0x473   : > { %v6900_v17 = vpop.f32.mrf.mxu0  ;;  %v5181_v50 = vld [vmem:[%s8391_s24 + $0x51] sm:$0xff] }
 0x474   : > { %v6613_v52 = vpop.f32.mrf.mxu1  ;;  %7222 = vmatmul.mubr.f32.gmra.mxu1 %v5082_v30  ;;  %v5084_v17 = vld [vmem:[#allocation3 + $0x69] sm:$0xff] }
 0x475   : > { %v6614_v25 = vadd.f32 %v6613_v52, %v12533_v13  ;;  %v6903_v20 = vpop.f32.mrf.mxu0  ;;  %7226 = vmatprep.mubr.f32.mxu1 %v5179_v61 }
 0x476   : > { %v12800_v33 = vadd.f32 %v6903_v20, %v6599_v3  ;;  %v6615_v26 = vpop.f32.mrf.mxu1 }
 0x477   : > { %v6905_v53 = vpop.f32.mrf.mxu0  ;;  %v5182_v26 = vld [vmem:[%s8391_s24 + $0x59] sm:$0xff] }
 0x478   : > { %v6618_v28 = vpop.f32.mrf.mxu1  ;;  %7227 = vmatmul.mubr.f32.gmra.mxu1 %v5083_v38  ;;  %v5085_v53 = vld [vmem:[#allocation3 + $0x71] sm:$0xff] }
 0x479   : > { %v6619_v47 = vadd.f32 %v6618_v28, %v12540_v12  ;;  %v6908_v34 = vpop.f32.mrf.mxu0  ;;  %7231 = vmatprep.mubr.f32.mxu1 %v5180_v48 }
 0x47a   : > { %v12804_v2 = vadd.f32 %v6908_v34, %v6604_v21  ;;  %v6620_v62 = vpop.f32.mrf.mxu1 }
 0x47b   : > { %v6910_v13 = vpop.f32.mrf.mxu0  ;;  %v5183_v62 = vld [vmem:[%s8391_s24 + $0x61] sm:$0xff] }
 0x47c   : > { %v6623_v61 = vpop.f32.mrf.mxu1  ;;  %7232 = vmatmul.mubr.f32.gmra.mxu1 %v5084_v17  ;;  %v5086_v13 = vld [vmem:[#allocation3 + $0x79] sm:$0xff] }
 0x47d   : > { %v6624_v3 = vadd.f32 %v6623_v61, %v12547_v29  ;;  %v6913_v30 = vpop.f32.mrf.mxu0  ;;  %7236 = vmatprep.mubr.f32.mxu1 %v5181_v50 }
 0x47e   : > { %v12808_v52 = vadd.f32 %v6913_v30, %v6609_v42  ;;  %v6625_v20 = vpop.f32.mrf.mxu1 }
 0x47f   : > { %v6915_v12 = vpop.f32.mrf.mxu0  ;;  %v5184_v20 = vld [vmem:[%s8391_s24 + $0x69] sm:$0xff] }
 0x480   : > { %v6628_v48 = vpop.f32.mrf.mxu1  ;;  %7237 = vmatmul.mubr.f32.gmra.mxu1 %v5085_v53  ;;  %v5087_v12 = vld [vmem:[#allocation3 + $0x81] sm:$0xff] }
 0x481   : > { %v6629_v21 = vadd.f32 %v6628_v48, %v12554_v55  ;;  %v6918_v38 = vpop.f32.mrf.mxu0  ;;  %7241 = vmatprep.mubr.f32.mxu1 %v5182_v26 }
 0x482   : > { %v12812_v28 = vadd.f32 %v6918_v38, %v6614_v25  ;;  %v6630_v34 = vpop.f32.mrf.mxu1 }
 0x483   : > { %v6920_v29 = vpop.f32.mrf.mxu0  ;;  %v5185_v34 = vld [vmem:[%s8391_s24 + $0x71] sm:$0xff] }
 0x484   : > { %v6633_v50 = vpop.f32.mrf.mxu1  ;;  %7242 = vmatmul.mubr.f32.gmra.mxu1 %v5086_v13  ;;  %v5088_v29 = vld [vmem:[#allocation3 + $0x89] sm:$0xff] }
 0x485   : > { %v6634_v42 = vadd.f32 %v6633_v50, %v12561_v22  ;;  %v6923_v17 = vpop.f32.mrf.mxu0  ;;  %7246 = vmatprep.mubr.f32.mxu1 %v5183_v62 }
 0x486   : > { %v12816_v61 = vadd.f32 %v6923_v17, %v6619_v47  ;;  %v6635_v30 = vpop.f32.mrf.mxu1 }
 0x487   : > { %v6925_v55 = vpop.f32.mrf.mxu0  ;;  %v5186_v30 = vld [vmem:[%s8391_s24 + $0x79] sm:$0xff] }
 0x488   : > { %v6638_v26 = vpop.f32.mrf.mxu1  ;;  %7247 = vmatmul.mubr.f32.gmra.mxu1 %v5087_v12  ;;  %v5089_v55 = vld [vmem:[#allocation3 + $0x91] sm:$0xff] }
 0x489   : > { %v6639_v25 = vadd.f32 %v6638_v26, %v12568_v15  ;;  %v6928_v53 = vpop.f32.mrf.mxu0  ;;  %7251 = vmatprep.mubr.f32.mxu1 %v5184_v20 }
 0x48a   : > { %v12820_v48 = vadd.f32 %v6928_v53, %v6624_v3  ;;  %v6640_v38 = vpop.f32.mrf.mxu1 }
 0x48b   : > { %v6930_v22 = vpop.f32.mrf.mxu0  ;;  %v5187_v38 = vld [vmem:[%s8391_s24 + $0x81] sm:$0xff] }
 0x48c   : > { %v6643_v62 = vpop.f32.mrf.mxu1  ;;  %7252 = vmatmul.mubr.f32.gmra.mxu1 %v5088_v29  ;;  %v5090_v22 = vld [vmem:[#allocation3 + $0x99] sm:$0xff] }
 0x48d   : > { %v6644_v47 = vadd.f32 %v6643_v62, %v12575_v36  ;;  %v6933_v13 = vpop.f32.mrf.mxu0  ;;  %7256 = vmatprep.mubr.f32.mxu1 %v5185_v34 }
 0x48e   : > { %v12824_v50 = vadd.f32 %v6933_v13, %v6629_v21  ;;  %v6645_v17 = vpop.f32.mrf.mxu1 }
 0x48f   : > { %v6935_v15 = vpop.f32.mrf.mxu0  ;;  %v5188_v17 = vld [vmem:[%s8391_s24 + $0x89] sm:$0xff] }
 0x490   : > { %v6648_v20 = vpop.f32.mrf.mxu1  ;;  %7257 = vmatmul.mubr.f32.gmra.mxu1 %v5089_v55  ;;  %v5091_v15 = vld [vmem:[#allocation3 + $0xa1] sm:$0xff] }
 0x491   : > { %v6649_v3 = vadd.f32 %v6648_v20, %v12584_v10  ;;  %v6938_v12 = vpop.f32.mrf.mxu0  ;;  %7261 = vmatprep.mubr.f32.mxu1 %v5186_v30 }
 0x492   : > { %v12828_v26 = vadd.f32 %v6938_v12, %v6634_v42  ;;  %v6650_v53 = vpop.f32.mrf.mxu1 }
 0x493   : > { %v6940_v36 = vpop.f32.mrf.mxu0  ;;  %v5189_v53 = vld [vmem:[%s8391_s24 + $0x91] sm:$0xff] }
 0x494   : > { %v6653_v34 = vpop.f32.mrf.mxu1  ;;  %7262 = vmatmul.mubr.f32.gmra.mxu1 %v5090_v22  ;;  %v5092_v36 = vld [vmem:[#allocation3 + $0xa9] sm:$0xff] }
 0x495   : > { %v6654_v21 = vadd.f32 %v6653_v34, %v12591_v24  ;;  %v6943_v29 = vpop.f32.mrf.mxu0  ;;  %7266 = vmatprep.mubr.f32.mxu1 %v5187_v38 }
 0x496   : > { %v12832_v62 = vadd.f32 %v6943_v29, %v6639_v25  ;;  %v6655_v13 = vpop.f32.mrf.mxu1 }
 0x497   : > { %v6945_v10 = vpop.f32.mrf.mxu0  ;;  %v5190_v13 = vld [vmem:[%s8391_s24 + $0x99] sm:$0xff] }
 0x498   : > { %v6658_v30 = vpop.f32.mrf.mxu1  ;;  %7267 = vmatmul.mubr.f32.gmra.mxu1 %v5091_v15  ;;  %v5093_v10 = vld [vmem:[#allocation3 + $0xb1] sm:$0xff] }
 0x499   : > { %v6659_v42 = vadd.f32 %v6658_v30, %v12598_v0  ;;  %v6948_v55 = vpop.f32.mrf.mxu0  ;;  %7271 = vmatprep.mubr.f32.mxu1 %v5188_v17 }
 0x49a   : > { %v12836_v20 = vadd.f32 %v6948_v55, %v6644_v47  ;;  %v6660_v12 = vpop.f32.mrf.mxu1 }
 0x49b   : > { %v6950_v24 = vpop.f32.mrf.mxu0  ;;  %v5191_v12 = vld [vmem:[%s8391_s24 + $0xa1] sm:$0xff] }
 0x49c   : > { %v6663_v38 = vpop.f32.mrf.mxu1  ;;  %7272 = vmatmul.mubr.f32.gmra.mxu1 %v5092_v36  ;;  %v5094_v24 = vld [vmem:[#allocation3 + $0xb9] sm:$0xff] }
 0x49d   : > { %v6664_v25 = vadd.f32 %v6663_v38, %v12605_v18  ;;  %v6953_v22 = vpop.f32.mrf.mxu0  ;;  %7276 = vmatprep.mubr.f32.mxu1 %v5189_v53 }
 0x49e   : > { %v12840_v34 = vadd.f32 %v6953_v22, %v6649_v3  ;;  %v6665_v29 = vpop.f32.mrf.mxu1 }
 0x49f   : > { %v6955_v0 = vpop.f32.mrf.mxu0  ;;  %v5192_v29 = vld [vmem:[%s8391_s24 + $0xa9] sm:$0xff] }
 0x4a0   : > { %v6668_v17 = vpop.f32.mrf.mxu1  ;;  %7277 = vmatmul.mubr.f32.gmra.mxu1 %v5093_v10  ;;  %v5095_v0 = vld [vmem:[#allocation3 + $0xc1] sm:$0xff] }
 0x4a1   : > { %v6669_v47 = vadd.f32 %v6668_v17, %v12612_v51  ;;  %v6958_v15 = vpop.f32.mrf.mxu0  ;;  %7281 = vmatprep.mubr.f32.mxu1 %v5190_v13 }
 0x4a2   : > { %v12844_v30 = vadd.f32 %v6958_v15, %v6654_v21  ;;  %v6670_v55 = vpop.f32.mrf.mxu1 }
 0x4a3   : > { %v6960_v18 = vpop.f32.mrf.mxu0  ;;  %v5193_v55 = vld [vmem:[%s8391_s24 + $0xb1] sm:$0xff] }
 0x4a4   : > { %v6673_v53 = vpop.f32.mrf.mxu1  ;;  %7282 = vmatmul.mubr.f32.gmra.mxu1 %v5094_v24  ;;  %v5096_v18 = vld [vmem:[#allocation3 + $0xc9] sm:$0xff] }
 0x4a5   : > { %v6674_v3 = vadd.f32 %v6673_v53, %v12619_v27  ;;  %v6963_v36 = vpop.f32.mrf.mxu0  ;;  %7286 = vmatprep.mubr.f32.mxu1 %v5191_v12 }
 0x4a6   : > { %v12848_v38 = vadd.f32 %v6963_v36, %v6659_v42  ;;  %v6675_v22 = vpop.f32.mrf.mxu1 }
 0x4a7   : > { %v6965_v51 = vpop.f32.mrf.mxu0  ;;  %v5194_v22 = vld [vmem:[%s8391_s24 + $0xb9] sm:$0xff] }
 0x4a8   : > { %v6678_v13 = vpop.f32.mrf.mxu1  ;;  %7287 = vmatmul.mubr.f32.gmra.mxu1 %v5095_v0  ;;  %v5097_v51 = vld [vmem:[#allocation3 + $0xd1] sm:$0xff] }
 0x4a9   : > { %v6679_v21 = vadd.f32 %v6678_v13, %v12626_v44  ;;  %v6968_v10 = vpop.f32.mrf.mxu0  ;;  %7291 = vmatprep.mubr.f32.mxu1 %v5192_v29 }
 0x4aa   : > { %v12852_v17 = vadd.f32 %v6968_v10, %v6664_v25  ;;  %v6680_v15 = vpop.f32.mrf.mxu1 }
 0x4ab   : > { %v6970_v27 = vpop.f32.mrf.mxu0  ;;  %v5195_v15 = vld [vmem:[%s8391_s24 + $0xc1] sm:$0xff] }
 0x4ac   : > { %v6683_v12 = vpop.f32.mrf.mxu1  ;;  %7292 = vmatmul.mubr.f32.gmra.mxu1 %v5096_v18  ;;  %v5098_v27 = vld [vmem:[#allocation3 + $0xd9] sm:$0xff] }
 0x4ad   : > { %v6684_v42 = vadd.f32 %v6683_v12, %v12633_v23  ;;  %v6973_v24 = vpop.f32.mrf.mxu0  ;;  %7296 = vmatprep.mubr.f32.mxu1 %v5193_v55 }
 0x4ae   : > { %v12856_v53 = vadd.f32 %v6973_v24, %v6669_v47  ;;  %v6685_v36 = vpop.f32.mrf.mxu1 }
 0x4af   : > { %v6975_v44 = vpop.f32.mrf.mxu0  ;;  %v5196_v36 = vld [vmem:[%s8391_s24 + $0xc9] sm:$0xff] }
 0x4b0   : > { %v6688_v29 = vpop.f32.mrf.mxu1  ;;  %7297 = vmatmul.mubr.f32.gmra.mxu1 %v5097_v51  ;;  %v5099_v44 = vld [vmem:[#allocation3 + $0xe1] sm:$0xff] }
 0x4b1   : > { %v6689_v25 = vadd.f32 %v6688_v29, %v12640_v37  ;;  %v6978_v0 = vpop.f32.mrf.mxu0  ;;  %7301 = vmatprep.mubr.f32.mxu1 %v5194_v22 }
 0x4b2   : > { %v12860_v13 = vadd.f32 %v6978_v0, %v6674_v3  ;;  %v6690_v10 = vpop.f32.mrf.mxu1 }
 0x4b3   : > { %v6980_v23 = vpop.f32.mrf.mxu0  ;;  %v5197_v10 = vld [vmem:[%s8391_s24 + $0xd1] sm:$0xff] }
 0x4b4   : > { %v6693_v55 = vpop.f32.mrf.mxu1  ;;  %7302 = vmatmul.mubr.f32.gmra.mxu1 %v5098_v27  ;;  %v5100_v23 = vld [vmem:[#allocation3 + $0xe9] sm:$0xff] }
 0x4b5   : > { %v6694_v47 = vadd.f32 %v6693_v55, %v12647_v41  ;;  %v6983_v18 = vpop.f32.mrf.mxu0  ;;  %7306 = vmatprep.mubr.f32.mxu1 %v5195_v15 }
 0x4b6   : > { %v12864_v12 = vadd.f32 %v6983_v18, %v6679_v21  ;;  %v6695_v24 = vpop.f32.mrf.mxu1 }
 0x4b7   : > { %v6985_v37 = vpop.f32.mrf.mxu0  ;;  %v5198_v24 = vld [vmem:[%s8391_s24 + $0xd9] sm:$0xff] }
 0x4b8   : > { %v6698_v22 = vpop.f32.mrf.mxu1  ;;  %7307 = vmatmul.mubr.f32.gmra.mxu1 %v5099_v44  ;;  %v5101_v37 = vld [vmem:[#allocation3 + $0xf1] sm:$0xff] }
 0x4b9   : > { %v6699_v3 = vadd.f32 %v6698_v22, %v12654_v19  ;;  %v6988_v51 = vpop.f32.mrf.mxu0  ;;  %7311 = vmatprep.mubr.f32.mxu1 %v5196_v36 }
 0x4ba   : > { %v12868_v29 = vadd.f32 %v6988_v51, %v6684_v42  ;;  %v6700_v0 = vpop.f32.mrf.mxu1 }
 0x4bb   : > { %v6990_v41 = vpop.f32.mrf.mxu0  ;;  %v5199_v0 = vld [vmem:[%s8391_s24 + $0xe1] sm:$0xff] }
 0x4bc   : > { %v6703_v15 = vpop.f32.mrf.mxu1  ;;  %7312 = vmatmul.mubr.f32.gmra.mxu1 %v5100_v23  ;;  %v5102_v41 = vld [vmem:[#allocation3 + $0xf9] sm:$0xff] }
 0x4bd   : > { %v6704_v21 = vadd.f32 %v6703_v15, %v12661_v60  ;;  %v6993_v27 = vpop.f32.mrf.mxu0  ;;  %7316 = vmatprep.mubr.f32.mxu1 %v5197_v10 }
 0x4be   : > { %v12872_v55 = vadd.f32 %v6993_v27, %v6689_v25  ;;  %v6705_v18 = vpop.f32.mrf.mxu1 }
 0x4bf   : > { %v6995_v19 = vpop.f32.mrf.mxu0  ;;  %v5200_v18 = vld [vmem:[%s8391_s24 + $0xe9] sm:$0xff] }
 0x4c0   : > { %v6708_v36 = vpop.f32.mrf.mxu1  ;;  %7317 = vmatmul.mubr.f32.gmra.mxu1 %v5101_v37  ;;  %v5103_v19 = vld [vmem:[#allocation3 + $0x101] sm:$0xff] }
 0x4c1   : > { %v6709_v42 = vadd.f32 %v6708_v36, %v12668_v9  ;;  %v6998_v44 = vpop.f32.mrf.mxu0  ;;  %7321 = vmatprep.mubr.f32.mxu1 %v5198_v24 }
 0x4c2   : > { %v12876_v22 = vadd.f32 %v6998_v44, %v6694_v47  ;;  %v6710_v51 = vpop.f32.mrf.mxu1 }
 0x4c3   : > { %v7000_v60 = vpop.f32.mrf.mxu0  ;;  %v5201_v51 = vld [vmem:[%s8391_s24 + $0xf1] sm:$0xff] }
 0x4c4   : > { %v6713_v10 = vpop.f32.mrf.mxu1  ;;  %7322 = vmatmul.mubr.f32.gmra.mxu1 %v5102_v41  ;;  %v5104_v60 = vld [vmem:[#allocation3 + $0x109] sm:$0xff] }
 0x4c5   : > { %v6714_v25 = vadd.f32 %v6713_v10, %v12675_v40  ;;  %v7003_v23 = vpop.f32.mrf.mxu0  ;;  %7326 = vmatprep.mubr.f32.mxu1 %v5199_v0 }
 0x4c6   : > { %v12880_v15 = vadd.f32 %v7003_v23, %v6699_v3  ;;  %v6715_v27 = vpop.f32.mrf.mxu1 }
 0x4c7   : > { %v7005_v9 = vpop.f32.mrf.mxu0  ;;  %v5202_v27 = vld [vmem:[%s8391_s24 + $0xf9] sm:$0xff] }
 0x4c8   : > { %v6718_v24 = vpop.f32.mrf.mxu1  ;;  %7327 = vmatmul.mubr.f32.gmra.mxu1 %v5103_v19  ;;  %v5105_v9 = vld [vmem:[#allocation3 + $0x111] sm:$0xff] }
 0x4c9   : > { %v6719_v47 = vadd.f32 %v6718_v24, %v12682_v14  ;;  %v7008_v37 = vpop.f32.mrf.mxu0  ;;  %7331 = vmatprep.mubr.f32.mxu1 %v5200_v18 }
 0x4ca   : > { %v12884_v36 = vadd.f32 %v7008_v37, %v6704_v21  ;;  %v6720_v44 = vpop.f32.mrf.mxu1 }
 0x4cb   : > { %v7010_v40 = vpop.f32.mrf.mxu0  ;;  %v5203_v44 = vld [vmem:[%s8391_s24 + $0x101] sm:$0xff] }
 0x4cc   : > { %v6723_v0 = vpop.f32.mrf.mxu1  ;;  %7332 = vmatmul.mubr.f32.gmra.mxu1 %v5104_v60  ;;  %v5106_v40 = vld [vmem:[#allocation3 + $0x119] sm:$0xff] }
 0x4cd   : > { %v6724_v3 = vadd.f32 %v6723_v0, %v12689_v1  ;;  %v7013_v41 = vpop.f32.mrf.mxu0  ;;  %7336 = vmatprep.mubr.f32.mxu1 %v5201_v51 }
 0x4ce   : > { %v12888_v10 = vadd.f32 %v7013_v41, %v6709_v42  ;;  %v6725_v23 = vpop.f32.mrf.mxu1 }
 0x4cf   : > { %v7015_v14 = vpop.f32.mrf.mxu0  ;;  %v5204_v23 = vld [vmem:[%s8391_s24 + $0x109] sm:$0xff] }
 0x4d0   : > { %v6728_v18 = vpop.f32.mrf.mxu1  ;;  %7337 = vmatmul.mubr.f32.gmra.mxu1 %v5105_v9  ;;  %v5107_v14 = vld [vmem:[#allocation3 + $0x121] sm:$0xff] }
 0x4d1   : > { %v6729_v21 = vadd.f32 %v6728_v18, %v12696_v39  ;;  %v7018_v19 = vpop.f32.mrf.mxu0  ;;  %7341 = vmatprep.mubr.f32.mxu1 %v5202_v27 }
 0x4d2   : > { %v12892_v24 = vadd.f32 %v7018_v19, %v6714_v25  ;;  %v6730_v37 = vpop.f32.mrf.mxu1 }
 0x4d3   : > { %v7020_v1 = vpop.f32.mrf.mxu0  ;;  %v5205_v37 = vld [vmem:[%s8391_s24 + $0x111] sm:$0xff] }
 0x4d4   : > { %v6733_v51 = vpop.f32.mrf.mxu1  ;;  %7342 = vmatmul.mubr.f32.gmra.mxu1 %v5106_v40  ;;  %v5108_v1 = vld [vmem:[#allocation3 + $0x129] sm:$0xff] }
 0x4d5   : > { %v6734_v42 = vadd.f32 %v6733_v51, %v12703_v32  ;;  %v7023_v60 = vpop.f32.mrf.mxu0  ;;  %7346 = vmatprep.mubr.f32.mxu1 %v5203_v44 }
 0x4d6   : > { %v12896_v0 = vadd.f32 %v7023_v60, %v6719_v47  ;;  %v6735_v41 = vpop.f32.mrf.mxu1 }
 0x4d7   : > { %v7025_v39 = vpop.f32.mrf.mxu0  ;;  %v5206_v41 = vld [vmem:[%s8391_s24 + $0x119] sm:$0xff] }
 0x4d8   : > { %v6738_v27 = vpop.f32.mrf.mxu1  ;;  %7347 = vmatmul.mubr.f32.gmra.mxu1 %v5107_v14  ;;  %v5109_v39 = vld [vmem:[#allocation3 + $0x131] sm:$0xff] }
 0x4d9   : > { %v6739_v25 = vadd.f32 %v6738_v27, %v12706_v6  ;;  %v7028_v9 = vpop.f32.mrf.mxu0  ;;  %7351 = vmatprep.mubr.f32.mxu1 %v5204_v23 }
 0x4da   : > { %v12900_v18 = vadd.f32 %v7028_v9, %v6724_v3  ;;  %v6740_v19 = vpop.f32.mrf.mxu1 }
 0x4db   : > { %v7030_v32 = vpop.f32.mrf.mxu0  ;;  %v5207_v19 = vld [vmem:[%s8391_s24 + $0x121] sm:$0xff] }
 0x4dc   : > { %v6743_v44 = vpop.f32.mrf.mxu1  ;;  %7352 = vmatmul.mubr.f32.gmra.mxu1 %v5108_v1  ;;  %v5110_v32 = vld [vmem:[#allocation3 + $0x139] sm:$0xff] }
 0x4dd   : > { %v6744_v47 = vadd.f32 %v6743_v44, %v12709_v58  ;;  %v7033_v40 = vpop.f32.mrf.mxu0  ;;  %7356 = vmatprep.mubr.f32.mxu1 %v5205_v37 }
 0x4de   : > { %v12904_v51 = vadd.f32 %v7033_v40, %v6729_v21  ;;  %v6745_v60 = vpop.f32.mrf.mxu1 }
 0x4df   : > { %v7035_v6 = vpop.f32.mrf.mxu0  ;;  %v5208_v60 = vld [vmem:[%s8391_s24 + $0x129] sm:$0xff] }
 0x4e0   : > { %v6748_v23 = vpop.f32.mrf.mxu1  ;;  %7357 = vmatmul.mubr.f32.gmra.mxu1 %v5109_v39  ;;  %v5111_v6 = vld [vmem:[#allocation3 + $0x141] sm:$0xff] }
 0x4e1   : > { %v6749_v3 = vadd.f32 %v6748_v23, %v12712_v43  ;;  %v7038_v14 = vpop.f32.mrf.mxu0  ;;  %7361 = vmatprep.mubr.f32.mxu1 %v5206_v41 }
 0x4e2   : > { %v12908_v27 = vadd.f32 %v7038_v14, %v6734_v42  ;;  %v6750_v9 = vpop.f32.mrf.mxu1 }
 0x4e3   : > { %v7040_v58 = vpop.f32.mrf.mxu0  ;;  %v5209_v9 = vld [vmem:[%s8391_s24 + $0x131] sm:$0xff] }
 0x4e4   : > { %v6753_v37 = vpop.f32.mrf.mxu1  ;;  %7362 = vmatmul.mubr.f32.gmra.mxu1 %v5110_v32  ;;  %v5112_v58 = vld [vmem:[#allocation3 + $0x149] sm:$0xff] }
 0x4e5   : > { %v6754_v21 = vadd.f32 %v6753_v37, %v12715_v56  ;;  %v7043_v1 = vpop.f32.mrf.mxu0  ;;  %7366 = vmatprep.mubr.f32.mxu1 %v5207_v19 }
 0x4e6   : > { %v12912_v44 = vadd.f32 %v7043_v1, %v6739_v25  ;;  %v6755_v40 = vpop.f32.mrf.mxu1 }
 0x4e7   : > { %v7045_v43 = vpop.f32.mrf.mxu0  ;;  %v5210_v40 = vld [vmem:[%s8391_s24 + $0x139] sm:$0xff] }
 0x4e8   : > { %v6758_v41 = vpop.f32.mrf.mxu1  ;;  %7367 = vmatmul.mubr.f32.gmra.mxu1 %v5111_v6  ;;  %v5113_v43 = vld [vmem:[#allocation3 + $0x151] sm:$0xff] }
 0x4e9   : > { %v6759_v42 = vadd.f32 %v6758_v41, %v12723_v45  ;;  %v7048_v39 = vpop.f32.mrf.mxu0  ;;  %7371 = vmatprep.mubr.f32.mxu1 %v5208_v60 }
 0x4ea   : > { %v12916_v23 = vadd.f32 %v7048_v39, %v6744_v47  ;;  %v6760_v14 = vpop.f32.mrf.mxu1 }
 0x4eb   : > { %v7050_v56 = vpop.f32.mrf.mxu0  ;;  %v5211_v14 = vld [vmem:[%s8391_s24 + $0x141] sm:$0xff] }
 0x4ec   : > { %v6763_v19 = vpop.f32.mrf.mxu1  ;;  %7372 = vmatmul.mubr.f32.gmra.mxu1 %v5112_v58  ;;  %v5114_v56 = vld [vmem:[#allocation3 + $0x159] sm:$0xff] }
 0x4ed   : > { %v6764_v25 = vadd.f32 %v6763_v19, %v12726_v49  ;;  %v7053_v32 = vpop.f32.mrf.mxu0  ;;  %7376 = vmatprep.mubr.f32.mxu1 %v5209_v9 }
 0x4ee   : > { %v12920_v37 = vadd.f32 %v7053_v32, %v6749_v3  ;;  %v6765_v1 = vpop.f32.mrf.mxu1 }
 0x4ef   : > { %v7055_v45 = vpop.f32.mrf.mxu0  ;;  %v5212_v1 = vld [vmem:[%s8391_s24 + $0x149] sm:$0xff] }
 0x4f0   : > { %v6768_v60 = vpop.f32.mrf.mxu1  ;;  %7377 = vmatmul.mubr.f32.gmra.mxu1 %v5113_v43  ;;  %v5115_v45 = vld [vmem:[#allocation3 + $0x161] sm:$0xff] }
 0x4f1   : > { %v6769_v47 = vadd.f32 %v6768_v60, %v12729_v5  ;;  %v7058_v6 = vpop.f32.mrf.mxu0  ;;  %7381 = vmatprep.mubr.f32.mxu1 %v5210_v40 }
 0x4f2   : > { %v12924_v41 = vadd.f32 %v7058_v6, %v6754_v21  ;;  %v6770_v39 = vpop.f32.mrf.mxu1 }
 0x4f3   : > { %v7060_v49 = vpop.f32.mrf.mxu0  ;;  %v5213_v39 = vld [vmem:[%s8391_s24 + $0x151] sm:$0xff] }
 0x4f4   : > { %v6773_v9 = vpop.f32.mrf.mxu1  ;;  %7382 = vmatmul.mubr.f32.gmra.mxu1 %v5114_v56  ;;  %v5116_v49 = vld [vmem:[#allocation3 + $0x169] sm:$0xff] }
 0x4f5   : > { %v6774_v3 = vadd.f32 %v6773_v9, %v12732_v31  ;;  %v7063_v58 = vpop.f32.mrf.mxu0  ;;  %7386 = vmatprep.mubr.f32.mxu1 %v5211_v14 }
 0x4f6   : > { %v12928_v19 = vadd.f32 %v7063_v58, %v6759_v42  ;;  %v6775_v32 = vpop.f32.mrf.mxu1 }
 0x4f7   : > { %v7065_v5 = vpop.f32.mrf.mxu0  ;;  %v5214_v32 = vld [vmem:[%s8391_s24 + $0x159] sm:$0xff] }
 0x4f8   : > { %v6778_v40 = vpop.f32.mrf.mxu1  ;;  %7387 = vmatmul.mubr.f32.gmra.mxu1 %v5115_v45 }
 0x4f9   : > { %v6779_v21 = vadd.f32 %v6778_v40, %v12735_v11  ;;  %v7068_v43 = vpop.f32.mrf.mxu0  ;;  %7391 = vmatprep.mubr.f32.mxu1 %v5212_v1 }
 0x4fa   : > { %v12932_v60 = vadd.f32 %v7068_v43, %v6764_v25  ;;  %v6780_v6 = vpop.f32.mrf.mxu1  ;;  %v5215_v43 = vld [vmem:[%s8391_s24 + $0x161] sm:$0xff] }
 0x4fb   : > { %v7070_v31 = vpop.f32.mrf.mxu0 }
 0x4fc   : > { %v6783_v14 = vpop.f32.mrf.mxu1  ;;  %7392 = vmatmul.mubr.f32.gmra.mxu1 %v5116_v49  ;;  %v5216_v49 = vld [vmem:[%s8391_s24 + $0x169] sm:$0xff] }
 0x4fd   : > { %v6784_v42 = vadd.f32 %v6783_v14, %v12741_v57  ;;  %v7073_v56 = vpop.f32.mrf.mxu0  ;;  %7396 = vmatprep.mubr.f32.mxu1 %v5213_v39 }
 0x4fe   : > { %v12936_v9 = vadd.f32 %v7073_v56, %v6769_v47  ;;  %v6785_v58 = vpop.f32.mrf.mxu1 }
 0x4ff   : > { %v7075_v11 = vpop.f32.mrf.mxu0 }
 0x500   : > { %v6788_v5 = vpop.f32.mrf.mxu1  ;;  %7397 = vmatmul.mubr.f32.gmra.mxu1 %v12738_v16  ;;  %v5217_v11 = vld [vmem:[%s8391_s24 + $0x171] sm:$0xff] }
 0x501   : > { %v6789_v25 = vadd.f32 %v6788_v5, %v12747_v4  ;;  %v7078_v1 = vpop.f32.mrf.mxu0  ;;  %7401 = vmatprep.mubr.f32.mxu1 %v5214_v32 }
 0x502   : > { %v12941_v45 = vadd.f32 %v7078_v1, %v6774_v3  ;;  %v6790_v40 = vpop.f32.mrf.mxu1  ;;  %v13826_v3 = vld [vmem:[#allocation59_spill] sm:$0xff]  ;;  %v13827_v1 = vld [vmem:[#allocation45_spill] sm:$0xff] }
 0x503   : > { %v7080_v57 = vpop.f32.mrf.mxu0 }
 0x504   : > { %v6793_v6 = vpop.f32.mrf.mxu1  ;;  %7402 = vmatmul.mubr.f32.gmra.mxu1 %v12744_v35 }
 0x505   : > { %v6794_v47 = vadd.f32 %v6793_v6, %v12753_v7  ;;  %v7083_v39 = vpop.f32.mrf.mxu0  ;;  %7406 = vmatprep.mubr.f32.mxu1 %v5215_v43  ;;  %v5218_v6 = vld [vmem:[%s8391_s24 + $0x179] sm:$0xff] }
 0x506   : > { %v12946_v31 = vadd.f32 %v7083_v39, %v6779_v21  ;;  %v6795_v16 = vpop.f32.mrf.mxu1  ;;  %v13828_v21 = vld [vmem:[#allocation49_spill] sm:$0xff] }
 0x507   : > { %v7085_v4 = vpop.f32.mrf.mxu0 }
 0x508   : > { %v6798_v14 = vpop.f32.mrf.mxu1  ;;  %7407 = vmatmul.mubr.f32.gmra.mxu1 %v12750_v63 }
 0x509   : > { %v6799_v56 = vadd.f32 %v6798_v14, %v13826_v3  ;;  %v7088_v58 = vpop.f32.mrf.mxu0  ;;  %7411 = vmatprep.mubr.f32.mxu1 %v5216_v49  ;;  %v13829_v49 = vld [vmem:[#allocation55_spill] sm:$0xff] }
 0x50a   : > { %v12951_v32 = vadd.f32 %v7088_v58, %v6784_v42  ;;  %v6800_v35 = vpop.f32.mrf.mxu1  ;;  %v13830_v42 = vld [vmem:[#allocation61_spill] sm:$0xff] }
 0x50b   : > { %v7090_v7 = vpop.f32.mrf.mxu0  ;;  %v5219_v35 = vld [vmem:[%s8391_s24 + $0x181] sm:$0xff] }
 0x50c   : > { %v6803_v5 = vpop.f32.mrf.mxu1  ;;  %7412 = vmatmul.mubr.f32.gmra.mxu1 %v13827_v1 }
 0x50d   : > { %v6804_v40 = vadd.f32 %v6803_v5, %v13828_v21  ;;  %v7093_v43 = vpop.f32.mrf.mxu0  ;;  %7416 = vmatprep.mubr.f32.mxu1 %v5217_v11  ;;  %v13831_v11 = vld [vmem:[#allocation8_spill] sm:$0xff] }
 0x50e   : > { %v12956_v57 = vadd.f32 %v7093_v43, %v6789_v25  ;;  %v6805_v63 = vpop.f32.mrf.mxu1  ;;  %v13832_v25 = vld [vmem:[#allocation60_spill] sm:$0xff] }
 0x50f   : > { %v7095_v39 = vpop.f32.mrf.mxu0  ;;  %v5123_v43 = vld [vmem:[#allocation3 + $0x1a1] sm:$0xff] }
 0x510   : > { %v6808_v16 = vpop.f32.mrf.mxu1  ;;  %7417 = vmatmul.mubr.f32.gmra.mxu1 %v13829_v49 }
 0x511   : > { %v6809_v4 = vadd.f32 %v6808_v16, %v13830_v42  ;;  %v7098_v14 = vpop.f32.mrf.mxu0  ;;  %7421 = vmatprep.mubr.f32.mxu1 %v5218_v6  ;;  %v5220_v16 = vld [vmem:[%s8391_s24 + $0x189] sm:$0xff] }
 0x512   : > { %v12961_v3 = vadd.f32 %v7098_v14, %v6794_v47  ;;  %v6810_v58 = vpop.f32.mrf.mxu1  ;;  %v5124_v14 = vld [vmem:[#allocation3 + $0x1a9] sm:$0xff] }
 0x513   : > { %v7100_v7 = vpop.f32.mrf.mxu0 }
 0x514   : > { %v6813_v5 = vpop.f32.mrf.mxu1  ;;  %7422 = vmatmul.mubr.f32.gmra.mxu1 %v13831_v11 }
 0x515   : > { %v6814_v1 = vadd.f32 %v6813_v5, %v13832_v25  ;;  %v7103_v21 = vpop.f32.mrf.mxu0  ;;  %7426 = vmatprep.mubr.f32.mxu1 %v5219_v35  ;;  %v5221_v5 = vld [vmem:[%s8391_s24 + $0x191] sm:$0xff]  ;;  %s7933_s24 = smul.u32 384, %s13834_s19 }
 0x516   : > { %v12966_v63 = vadd.f32 %v7103_v21, %v6799_v56  ;;  %v6815_v39 = vpop.f32.mrf.mxu1  ;;  %v5125_v21 = vld [vmem:[#allocation3 + $0x1b1] sm:$0xff] }
 0x517   : > { %v7105_v49 = vpop.f32.mrf.mxu0  ;;  %s12986_s20 = scalar_lea.vmem %s13095_s5, %s7933_s24 }
 0x518   : > { %v6818_v6 = vpop.f32.mrf.mxu1  ;;  %7427 = vmatmul.mubr.f32.gmra.mxu1 %v5123_v43 }
 0x519   : > { %v6819_v47 = vadd.f32 %v6818_v6, %v12781_v8  ;;  %v7108_v42 = vpop.f32.mrf.mxu0  ;;  %7431 = vmatprep.mubr.f32.mxu1 %v5220_v16 }
 0x51a   : > { %v12970_v58 = vadd.f32 %v7108_v42, %v6804_v40  ;;  %v6820_v7 = vpop.f32.mrf.mxu1 }
 0x51b   : > { %v7110_v11 = vpop.f32.mrf.mxu0 }
 0x51c   : > { %v6823_v25 = vpop.f32.mrf.mxu1  ;;  %7432 = vmatmul.mubr.f32.gmra.mxu1 %v5124_v14 }
 0x51d   : > { %v6824_v56 = vadd.f32 %v6823_v25, %v12787_v59  ;;  %v7113_v35 = vpop.f32.mrf.mxu0  ;;  %7436 = vmatprep.mubr.f32.mxu1 %v5221_v5 }
 0x51e   : > { %v12974_v39 = vadd.f32 %v7113_v35, %v6809_v4  ;;  %v6825_v43 = vpop.f32.mrf.mxu1 }
 0x51f   : > { %v7115_v8 = vpop.f32.mrf.mxu0 }
 0x520   : > { %v6828_v49 = vpop.f32.mrf.mxu1  ;;  %7437 = vmatmul.mubr.f32.gmra.mxu1 %v5125_v21 }
 0x521   : > { %v6829_v40 = vadd.f32 %v6828_v49, %v12792_v54  ;;  %v7118_v16 = vpop.f32.mrf.mxu0 }
 0x522   : > { %v12977_v6 = vadd.f32 %v7118_v16, %v6814_v1  ;;  %v6830_v42 = vpop.f32.mrf.mxu1 }
 0x523   : > { %v7120_v7 = vpop.f32.mrf.mxu0 }
 0x524   : > { %v7203_v14 = vpop.f32.mrf.mxu1 }
 0x525   : > { %v7123_v11 = vpop.f32.mrf.mxu0  ;;  %v7204_v59 = vadd.f32 %v7203_v14, %v12796_v46 }
 0x526   : > { %v12981_v5 = vadd.f32 %v7123_v11, %v6819_v47  ;;  %v7205_v4 = vpop.f32.mrf.mxu1 }
 0x527   : > { %vm7442_vm10 = vcmp.gt.f32.partialorder %v7204_v59, 0.0  ;;  %v7490_v54 = vmul.f32 0.1, %v7204_v59  ;;  %v7125_v1 = vpop.f32.mrf.mxu0 }
 0x528   : > { %v7208_v25 = vpop.f32.mrf.mxu1 }
 0x529   : > { %v7538_v35 = vsel %vm7442_vm10, %v7204_v59, %v7490_v54  ;;  %v7128_v21 = vpop.f32.mrf.mxu0  ;;  %v7209_v43 = vadd.f32 %v7208_v25, %v12800_v33 }
 0x52a   : > { %7586 = vst [vmem:[%s12986_s20] sm:$0xff] %v7538_v35  ;;  %v12990_v46 = vadd.f32 %v7128_v21, %v6824_v56  ;;  %v7210_v47 = vpop.f32.mrf.mxu1 }
 0x52b   : > { %vm7443_vm4 = vcmp.gt.f32.partialorder %v7209_v43, 0.0  ;;  %v7491_v8 = vmul.f32 0.1, %v7209_v43  ;;  %v7130_v49 = vpop.f32.mrf.mxu0 }
 0x52c   : > { %v7213_v16 = vpop.f32.mrf.mxu1 }
 0x52d   : > { %v7539_v42 = vsel %vm7443_vm4, %v7209_v43, %v7491_v8  ;;  %v7133_v7 = vpop.f32.mrf.mxu0  ;;  %v7214_v14 = vadd.f32 %v7213_v16, %v12804_v2 }
 0x52e   : > { %7587 = vst [vmem:[%s12986_s20 + $0x8] sm:$0xff] %v7539_v42  ;;  %v12994_v11 = vadd.f32 %v7133_v7, %v6829_v40  ;;  %v7215_v59 = vpop.f32.mrf.mxu1 }
 0x52f   : > { %vm7444_vm1 = vcmp.gt.f32.partialorder %v7214_v14, 0.0  ;;  %v7492_v33 = vmul.f32 0.1, %v7214_v14  ;;  %v7135_v4 = vpop.f32.mrf.mxu0 }
 0x530   : > { %v7218_v56 = vpop.f32.mrf.mxu1 }
 0x531   : > { %v7540_v54 = vsel %vm7444_vm1, %v7214_v14, %v7492_v33  ;;  %v7219_v1 = vadd.f32 %v7218_v56, %v12808_v52 }
 0x532   : > { %7588 = vst [vmem:[%s12986_s20 + $0x10] sm:$0xff] %v7540_v54  ;;  %v7220_v25 = vpop.f32.mrf.mxu1 }
 0x533   : > { %vm7445_vm8 = vcmp.gt.f32.partialorder %v7219_v1, 0.0  ;;  %v7493_v35 = vmul.f32 0.1, %v7219_v1 }
 0x534   : > { %v7223_v21 = vpop.f32.mrf.mxu1 }
 0x535   : > { %v7541_v43 = vsel %vm7445_vm8, %v7219_v1, %v7493_v35  ;;  %v7224_v2 = vadd.f32 %v7223_v21, %v12812_v28 }
 0x536   : > { %7589 = vst [vmem:[%s12986_s20 + $0x18] sm:$0xff] %v7541_v43  ;;  %v7225_v40 = vpop.f32.mrf.mxu1 }
 0x537   : > { %vm7446_vm5 = vcmp.gt.f32.partialorder %v7224_v2, 0.0  ;;  %v7494_v47 = vmul.f32 0.1, %v7224_v2 }
 0x538   : > { %v7228_v8 = vpop.f32.mrf.mxu1 }
 0x539   : > { %v7542_v49 = vsel %vm7446_vm5, %v7224_v2, %v7494_v47  ;;  %v7229_v16 = vadd.f32 %v7228_v8, %v12816_v61 }
 0x53a   : > { %7590 = vst [vmem:[%s12986_s20 + $0x20] sm:$0xff] %v7542_v49  ;;  %v7230_v52 = vpop.f32.mrf.mxu1 }
 0x53b   : > { %vm7447_vm7 = vcmp.gt.f32.partialorder %v7229_v16, 0.0  ;;  %v7495_v42 = vmul.f32 0.1, %v7229_v16 }
 0x53c   : > { %v7233_v7 = vpop.f32.mrf.mxu1 }
 0x53d   : > { %v7543_v14 = vsel %vm7447_vm7, %v7229_v16, %v7495_v42  ;;  %v7234_v59 = vadd.f32 %v7233_v7, %v12820_v48 }
 0x53e   : > { %7591 = vst [vmem:[%s12986_s20 + $0x28] sm:$0xff] %v7543_v14  ;;  %v7235_v28 = vpop.f32.mrf.mxu1 }
 0x53f   : > { %vm7448_vm2 = vcmp.gt.f32.partialorder %v7234_v59, 0.0  ;;  %v7496_v33 = vmul.f32 0.1, %v7234_v59 }
 0x540   : > { %v7238_v4 = vpop.f32.mrf.mxu1 }
 0x541   : > { %v7544_v56 = vsel %vm7448_vm2, %v7234_v59, %v7496_v33  ;;  %v7239_v54 = vadd.f32 %v7238_v4, %v12824_v50 }
 0x542   : > { %7592 = vst [vmem:[%s12986_s20 + $0x30] sm:$0xff] %v7544_v56  ;;  %v7240_v61 = vpop.f32.mrf.mxu1 }
 0x543   : > { %vm7449_vm6 = vcmp.gt.f32.partialorder %v7239_v54, 0.0  ;;  %v7497_v1 = vmul.f32 0.1, %v7239_v54 }
 0x544   : > { %v7243_v25 = vpop.f32.mrf.mxu1 }
 0x545   : > { %v7545_v35 = vsel %vm7449_vm6, %v7239_v54, %v7497_v1  ;;  %v7244_v21 = vadd.f32 %v7243_v25, %v12828_v26 }
 0x546   : > { %7593 = vst [vmem:[%s12986_s20 + $0x38] sm:$0xff] %v7545_v35  ;;  %v7245_v48 = vpop.f32.mrf.mxu1 }
 0x547   : > { %vm7450_vm3 = vcmp.gt.f32.partialorder %v7244_v21, 0.0  ;;  %v7498_v43 = vmul.f32 0.1, %v7244_v21 }
 0x548   : > { %v7248_v2 = vpop.f32.mrf.mxu1 }
 0x549   : > { %v7546_v40 = vsel %vm7450_vm3, %v7244_v21, %v7498_v43  ;;  %v7249_v47 = vadd.f32 %v7248_v2, %v12832_v62 }
 0x54a   : > { %7594 = vst [vmem:[%s12986_s20 + $0x40] sm:$0xff] %v7546_v40  ;;  %v7250_v50 = vpop.f32.mrf.mxu1 }
 0x54b   : > { %vm7451_vm11 = vcmp.gt.f32.partialorder %v7249_v47, 0.0  ;;  %v7499_v8 = vmul.f32 0.1, %v7249_v47 }
 0x54c   : > { %v7253_v49 = vpop.f32.mrf.mxu1 }
 0x54d   : > { %v7547_v16 = vsel %vm7451_vm11, %v7249_v47, %v7499_v8  ;;  %v7254_v52 = vadd.f32 %v7253_v49, %v12836_v20 }
 0x54e   : > { %7595 = vst [vmem:[%s12986_s20 + $0x48] sm:$0xff] %v7547_v16  ;;  %v7255_v26 = vpop.f32.mrf.mxu1 }
 0x54f   : > { %vm7452_vm0 = vcmp.gt.f32.partialorder %v7254_v52, 0.0  ;;  %v7500_v42 = vmul.f32 0.1, %v7254_v52 }
 0x550   : > { %v7258_v7 = vpop.f32.mrf.mxu1 }
 0x551   : > { %v7548_v14 = vsel %vm7452_vm0, %v7254_v52, %v7500_v42  ;;  %v7259_v59 = vadd.f32 %v7258_v7, %v12840_v34 }
 0x552   : > { %7596 = vst [vmem:[%s12986_s20 + $0x50] sm:$0xff] %v7548_v14  ;;  %v7260_v62 = vpop.f32.mrf.mxu1 }
 0x553   : > { %vm7453_vm13 = vcmp.gt.f32.partialorder %v7259_v59, 0.0  ;;  %v7501_v28 = vmul.f32 0.1, %v7259_v59 }
 0x554   : > { %v7263_v33 = vpop.f32.mrf.mxu1 }
 0x555   : > { %v7549_v4 = vsel %vm7453_vm13, %v7259_v59, %v7501_v28  ;;  %v7264_v56 = vadd.f32 %v7263_v33, %v12844_v30 }
 0x556   : > { %7597 = vst [vmem:[%s12986_s20 + $0x58] sm:$0xff] %v7549_v4  ;;  %v7265_v20 = vpop.f32.mrf.mxu1 }
 0x557   : > { %vm7454_vm15 = vcmp.gt.f32.partialorder %v7264_v56, 0.0  ;;  %v7502_v54 = vmul.f32 0.1, %v7264_v56 }
 0x558   : > { %v7268_v61 = vpop.f32.mrf.mxu1 }
 0x559   : > { %v7550_v1 = vsel %vm7454_vm15, %v7264_v56, %v7502_v54  ;;  %v7269_v25 = vadd.f32 %v7268_v61, %v12848_v38 }
 0x55a   : > { %7598 = vst [vmem:[%s12986_s20 + $0x60] sm:$0xff] %v7550_v1  ;;  %v7270_v34 = vpop.f32.mrf.mxu1 }
 0x55b   : > { %vm7455_vm9 = vcmp.gt.f32.partialorder %v7269_v25, 0.0  ;;  %v7503_v35 = vmul.f32 0.1, %v7269_v25 }
 0x55c   : > { %v7273_v21 = vpop.f32.mrf.mxu1 }
 0x55d   : > { %v7551_v48 = vsel %vm7455_vm9, %v7269_v25, %v7503_v35  ;;  %v7274_v43 = vadd.f32 %v7273_v21, %v12852_v17 }
 0x55e   : > { %7599 = vst [vmem:[%s12986_s20 + $0x68] sm:$0xff] %v7551_v48  ;;  %v7275_v30 = vpop.f32.mrf.mxu1 }
 0x55f   : > { %vm7456_vm12 = vcmp.gt.f32.partialorder %v7274_v43, 0.0  ;;  %v7504_v2 = vmul.f32 0.1, %v7274_v43 }
 0x560   : > { %v7278_v40 = vpop.f32.mrf.mxu1 }
 0x561   : > { %v7552_v47 = vsel %vm7456_vm12, %v7274_v43, %v7504_v2  ;;  %v7279_v50 = vadd.f32 %v7278_v40, %v12856_v53 }
 0x562   : > { %7600 = vst [vmem:[%s12986_s20 + $0x70] sm:$0xff] %v7552_v47  ;;  %v7280_v38 = vpop.f32.mrf.mxu1 }
 0x563   : > { %vm7457_vm14 = vcmp.gt.f32.partialorder %v7279_v50, 0.0  ;;  %v7505_v8 = vmul.f32 0.1, %v7279_v50 }
 0x564   : > { %v7283_v49 = vpop.f32.mrf.mxu1 }
 0x565   : > { %v7553_v16 = vsel %vm7457_vm14, %v7279_v50, %v7505_v8  ;;  %v7284_v52 = vadd.f32 %v7283_v49, %v12860_v13 }
 0x566   : > { %7601 = vst [vmem:[%s12986_s20 + $0x78] sm:$0xff] %v7553_v16  ;;  %v7285_v17 = vpop.f32.mrf.mxu1 }
 0x567   : > { %vm7458_vm10 = vcmp.gt.f32.partialorder %v7284_v52, 0.0  ;;  %v7506_v26 = vmul.f32 0.1, %v7284_v52 }
 0x568   : > { %v7288_v42 = vpop.f32.mrf.mxu1 }
 0x569   : > { %v7554_v7 = vsel %vm7458_vm10, %v7284_v52, %v7506_v26  ;;  %v7289_v14 = vadd.f32 %v7288_v42, %v12864_v12 }
 0x56a   : > { %7602 = vst [vmem:[%s12986_s20 + $0x80] sm:$0xff] %v7554_v7  ;;  %v7290_v53 = vpop.f32.mrf.mxu1 }
 0x56b   : > { %vm7459_vm4 = vcmp.gt.f32.partialorder %v7289_v14, 0.0  ;;  %v7507_v59 = vmul.f32 0.1, %v7289_v14 }
 0x56c   : > { %v7293_v62 = vpop.f32.mrf.mxu1 }
 0x56d   : > { %v7555_v28 = vsel %vm7459_vm4, %v7289_v14, %v7507_v59  ;;  %v7294_v33 = vadd.f32 %v7293_v62, %v12868_v29 }
 0x56e   : > { %7603 = vst [vmem:[%s12986_s20 + $0x88] sm:$0xff] %v7555_v28  ;;  %v7295_v13 = vpop.f32.mrf.mxu1 }
 0x56f   : > { %vm7460_vm1 = vcmp.gt.f32.partialorder %v7294_v33, 0.0  ;;  %v7508_v4 = vmul.f32 0.1, %v7294_v33 }
 0x570   : > { %v7298_v56 = vpop.f32.mrf.mxu1 }
 0x571   : > { %v7556_v20 = vsel %vm7460_vm1, %v7294_v33, %v7508_v4  ;;  %v7299_v54 = vadd.f32 %v7298_v56, %v12872_v55 }
 0x572   : > { %7604 = vst [vmem:[%s12986_s20 + $0x90] sm:$0xff] %v7556_v20  ;;  %v7300_v12 = vpop.f32.mrf.mxu1 }
 0x573   : > { %vm7461_vm8 = vcmp.gt.f32.partialorder %v7299_v54, 0.0  ;;  %v7509_v61 = vmul.f32 0.1, %v7299_v54 }
 0x574   : > { %v7303_v1 = vpop.f32.mrf.mxu1 }
 0x575   : > { %v7557_v25 = vsel %vm7461_vm8, %v7299_v54, %v7509_v61  ;;  %v7304_v34 = vadd.f32 %v7303_v1, %v12876_v22 }
 0x576   : > { %7605 = vst [vmem:[%s12986_s20 + $0x98] sm:$0xff] %v7557_v25  ;;  %v7305_v29 = vpop.f32.mrf.mxu1 }
 0x577   : > { %vm7462_vm5 = vcmp.gt.f32.partialorder %v7304_v34, 0.0  ;;  %v7510_v35 = vmul.f32 0.1, %v7304_v34 }
 0x578   : > { %v7308_v21 = vpop.f32.mrf.mxu1 }
 0x579   : > { %v7558_v48 = vsel %vm7462_vm5, %v7304_v34, %v7510_v35  ;;  %v7309_v43 = vadd.f32 %v7308_v21, %v12880_v15 }
 0x57a   : > { %7606 = vst [vmem:[%s12986_s20 + $0xa0] sm:$0xff] %v7558_v48  ;;  %v7310_v55 = vpop.f32.mrf.mxu1 }
 0x57b   : > { %vm7463_vm7 = vcmp.gt.f32.partialorder %v7309_v43, 0.0  ;;  %v7511_v30 = vmul.f32 0.1, %v7309_v43 }
 0x57c   : > { %v7313_v2 = vpop.f32.mrf.mxu1 }
 0x57d   : > { %v7559_v40 = vsel %vm7463_vm7, %v7309_v43, %v7511_v30  ;;  %v7314_v47 = vadd.f32 %v7313_v2, %v12884_v36 }
 0x57e   : > { %7607 = vst [vmem:[%s12986_s20 + $0xa8] sm:$0xff] %v7559_v40  ;;  %v7315_v22 = vpop.f32.mrf.mxu1 }
 0x57f   : > { %vm7464_vm2 = vcmp.gt.f32.partialorder %v7314_v47, 0.0  ;;  %v7512_v50 = vmul.f32 0.1, %v7314_v47 }
 0x580   : > { %v7318_v38 = vpop.f32.mrf.mxu1 }
 0x581   : > { %v7560_v8 = vsel %vm7464_vm2, %v7314_v47, %v7512_v50  ;;  %v7319_v49 = vadd.f32 %v7318_v38, %v12888_v10 }
 0x582   : > { %7608 = vst [vmem:[%s12986_s20 + $0xb0] sm:$0xff] %v7560_v8  ;;  %v7320_v15 = vpop.f32.mrf.mxu1 }
 0x583   : > { %vm7465_vm6 = vcmp.gt.f32.partialorder %v7319_v49, 0.0  ;;  %v7513_v16 = vmul.f32 0.1, %v7319_v49 }
 0x584   : > { %v7323_v52 = vpop.f32.mrf.mxu1 }
 0x585   : > { %v7561_v17 = vsel %vm7465_vm6, %v7319_v49, %v7513_v16  ;;  %v7324_v26 = vadd.f32 %v7323_v52, %v12892_v24 }
 0x586   : > { %7609 = vst [vmem:[%s12986_s20 + $0xb8] sm:$0xff] %v7561_v17  ;;  %v7325_v36 = vpop.f32.mrf.mxu1 }
 0x587   : > { %vm7466_vm3 = vcmp.gt.f32.partialorder %v7324_v26, 0.0  ;;  %v7514_v42 = vmul.f32 0.1, %v7324_v26 }
 0x588   : > { %v7328_v7 = vpop.f32.mrf.mxu1 }
 0x589   : > { %v7562_v14 = vsel %vm7466_vm3, %v7324_v26, %v7514_v42  ;;  %v7329_v53 = vadd.f32 %v7328_v7, %v12896_v0 }
 0x58a   : > { %7610 = vst [vmem:[%s12986_s20 + $0xc0] sm:$0xff] %v7562_v14  ;;  %v7330_v10 = vpop.f32.mrf.mxu1 }
 0x58b   : > { %vm7467_vm11 = vcmp.gt.f32.partialorder %v7329_v53, 0.0  ;;  %v7515_v59 = vmul.f32 0.1, %v7329_v53 }
 0x58c   : > { %v7333_v62 = vpop.f32.mrf.mxu1 }
 0x58d   : > { %v7563_v28 = vsel %vm7467_vm11, %v7329_v53, %v7515_v59  ;;  %v7334_v33 = vadd.f32 %v7333_v62, %v12900_v18 }
 0x58e   : > { %7611 = vst [vmem:[%s12986_s20 + $0xc8] sm:$0xff] %v7563_v28  ;;  %v7335_v24 = vpop.f32.mrf.mxu1 }
 0x58f   : > { %vm7468_vm0 = vcmp.gt.f32.partialorder %v7334_v33, 0.0  ;;  %v7516_v13 = vmul.f32 0.1, %v7334_v33 }
 0x590   : > { %v7338_v4 = vpop.f32.mrf.mxu1 }
 0x591   : > { %v7564_v56 = vsel %vm7468_vm0, %v7334_v33, %v7516_v13  ;;  %v7339_v20 = vadd.f32 %v7338_v4, %v12904_v51 }
 0x592   : > { %7612 = vst [vmem:[%s12986_s20 + $0xd0] sm:$0xff] %v7564_v56  ;;  %v7340_v0 = vpop.f32.mrf.mxu1 }
 0x593   : > { %vm7469_vm13 = vcmp.gt.f32.partialorder %v7339_v20, 0.0  ;;  %v7517_v54 = vmul.f32 0.1, %v7339_v20 }
 0x594   : > { %v7343_v12 = vpop.f32.mrf.mxu1 }
 0x595   : > { %v7565_v61 = vsel %vm7469_vm13, %v7339_v20, %v7517_v54  ;;  %v7344_v1 = vadd.f32 %v7343_v12, %v12908_v27 }
 0x596   : > { %7613 = vst [vmem:[%s12986_s20 + $0xd8] sm:$0xff] %v7565_v61  ;;  %v7345_v18 = vpop.f32.mrf.mxu1 }
 0x597   : > { %vm7470_vm15 = vcmp.gt.f32.partialorder %v7344_v1, 0.0  ;;  %v7518_v25 = vmul.f32 0.1, %v7344_v1 }
 0x598   : > { %v7348_v34 = vpop.f32.mrf.mxu1 }
 0x599   : > { %v7566_v29 = vsel %vm7470_vm15, %v7344_v1, %v7518_v25  ;;  %v7349_v35 = vadd.f32 %v7348_v34, %v12912_v44 }
 0x59a   : > { %7614 = vst [vmem:[%s12986_s20 + $0xe0] sm:$0xff] %v7566_v29  ;;  %v7350_v51 = vpop.f32.mrf.mxu1 }
 0x59b   : > { %vm7471_vm9 = vcmp.gt.f32.partialorder %v7349_v35, 0.0  ;;  %v7519_v21 = vmul.f32 0.1, %v7349_v35 }
 0x59c   : > { %v7353_v48 = vpop.f32.mrf.mxu1 }
 0x59d   : > { %v7567_v43 = vsel %vm7471_vm9, %v7349_v35, %v7519_v21  ;;  %v7354_v55 = vadd.f32 %v7353_v48, %v12916_v23 }
 0x59e   : > { %7615 = vst [vmem:[%s12986_s20 + $0xe8] sm:$0xff] %v7567_v43  ;;  %v7355_v27 = vpop.f32.mrf.mxu1 }
 0x59f   : > { %vm7472_vm12 = vcmp.gt.f32.partialorder %v7354_v55, 0.0  ;;  %v7520_v30 = vmul.f32 0.1, %v7354_v55 }
 0x5a0   : > { %v7358_v2 = vpop.f32.mrf.mxu1 }
 0x5a1   : > { %v7568_v40 = vsel %vm7472_vm12, %v7354_v55, %v7520_v30  ;;  %v7359_v47 = vadd.f32 %v7358_v2, %v12920_v37 }
 0x5a2   : > { %7616 = vst [vmem:[%s12986_s20 + $0xf0] sm:$0xff] %v7568_v40  ;;  %v7360_v44 = vpop.f32.mrf.mxu1 }
 0x5a3   : > { %vm7473_vm14 = vcmp.gt.f32.partialorder %v7359_v47, 0.0  ;;  %v7521_v22 = vmul.f32 0.1, %v7359_v47 }
 0x5a4   : > { %v7363_v50 = vpop.f32.mrf.mxu1 }
 0x5a5   : > { %v7569_v38 = vsel %vm7473_vm14, %v7359_v47, %v7521_v22  ;;  %v7364_v8 = vadd.f32 %v7363_v50, %v12924_v41 }
 0x5a6   : > { %7617 = vst [vmem:[%s12986_s20 + $0xf8] sm:$0xff] %v7569_v38  ;;  %v7365_v23 = vpop.f32.mrf.mxu1 }
 0x5a7   : > { %vm7474_vm10 = vcmp.gt.f32.partialorder %v7364_v8, 0.0  ;;  %v7522_v49 = vmul.f32 0.1, %v7364_v8 }
 0x5a8   : > { %v7368_v15 = vpop.f32.mrf.mxu1 }
 0x5a9   : > { %v7570_v16 = vsel %vm7474_vm10, %v7364_v8, %v7522_v49  ;;  %v7369_v52 = vadd.f32 %v7368_v15, %v12928_v19 }
 0x5aa   : > { %7618 = vst [vmem:[%s12986_s20 + $0x100] sm:$0xff] %v7570_v16  ;;  %v7370_v37 = vpop.f32.mrf.mxu1 }
 0x5ab   : > { %vm7475_vm4 = vcmp.gt.f32.partialorder %v7369_v52, 0.0  ;;  %v7523_v17 = vmul.f32 0.1, %v7369_v52 }
 0x5ac   : > { %v7373_v26 = vpop.f32.mrf.mxu1 }
 0x5ad   : > { %v7571_v36 = vsel %vm7475_vm4, %v7369_v52, %v7523_v17  ;;  %v7374_v42 = vadd.f32 %v7373_v26, %v12932_v60 }
 0x5ae   : > { %7619 = vst [vmem:[%s12986_s20 + $0x108] sm:$0xff] %v7571_v36  ;;  %v7375_v41 = vpop.f32.mrf.mxu1 }
 0x5af   : > { %vm7476_vm1 = vcmp.gt.f32.partialorder %v7374_v42, 0.0  ;;  %v7524_v7 = vmul.f32 0.1, %v7374_v42 }
 0x5b0   : > { %v7378_v14 = vpop.f32.mrf.mxu1 }
 0x5b1   : > { %v7572_v53 = vsel %vm7476_vm1, %v7374_v42, %v7524_v7  ;;  %v7379_v10 = vadd.f32 %v7378_v14, %v12936_v9 }
 0x5b2   : > { %7620 = vst [vmem:[%s12986_s20 + $0x110] sm:$0xff] %v7572_v53  ;;  %v7380_v19 = vpop.f32.mrf.mxu1 }
 0x5b3   : > { %vm7477_vm8 = vcmp.gt.f32.partialorder %v7379_v10, 0.0  ;;  %v7525_v59 = vmul.f32 0.1, %v7379_v10 }
 0x5b4   : > { %v7383_v62 = vpop.f32.mrf.mxu1 }
 0x5b5   : > { %v7573_v28 = vsel %vm7477_vm8, %v7379_v10, %v7525_v59  ;;  %v7384_v33 = vadd.f32 %v7383_v62, %v12941_v45 }
 0x5b6   : > { %7621 = vst [vmem:[%s12986_s20 + $0x118] sm:$0xff] %v7573_v28  ;;  %v7385_v60 = vpop.f32.mrf.mxu1 }
 0x5b7   : > { %vm7478_vm5 = vcmp.gt.f32.partialorder %v7384_v33, 0.0  ;;  %v7526_v24 = vmul.f32 0.1, %v7384_v33 }
 0x5b8   : > { %v7388_v13 = vpop.f32.mrf.mxu1 }
 0x5b9   : > { %v7574_v4 = vsel %vm7478_vm5, %v7384_v33, %v7526_v24  ;;  %v7389_v56 = vadd.f32 %v7388_v13, %v12946_v31 }
 0x5ba   : > { %7622 = vst [vmem:[%s12986_s20 + $0x120] sm:$0xff] %v7574_v4  ;;  %v7390_v9 = vpop.f32.mrf.mxu1 }
 0x5bb   : > { %vm7479_vm7 = vcmp.gt.f32.partialorder %v7389_v56, 0.0  ;;  %v7527_v20 = vmul.f32 0.1, %v7389_v56 }
 0x5bc   : > { %v7393_v0 = vpop.f32.mrf.mxu1 }
 0x5bd   : > { %v7575_v54 = vsel %vm7479_vm7, %v7389_v56, %v7527_v20  ;;  %v7394_v12 = vadd.f32 %v7393_v0, %v12951_v32 }
 0x5be   : > { %7623 = vst [vmem:[%s12986_s20 + $0x128] sm:$0xff] %v7575_v54  ;;  %v7395_v45 = vpop.f32.mrf.mxu1 }
 0x5bf   : > { %vm7480_vm2 = vcmp.gt.f32.partialorder %v7394_v12, 0.0  ;;  %v7528_v61 = vmul.f32 0.1, %v7394_v12 }
 0x5c0   : > { %v7398_v1 = vpop.f32.mrf.mxu1 }
 0x5c1   : > { %v7576_v18 = vsel %vm7480_vm2, %v7394_v12, %v7528_v61  ;;  %v7399_v25 = vadd.f32 %v7398_v1, %v12956_v57 }
 0x5c2   : > { %7624 = vst [vmem:[%s12986_s20 + $0x130] sm:$0xff] %v7576_v18  ;;  %v7400_v31 = vpop.f32.mrf.mxu1 }
 0x5c3   : > { %vm7481_vm6 = vcmp.gt.f32.partialorder %v7399_v25, 0.0  ;;  %v7529_v34 = vmul.f32 0.1, %v7399_v25 }
 0x5c4   : > { %v7403_v29 = vpop.f32.mrf.mxu1 }
 0x5c5   : > { %v7577_v35 = vsel %vm7481_vm6, %v7399_v25, %v7529_v34  ;;  %v7404_v51 = vadd.f32 %v7403_v29, %v12961_v3 }
 0x5c6   : > { %7625 = vst [vmem:[%s12986_s20 + $0x138] sm:$0xff] %v7577_v35  ;;  %v7405_v32 = vpop.f32.mrf.mxu1 }
 0x5c7   : > { %vm7482_vm3 = vcmp.gt.f32.partialorder %v7404_v51, 0.0  ;;  %v7530_v21 = vmul.f32 0.1, %v7404_v51 }
 0x5c8   : > { %v7408_v48 = vpop.f32.mrf.mxu1 }
 0x5c9   : > { %v7578_v43 = vsel %vm7482_vm3, %v7404_v51, %v7530_v21  ;;  %v7409_v55 = vadd.f32 %v7408_v48, %v12966_v63 }
 0x5ca   : > { %7626 = vst [vmem:[%s12986_s20 + $0x140] sm:$0xff] %v7578_v43  ;;  %v7410_v57 = vpop.f32.mrf.mxu1 }
 0x5cb   : > { %vm7483_vm11 = vcmp.gt.f32.partialorder %v7409_v55, 0.0  ;;  %v7531_v27 = vmul.f32 0.1, %v7409_v55 }
 0x5cc   : > { %v7413_v30 = vpop.f32.mrf.mxu1 }
 0x5cd   : > { %v7579_v2 = vsel %vm7483_vm11, %v7409_v55, %v7531_v27  ;;  %v7414_v40 = vadd.f32 %v7413_v30, %v12970_v58 }
 0x5ce   : > { %7627 = vst [vmem:[%s12986_s20 + $0x148] sm:$0xff] %v7579_v2  ;;  %v7415_v3 = vpop.f32.mrf.mxu1 }
 0x5cf   : > { %vm7484_vm0 = vcmp.gt.f32.partialorder %v7414_v40, 0.0  ;;  %v7532_v47 = vmul.f32 0.1, %v7414_v40 }
 0x5d0   : > { %v7418_v44 = vpop.f32.mrf.mxu1 }
 0x5d1   : > { %v7580_v22 = vsel %vm7484_vm0, %v7414_v40, %v7532_v47  ;;  %v7419_v50 = vadd.f32 %v7418_v44, %v12974_v39 }
 0x5d2   : > { %7628 = vst [vmem:[%s12986_s20 + $0x150] sm:$0xff] %v7580_v22  ;;  %v7420_v63 = vpop.f32.mrf.mxu1 }
 0x5d3   : > { %vm7485_vm13 = vcmp.gt.f32.partialorder %v7419_v50, 0.0  ;;  %v7533_v38 = vmul.f32 0.1, %v7419_v50 }
 0x5d4   : > { %v7423_v8 = vpop.f32.mrf.mxu1 }
 0x5d5   : > { %v7581_v23 = vsel %vm7485_vm13, %v7419_v50, %v7533_v38  ;;  %v7424_v49 = vadd.f32 %v7423_v8, %v12977_v6 }
 0x5d6   : > { %7629 = vst [vmem:[%s12986_s20 + $0x158] sm:$0xff] %v7581_v23  ;;  %v7425_v58 = vpop.f32.mrf.mxu1 }
 0x5d7   : > { %vm7486_vm15 = vcmp.gt.f32.partialorder %v7424_v49, 0.0  ;;  %v7534_v15 = vmul.f32 0.1, %v7424_v49 }
 0x5d8   : > { %v7428_v16 = vpop.f32.mrf.mxu1 }
 0x5d9   : > { %v7582_v52 = vsel %vm7486_vm15, %v7424_v49, %v7534_v15  ;;  %v7429_v37 = vadd.f32 %v7428_v16, %v12981_v5 }
 0x5da   : > { %7630 = vst [vmem:[%s12986_s20 + $0x160] sm:$0xff] %v7582_v52  ;;  %v7430_v39 = vpop.f32.mrf.mxu1 }
 0x5db   : > { %vm7487_vm9 = vcmp.gt.f32.partialorder %v7429_v37, 0.0  ;;  %v7535_v17 = vmul.f32 0.1, %v7429_v37 }
 0x5dc   : > { %v7433_v26 = vpop.f32.mrf.mxu1 }
 0x5dd   : > { %v7583_v36 = vsel %vm7487_vm9, %v7429_v37, %v7535_v17  ;;  %v7434_v42 = vadd.f32 %v7433_v26, %v12990_v46 }
 0x5de   : > { %7631 = vst [vmem:[%s12986_s20 + $0x168] sm:$0xff] %v7583_v36  ;;  %v7435_v6 = vpop.f32.mrf.mxu1 }
 0x5df   : > { %vm7488_vm12 = vcmp.gt.f32.partialorder %v7434_v42, 0.0  ;;  %v7536_v41 = vmul.f32 0.1, %v7434_v42 }
 0x5e0   : > { %v7438_v7 = vpop.f32.mrf.mxu1 }
 0x5e1   : > { %v7584_v14 = vsel %vm7488_vm12, %v7434_v42, %v7536_v41  ;;  %v7439_v53 = vadd.f32 %v7438_v7, %v12994_v11 }
 0x5e2   : > { %7632 = vst [vmem:[%s12986_s20 + $0x170] sm:$0xff] %v7584_v14  ;;  %v7440_v10 = vpop.f32.mrf.mxu1 }
 0x5e3   : > { %vm7489_vm14 = vcmp.gt.f32.partialorder %v7439_v53, 0.0  ;;  %v7537_v5 = vmul.f32 0.1, %v7439_v53 }
 0x5e5   : > { %v7585_v19 = vsel %vm7489_vm14, %v7439_v53, %v7537_v5 }
 0x5e6   : > { %7633 = vst [vmem:[%s12986_s20 + $0x178] sm:$0xff] %v7585_v19 }
 0x5e7 PF: > { %s15_s18 = sadd.s32 1, %s8102_s18  }
 0x5e8   : > { %p12_p4 = scmp.ge.s32.totalorder %s15_s18, 4  }
 0x5ea   :  { %14 = sbr.rel (!%p12_p4) target bundleno = 1 (0x1), region = 70 }

</bundles_post_ra>
